<compile_context>
chip_gen: v7x
topology: tpu7x:2x2x1
jax: 0.10.0
libtpu: 0.0.40
codegen_flags: <defaults>
</compile_context>

<pallas_src>
import functools

import numpy as np
import jax
import jax.numpy as jnp
from jax.experimental import pallas as pl
from jax.experimental.pallas import tpu as pltpu


# ----------------------------- Pallas kernels ------------------------------


def _conv_bn_relu_kernel(x_ref, w_ref, bias_ref, o_ref):
    # x_ref:    (1, Ptile, K)   bf16 im2col patches, K = KH*KW*Cin
    # w_ref:    (K, Cout)       bf16, BN scale pre-folded into the weights
    # bias_ref: (1, Cout) f32   beta - running_mean * scale
    # o_ref:    (1, Ptile, Cout)
    acc = jnp.dot(x_ref[0], w_ref[...], preferred_element_type=jnp.float32)
    o_ref[0] = jnp.maximum(acc + bias_ref[...], 0.0).astype(o_ref.dtype)


def _max_taps_kernel(x_ref, o_ref):
    # x_ref: (T, 1, P, C); o_ref: (1, P, C) -- running max over T taps.
    v = x_ref[0, 0]
    for t in range(1, x_ref.shape[0]):  # static unrolled, T = 9
        v = jnp.maximum(v, x_ref[t, 0])
    o_ref[0] = v


# ------------------------------ JAX glue ------------------------------------


def _pick_p_tile(P, row_bytes, budget=2 * 1024 * 1024):
    """Full P if the x-patch tile fits the budget; else the largest
    multiple-of-8 divisor of P that fits (falls back to full P)."""
    if P * row_bytes <= budget:
        return P
    best = P
    for t in range(8, P, 8):
        if P % t == 0 and t * row_bytes <= budget:
            best = t
    return best


def _im2col(x_nhwc, kh, kw, stride, pad_h, pad_w):
    """(N, Ho*Wo, KH*KW*Cin) patches, taps stacked along the channel axis."""
    if pad_h or pad_w:
        x_nhwc = jnp.pad(
            x_nhwc, ((0, 0), (pad_h, pad_h), (pad_w, pad_w), (0, 0))
        )
    N, H, W, C = x_nhwc.shape
    Ho = (H - kh) // stride + 1
    Wo = (W - kw) // stride + 1
    cols = []
    for i in range(kh):
        for j in range(kw):
            cols.append(
                x_nhwc[
                    :,
                    i : i + (Ho - 1) * stride + 1 : stride,
                    j : j + (Wo - 1) * stride + 1 : stride,
                    :,
                ]
            )
    patches = jnp.concatenate(cols, axis=-1)  # (N, Ho, Wo, T*C)
    return patches.reshape(N, Ho * Wo, kh * kw * C), Ho, Wo


def conv_bn_relu(x_nhwc, w, scale, bias, *, stride=1, padding=(0, 0),
                 out_dtype=jnp.bfloat16):
    """BasicConv2d: Conv2d(bias=False) + BatchNorm2d(eval, folded) + ReLU."""
    Cout, Cin, KH, KW = w.shape  # PyTorch OIHW weight layout

    if KH == 1 and KW == 1 and stride == 1 and padding == (0, 0):
        N, H, W, _ = x_nhwc.shape
        Ho, Wo = H, W
        patches = x_nhwc.reshape(N, H * W, Cin)     # no im2col needed
    else:
        patches, Ho, Wo = _im2col(x_nhwc, KH, KW, stride, padding[0], padding[1])

    patches = patches.astype(jnp.bfloat16)
    N, P, K = patches.shape

    # OIHW -> (KH, KW, Cin, Cout) -> (K, Cout); fold BN scale, cast once.
    w2 = jnp.transpose(w, (2, 3, 1, 0)).reshape(K, Cout)
    w2 = (w2 * scale.reshape(1, Cout)).astype(jnp.bfloat16)
    bias2 = bias.reshape(1, Cout).astype(jnp.float32)

    tile_p = _pick_p_tile(P, K * 2)  # bf16 patch row bytes
    grid = (N, P // tile_p)

    out = pl.pallas_call(
        _conv_bn_relu_kernel,
        out_shape=jax.ShapeDtypeStruct((N, P, Cout), out_dtype),
        grid=grid,
        in_specs=[
            pl.BlockSpec((1, tile_p, K), lambda n, p: (n, p, 0)),
            pl.BlockSpec((K, Cout), lambda n, p: (0, 0)),     # VMEM-resident
            pl.BlockSpec((1, Cout), lambda n, p: (0, 0)),
        ],
        out_specs=pl.BlockSpec((1, tile_p, Cout), lambda n, p: (n, p, 0)),
        compiler_params=pltpu.CompilerParams(
            dimension_semantics=("parallel", "parallel"),
            vmem_limit_bytes=48 * 1024 * 1024,
        ),
    )(patches, w2, bias2)
    return out.reshape(N, Ho, Wo, Cout)


def maxpool3x3s2(x_nhwc):
    """F.max_pool2d(x, kernel_size=3, stride=2), VALID padding.

    The 9 window taps are gathered (strided slices) by XLA in glue; a single
    Pallas launch reduces them with an unrolled max."""
    N, H, W, C = x_nhwc.shape
    k, s = 3, 2
    Ho = (H - k) // s + 1
    Wo = (W - k) // s + 1
    taps = []
    for i in range(k):
        for j in range(k):
            taps.append(
                x_nhwc[:, i:i + (Ho - 1) * s + 1:s, j:j + (Wo - 1) * s + 1:s, :]
            )
    T = k * k
    P = Ho * Wo
    stacked = jnp.stack(taps, axis=0).reshape(T, N, P, C)

    out = pl.pallas_call(
        _max_taps_kernel,
        out_shape=jax.ShapeDtypeStruct((N, P, C), x_nhwc.dtype),
        grid=(N,),
        in_specs=[pl.BlockSpec((T, 1, P, C), lambda n: (0, n, 0, 0))],
        out_specs=pl.BlockSpec((1, P, C), lambda n: (n, 0, 0)),
        compiler_params=pltpu.CompilerParams(
            dimension_semantics=("parallel",),
            vmem_limit_bytes=48 * 1024 * 1024,
        ),
    )(stacked)
    return out.reshape(N, Ho, Wo, C)


def inception_d_forward(params, x_nchw):
    x = jnp.transpose(x_nchw, (0, 2, 3, 1)).astype(jnp.float32)  # NCHW -> NHWC
    p = params

    # Fused 1x1 conv: branch3x3_1 (192) + branch7x7x3_1 (192) share input x.
    n3 = p["branch3x3_1"]["w"].shape[0]
    w1 = jnp.concatenate([p["branch3x3_1"]["w"], p["branch7x7x3_1"]["w"]], axis=0)
    s1 = jnp.concatenate([p["branch3x3_1"]["scale"], p["branch7x7x3_1"]["scale"]])
    c1 = jnp.concatenate([p["branch3x3_1"]["bias"], p["branch7x7x3_1"]["bias"]])
    y1 = conv_bn_relu(x, w1, s1, c1, stride=1, padding=(0, 0),
                      out_dtype=jnp.bfloat16)
    b3_in = y1[..., :n3]
    b7_in = y1[..., n3:]

    b3 = conv_bn_relu(b3_in, **p["branch3x3_2"], stride=2, padding=(0, 0),
                      out_dtype=jnp.float32)

    b7 = conv_bn_relu(b7_in, **p["branch7x7x3_2"], stride=1, padding=(0, 3),
                      out_dtype=jnp.bfloat16)
    b7 = conv_bn_relu(b7, **p["branch7x7x3_3"], stride=1, padding=(3, 0),
                      out_dtype=jnp.bfloat16)
    b7 = conv_bn_relu(b7, **p["branch7x7x3_4"], stride=2, padding=(0, 0),
                      out_dtype=jnp.float32)

    bp = maxpool3x3s2(x)

    out = jnp.concatenate([b3, b7, bp], axis=-1)  # channel concat (dim=1 NCHW)
    return jnp.transpose(out, (0, 3, 1, 2))       # NHWC -> NCHW


# --------------------------- deterministic params ---------------------------


def init_basic_conv(key, cin, cout, kh, kw):
    kconv, kbn = jax.random.split(key)
    w = 0.05 * jax.random.normal(kconv, (cout, cin, kh, kw), jnp.float32)
    ks = jax.random.split(kbn, 4)
    gamma = 1.0 + 0.1 * jax.random.normal(ks[0], (cout,), jnp.float32)
    beta = 0.1 * jax.random.normal(ks[1], (cout,), jnp.float32)
    running_mean = 0.1 * jax.random.normal(ks[2], (cout,), jnp.float32)
    running_var = 0.5 + jax.random.uniform(ks[3], (cout,), jnp.float32)
    eps = 0.001
    scale = gamma / jnp.sqrt(running_var + eps)
    bias = beta - running_mean * scale
    return dict(w=w, scale=scale, bias=bias)


# ------------------------------ pure-JAX ref ---------------------------------


def _ref_conv_bn_relu(x_nhwc, w, scale, bias, stride, padding):
    y = jax.lax.conv_general_dilated(
        x_nhwc,
        jnp.transpose(w, (2, 3, 1, 0)),  # OIHW -> HWIO
        window_strides=(stride, stride),
        padding=((padding[0], padding[0]), (padding[1], padding[1])),
        dimension_numbers=("NHWC", "HWIO", "NHWC"),
    )
    y = y * scale.reshape(1, 1, 1, -1) + bias.reshape(1, 1, 1, -1)
    return jnp.maximum(y, 0.0)


def reference_forward(params, x_nchw):
    x = jnp.transpose(x_nchw, (0, 2, 3, 1))
    p = params
    b3 = _ref_conv_bn_relu(x, p["branch3x3_1"]["w"], p["branch3x3_1"]["scale"],
                           p["branch3x3_1"]["bias"], 1, (0, 0))
    b3 = _ref_conv_bn_relu(b3, p["branch3x3_2"]["w"], p["branch3x3_2"]["scale"],
                           p["branch3x3_2"]["bias"], 2, (0, 0))
    b7 = _ref_conv_bn_relu(x, p["branch7x7x3_1"]["w"], p["branch7x7x3_1"]["scale"],
                           p["branch7x7x3_1"]["bias"], 1, (0, 0))
    b7 = _ref_conv_bn_relu(b7, p["branch7x7x3_2"]["w"], p["branch7x7x3_2"]["scale"],
                           p["branch7x7x3_2"]["bias"], 1, (0, 3))
    b7 = _ref_conv_bn_relu(b7, p["branch7x7x3_3"]["w"], p["branch7x7x3_3"]["scale"],
                           p["branch7x7x3_3"]["bias"], 1, (3, 0))
    b7 = _ref_conv_bn_relu(b7, p["branch7x7x3_4"]["w"], p["branch7x7x3_4"]["scale"],
                           p["branch7x7x3_4"]["bias"], 2, (0, 0))
    bp = jax.lax.reduce_window(
        x, -jnp.inf, jax.lax.max, (1, 3, 3, 1), (1, 2, 2, 1), "VALID"
    )
    out = jnp.concatenate([b3, b7, bp], axis=-1)
    return jnp.transpose(out, (0, 3, 1, 2))


# ------------------------------------ main -----------------------------------

if __name__ == "__main__":
    key = jax.random.PRNGKey(0)
    k_x, k_p = jax.random.split(key)

    N, Cin, H, W = 2, 4, 16, 16
    x = jax.random.normal(k_x, (N, Cin, H, W), jnp.float32)

    keys = jax.random.split(k_p, 6)
    params = {
        "branch3x3_1": init_basic_conv(keys[0], Cin, 192, 1, 1),
        "branch3x3_2": init_basic_conv(keys[1], 192, 320, 3, 3),
        "branch7x7x3_1": init_basic_conv(keys[2], Cin, 192, 1, 1),
        "branch7x7x3_2": init_basic_conv(keys[3], 192, 192, 1, 7),
        "branch7x7x3_3": init_basic_conv(keys[4], 192, 192, 7, 1),
        "branch7x7x3_4": init_basic_conv(keys[5], 192, 192, 3, 3),
    }

    fwd = jax.jit(functools.partial(inception_d_forward, params))
    out = jax.block_until_ready(fwd(x))

    # output spatial: (16 - 3)//2 + 1 = 7; channels: 320 + 192 + Cin
    assert out.shape == (N, 320 + 192 + Cin, 7, 7), out.shape
    assert bool(jnp.all(jnp.isfinite(out)))

    ref = jax.block_until_ready(reference_forward(params, x))
    # bf16 matmul inputs + f32 accumulation vs. full-f32 reference
    np.testing.assert_allclose(
        np.asarray(out), np.asarray(ref), rtol=3e-2, atol=3e-2
    )

    print("KERNEL_OK")
</pallas_src>

<mosaic_0001>
module attributes {stable_mosaic.version = 11 : i64} {
  func.func @_conv_bn_relu_kernel(%arg0: i32, %arg1: i32, %arg2: memref<1x256x4xbf16, #tpu.memory_space<vmem>>, %arg3: memref<4x384xbf16, #tpu.memory_space<vmem>>, %arg4: memref<1x384xf32, #tpu.memory_space<vmem>>, %arg5: memref<1x256x384xbf16, #tpu.memory_space<vmem>>) attributes {dimension_semantics = [#tpu.dimension_semantics<parallel>, #tpu.dimension_semantics<parallel>], iteration_bounds = array<i64: 2, 1>, scalar_prefetch = 0 : i64, scratch_operands = 0 : i64, tpu.core_type = #tpu.core_type<tc>, window_params = [{transform_indices = @transform_0, window_bounds = array<i64: 1, 256, 4>}, {pipeline_mode = #tpu.pipeline_mode<synchronous>, transform_indices = @transform_1, window_bounds = array<i64: 4, 384>}, {pipeline_mode = #tpu.pipeline_mode<synchronous>, transform_indices = @transform_2, window_bounds = array<i64: 1, 384>}, {transform_indices = @transform_3, window_bounds = array<i64: 1, 256, 384>}]} {
    %c0 = arith.constant 0 : index
    %c0_0 = arith.constant 0 : index
    %c0_1 = arith.constant 0 : index
    %0 = vector.load %arg2[%c0, %c0_0, %c0_1] : memref<1x256x4xbf16, #tpu.memory_space<vmem>>, vector<1x256x4xbf16>
    %1 = vector.shape_cast %0 : vector<1x256x4xbf16> to vector<256x4xbf16>
    %c0_2 = arith.constant 0 : index
    %c0_3 = arith.constant 0 : index
    %2 = vector.load %arg3[%c0_2, %c0_3] : memref<4x384xbf16, #tpu.memory_space<vmem>>, vector<4x384xbf16>
    %cst = arith.constant dense<0.000000e+00> : vector<256x384xf32>
    %3 = tpu.matmul %1, %2, %cst {dimension_numbers = #tpu.dot_dimension_numbers<[1], [0], [0], [1], [0, 0, 1, 1], [], []>} : vector<256x4xbf16>, vector<4x384xbf16>, vector<256x384xf32> -> vector<256x384xf32>
    %c0_4 = arith.constant 0 : index
    %c0_5 = arith.constant 0 : index
    %4 = vector.load %arg4[%c0_4, %c0_5] : memref<1x384xf32, #tpu.memory_space<vmem>>, vector<1x384xf32>
    %5 = vector.broadcast %4 : vector<1x384xf32> to vector<256x384xf32>
    %6 = arith.addf %3, %5 : vector<256x384xf32>
    %cst_6 = arith.constant 0.000000e+00 : f32
    %7 = vector.broadcast %cst_6 : f32 to vector<256x384xf32>
    %8 = arith.maximumf %6, %7 : vector<256x384xf32>
    %9 = arith.truncf %8 : vector<256x384xf32> to vector<256x384xbf16>
    %c0_7 = arith.constant 0 : index
    %c0_8 = arith.constant 0 : index
    %c0_9 = arith.constant 0 : index
    %10 = vector.load %arg5[%c0_7, %c0_8, %c0_9] : memref<1x256x384xbf16, #tpu.memory_space<vmem>>, vector<1x256x384xbf16>
    %11 = vector.shape_cast %10 : vector<1x256x384xbf16> to vector<256x384xbf16>
    %12 = vector.shape_cast %9 : vector<256x384xbf16> to vector<1x256x384xbf16>
    tpu.vector_store %arg5[%c0_7, %c0_8, %c0_9], %12 {strides = array<i32>} : memref<1x256x384xbf16, #tpu.memory_space<vmem>>, vector<1x256x384xbf16>,
    return
  }
  func.func @transform_0(%arg0: i32, %arg1: i32) -> (i32, i32, i32) {
    %c0_i32 = arith.constant 0 : i32
    %c0_i32_0 = arith.constant 0 : i32
    return %arg0, %arg1, %c0_i32 : i32, i32, i32
  }
  func.func @transform_1(%arg0: i32, %arg1: i32) -> (i32, i32) {
    %c0_i32 = arith.constant 0 : i32
    %c0_i32_0 = arith.constant 0 : i32
    %c0_i32_1 = arith.constant 0 : i32
    return %c0_i32, %c0_i32_0 : i32, i32
  }
  func.func @transform_2(%arg0: i32, %arg1: i32) -> (i32, i32) {
    %c0_i32 = arith.constant 0 : i32
    %c0_i32_0 = arith.constant 0 : i32
    %c0_i32_1 = arith.constant 0 : i32
    return %c0_i32, %c0_i32_0 : i32, i32
  }
  func.func @transform_3(%arg0: i32, %arg1: i32) -> (i32, i32, i32) {
    %c0_i32 = arith.constant 0 : i32
    %c0_i32_0 = arith.constant 0 : i32
    return %arg0, %arg1, %c0_i32 : i32, i32, i32
  }
}

module attributes {stable_mosaic.version = 11 : i64} {
  func.func @_conv_bn_relu_kernel(%arg0: i32, %arg1: i32, %arg2: memref<1x256x1344xbf16, #tpu.memory_space<vmem>>, %arg3: memref<1344x192xbf16, #tpu.memory_space<vmem>>, %arg4: memref<1x192xf32, #tpu.memory_space<vmem>>, %arg5: memref<1x256x192xbf16, #tpu.memory_space<vmem>>) attributes {dimension_semantics = [#tpu.dimension_semantics<parallel>, #tpu.dimension_semantics<parallel>], iteration_bounds = array<i64: 2, 1>, scalar_prefetch = 0 : i64, scratch_operands = 0 : i64, tpu.core_type = #tpu.core_type<tc>, window_params = [{transform_indices = @transform_0, window_bounds = array<i64: 1, 256, 1344>}, {pipeline_mode = #tpu.pipeline_mode<synchronous>, transform_indices = @transform_1, window_bounds = array<i64: 1344, 192>}, {pipeline_mode = #tpu.pipeline_mode<synchronous>, transform_indices = @transform_2, window_bounds = array<i64: 1, 192>}, {transform_indices = @transform_3, window_bounds = array<i64: 1, 256, 192>}]} {
    %c0 = arith.constant 0 : index
    %c0_0 = arith.constant 0 : index
    %c0_1 = arith.constant 0 : index
    %0 = vector.load %arg2[%c0, %c0_0, %c0_1] : memref<1x256x1344xbf16, #tpu.memory_space<vmem>>, vector<1x256x1344xbf16>
    %1 = vector.shape_cast %0 : vector<1x256x1344xbf16> to vector<256x1344xbf16>
    %c0_2 = arith.constant 0 : index
    %c0_3 = arith.constant 0 : index
    %2 = vector.load %arg3[%c0_2, %c0_3] : memref<1344x192xbf16, #tpu.memory_space<vmem>>, vector<1344x192xbf16>
    %cst = arith.constant dense<0.000000e+00> : vector<256x192xf32>
    %3 = tpu.matmul %1, %2, %cst {dimension_numbers = #tpu.dot_dimension_numbers<[1], [0], [0], [1], [0, 0, 1, 1], [], []>} : vector<256x1344xbf16>, vector<1344x192xbf16>, vector<256x192xf32> -> vector<256x192xf32>
    %c0_4 = arith.constant 0 : index
    %c0_5 = arith.constant 0 : index
    %4 = vector.load %arg4[%c0_4, %c0_5] : memref<1x192xf32, #tpu.memory_space<vmem>>, vector<1x192xf32>
    %5 = vector.broadcast %4 : vector<1x192xf32> to vector<256x192xf32>
    %6 = arith.addf %3, %5 : vector<256x192xf32>
    %cst_6 = arith.constant 0.000000e+00 : f32
    %7 = vector.broadcast %cst_6 : f32 to vector<256x192xf32>
    %8 = arith.maximumf %6, %7 : vector<256x192xf32>
    %9 = arith.truncf %8 : vector<256x192xf32> to vector<256x192xbf16>
    %c0_7 = arith.constant 0 : index
    %c0_8 = arith.constant 0 : index
    %c0_9 = arith.constant 0 : index
    %10 = vector.load %arg5[%c0_7, %c0_8, %c0_9] : memref<1x256x192xbf16, #tpu.memory_space<vmem>>, vector<1x256x192xbf16>
    %11 = vector.shape_cast %10 : vector<1x256x192xbf16> to vector<256x192xbf16>
    %12 = vector.shape_cast %9 : vector<256x192xbf16> to vector<1x256x192xbf16>
    tpu.vector_store %arg5[%c0_7, %c0_8, %c0_9], %12 {strides = array<i32>} : memref<1x256x192xbf16, #tpu.memory_space<vmem>>, vector<1x256x192xbf16>,
    return
  }
  func.func @transform_0(%arg0: i32, %arg1: i32) -> (i32, i32, i32) {
    %c0_i32 = arith.constant 0 : i32
    %c0_i32_0 = arith.constant 0 : i32
    return %arg0, %arg1, %c0_i32 : i32, i32, i32
  }
  func.func @transform_1(%arg0: i32, %arg1: i32) -> (i32, i32) {
    %c0_i32 = arith.constant 0 : i32
    %c0_i32_0 = arith.constant 0 : i32
    %c0_i32_1 = arith.constant 0 : i32
    return %c0_i32, %c0_i32_0 : i32, i32
  }
  func.func @transform_2(%arg0: i32, %arg1: i32) -> (i32, i32) {
    %c0_i32 = arith.constant 0 : i32
    %c0_i32_0 = arith.constant 0 : i32
    %c0_i32_1 = arith.constant 0 : i32
    return %c0_i32, %c0_i32_0 : i32, i32
  }
  func.func @transform_3(%arg0: i32, %arg1: i32) -> (i32, i32, i32) {
    %c0_i32 = arith.constant 0 : i32
    %c0_i32_0 = arith.constant 0 : i32
    return %arg0, %arg1, %c0_i32 : i32, i32, i32
  }
}

module attributes {stable_mosaic.version = 11 : i64} {
  func.func @_conv_bn_relu_kernel(%arg0: i32, %arg1: i32, %arg2: memref<1x49x1728xbf16, #tpu.memory_space<vmem>>, %arg3: memref<1728x192xbf16, #tpu.memory_space<vmem>>, %arg4: memref<1x192xf32, #tpu.memory_space<vmem>>, %arg5: memref<1x49x192xf32, #tpu.memory_space<vmem>>) attributes {dimension_semantics = [#tpu.dimension_semantics<parallel>, #tpu.dimension_semantics<parallel>], iteration_bounds = array<i64: 2, 1>, scalar_prefetch = 0 : i64, scratch_operands = 0 : i64, tpu.core_type = #tpu.core_type<tc>, window_params = [{transform_indices = @transform_0, window_bounds = array<i64: 1, 49, 1728>}, {pipeline_mode = #tpu.pipeline_mode<synchronous>, transform_indices = @transform_1, window_bounds = array<i64: 1728, 192>}, {pipeline_mode = #tpu.pipeline_mode<synchronous>, transform_indices = @transform_2, window_bounds = array<i64: 1, 192>}, {transform_indices = @transform_3, window_bounds = array<i64: 1, 49, 192>}]} {
    %c0 = arith.constant 0 : index
    %c0_0 = arith.constant 0 : index
    %c0_1 = arith.constant 0 : index
    %0 = vector.load %arg2[%c0, %c0_0, %c0_1] : memref<1x49x1728xbf16, #tpu.memory_space<vmem>>, vector<1x49x1728xbf16>
    %1 = vector.shape_cast %0 : vector<1x49x1728xbf16> to vector<49x1728xbf16>
    %c0_2 = arith.constant 0 : index
    %c0_3 = arith.constant 0 : index
    %2 = vector.load %arg3[%c0_2, %c0_3] : memref<1728x192xbf16, #tpu.memory_space<vmem>>, vector<1728x192xbf16>
    %cst = arith.constant dense<0.000000e+00> : vector<49x192xf32>
    %3 = tpu.matmul %1, %2, %cst {dimension_numbers = #tpu.dot_dimension_numbers<[1], [0], [0], [1], [0, 0, 1, 1], [], []>} : vector<49x1728xbf16>, vector<1728x192xbf16>, vector<49x192xf32> -> vector<49x192xf32>
    %c0_4 = arith.constant 0 : index
    %c0_5 = arith.constant 0 : index
    %4 = vector.load %arg4[%c0_4, %c0_5] : memref<1x192xf32, #tpu.memory_space<vmem>>, vector<1x192xf32>
    %5 = vector.broadcast %4 : vector<1x192xf32> to vector<49x192xf32>
    %6 = arith.addf %3, %5 : vector<49x192xf32>
    %cst_6 = arith.constant 0.000000e+00 : f32
    %7 = vector.broadcast %cst_6 : f32 to vector<49x192xf32>
    %8 = arith.maximumf %6, %7 : vector<49x192xf32>
    %c0_7 = arith.constant 0 : index
    %c0_8 = arith.constant 0 : index
    %c0_9 = arith.constant 0 : index
    %9 = vector.load %arg5[%c0_7, %c0_8, %c0_9] : memref<1x49x192xf32, #tpu.memory_space<vmem>>, vector<1x49x192xf32>
    %10 = vector.shape_cast %9 : vector<1x49x192xf32> to vector<49x192xf32>
    %11 = vector.shape_cast %8 : vector<49x192xf32> to vector<1x49x192xf32>
    tpu.vector_store %arg5[%c0_7, %c0_8, %c0_9], %11 {strides = array<i32>} : memref<1x49x192xf32, #tpu.memory_space<vmem>>, vector<1x49x192xf32>,
    return
  }
  func.func @transform_0(%arg0: i32, %arg1: i32) -> (i32, i32, i32) {
    %c0_i32 = arith.constant 0 : i32
    %c0_i32_0 = arith.constant 0 : i32
    return %arg0, %arg1, %c0_i32 : i32, i32, i32
  }
  func.func @transform_1(%arg0: i32, %arg1: i32) -> (i32, i32) {
    %c0_i32 = arith.constant 0 : i32
    %c0_i32_0 = arith.constant 0 : i32
    %c0_i32_1 = arith.constant 0 : i32
    return %c0_i32, %c0_i32_0 : i32, i32
  }
  func.func @transform_2(%arg0: i32, %arg1: i32) -> (i32, i32) {
    %c0_i32 = arith.constant 0 : i32
    %c0_i32_0 = arith.constant 0 : i32
    %c0_i32_1 = arith.constant 0 : i32
    return %c0_i32, %c0_i32_0 : i32, i32
  }
  func.func @transform_3(%arg0: i32, %arg1: i32) -> (i32, i32, i32) {
    %c0_i32 = arith.constant 0 : i32
    %c0_i32_0 = arith.constant 0 : i32
    return %arg0, %arg1, %c0_i32 : i32, i32, i32
  }
}

module attributes {stable_mosaic.version = 11 : i64} {
  func.func @_conv_bn_relu_kernel(%arg0: i32, %arg1: i32, %arg2: memref<1x49x1728xbf16, #tpu.memory_space<vmem>>, %arg3: memref<1728x320xbf16, #tpu.memory_space<vmem>>, %arg4: memref<1x320xf32, #tpu.memory_space<vmem>>, %arg5: memref<1x49x320xf32, #tpu.memory_space<vmem>>) attributes {dimension_semantics = [#tpu.dimension_semantics<parallel>, #tpu.dimension_semantics<parallel>], iteration_bounds = array<i64: 2, 1>, scalar_prefetch = 0 : i64, scratch_operands = 0 : i64, tpu.core_type = #tpu.core_type<tc>, window_params = [{transform_indices = @transform_0, window_bounds = array<i64: 1, 49, 1728>}, {pipeline_mode = #tpu.pipeline_mode<synchronous>, transform_indices = @transform_1, window_bounds = array<i64: 1728, 320>}, {pipeline_mode = #tpu.pipeline_mode<synchronous>, transform_indices = @transform_2, window_bounds = array<i64: 1, 320>}, {transform_indices = @transform_3, window_bounds = array<i64: 1, 49, 320>}]} {
    %c0 = arith.constant 0 : index
    %c0_0 = arith.constant 0 : index
    %c0_1 = arith.constant 0 : index
    %0 = vector.load %arg2[%c0, %c0_0, %c0_1] : memref<1x49x1728xbf16, #tpu.memory_space<vmem>>, vector<1x49x1728xbf16>
    %1 = vector.shape_cast %0 : vector<1x49x1728xbf16> to vector<49x1728xbf16>
    %c0_2 = arith.constant 0 : index
    %c0_3 = arith.constant 0 : index
    %2 = vector.load %arg3[%c0_2, %c0_3] : memref<1728x320xbf16, #tpu.memory_space<vmem>>, vector<1728x320xbf16>
    %cst = arith.constant dense<0.000000e+00> : vector<49x320xf32>
    %3 = tpu.matmul %1, %2, %cst {dimension_numbers = #tpu.dot_dimension_numbers<[1], [0], [0], [1], [0, 0, 1, 1], [], []>} : vector<49x1728xbf16>, vector<1728x320xbf16>, vector<49x320xf32> -> vector<49x320xf32>
    %c0_4 = arith.constant 0 : index
    %c0_5 = arith.constant 0 : index
    %4 = vector.load %arg4[%c0_4, %c0_5] : memref<1x320xf32, #tpu.memory_space<vmem>>, vector<1x320xf32>
    %5 = vector.broadcast %4 : vector<1x320xf32> to vector<49x320xf32>
    %6 = arith.addf %3, %5 : vector<49x320xf32>
    %cst_6 = arith.constant 0.000000e+00 : f32
    %7 = vector.broadcast %cst_6 : f32 to vector<49x320xf32>
    %8 = arith.maximumf %6, %7 : vector<49x320xf32>
    %c0_7 = arith.constant 0 : index
    %c0_8 = arith.constant 0 : index
    %c0_9 = arith.constant 0 : index
    %9 = vector.load %arg5[%c0_7, %c0_8, %c0_9] : memref<1x49x320xf32, #tpu.memory_space<vmem>>, vector<1x49x320xf32>
    %10 = vector.shape_cast %9 : vector<1x49x320xf32> to vector<49x320xf32>
    %11 = vector.shape_cast %8 : vector<49x320xf32> to vector<1x49x320xf32>
    tpu.vector_store %arg5[%c0_7, %c0_8, %c0_9], %11 {strides = array<i32>} : memref<1x49x320xf32, #tpu.memory_space<vmem>>, vector<1x49x320xf32>,
    return
  }
  func.func @transform_0(%arg0: i32, %arg1: i32) -> (i32, i32, i32) {
    %c0_i32 = arith.constant 0 : i32
    %c0_i32_0 = arith.constant 0 : i32
    return %arg0, %arg1, %c0_i32 : i32, i32, i32
  }
  func.func @transform_1(%arg0: i32, %arg1: i32) -> (i32, i32) {
    %c0_i32 = arith.constant 0 : i32
    %c0_i32_0 = arith.constant 0 : i32
    %c0_i32_1 = arith.constant 0 : i32
    return %c0_i32, %c0_i32_0 : i32, i32
  }
  func.func @transform_2(%arg0: i32, %arg1: i32) -> (i32, i32) {
    %c0_i32 = arith.constant 0 : i32
    %c0_i32_0 = arith.constant 0 : i32
    %c0_i32_1 = arith.constant 0 : i32
    return %c0_i32, %c0_i32_0 : i32, i32
  }
  func.func @transform_3(%arg0: i32, %arg1: i32) -> (i32, i32, i32) {
    %c0_i32 = arith.constant 0 : i32
    %c0_i32_0 = arith.constant 0 : i32
    return %arg0, %arg1, %c0_i32 : i32, i32, i32
  }
}

module attributes {stable_mosaic.version = 11 : i64} {
  func.func @_max_taps_kernel(%arg0: i32, %arg1: memref<9x1x49x4xf32, #tpu.memory_space<vmem>>, %arg2: memref<1x49x4xf32, #tpu.memory_space<vmem>>) attributes {dimension_semantics = [#tpu.dimension_semantics<parallel>], iteration_bounds = array<i64: 2>, scalar_prefetch = 0 : i64, scratch_operands = 0 : i64, tpu.core_type = #tpu.core_type<tc>, window_params = [{transform_indices = @transform_0, window_bounds = array<i64: 9, 1, 49, 4>}, {transform_indices = @transform_1, window_bounds = array<i64: 1, 49, 4>}]} {
    %c0 = arith.constant 0 : index
    %c0_0 = arith.constant 0 : index
    %c0_1 = arith.constant 0 : index
    %c0_2 = arith.constant 0 : index
    %0 = vector.load %arg1[%c0, %c0_0, %c0_1, %c0_2] : memref<9x1x49x4xf32, #tpu.memory_space<vmem>>, vector<1x1x49x4xf32>
    %1 = vector.shape_cast %0 : vector<1x1x49x4xf32> to vector<49x4xf32>
    %c1 = arith.constant 1 : index
    %c0_3 = arith.constant 0 : index
    %c0_4 = arith.constant 0 : index
    %c0_5 = arith.constant 0 : index
    %2 = vector.load %arg1[%c1, %c0_3, %c0_4, %c0_5] : memref<9x1x49x4xf32, #tpu.memory_space<vmem>>, vector<1x1x49x4xf32>
    %3 = vector.shape_cast %2 : vector<1x1x49x4xf32> to vector<49x4xf32>
    %4 = arith.maximumf %1, %3 : vector<49x4xf32>
    %c2 = arith.constant 2 : index
    %c0_6 = arith.constant 0 : index
    %c0_7 = arith.constant 0 : index
    %c0_8 = arith.constant 0 : index
    %5 = vector.load %arg1[%c2, %c0_6, %c0_7, %c0_8] : memref<9x1x49x4xf32, #tpu.memory_space<vmem>>, vector<1x1x49x4xf32>
    %6 = vector.shape_cast %5 : vector<1x1x49x4xf32> to vector<49x4xf32>
    %7 = arith.maximumf %4, %6 : vector<49x4xf32>
    %c3 = arith.constant 3 : index
    %c0_9 = arith.constant 0 : index
    %c0_10 = arith.constant 0 : index
    %c0_11 = arith.constant 0 : index
    %8 = vector.load %arg1[%c3, %c0_9, %c0_10, %c0_11] : memref<9x1x49x4xf32, #tpu.memory_space<vmem>>, vector<1x1x49x4xf32>
    %9 = vector.shape_cast %8 : vector<1x1x49x4xf32> to vector<49x4xf32>
    %10 = arith.maximumf %7, %9 : vector<49x4xf32>
    %c4 = arith.constant 4 : index
    %c0_12 = arith.constant 0 : index
    %c0_13 = arith.constant 0 : index
    %c0_14 = arith.constant 0 : index
    %11 = vector.load %arg1[%c4, %c0_12, %c0_13, %c0_14] : memref<9x1x49x4xf32, #tpu.memory_space<vmem>>, vector<1x1x49x4xf32>
    %12 = vector.shape_cast %11 : vector<1x1x49x4xf32> to vector<49x4xf32>
    %13 = arith.maximumf %10, %12 : vector<49x4xf32>
    %c5 = arith.constant 5 : index
    %c0_15 = arith.constant 0 : index
    %c0_16 = arith.constant 0 : index
    %c0_17 = arith.constant 0 : index
    %14 = vector.load %arg1[%c5, %c0_15, %c0_16, %c0_17] : memref<9x1x49x4xf32, #tpu.memory_space<vmem>>, vector<1x1x49x4xf32>
    %15 = vector.shape_cast %14 : vector<1x1x49x4xf32> to vector<49x4xf32>
    %16 = arith.maximumf %13, %15 : vector<49x4xf32>
    %c6 = arith.constant 6 : index
    %c0_18 = arith.constant 0 : index
    %c0_19 = arith.constant 0 : index
    %c0_20 = arith.constant 0 : index
    %17 = vector.load %arg1[%c6, %c0_18, %c0_19, %c0_20] : memref<9x1x49x4xf32, #tpu.memory_space<vmem>>, vector<1x1x49x4xf32>
    %18 = vector.shape_cast %17 : vector<1x1x49x4xf32> to vector<49x4xf32>
    %19 = arith.maximumf %16, %18 : vector<49x4xf32>
    %c7 = arith.constant 7 : index
    %c0_21 = arith.constant 0 : index
    %c0_22 = arith.constant 0 : index
    %c0_23 = arith.constant 0 : index
    %20 = vector.load %arg1[%c7, %c0_21, %c0_22, %c0_23] : memref<9x1x49x4xf32, #tpu.memory_space<vmem>>, vector<1x1x49x4xf32>
    %21 = vector.shape_cast %20 : vector<1x1x49x4xf32> to vector<49x4xf32>
    %22 = arith.maximumf %19, %21 : vector<49x4xf32>
    %c8 = arith.constant 8 : index
    %c0_24 = arith.constant 0 : index
    %c0_25 = arith.constant 0 : index
    %c0_26 = arith.constant 0 : index
    %23 = vector.load %arg1[%c8, %c0_24, %c0_25, %c0_26] : memref<9x1x49x4xf32, #tpu.memory_space<vmem>>, vector<1x1x49x4xf32>
    %24 = vector.shape_cast %23 : vector<1x1x49x4xf32> to vector<49x4xf32>
    %25 = arith.maximumf %22, %24 : vector<49x4xf32>
    %c0_27 = arith.constant 0 : index
    %c0_28 = arith.constant 0 : index
    %c0_29 = arith.constant 0 : index
    %26 = vector.load %arg2[%c0_27, %c0_28, %c0_29] : memref<1x49x4xf32, #tpu.memory_space<vmem>>, vector<1x49x4xf32>
    %27 = vector.shape_cast %26 : vector<1x49x4xf32> to vector<49x4xf32>
    %28 = vector.shape_cast %25 : vector<49x4xf32> to vector<1x49x4xf32>
    tpu.vector_store %arg2[%c0_27, %c0_28, %c0_29], %28 {strides = array<i32>} : memref<1x49x4xf32, #tpu.memory_space<vmem>>, vector<1x49x4xf32>,
    return
  }
  func.func @transform_0(%arg0: i32) -> (i32, i32, i32, i32) {
    %c0_i32 = arith.constant 0 : i32
    %c0_i32_0 = arith.constant 0 : i32
    %c0_i32_1 = arith.constant 0 : i32
    %c0_i32_2 = arith.constant 0 : i32
    return %c0_i32, %arg0, %c0_i32_0, %c0_i32_1 : i32, i32, i32, i32
  }
  func.func @transform_1(%arg0: i32) -> (i32, i32, i32) {
    %c0_i32 = arith.constant 0 : i32
    %c0_i32_0 = arith.constant 0 : i32
    %c0_i32_1 = arith.constant 0 : i32
    return %arg0, %c0_i32, %c0_i32_0 : i32, i32, i32
  }
}

</mosaic_0001>

<bundles_post_ra>
// kernel: inception_d_forward.6
= control target key start
LH: loop header
LB: loop body
LE: loop exit
PB: predicated region body
PF: predicated region fallthrough
CT: control target
= control target key end

     0   :  { %8 = vsyncpa [#allocation3], 0  ;;  %s2185_s0 = inlined_call_operand.vmem [shape: bf16[2,256,4], index: 0, kind: input, shape index: {}]   ;;  %s2186_s1 = inlined_call_operand.hbm [shape: bf16[4,384], index: 1, kind: input, shape index: {}]   ;;  %s2187_s2 = inlined_call_operand.hbm [shape: f32[1,384], index: 2, kind: input, shape index: {}]   ;;  %s2188_s3 = inlined_call_operand.vmem [shape: bf16[2,256,384], index: 3, kind: output, shape index: {}]  }
   0x1   :  { %9 = vsyncpa [#allocation5], 0  ;;  %s1817_s12 = smov 0   ;;  %s1819_s13 = smov 0  }
   0x2   :  { %s1821_s14 = smov 0  }
   0x3 LB: > { %s1394_s15 = sadd.s32 4294967295, %s1791_s14   ;;  %s27_s16 = sadd.s32 1, %s1787_s13  ;;  %s1791_s14 = sphi %s1821_s14, %s15_s14   ;;  %s1787_s13 = sphi %s1819_s13, %s2198_s13   ;;  %s1783_s12 = sphi %s1817_s12, %s2197_s12  }
   0x4   : > { %p29_p0 = scmp.ge.s32.totalorder %s27_s16, 2  ;;  %p1396_p1 = scmp.ge.s32.totalorder %s1791_s14, 1 }
   0x5   : > { %p130_p2 = scmp.lt.s32.totalorder %s1791_s14, 3  ;;  %p1842_p4 = scmp.eq.s32.totalorder %s1394_s15, 0 }
   0x6   : > { %s2200_s16 = smov (%p29_p0, %s27_s16), 0  ;;  %s1793_s19 = smov [#allocation2]  }
   0x7   : > { %p1838_p3 = pnand %p1396_p1, %p130_p2  ;;  %s143_s20 = sshll.u32 %s1793_s19, 4  ;;  %s144_s20 = int_to_ptr.vmem [resolvable:$true] %s143_s20 }
   0x8   : > { %s2193_s18 = scalar_select %p1842_p4, 1, 0 }
   0x9   : > { %s2192_s17 = scalar_select %p1838_p3, 1, 0 }
   0xa   : > { %p1649_p5 = pneg %p1838_p3  ;;  %s1794_s21 = smov [#allocation4]  }
   0xb   : > { %s154_s22 = sshll.u32 %s1794_s21, 4  ;;  %s1705_s26 = scalar_lea.hbm %s2186_s1, 96  ;;  %s1854_s22 = int_to_ptr.vmem [resolvable:$true] %s154_s22 }
   0xc   : > { %p1850_p6 = pnand %p1842_p4, %p1649_p5  ;;  %p1706_p7 = scmp.ne.s32.totalorder %s2186_s1, %s1705_s26 }
   0xd   : > { %p1712_p11 = scmp.lt.u32.totalorder %s1705_s26, %s2186_s1 }
   0xe   : > { %p1707_p8 = pneg %p1850_p6 }
  0x10   : > { %p1708_p9 = pnand %p1707_p8, %p1706_p7 }
  0x12   : > { %p1709_p10 = pneg %p1708_p9 }
  0x14   : > { %p1714_p12 = pnand %p1712_p11, %p1709_p10 }
  0x16   : > { %1717 = shalt.err (!%p1714_p12)
}
  0x17   : > { %s1718_s4 = scalar_lea.vmem %s144_s20, 96  ;;  %p1726_p2 = scmp.lt.s32.totalorder %s144_s20, %s144_s20 }
  0x18   : > { %p1719_p13 = scmp.ne.s32.totalorder %s144_s20, %s1718_s4  ;;  %p1727_p5 = scmp.lt.s32.totalorder %s1718_s4, %s1718_s4 }
  0x1a   : > { %p1721_p0 = pnand %p1719_p13, %p1707_p8  ;;  %p1728_p4 = por %p1727_p5, %p1726_p2 }
  0x1c   : > { %p1722_p1 = pneg %p1721_p0 }
  0x1e   : > { %p1729_p3 = pnand %p1728_p4, %p1722_p1 }
  0x20   : > { %1732 = shalt.err (!%p1729_p3)
}
  0x21   : > { %1652 = dma.hbm_to_vmem [thread:$0]  (!%p1850_p6), %s2186_s1, 96, %s144_s20, [#allocation3]  }
  0x22   : > { %s1733_s9 = scalar_lea.hbm %s2187_s2, 48 }
  0x23   : > { %p1734_p7 = scmp.ne.s32.totalorder %s2187_s2, %s1733_s9  ;;  %p1740_p3 = scmp.lt.u32.totalorder %s1733_s9, %s2187_s2 }
  0x25   : > { %p1736_p9 = pnand %p1734_p7, %p1707_p8 }
  0x27   : > { %p1737_p4 = pneg %p1736_p9 }
  0x29   : > { %p1742_p10 = pnand %p1740_p3, %p1737_p4 }
  0x2b   : > { %1745 = shalt.err (!%p1742_p10)
}
  0x2c   : > { %s1746_s20 = scalar_lea.vmem %s1854_s22, 48  ;;  %s1753_s21 = scalar_lea.vmem %s1854_s22, 64 }
  0x2d   : > { %p1747_p11 = scmp.ne.s32.totalorder %s1854_s22, %s1746_s20  ;;  %p1754_p0 = scmp.lt.s32.totalorder %s1854_s22, %s1854_s22 }
  0x2e   : > { %p1755_p1 = scmp.lt.s32.totalorder %s1753_s21, %s1746_s20 }
  0x2f   : > { %p1749_p12 = pnand %p1747_p11, %p1707_p8 }
  0x30   : > { %p1756_p2 = por %p1755_p1, %p1754_p0 }
  0x31   : > { %p1750_p13 = pneg %p1749_p12 }
  0x33   : > { %p1757_p5 = pnand %p1756_p2, %p1750_p13 }
  0x35   : > { %1760 = shalt.err (!%p1757_p5)
}
  0x36   : > { %1655 = dma.hbm_to_vmem [thread:$0]  (!%p1850_p6), %s2187_s2, 48, %s1854_s22, [#allocation5]  }
  0x37   : > { %p2195_p7 = scmp.ne.s32.totalorder %s2192_s17, 0 }
  0x38   : > { %p2196_p8 = scmp.ne.s32.totalorder (!%p2195_p7), %s2193_s18, 0 }
  0x39   : > { %180 = sbr.rel (%p2195_p7) target bundleno = 392 (0x188), region = 32 }
  0x40   : > { %1774 = dma.done.wait (%p2196_p8), [#allocation3], 96  }
  0x41   : > { %1776 = vsyncadd (%p2196_p8), [#allocation3], 4294967200 }
  0x42   : > { %1778 = dma.done.wait (%p2196_p8), [#allocation5], 48  }
  0x43   : > { %1780 = vsyncadd (%p2196_p8), [#allocation5], 4294967248  ;;  %v274_v0 = vlaneseq  ;;  %v1795_v1 = vmov 1983009808   ;;  %v1796_v3 = vmov 0   ;;  %p218_p6 = scmp.lt.s32.totalorder %s1783_s12, 1 }
  0x44   : > { %v372_v2 = vunpack.c.l.s4 %v1795_v1  ;;  %477 = vmatprep.mubr.bf16.mxu0 %v1796_v3  ;;  %597 = vmatprep.mubr.bf16.mxu1 %v1796_v3  ;;  %vm435_vm0 = vcmask 1041408   ;;  %v271_v7 = vld [vmem:[#allocation2] sm:$0x3f]  ;;  %vm386_vm1 = vcmask 31744   ;;  %v1997_v31 = vld [vmem:[#allocation4] sm:$0x7] }
  0x45   : > { %v1917_v4 = vshrl.u32 %v274_v0, 7  ;;  %s2202_s12 = smov (!%p218_p6, %s1783_s12), 1  ;;  %v370_v8 = vcombine.high %v271_v7, %v271_v7 }
  0x46   : > { %v373_v5 = vunpack.c.0.s8 %v372_v2  ;;  %s1521_s17 = sshll.u32 %s2202_s12, 7  ;;  %s1640_s26 = smul.u32 384, %s2202_s12 }
  0x47   : > { %s1927_s23 = scalar_lea.vmem %s2185_s0, %s1521_s17  ;;  %v276_v30 = vsub.s32 0, %v1917_v4  ;;  %v280_v32 = vsub.s32 1, %v1917_v4 }
  0x48   : > { %v376_v6 = vsub.s32 %v373_v5, %v1917_v4  ;;  %v1689_v13 = vld [vmem:[%s1927_s23] sm:$0xff]   ;;  %v1691_v16 = vld [vmem:[%s1927_s23 + $0x8] sm:$0xff]   ;;  %v1693_v18 = vld [vmem:[%s1927_s23 + $0x10] sm:$0xff]   ;;  %s2018_s28 = scalar_lea.vmem %s2188_s3, %s1640_s26 }
  0x49   : > { %v1690_v14 = vld [vmem:[%s1927_s23 + $0x60] sm:$0xff]   ;;  %v1692_v17 = vld [vmem:[%s1927_s23 + $0x68] sm:$0xff]   ;;  %v1694_v19 = vld [vmem:[%s1927_s23 + $0x70] sm:$0xff]   ;;  %v2001_v33 = vrot.slane %v1997_v31, %v276_v30  ;;  %v2004_v34 = vrot.slane %v1997_v31, %v280_v32 }
  0x4a   : > { %v377_v9 = vrot.slane %v271_v7, %v376_v6  ;;  %v384_v12 = vrot.slane %v370_v8, %v376_v6  ;;  %v1695_v20 = vld [vmem:[%s1927_s23 + $0x18] sm:$0xff]   ;;  %v1697_v22 = vld [vmem:[%s1927_s23 + $0x20] sm:$0xff]   ;;  %v1698_v23 = vld [vmem:[%s1927_s23 + $0x28] sm:$0xff]  }
  0x4b   : > { %v1696_v21 = vld [vmem:[%s1927_s23 + $0x78] sm:$0xff]   ;;  %v1699_v24 = vld [vmem:[%s1927_s23 + $0x30] sm:$0xff]   ;;  %v1701_v26 = vld [vmem:[%s1927_s23 + $0x40] sm:$0xff]  }
  0x4c   : > { %v385_v10 = vcombine.high %v377_v9, %v377_v9  ;;  %v437_v11 = vsel %vm435_vm0, %v377_v9, 0  ;;  %v443_v15 = vsel %vm435_vm0, %v384_v12, 0  ;;  %v1700_v25 = vld [vmem:[%s1927_s23 + $0x38] sm:$0xff]   ;;  %v1702_v27 = vld [vmem:[%s1927_s23 + $0x48] sm:$0xff]   ;;  %v1703_v28 = vld [vmem:[%s1927_s23 + $0x50] sm:$0xff]  }
  0x4d   : > { %v1704_v29 = vld [vmem:[%s1927_s23 + $0x58] sm:$0xff]  }
  0x4e   : > { %1422 = vmatprep.subr.msk.bf16.mxu0 %vm435_vm0, %v385_v10  ;;  %1637 = vmatprep.subr.msk.bf16.mxu1 %vm435_vm0, %v385_v10 }
  0x4f   : > { %446 = vmatpush1.bf16.msra.mxu0 %v437_v11  ;;  %1638 = vmatpush1.bf16.msra.mxu1 %v437_v11 }
  0x50   : > { %1639 = vmatprep.subr.msk.bf16.mxu1 %vm435_vm0, %v384_v12 }
  0x52   : > { %1423 = vmatmul.mubr.msk.bf16.vlgmr.msra.gmra.mrb[0].mxu0 %vm386_vm1, %v1689_v13  ;;  %1435 = vmatmul.mubr.msk.bf16.vlgmr.msra.gmra.mrb[0].mxu1 %vm386_vm1, %v1690_v14 }
  0x53   : > { %1604 = vmatpush3.bf16.msra.mxu1 %v443_v15  ;;  %487 = vmatprep.mubr.bf16.mxu0 %v1796_v3 }
  0x54   : > { %607 = vmatprep.mubr.bf16.mxu1 %v1796_v3 }
  0x5a   : > { %1424 = vmatmul.mubr.msk.bf16.gmra.mrb[4].mxu0 %vm386_vm1, %v1691_v16  ;;  %1436 = vmatmul.mubr.msk.bf16.gmra.mrb[4].mxu1 %vm386_vm1, %v1692_v17 }
  0x5b   : > { %497 = vmatprep.mubr.bf16.mxu0 %v1796_v3  ;;  %617 = vmatprep.mubr.bf16.mxu1 %v1796_v3 }
  0x62   : > { %1425 = vmatmul.mubr.msk.bf16.gmra.mrb[8].mxu0 %vm386_vm1, %v1693_v18  ;;  %1437 = vmatmul.mubr.msk.bf16.gmra.mrb[8].mxu1 %vm386_vm1, %v1694_v19 }
  0x63   : > { %507 = vmatprep.mubr.bf16.mxu0 %v1796_v3  ;;  %627 = vmatprep.mubr.bf16.mxu1 %v1796_v3 }
  0x6a   : > { %1426 = vmatmul.mubr.msk.bf16.gmra.mrb[12].mxu0 %vm386_vm1, %v1695_v20  ;;  %1438 = vmatmul.mubr.msk.bf16.gmra.mrb[12].mxu1 %vm386_vm1, %v1696_v21 }
  0x6b   : > { %517 = vmatprep.mubr.bf16.mxu0 %v1796_v3  ;;  %1605 = vmatprep.mubr.msk.bf16.mxu1 %vm386_vm1, %v1689_v13 }
  0x72   : > { %1427 = vmatmul.mubr.msk.bf16.gmra.mrb[16].mxu0 %vm386_vm1, %v1697_v22  ;;  %1606 = vmatmul.mubr.msk.bf16.vlgmr.msra.gmra.mrb[16].mxu1 %vm386_vm1, %v1691_v16 }
  0x73   : > { %527 = vmatprep.mubr.bf16.mxu0 %v1796_v3  ;;  %1609 = vmatprep.mubr.msk.bf16.mxu1 %vm386_vm1, %v1693_v18 }
  0x7a   : > { %1428 = vmatmul.mubr.msk.bf16.gmra.mrb[20].mxu0 %vm386_vm1, %v1698_v23  ;;  %1610 = vmatmul.mubr.msk.bf16.gmra.mrb[20].mxu1 %vm386_vm1, %v1695_v20 }
  0x7b   : > { %537 = vmatprep.mubr.bf16.mxu0 %v1796_v3  ;;  %1613 = vmatprep.mubr.msk.bf16.mxu1 %vm386_vm1, %v1697_v22 }
  0x82   : > { %1429 = vmatmul.mubr.msk.bf16.gmra.mrb[24].mxu0 %vm386_vm1, %v1699_v24  ;;  %1614 = vmatmul.mubr.msk.bf16.gmra.mrb[24].mxu1 %vm386_vm1, %v1698_v23 }
  0x83   : > { %547 = vmatprep.mubr.bf16.mxu0 %v1796_v3  ;;  %1617 = vmatprep.mubr.msk.bf16.mxu1 %vm386_vm1, %v1699_v24 }
  0x8a   : > { %1430 = vmatmul.mubr.msk.bf16.gmra.mrb[28].mxu0 %vm386_vm1, %v1700_v25  ;;  %1618 = vmatmul.mubr.msk.bf16.gmra.mrb[28].mxu1 %vm386_vm1, %v1700_v25 }
  0x8b   : > { %557 = vmatprep.mubr.bf16.mxu0 %v1796_v3  ;;  %1621 = vmatprep.mubr.msk.bf16.mxu1 %vm386_vm1, %v1701_v26 }
  0x92   : > { %1431 = vmatmul.mubr.msk.bf16.gmra.mrb[32].mxu0 %vm386_vm1, %v1701_v26  ;;  %1622 = vmatmul.mubr.msk.bf16.gmra.mrb[32].mxu1 %vm386_vm1, %v1702_v27 }
  0x93   : > { %567 = vmatprep.mubr.bf16.mxu0 %v1796_v3  ;;  %1625 = vmatprep.mubr.msk.bf16.mxu1 %vm386_vm1, %v1703_v28 }
  0x9a   : > { %1432 = vmatmul.mubr.msk.bf16.gmra.mrb[36].mxu0 %vm386_vm1, %v1702_v27  ;;  %1626 = vmatmul.mubr.msk.bf16.gmra.mrb[36].mxu1 %vm386_vm1, %v1704_v29 }
  0x9b   : > { %577 = vmatprep.mubr.bf16.mxu0 %v1796_v3  ;;  %1629 = vmatprep.mubr.msk.bf16.mxu1 %vm386_vm1, %v1690_v14 }
  0xa2   : > { %1433 = vmatmul.mubr.msk.bf16.gmra.mrb[40].mxu0 %vm386_vm1, %v1703_v28  ;;  %1630 = vmatmul.mubr.msk.bf16.gmra.mrb[40].mxu1 %vm386_vm1, %v1692_v17 }
  0xa3   : > { %587 = vmatprep.mubr.bf16.mxu0 %v1796_v3  ;;  %1633 = vmatprep.mubr.msk.bf16.mxu1 %vm386_vm1, %v1694_v19 }
  0xaa   : > { %1434 = vmatmul.mubr.msk.bf16.gmra.mrb[44].mxu0 %vm386_vm1, %v1704_v29  ;;  %1634 = vmatmul.mubr.msk.bf16.gmra.mrb[44].mxu1 %vm386_vm1, %v1696_v21 }
 0x125   : > { %v479_v35 = vpop.f32.mrb[0].mxu0  ;;  %v599_v36 = vpop.f32.mrb[0].mxu1 }
 0x126   : > { %v480_v37 = vadd.f32 %v479_v35, %v2001_v33  ;;  %v600_v38 = vadd.f32 %v599_v36, %v2001_v33  ;;  %v481_v39 = vpop.f32.mrb[1].mxu0  ;;  %v601_v40 = vpop.f32.mrb[1].mxu1 }
 0x127   : > { %v482_v41 = vadd.f32 %v481_v39, %v2004_v34  ;;  %v602_v42 = vadd.f32 %v601_v40, %v2004_v34  ;;  %v483_v43 = vpop.f32.mrb[2].mxu0  ;;  %v603_v44 = vpop.f32.mrb[2].mxu1 }
 0x128   : > { %v799_v45 = vmax.f32 %v480_v37, 0.0  ;;  %v871_v46 = vmax.f32 %v600_v38, 0.0  ;;  %v484_v47 = vadd.f32 %v483_v43, %v2001_v33  ;;  %v604_v48 = vadd.f32 %v603_v44, %v2001_v33  ;;  %v485_v49 = vpop.f32.mrb[3].mxu0  ;;  %v605_v50 = vpop.f32.mrb[3].mxu1 }
 0x129   : > { %v800_v51 = vmax.f32 %v482_v41, 0.0  ;;  %v872_v52 = vmax.f32 %v602_v42, 0.0  ;;  %v486_v53 = vadd.f32 %v485_v49, %v2004_v34  ;;  %v606_v54 = vadd.f32 %v605_v50, %v2004_v34 }
 0x12a   : > { %v802_v55 = vmax.f32 %v484_v47, 0.0  ;;  %v874_v56 = vmax.f32 %v604_v48, 0.0 }
 0x12b   : > { %v1522_v57 = vpack.c.bf16 %v800_v51, %v799_v45  ;;  %v1570_v58 = vpack.c.bf16 %v872_v52, %v871_v46  ;;  %v803_v59 = vmax.f32 %v486_v53, 0.0  ;;  %v875_v60 = vmax.f32 %v606_v54, 0.0 }
 0x12d   : > { %1215 = vst [vmem:[%s2018_s28] sm:$0xff] %v1522_v57  ;;  %1263 = vst [vmem:[%s2018_s28 + $0x120] sm:$0xff] %v1570_v58  ;;  %v1524_v61 = vpack.c.bf16 %v803_v59, %v802_v55  ;;  %v1572_v62 = vpack.c.bf16 %v875_v60, %v874_v56  ;;  %v489_v63 = vpop.f32.mrb[4].mxu0  ;;  %v609_v0 = vpop.f32.mrb[4].mxu1 }
 0x12e   : > { %v490_v1 = vadd.f32 %v489_v63, %v2001_v33  ;;  %v610_v2 = vadd.f32 %v609_v0, %v2001_v33  ;;  %v491_v3 = vpop.f32.mrb[5].mxu0  ;;  %v611_v5 = vpop.f32.mrb[5].mxu1 }
 0x12f   : > { %1217 = vst [vmem:[%s2018_s28 + $0xc] sm:$0xff] %v1524_v61  ;;  %1265 = vst [vmem:[%s2018_s28 + $0x12c] sm:$0xff] %v1572_v62  ;;  %v492_v6 = vadd.f32 %v491_v3, %v2004_v34  ;;  %v612_v7 = vadd.f32 %v611_v5, %v2004_v34  ;;  %v493_v8 = vpop.f32.mrb[6].mxu0  ;;  %v613_v9 = vpop.f32.mrb[6].mxu1 }
 0x130   : > { %v805_v10 = vmax.f32 %v490_v1, 0.0  ;;  %v877_v11 = vmax.f32 %v610_v2, 0.0  ;;  %v494_v12 = vadd.f32 %v493_v8, %v2001_v33  ;;  %v614_v13 = vadd.f32 %v613_v9, %v2001_v33  ;;  %v495_v14 = vpop.f32.mrb[7].mxu0  ;;  %v615_v15 = vpop.f32.mrb[7].mxu1 }
 0x131   : > { %v806_v16 = vmax.f32 %v492_v6, 0.0  ;;  %v878_v17 = vmax.f32 %v612_v7, 0.0  ;;  %v496_v18 = vadd.f32 %v495_v14, %v2004_v34  ;;  %v616_v19 = vadd.f32 %v615_v15, %v2004_v34 }
 0x132   : > { %v808_v20 = vmax.f32 %v494_v12, 0.0  ;;  %v880_v21 = vmax.f32 %v614_v13, 0.0  ;;  %v284_v1 = vsub.s32 2, %v1917_v4 }
 0x133   : > { %v1526_v22 = vpack.c.bf16 %v806_v16, %v805_v10  ;;  %v1574_v23 = vpack.c.bf16 %v878_v17, %v877_v11  ;;  %v809_v24 = vmax.f32 %v496_v18, 0.0  ;;  %v881_v25 = vmax.f32 %v616_v19, 0.0 }
 0x134   : > { %v2058_v18 = vrot.slane %v1997_v31, %v284_v1 }
 0x135   : > { %1219 = vst [vmem:[%s2018_s28 + $0x18] sm:$0xff] %v1526_v22  ;;  %1267 = vst [vmem:[%s2018_s28 + $0x138] sm:$0xff] %v1574_v23  ;;  %v1528_v26 = vpack.c.bf16 %v809_v24, %v808_v20  ;;  %v1576_v27 = vpack.c.bf16 %v881_v25, %v880_v21  ;;  %v499_v28 = vpop.f32.mrb[8].mxu0  ;;  %v619_v29 = vpop.f32.mrb[8].mxu1 }
 0x136   : > { %v500_v30 = vadd.f32 %v499_v28, %v2001_v33  ;;  %v620_v32 = vadd.f32 %v619_v29, %v2001_v33  ;;  %v501_v35 = vpop.f32.mrb[9].mxu0  ;;  %v621_v36 = vpop.f32.mrb[9].mxu1 }
 0x137   : > { %1221 = vst [vmem:[%s2018_s28 + $0x24] sm:$0xff] %v1528_v26  ;;  %1269 = vst [vmem:[%s2018_s28 + $0x144] sm:$0xff] %v1576_v27  ;;  %v502_v37 = vadd.f32 %v501_v35, %v2004_v34  ;;  %v622_v38 = vadd.f32 %v621_v36, %v2004_v34  ;;  %v503_v39 = vpop.f32.mrb[10].mxu0  ;;  %v623_v40 = vpop.f32.mrb[10].mxu1 }
 0x138   : > { %v811_v41 = vmax.f32 %v500_v30, 0.0  ;;  %v883_v42 = vmax.f32 %v620_v32, 0.0  ;;  %v504_v43 = vadd.f32 %v503_v39, %v2001_v33  ;;  %v624_v44 = vadd.f32 %v623_v40, %v2001_v33  ;;  %v505_v45 = vpop.f32.mrb[11].mxu0  ;;  %v625_v46 = vpop.f32.mrb[11].mxu1 }
 0x139   : > { %v812_v47 = vmax.f32 %v502_v37, 0.0  ;;  %v884_v48 = vmax.f32 %v622_v38, 0.0  ;;  %v506_v49 = vadd.f32 %v505_v45, %v2004_v34  ;;  %v626_v50 = vadd.f32 %v625_v46, %v2004_v34 }
 0x13a   : > { %v814_v51 = vmax.f32 %v504_v43, 0.0  ;;  %v886_v52 = vmax.f32 %v624_v44, 0.0 }
 0x13b   : > { %v1530_v53 = vpack.c.bf16 %v812_v47, %v811_v41  ;;  %v1578_v54 = vpack.c.bf16 %v884_v48, %v883_v42  ;;  %v815_v55 = vmax.f32 %v506_v49, 0.0  ;;  %v887_v56 = vmax.f32 %v626_v50, 0.0 }
 0x13d   : > { %1223 = vst [vmem:[%s2018_s28 + $0x30] sm:$0xff] %v1530_v53  ;;  %1271 = vst [vmem:[%s2018_s28 + $0x150] sm:$0xff] %v1578_v54  ;;  %v1532_v57 = vpack.c.bf16 %v815_v55, %v814_v51  ;;  %v1580_v58 = vpack.c.bf16 %v887_v56, %v886_v52  ;;  %v509_v59 = vpop.f32.mrb[12].mxu0  ;;  %v629_v60 = vpop.f32.mrb[12].mxu1 }
 0x13e   : > { %v510_v61 = vadd.f32 %v509_v59, %v2001_v33  ;;  %v630_v62 = vadd.f32 %v629_v60, %v2001_v33  ;;  %v511_v63 = vpop.f32.mrb[13].mxu0  ;;  %v631_v0 = vpop.f32.mrb[13].mxu1 }
 0x13f   : > { %1225 = vst [vmem:[%s2018_s28 + $0x3c] sm:$0xff] %v1532_v57  ;;  %1273 = vst [vmem:[%s2018_s28 + $0x15c] sm:$0xff] %v1580_v58  ;;  %v512_v2 = vadd.f32 %v511_v63, %v2004_v34  ;;  %v632_v3 = vadd.f32 %v631_v0, %v2004_v34  ;;  %v513_v5 = vpop.f32.mrb[14].mxu0  ;;  %v633_v6 = vpop.f32.mrb[14].mxu1 }
 0x140   : > { %v817_v7 = vmax.f32 %v510_v61, 0.0  ;;  %v889_v8 = vmax.f32 %v630_v62, 0.0  ;;  %v514_v9 = vadd.f32 %v513_v5, %v2001_v33  ;;  %v634_v10 = vadd.f32 %v633_v6, %v2001_v33  ;;  %v515_v11 = vpop.f32.mrb[15].mxu0  ;;  %v635_v12 = vpop.f32.mrb[15].mxu1 }
 0x141   : > { %v818_v13 = vmax.f32 %v512_v2, 0.0  ;;  %v890_v4 = vmax.f32 %v632_v3, 0.0  ;;  %v516_v14 = vadd.f32 %v515_v11, %v2004_v34  ;;  %v636_v15 = vadd.f32 %v635_v12, %v2004_v34 }
 0x142   : > { %v820_v16 = vmax.f32 %v514_v9, 0.0  ;;  %v892_v17 = vmax.f32 %v634_v10, 0.0 }
 0x143   : > { %v1534_v19 = vpack.c.bf16 %v818_v13, %v817_v7  ;;  %v1582_v20 = vpack.c.bf16 %v890_v4, %v889_v8  ;;  %v821_v21 = vmax.f32 %v516_v14, 0.0  ;;  %v893_v22 = vmax.f32 %v636_v15, 0.0 }
 0x145   : > { %1227 = vst [vmem:[%s2018_s28 + $0x48] sm:$0xff] %v1534_v19  ;;  %1275 = vst [vmem:[%s2018_s28 + $0x168] sm:$0xff] %v1582_v20  ;;  %v1536_v23 = vpack.c.bf16 %v821_v21, %v820_v16  ;;  %v1584_v24 = vpack.c.bf16 %v893_v22, %v892_v17  ;;  %v519_v25 = vpop.f32.mrb[16].mxu0  ;;  %v1607_v26 = vpop.f32.mrb[16].mxu1 }
 0x146   : > { %v520_v27 = vadd.f32 %v519_v25, %v2001_v33  ;;  %v681_v28 = vadd.f32 %v1607_v26, %v2058_v18  ;;  %v521_v29 = vpop.f32.mrb[17].mxu0  ;;  %v672_v30 = vpop.f32.mrb[17].mxu1 }
 0x147   : > { %1229 = vst [vmem:[%s2018_s28 + $0x54] sm:$0xff] %v1536_v23  ;;  %1277 = vst [vmem:[%s2018_s28 + $0x174] sm:$0xff] %v1584_v24  ;;  %v522_v31 = vadd.f32 %v521_v29, %v2004_v34  ;;  %v673_v32 = vadd.f32 %v672_v30, %v2058_v18  ;;  %v523_v35 = vpop.f32.mrb[18].mxu0  ;;  %v1608_v36 = vpop.f32.mrb[18].mxu1 }
 0x148   : > { %v823_v37 = vmax.f32 %v520_v27, 0.0  ;;  %v807_v38 = vmax.f32 %v681_v28, 0.0  ;;  %v524_v39 = vadd.f32 %v523_v35, %v2001_v33  ;;  %v684_v40 = vadd.f32 %v1608_v36, %v2058_v18  ;;  %v525_v41 = vpop.f32.mrb[19].mxu0  ;;  %v675_v42 = vpop.f32.mrb[19].mxu1 }
 0x149   : > { %v824_v43 = vmax.f32 %v522_v31, 0.0  ;;  %v801_v44 = vmax.f32 %v673_v32, 0.0  ;;  %v526_v45 = vadd.f32 %v525_v41, %v2004_v34  ;;  %v676_v46 = vadd.f32 %v675_v42, %v2058_v18 }
 0x14a   : > { %v1527_v47 = vpack.c.bf16 %v807_v38, %v807_v38  ;;  %v826_v48 = vmax.f32 %v524_v39, 0.0  ;;  %v810_v49 = vmax.f32 %v684_v40, 0.0 }
 0x14b   : > { %v1538_v50 = vpack.c.bf16 %v824_v43, %v823_v37  ;;  %v1523_v51 = vpack.c.bf16 %v801_v44, %v801_v44  ;;  %v827_v52 = vmax.f32 %v526_v45, 0.0  ;;  %v804_v53 = vmax.f32 %v676_v46, 0.0 }
 0x14c   : > { %1220 = vst [vmem:[%s2018_s28 + $0x20] sm:$0xf] %v1527_v47  ;;  %v1529_v54 = vpack.c.bf16 %v810_v49, %v810_v49 }
 0x14d   : > { %1231 = vst [vmem:[%s2018_s28 + $0x60] sm:$0xff] %v1538_v50  ;;  %1216 = vst [vmem:[%s2018_s28 + $0x8] sm:$0xf] %v1523_v51  ;;  %v1540_v55 = vpack.c.bf16 %v827_v52, %v826_v48  ;;  %v1525_v56 = vpack.c.bf16 %v804_v53, %v804_v53  ;;  %v529_v57 = vpop.f32.mrb[20].mxu0  ;;  %v1611_v58 = vpop.f32.mrb[20].mxu1 }
 0x14e   : > { %1222 = vst [vmem:[%s2018_s28 + $0x2c] sm:$0xf] %v1529_v54  ;;  %v530_v59 = vadd.f32 %v529_v57, %v2001_v33  ;;  %v697_v60 = vadd.f32 %v1611_v58, %v2058_v18  ;;  %v531_v61 = vpop.f32.mrb[21].mxu0  ;;  %v688_v62 = vpop.f32.mrb[21].mxu1 }
 0x14f   : > { %1233 = vst [vmem:[%s2018_s28 + $0x6c] sm:$0xff] %v1540_v55  ;;  %1218 = vst [vmem:[%s2018_s28 + $0x14] sm:$0xf] %v1525_v56  ;;  %v532_v63 = vadd.f32 %v531_v61, %v2004_v34  ;;  %v689_v0 = vadd.f32 %v688_v62, %v2058_v18  ;;  %v533_v1 = vpop.f32.mrb[22].mxu0  ;;  %v1612_v2 = vpop.f32.mrb[22].mxu1 }
 0x150   : > { %v829_v3 = vmax.f32 %v530_v59, 0.0  ;;  %v819_v5 = vmax.f32 %v697_v60, 0.0  ;;  %v534_v6 = vadd.f32 %v533_v1, %v2001_v33  ;;  %v700_v7 = vadd.f32 %v1612_v2, %v2058_v18  ;;  %v535_v8 = vpop.f32.mrb[23].mxu0  ;;  %v691_v9 = vpop.f32.mrb[23].mxu1 }
 0x151   : > { %v830_v10 = vmax.f32 %v532_v63, 0.0  ;;  %v813_v11 = vmax.f32 %v689_v0, 0.0  ;;  %v536_v12 = vadd.f32 %v535_v8, %v2004_v34  ;;  %v692_v13 = vadd.f32 %v691_v9, %v2058_v18 }
 0x152   : > { %v1535_v4 = vpack.c.bf16 %v819_v5, %v819_v5  ;;  %v832_v14 = vmax.f32 %v534_v6, 0.0  ;;  %v822_v15 = vmax.f32 %v700_v7, 0.0 }
 0x153   : > { %v1542_v16 = vpack.c.bf16 %v830_v10, %v829_v3  ;;  %v1531_v17 = vpack.c.bf16 %v813_v11, %v813_v11  ;;  %v833_v19 = vmax.f32 %v536_v12, 0.0  ;;  %v816_v20 = vmax.f32 %v692_v13, 0.0 }
 0x154   : > { %1228 = vst [vmem:[%s2018_s28 + $0x50] sm:$0xf] %v1535_v4  ;;  %v1537_v21 = vpack.c.bf16 %v822_v15, %v822_v15 }
 0x155   : > { %1235 = vst [vmem:[%s2018_s28 + $0x78] sm:$0xff] %v1542_v16  ;;  %1224 = vst [vmem:[%s2018_s28 + $0x38] sm:$0xf] %v1531_v17  ;;  %v1544_v22 = vpack.c.bf16 %v833_v19, %v832_v14  ;;  %v1533_v23 = vpack.c.bf16 %v816_v20, %v816_v20  ;;  %v539_v24 = vpop.f32.mrb[24].mxu0  ;;  %v1615_v25 = vpop.f32.mrb[24].mxu1 }
 0x156   : > { %1230 = vst [vmem:[%s2018_s28 + $0x5c] sm:$0xf] %v1537_v21  ;;  %v540_v26 = vadd.f32 %v539_v24, %v2001_v33  ;;  %v713_v27 = vadd.f32 %v1615_v25, %v2058_v18  ;;  %v541_v28 = vpop.f32.mrb[25].mxu0  ;;  %v704_v29 = vpop.f32.mrb[25].mxu1 }
 0x157   : > { %1237 = vst [vmem:[%s2018_s28 + $0x84] sm:$0xff] %v1544_v22  ;;  %1226 = vst [vmem:[%s2018_s28 + $0x44] sm:$0xf] %v1533_v23  ;;  %v542_v30 = vadd.f32 %v541_v28, %v2004_v34  ;;  %v705_v31 = vadd.f32 %v704_v29, %v2058_v18  ;;  %v543_v32 = vpop.f32.mrb[26].mxu0  ;;  %v1616_v35 = vpop.f32.mrb[26].mxu1 }
 0x158   : > { %v835_v36 = vmax.f32 %v540_v26, 0.0  ;;  %v831_v37 = vmax.f32 %v713_v27, 0.0  ;;  %v544_v38 = vadd.f32 %v543_v32, %v2001_v33  ;;  %v716_v39 = vadd.f32 %v1616_v35, %v2058_v18  ;;  %v545_v40 = vpop.f32.mrb[27].mxu0  ;;  %v707_v41 = vpop.f32.mrb[27].mxu1 }
 0x159   : > { %v836_v42 = vmax.f32 %v542_v30, 0.0  ;;  %v825_v43 = vmax.f32 %v705_v31, 0.0  ;;  %v546_v44 = vadd.f32 %v545_v40, %v2004_v34  ;;  %v708_v45 = vadd.f32 %v707_v41, %v2058_v18 }
 0x15a   : > { %v1543_v46 = vpack.c.bf16 %v831_v37, %v831_v37  ;;  %v838_v47 = vmax.f32 %v544_v38, 0.0  ;;  %v834_v48 = vmax.f32 %v716_v39, 0.0 }
 0x15b   : > { %v1546_v49 = vpack.c.bf16 %v836_v42, %v835_v36  ;;  %v1539_v50 = vpack.c.bf16 %v825_v43, %v825_v43  ;;  %v839_v51 = vmax.f32 %v546_v44, 0.0  ;;  %v828_v52 = vmax.f32 %v708_v45, 0.0 }
 0x15c   : > { %1236 = vst [vmem:[%s2018_s28 + $0x80] sm:$0xf] %v1543_v46  ;;  %v1545_v53 = vpack.c.bf16 %v834_v48, %v834_v48 }
 0x15d   : > { %1239 = vst [vmem:[%s2018_s28 + $0x90] sm:$0xff] %v1546_v49  ;;  %1232 = vst [vmem:[%s2018_s28 + $0x68] sm:$0xf] %v1539_v50  ;;  %v1548_v54 = vpack.c.bf16 %v839_v51, %v838_v47  ;;  %v1541_v55 = vpack.c.bf16 %v828_v52, %v828_v52  ;;  %v549_v56 = vpop.f32.mrb[28].mxu0  ;;  %v1619_v57 = vpop.f32.mrb[28].mxu1 }
 0x15e   : > { %1238 = vst [vmem:[%s2018_s28 + $0x8c] sm:$0xf] %v1545_v53  ;;  %v550_v58 = vadd.f32 %v549_v56, %v2001_v33  ;;  %v729_v59 = vadd.f32 %v1619_v57, %v2058_v18  ;;  %v551_v60 = vpop.f32.mrb[29].mxu0  ;;  %v720_v61 = vpop.f32.mrb[29].mxu1 }
 0x15f   : > { %1241 = vst [vmem:[%s2018_s28 + $0x9c] sm:$0xff] %v1548_v54  ;;  %1234 = vst [vmem:[%s2018_s28 + $0x74] sm:$0xf] %v1541_v55  ;;  %v552_v62 = vadd.f32 %v551_v60, %v2004_v34  ;;  %v721_v63 = vadd.f32 %v720_v61, %v2058_v18  ;;  %v553_v0 = vpop.f32.mrb[30].mxu0  ;;  %v1620_v1 = vpop.f32.mrb[30].mxu1 }
 0x160   : > { %v841_v2 = vmax.f32 %v550_v58, 0.0  ;;  %v843_v3 = vmax.f32 %v729_v59, 0.0  ;;  %v554_v5 = vadd.f32 %v553_v0, %v2001_v33  ;;  %v732_v6 = vadd.f32 %v1620_v1, %v2058_v18  ;;  %v555_v7 = vpop.f32.mrb[31].mxu0  ;;  %v723_v8 = vpop.f32.mrb[31].mxu1 }
 0x161   : > { %v842_v9 = vmax.f32 %v552_v62, 0.0  ;;  %v837_v10 = vmax.f32 %v721_v63, 0.0  ;;  %v556_v11 = vadd.f32 %v555_v7, %v2004_v34  ;;  %v724_v12 = vadd.f32 %v723_v8, %v2058_v18 }
 0x162   : > { %v1551_v13 = vpack.c.bf16 %v843_v3, %v843_v3  ;;  %v844_v4 = vmax.f32 %v554_v5, 0.0  ;;  %v846_v14 = vmax.f32 %v732_v6, 0.0 }
 0x163   : > { %v1550_v15 = vpack.c.bf16 %v842_v9, %v841_v2  ;;  %v1547_v16 = vpack.c.bf16 %v837_v10, %v837_v10  ;;  %v845_v17 = vmax.f32 %v556_v11, 0.0  ;;  %v840_v19 = vmax.f32 %v724_v12, 0.0 }
 0x164   : > { %1244 = vst [vmem:[%s2018_s28 + $0xb0] sm:$0xf] %v1551_v13  ;;  %v1553_v20 = vpack.c.bf16 %v846_v14, %v846_v14 }
 0x165   : > { %1243 = vst [vmem:[%s2018_s28 + $0xa8] sm:$0xff] %v1550_v15  ;;  %1240 = vst [vmem:[%s2018_s28 + $0x98] sm:$0xf] %v1547_v16  ;;  %v1552_v21 = vpack.c.bf16 %v845_v17, %v844_v4  ;;  %v1549_v22 = vpack.c.bf16 %v840_v19, %v840_v19  ;;  %v559_v23 = vpop.f32.mrb[32].mxu0  ;;  %v1623_v24 = vpop.f32.mrb[32].mxu1 }
 0x166   : > { %1246 = vst [vmem:[%s2018_s28 + $0xbc] sm:$0xf] %v1553_v20  ;;  %v560_v25 = vadd.f32 %v559_v23, %v2001_v33  ;;  %v745_v26 = vadd.f32 %v1623_v24, %v2058_v18  ;;  %v561_v27 = vpop.f32.mrb[33].mxu0  ;;  %v736_v28 = vpop.f32.mrb[33].mxu1 }
 0x167   : > { %1245 = vst [vmem:[%s2018_s28 + $0xb4] sm:$0xff] %v1552_v21  ;;  %1242 = vst [vmem:[%s2018_s28 + $0xa4] sm:$0xf] %v1549_v22  ;;  %v562_v29 = vadd.f32 %v561_v27, %v2004_v34  ;;  %v737_v30 = vadd.f32 %v736_v28, %v2058_v18  ;;  %v563_v31 = vpop.f32.mrb[34].mxu0  ;;  %v1624_v32 = vpop.f32.mrb[34].mxu1 }
 0x168   : > { %v847_v35 = vmax.f32 %v560_v25, 0.0  ;;  %v855_v36 = vmax.f32 %v745_v26, 0.0  ;;  %v564_v37 = vadd.f32 %v563_v31, %v2001_v33  ;;  %v748_v38 = vadd.f32 %v1624_v32, %v2058_v18  ;;  %v565_v39 = vpop.f32.mrb[35].mxu0  ;;  %v739_v40 = vpop.f32.mrb[35].mxu1 }
 0x169   : > { %v848_v41 = vmax.f32 %v562_v29, 0.0  ;;  %v849_v42 = vmax.f32 %v737_v30, 0.0  ;;  %v566_v43 = vadd.f32 %v565_v39, %v2004_v34  ;;  %v740_v44 = vadd.f32 %v739_v40, %v2058_v18 }
 0x16a   : > { %v1559_v45 = vpack.c.bf16 %v855_v36, %v855_v36  ;;  %v850_v46 = vmax.f32 %v564_v37, 0.0  ;;  %v858_v47 = vmax.f32 %v748_v38, 0.0 }
 0x16b   : > { %v1554_v48 = vpack.c.bf16 %v848_v41, %v847_v35  ;;  %v1555_v49 = vpack.c.bf16 %v849_v42, %v849_v42  ;;  %v851_v50 = vmax.f32 %v566_v43, 0.0  ;;  %v852_v51 = vmax.f32 %v740_v44, 0.0 }
 0x16c   : > { %1252 = vst [vmem:[%s2018_s28 + $0xe0] sm:$0xf] %v1559_v45  ;;  %v1561_v52 = vpack.c.bf16 %v858_v47, %v858_v47 }
 0x16d   : > { %1247 = vst [vmem:[%s2018_s28 + $0xc0] sm:$0xff] %v1554_v48  ;;  %1248 = vst [vmem:[%s2018_s28 + $0xc8] sm:$0xf] %v1555_v49  ;;  %v1556_v53 = vpack.c.bf16 %v851_v50, %v850_v46  ;;  %v1557_v54 = vpack.c.bf16 %v852_v51, %v852_v51  ;;  %v569_v55 = vpop.f32.mrb[36].mxu0  ;;  %v1627_v56 = vpop.f32.mrb[36].mxu1 }
 0x16e   : > { %1254 = vst [vmem:[%s2018_s28 + $0xec] sm:$0xf] %v1561_v52  ;;  %v570_v57 = vadd.f32 %v569_v55, %v2001_v33  ;;  %v761_v58 = vadd.f32 %v1627_v56, %v2058_v18  ;;  %v571_v59 = vpop.f32.mrb[37].mxu0  ;;  %v752_v60 = vpop.f32.mrb[37].mxu1 }
 0x16f   : > { %1249 = vst [vmem:[%s2018_s28 + $0xcc] sm:$0xff] %v1556_v53  ;;  %1250 = vst [vmem:[%s2018_s28 + $0xd4] sm:$0xf] %v1557_v54  ;;  %v572_v61 = vadd.f32 %v571_v59, %v2004_v34  ;;  %v753_v62 = vadd.f32 %v752_v60, %v2058_v18  ;;  %v573_v63 = vpop.f32.mrb[38].mxu0  ;;  %v1628_v0 = vpop.f32.mrb[38].mxu1 }
 0x170   : > { %v853_v1 = vmax.f32 %v570_v57, 0.0  ;;  %v867_v2 = vmax.f32 %v761_v58, 0.0  ;;  %v574_v3 = vadd.f32 %v573_v63, %v2001_v33  ;;  %v764_v5 = vadd.f32 %v1628_v0, %v2058_v18  ;;  %v575_v6 = vpop.f32.mrb[39].mxu0  ;;  %v755_v7 = vpop.f32.mrb[39].mxu1 }
 0x171   : > { %v854_v8 = vmax.f32 %v572_v61, 0.0  ;;  %v861_v9 = vmax.f32 %v753_v62, 0.0  ;;  %v576_v10 = vadd.f32 %v575_v6, %v2004_v34  ;;  %v756_v11 = vadd.f32 %v755_v7, %v2058_v18 }
 0x172   : > { %v1567_v12 = vpack.c.bf16 %v867_v2, %v867_v2  ;;  %v856_v13 = vmax.f32 %v574_v3, 0.0  ;;  %v870_v4 = vmax.f32 %v764_v5, 0.0 }
 0x173   : > { %v1558_v14 = vpack.c.bf16 %v854_v8, %v853_v1  ;;  %v1563_v15 = vpack.c.bf16 %v861_v9, %v861_v9  ;;  %v857_v16 = vmax.f32 %v576_v10, 0.0  ;;  %v864_v17 = vmax.f32 %v756_v11, 0.0 }
 0x174   : > { %1260 = vst [vmem:[%s2018_s28 + $0x110] sm:$0xf] %v1567_v12  ;;  %v1569_v19 = vpack.c.bf16 %v870_v4, %v870_v4 }
 0x175   : > { %1251 = vst [vmem:[%s2018_s28 + $0xd8] sm:$0xff] %v1558_v14  ;;  %1256 = vst [vmem:[%s2018_s28 + $0xf8] sm:$0xf] %v1563_v15  ;;  %v1560_v20 = vpack.c.bf16 %v857_v16, %v856_v13  ;;  %v1565_v21 = vpack.c.bf16 %v864_v17, %v864_v17  ;;  %v579_v22 = vpop.f32.mrb[40].mxu0  ;;  %v1631_v23 = vpop.f32.mrb[40].mxu1 }
 0x176   : > { %1262 = vst [vmem:[%s2018_s28 + $0x11c] sm:$0xf] %v1569_v19  ;;  %v580_v24 = vadd.f32 %v579_v22, %v2001_v33  ;;  %v777_v25 = vadd.f32 %v1631_v23, %v2058_v18  ;;  %v581_v26 = vpop.f32.mrb[41].mxu0  ;;  %v768_v27 = vpop.f32.mrb[41].mxu1 }
 0x177   : > { %1253 = vst [vmem:[%s2018_s28 + $0xe4] sm:$0xff] %v1560_v20  ;;  %1258 = vst [vmem:[%s2018_s28 + $0x104] sm:$0xf] %v1565_v21  ;;  %v582_v28 = vadd.f32 %v581_v26, %v2004_v34  ;;  %v769_v29 = vadd.f32 %v768_v27, %v2058_v18  ;;  %v583_v30 = vpop.f32.mrb[42].mxu0  ;;  %v1632_v31 = vpop.f32.mrb[42].mxu1 }
 0x178   : > { %v859_v32 = vmax.f32 %v580_v24, 0.0  ;;  %v879_v35 = vmax.f32 %v777_v25, 0.0  ;;  %v584_v36 = vadd.f32 %v583_v30, %v2001_v33  ;;  %v780_v37 = vadd.f32 %v1632_v31, %v2058_v18  ;;  %v585_v38 = vpop.f32.mrb[43].mxu0  ;;  %v771_v39 = vpop.f32.mrb[43].mxu1 }
 0x179   : > { %v860_v40 = vmax.f32 %v582_v28, 0.0  ;;  %v873_v41 = vmax.f32 %v769_v29, 0.0  ;;  %v586_v42 = vadd.f32 %v585_v38, %v2004_v34  ;;  %v772_v43 = vadd.f32 %v771_v39, %v2058_v18 }
 0x17a   : > { %v1575_v44 = vpack.c.bf16 %v879_v35, %v879_v35  ;;  %v862_v45 = vmax.f32 %v584_v36, 0.0  ;;  %v882_v46 = vmax.f32 %v780_v37, 0.0 }
 0x17b   : > { %v1562_v47 = vpack.c.bf16 %v860_v40, %v859_v32  ;;  %v1571_v48 = vpack.c.bf16 %v873_v41, %v873_v41  ;;  %v863_v49 = vmax.f32 %v586_v42, 0.0  ;;  %v876_v50 = vmax.f32 %v772_v43, 0.0 }
 0x17c   : > { %1268 = vst [vmem:[%s2018_s28 + $0x140] sm:$0xf] %v1575_v44  ;;  %v1577_v51 = vpack.c.bf16 %v882_v46, %v882_v46 }
 0x17d   : > { %1255 = vst [vmem:[%s2018_s28 + $0xf0] sm:$0xff] %v1562_v47  ;;  %1264 = vst [vmem:[%s2018_s28 + $0x128] sm:$0xf] %v1571_v48  ;;  %v1564_v52 = vpack.c.bf16 %v863_v49, %v862_v45  ;;  %v1573_v53 = vpack.c.bf16 %v876_v50, %v876_v50  ;;  %v589_v54 = vpop.f32.mrb[44].mxu0  ;;  %v1635_v55 = vpop.f32.mrb[44].mxu1 }
 0x17e   : > { %1270 = vst [vmem:[%s2018_s28 + $0x14c] sm:$0xf] %v1577_v51  ;;  %v590_v56 = vadd.f32 %v589_v54, %v2001_v33  ;;  %v793_v57 = vadd.f32 %v1635_v55, %v2058_v18  ;;  %v591_v58 = vpop.f32.mrb[45].mxu0  ;;  %v784_v59 = vpop.f32.mrb[45].mxu1 }
 0x17f   : > { %1257 = vst [vmem:[%s2018_s28 + $0xfc] sm:$0xff] %v1564_v52  ;;  %1266 = vst [vmem:[%s2018_s28 + $0x134] sm:$0xf] %v1573_v53  ;;  %v592_v60 = vadd.f32 %v591_v58, %v2004_v34  ;;  %v785_v61 = vadd.f32 %v784_v59, %v2058_v18  ;;  %v593_v62 = vpop.f32.mrb[46].mxu0  ;;  %v1636_v63 = vpop.f32.mrb[46].mxu1 }
 0x180   : > { %v865_v0 = vmax.f32 %v590_v56, 0.0  ;;  %v891_v1 = vmax.f32 %v793_v57, 0.0  ;;  %v594_v2 = vadd.f32 %v593_v62, %v2001_v33  ;;  %v796_v3 = vadd.f32 %v1636_v63, %v2058_v18  ;;  %v595_v5 = vpop.f32.mrb[47].mxu0  ;;  %v787_v6 = vpop.f32.mrb[47].mxu1 }
 0x181   : > { %v866_v7 = vmax.f32 %v592_v60, 0.0  ;;  %v885_v8 = vmax.f32 %v785_v61, 0.0  ;;  %v596_v9 = vadd.f32 %v595_v5, %v2004_v34  ;;  %v788_v10 = vadd.f32 %v787_v6, %v2058_v18 }
 0x182   : > { %v1583_v11 = vpack.c.bf16 %v891_v1, %v891_v1  ;;  %v868_v12 = vmax.f32 %v594_v2, 0.0  ;;  %v894_v13 = vmax.f32 %v796_v3, 0.0 }
 0x183   : > { %v1566_v4 = vpack.c.bf16 %v866_v7, %v865_v0  ;;  %v1579_v33 = vpack.c.bf16 %v885_v8, %v885_v8  ;;  %v869_v14 = vmax.f32 %v596_v9, 0.0  ;;  %v888_v15 = vmax.f32 %v788_v10, 0.0 }
 0x184   : > { %1276 = vst [vmem:[%s2018_s28 + $0x170] sm:$0xf] %v1583_v11  ;;  %v1585_v16 = vpack.c.bf16 %v894_v13, %v894_v13 }
 0x185   : > { %1259 = vst [vmem:[%s2018_s28 + $0x108] sm:$0xff] %v1566_v4  ;;  %1272 = vst [vmem:[%s2018_s28 + $0x158] sm:$0xf] %v1579_v33  ;;  %v1568_v17 = vpack.c.bf16 %v869_v14, %v868_v12  ;;  %v1581_v19 = vpack.c.bf16 %v888_v15, %v888_v15 }
 0x186   : > { %1278 = vst [vmem:[%s2018_s28 + $0x17c] sm:$0xf] %v1585_v16 }
 0x187   : > { %1261 = vst [vmem:[%s2018_s28 + $0x114] sm:$0xff] %v1568_v17  ;;  %1274 = vst [vmem:[%s2018_s28 + $0x164] sm:$0xf] %v1581_v19 }
 0x188 PF: > { %s15_s14 = sadd.s32 1, %s1791_s14   ;;  %s2197_s12 = smov %s1787_s13 }
 0x189   : > { %p12_p9 = scmp.ge.s32.totalorder %s15_s14, 4   ;;  %s2198_s13 = smov %s2200_s16 }
 0x18b   :  { %14 = sbr.rel (!%p12_p9) target bundleno = 3 (0x3), region = 71 }
 0x192   :  { %1311 = vsyncpa [#allocation3], 1 }
 0x193   :  { %1313 = vsyncpa [#allocation3 + $0x1], 1 }
 0x194   :  { %1314 = vsyncpa [#allocation5], 1 }

// kernel: inception_d_forward.8
= control target key start
LH: loop header
LB: loop body
LE: loop exit
PB: predicated region body
PF: predicated region fallthrough
CT: control target
= control target key end

     0   :  { %s5300_s12 = smov 0   ;;  %s5302_s13 = smov 0   ;;  %s6228_s0 = inlined_call_operand.vmem [shape: bf16[2,256,1344], index: 0, kind: input, shape index: {}]   ;;  %s6229_s1 = inlined_call_operand.vmem [shape: bf16[1344,192], index: 1, kind: input, shape index: {}]   ;;  %s6230_s2 = inlined_call_operand.vmem [shape: f32[1,192], index: 2, kind: input, shape index: {}]   ;;  %s6231_s3 = inlined_call_operand.vmem [shape: bf16[2,256,192], index: 3, kind: output, shape index: {}]  }
   0x1   :  { %s5304_s14 = smov 0  }
   0x2 LB: > { %s25_s15 = sadd.s32 1, %s5273_s13  ;;  %p3906_p0 = scmp.ge.s32.totalorder %s5277_s14, 1  ;;  %s5277_s14 = sphi %s5304_s14, %s13_s14   ;;  %s5273_s13 = sphi %s5302_s13, %s6235_s13   ;;  %s5269_s12 = sphi %s5300_s12, %s6234_s12  }
   0x3   : > { %p27_p1 = scmp.ge.s32.totalorder %s25_s15, 2  ;;  %p159_p2 = scmp.lt.s32.totalorder %s5277_s14, 3 }
   0x5   : > { %s6237_s15 = smov (%p27_p1, %s25_s15), 0  ;;  %p160_p3 = pnand %p3906_p0, %p159_p2 }
   0x6   : > { %v4747_v0 = vld [vmem:[%s6229_s1 + $0x4] ss:$8 sps:$4 sm:$0xff] (!%p160_p3)   ;;  %v4751_v2 = vld [vmem:[%s6229_s1] ss:$8 sps:$4 sm:$0xff] (!%p160_p3)   ;;  %v4753_v4 = vld [vmem:[%s6229_s1 + $0x14] ss:$8 sps:$4 sm:$0xff] (!%p160_p3)  }
   0x7   : > { %163 = sbr.rel (%p160_p3) target bundleno = 671 (0x29f), region = 32  ;;  %v4749_v1 = vld [vmem:[%s6229_s1 + $0x304] ss:$8 sps:$4 sm:$0xff] (!%p160_p3)   ;;  %2357 = vmatprep.subr.bf16.mxu1 (!%p160_p3), %v4747_v0  ;;  %v4752_v3 = vld [vmem:[%s6229_s1 + $0x300] ss:$8 sps:$4 sm:$0xff] (!%p160_p3)   ;;  %p194_p4 = scmp.lt.s32.totalorder (!%p160_p3), %s5269_s12, 1 }
   0x8   : > { %2936 = vmatprep.subr.bf16.mxu0 (!%p160_p3), %v4749_v1  ;;  %2358 = vmatpush1.bf16.msra.mxu1 (!%p160_p3), %v4751_v2  ;;  %v4755_v5 = vld [vmem:[%s6229_s1 + $0x314] ss:$8 sps:$4 sm:$0xff] (!%p160_p3)   ;;  %v4757_v6 = vld [vmem:[%s6229_s1 + $0x10] ss:$8 sps:$4 sm:$0xff] (!%p160_p3)   ;;  %v4759_v8 = vld [vmem:[%s6229_s1 + $0x24] ss:$8 sps:$4 sm:$0xff] (!%p160_p3)  }
   0x9   : > { %2937 = vmatpush1.bf16.msra.mxu0 (!%p160_p3), %v4752_v3  ;;  %2359 = vmatprep.subr.bf16.mxu1 (!%p160_p3), %v4753_v4  ;;  %v4758_v7 = vld [vmem:[%s6229_s1 + $0x310] ss:$8 sps:$4 sm:$0xff] (!%p160_p3)   ;;  %v4761_v9 = vld [vmem:[%s6229_s1 + $0x324] ss:$8 sps:$4 sm:$0xff] (!%p160_p3)   ;;  %v4763_v10 = vld [vmem:[%s6229_s1 + $0x20] ss:$8 sps:$4 sm:$0xff] (!%p160_p3)  }
   0xa   : > { %2938 = vmatprep.subr.bf16.mxu0 (!%p160_p3), %v4755_v5  ;;  %v4764_v11 = vld [vmem:[%s6229_s1 + $0x320] ss:$8 sps:$4 sm:$0xff] (!%p160_p3)   ;;  %v4765_v12 = vld [vmem:[%s6229_s1 + $0x34] ss:$8 sps:$4 sm:$0xff] (!%p160_p3)   ;;  %v4769_v14 = vld [vmem:[%s6229_s1 + $0x30] ss:$8 sps:$4 sm:$0xff] (!%p160_p3)  }
   0xb   : > { %v4767_v13 = vld [vmem:[%s6229_s1 + $0x334] ss:$8 sps:$4 sm:$0xff] (!%p160_p3)   ;;  %v4770_v15 = vld [vmem:[%s6229_s1 + $0x330] ss:$8 sps:$4 sm:$0xff] (!%p160_p3)   ;;  %v4771_v16 = vld [vmem:[%s6229_s1 + $0x44] ss:$8 sps:$4 sm:$0xff] (!%p160_p3)  }
   0xc   : > { %2360 = vmatpush1.bf16.msra.mxu1 (!%p160_p3), %v4757_v6  ;;  %v4773_v17 = vld [vmem:[%s6229_s1 + $0x344] ss:$8 sps:$4 sm:$0xff] (!%p160_p3)   ;;  %v4775_v18 = vld [vmem:[%s6229_s1 + $0x40] ss:$8 sps:$4 sm:$0xff] (!%p160_p3)   ;;  %v4777_v20 = vld [vmem:[%s6229_s1 + $0x54] ss:$8 sps:$4 sm:$0xff] (!%p160_p3)  }
   0xd   : > { %2939 = vmatpush1.bf16.msra.mxu0 (!%p160_p3), %v4758_v7  ;;  %2361 = vmatprep.subr.bf16.mxu1 (!%p160_p3), %v4759_v8  ;;  %v4776_v19 = vld [vmem:[%s6229_s1 + $0x340] ss:$8 sps:$4 sm:$0xff] (!%p160_p3)   ;;  %v4779_v21 = vld [vmem:[%s6229_s1 + $0x354] ss:$8 sps:$4 sm:$0xff] (!%p160_p3)   ;;  %v4781_v22 = vld [vmem:[%s6229_s1 + $0x50] ss:$8 sps:$4 sm:$0xff] (!%p160_p3)  }
   0xe   : > { %2940 = vmatprep.subr.bf16.mxu0 %v4761_v9  ;;  %v4782_v23 = vld [vmem:[%s6229_s1 + $0x350] ss:$8 sps:$4 sm:$0xff]   ;;  %v4783_v24 = vld [vmem:[%s6229_s1 + $0x64] ss:$8 sps:$4 sm:$0xff]   ;;  %v4787_v26 = vld [vmem:[%s6229_s1 + $0x60] ss:$8 sps:$4 sm:$0xff]  }
   0xf   : > { %v4785_v25 = vld [vmem:[%s6229_s1 + $0x364] ss:$8 sps:$4 sm:$0xff]   ;;  %v4788_v27 = vld [vmem:[%s6229_s1 + $0x360] ss:$8 sps:$4 sm:$0xff]   ;;  %v4789_v28 = vld [vmem:[%s6229_s1 + $0x74] ss:$8 sps:$4 sm:$0xff]  }
  0x10   : > { %2362 = vmatpush1.bf16.msra.mxu1 %v4763_v10  ;;  %v4791_v29 = vld [vmem:[%s6229_s1 + $0x374] ss:$8 sps:$4 sm:$0xff]   ;;  %v4793_v30 = vld [vmem:[%s6229_s1 + $0x70] ss:$8 sps:$4 sm:$0xff]   ;;  %v4795_v32 = vld [vmem:[%s6229_s1 + $0x84] ss:$8 sps:$4 sm:$0xff]  }
  0x11   : > { %2941 = vmatpush1.bf16.msra.mxu0 %v4764_v11  ;;  %2363 = vmatprep.subr.bf16.mxu1 %v4765_v12  ;;  %v4794_v31 = vld [vmem:[%s6229_s1 + $0x370] ss:$8 sps:$4 sm:$0xff]   ;;  %v4797_v33 = vld [vmem:[%s6229_s1 + $0x384] ss:$8 sps:$4 sm:$0xff]   ;;  %v4799_v34 = vld [vmem:[%s6229_s1 + $0x80] ss:$8 sps:$4 sm:$0xff]  }
  0x12   : > { %2942 = vmatprep.subr.bf16.mxu0 %v4767_v13  ;;  %v4800_v35 = vld [vmem:[%s6229_s1 + $0x380] ss:$8 sps:$4 sm:$0xff]   ;;  %v4801_v36 = vld [vmem:[%s6229_s1 + $0x94] ss:$8 sps:$4 sm:$0xff]   ;;  %s6239_s12 = smov (!%p194_p4, %s5269_s12), 1  ;;  %vm2308_vm0 = vcmask 523264  }
  0x13   : > { %v4803_v37 = vld [vmem:[%s6229_s1 + $0x394] ss:$8 sps:$4 sm:$0xff]   ;;  %v4805_v38 = vld [vmem:[%s6229_s1 + $0x90] ss:$8 sps:$4 sm:$0xff]   ;;  %v4807_v40 = vld [vmem:[%s6229_s1 + $0xa4] ss:$8 sps:$4 sm:$0xff]  }
  0x14   : > { %2364 = vmatpush1.bf16.msra.mxu1 %v4769_v14  ;;  %v4806_v39 = vld [vmem:[%s6229_s1 + $0x390] ss:$8 sps:$4 sm:$0xff]   ;;  %s4721_s29 = smul.u32 1408, %s6239_s12  ;;  %v4809_v41 = vld [vmem:[%s6229_s1 + $0x3a4] ss:$8 sps:$4 sm:$0xff]   ;;  %vm3771_vm1 = vcmask 1043456  }
  0x15   : > { %2943 = vmatpush1.bf16.msra.mxu0 %v4770_v15  ;;  %2365 = vmatprep.subr.bf16.mxu1 %v4771_v16  ;;  %v4811_v42 = vld [vmem:[%s6229_s1 + $0xa0] ss:$8 sps:$4 sm:$0xff]   ;;  %v4813_v44 = vld [vmem:[%s6229_s1 + $0xb4] ss:$8 sps:$4 sm:$0xff]   ;;  %v4817_v46 = vld [vmem:[%s6229_s1 + $0xb0] ss:$8 sps:$4 sm:$0xff]  }
  0x16   : > { %2944 = vmatprep.subr.bf16.mxu0 %v4773_v17  ;;  %v4812_v43 = vld [vmem:[%s6229_s1 + $0x3a0] ss:$8 sps:$4 sm:$0xff]   ;;  %s5463_s17 = scalar_lea.vmem %s6228_s0, %s4721_s29  ;;  %v4815_v45 = vld [vmem:[%s6229_s1 + $0x3b4] ss:$8 sps:$4 sm:$0xff]   ;;  %v4818_v47 = vld [vmem:[%s6229_s1 + $0x3b0] ss:$8 sps:$4 sm:$0xff]  }
  0x17   : > { %v4819_v48 = vld [vmem:[%s6229_s1 + $0xc4] ss:$8 sps:$4 sm:$0xff]   ;;  %v4848_v51 = vld [vmem:[%s5463_s17 + $0x1c] ss:$44 sps:$4 sm:$0xff]   ;;  %v4829_v56 = vld [vmem:[%s6229_s1 + $0xd0] ss:$8 sps:$4 sm:$0xff]  }
  0x18   : > { %2366 = vmatpush1.bf16.msra.mxu1 %v4775_v18  ;;  %v4845_v49 = vld [vmem:[%s5463_s17 + $0x4] ss:$44 sps:$4 sm:$0xff]   ;;  %v4823_v52 = vld [vmem:[%s6229_s1 + $0xc0] ss:$8 sps:$4 sm:$0xff]   ;;  %2968 = vmatprep.mubr.bf16.mxu0 %v4848_v51  ;;  %v4825_v54 = vld [vmem:[%s6229_s1 + $0xd4] ss:$8 sps:$4 sm:$0xff]  }
  0x19   : > { %2945 = vmatpush1.bf16.msra.mxu0 %v4776_v19  ;;  %2367 = vmatprep.subr.bf16.mxu1 %v4777_v20  ;;  %v4821_v50 = vld [vmem:[%s6229_s1 + $0x3c4] ss:$8 sps:$4 sm:$0xff]   ;;  %v4824_v53 = vld [vmem:[%s6229_s1 + $0x3c0] ss:$8 sps:$4 sm:$0xff]   ;;  %v4827_v55 = vld [vmem:[%s6229_s1 + $0x3d4] ss:$8 sps:$4 sm:$0xff]  }
  0x1a   : > { %2946 = vmatprep.subr.bf16.mxu0 %v4779_v21  ;;  %2389 = vmatprep.mubr.bf16.mxu1 %v4845_v49  ;;  %v4830_v57 = vld [vmem:[%s6229_s1 + $0x3d0] ss:$8 sps:$4 sm:$0xff]   ;;  %v4831_v58 = vld [vmem:[%s6229_s1 + $0xe4] ss:$8 sps:$4 sm:$0xff]   ;;  %v4835_v60 = vld [vmem:[%s6229_s1 + $0xe0] ss:$8 sps:$4 sm:$0xff]  }
  0x1b   : > { %v4833_v59 = vld [vmem:[%s6229_s1 + $0x3e4] ss:$8 sps:$4 sm:$0xff]   ;;  %v4836_v61 = vld [vmem:[%s6229_s1 + $0x3e0] ss:$8 sps:$4 sm:$0xff]   ;;  %v4837_v62 = vld [vmem:[%s6229_s1 + $0xf4] ss:$8 sps:$4 sm:$0xff]  }
  0x1c   : > { %2368 = vmatpush1.bf16.msra.mxu1 %v4781_v22  ;;  %v4839_v63 = vld [vmem:[%s6229_s1 + $0x3f4] ss:$8 sps:$4 sm:$0xff]   ;;  %v4841_v0 = vld [vmem:[%s6229_s1 + $0xf0] ss:$8 sps:$4 sm:$0xff]   ;;  %v4851_v2 = vld [vmem:[%s6229_s1 + $0x104] ss:$8 sps:$4 sm:$0xff]  }
  0x1d   : > { %2947 = vmatpush1.bf16.msra.mxu0 %v4782_v23  ;;  %2369 = vmatprep.subr.bf16.mxu1 %v4783_v24  ;;  %v4842_v1 = vld [vmem:[%s6229_s1 + $0x3f0] ss:$8 sps:$4 sm:$0xff]   ;;  %v4843_v3 = vld [vmem:[%s5463_s17] ss:$44 sps:$4 sm:$0xff]   ;;  %v4855_v8 = vld [vmem:[%s5463_s17 + $0x5c] ss:$44 sps:$4 sm:$0xff]  }
  0x1e   : > { %2948 = vmatprep.subr.bf16.mxu0 %v4785_v25  ;;  %v4854_v4 = vld [vmem:[%s6229_s1 + $0x404] ss:$8 sps:$4 sm:$0xff]   ;;  %v4849_v6 = vld [vmem:[%s6229_s1 + $0x100] ss:$8 sps:$4 sm:$0xff]   ;;  %v4862_v10 = vld [vmem:[%s6229_s1 + $0x114] ss:$8 sps:$4 sm:$0xff]  }
  0x1f   : > { %v4846_v5 = vld [vmem:[%s5463_s17 + $0x18] ss:$44 sps:$4 sm:$0xff]   ;;  %v4852_v7 = vld [vmem:[%s6229_s1 + $0x400] ss:$8 sps:$4 sm:$0xff]   ;;  %v4866_v11 = vld [vmem:[%s6229_s1 + $0x414] ss:$8 sps:$4 sm:$0xff]  }
  0x20   : > { %2370 = vmatpush1.bf16.msra.mxu1 %v4787_v26  ;;  %v4857_v9 = vld [vmem:[%s5463_s17 + $0x74] ss:$44 sps:$4 sm:$0xff]   ;;  %v4860_v12 = vld [vmem:[%s6229_s1 + $0x110] ss:$8 sps:$4 sm:$0xff]   ;;  %v4874_v14 = vld [vmem:[%s6229_s1 + $0x124] ss:$8 sps:$4 sm:$0xff]  }
  0x21   : > { %2949 = vmatpush1.bf16.msra.mxu0 %v4788_v27  ;;  %2371 = vmatprep.subr.bf16.mxu1 %v4789_v28  ;;  %v4864_v13 = vld [vmem:[%s6229_s1 + $0x410] ss:$8 sps:$4 sm:$0xff]   ;;  %v4878_v15 = vld [vmem:[%s6229_s1 + $0x424] ss:$8 sps:$4 sm:$0xff]   ;;  %v4867_v18 = vld [vmem:[%s5463_s17 + $0xb4] ss:$44 sps:$4 sm:$0xff]  }
  0x22   : > { %2950 = vmatprep.subr.bf16.mxu0 %v4791_v29  ;;  %v4859_v16 = vld [vmem:[%s5463_s17 + $0x58] ss:$44 sps:$4 sm:$0xff]   ;;  %v4863_v17 = vld [vmem:[%s5463_s17 + $0x70] ss:$44 sps:$4 sm:$0xff]   ;;  %v4872_v20 = vld [vmem:[%s6229_s1 + $0x120] ss:$8 sps:$4 sm:$0xff]  }
  0x23   : > { %v4869_v19 = vld [vmem:[%s5463_s17 + $0xcc] ss:$44 sps:$4 sm:$0xff]   ;;  %v4876_v21 = vld [vmem:[%s6229_s1 + $0x420] ss:$8 sps:$4 sm:$0xff]   ;;  %v4886_v22 = vld [vmem:[%s6229_s1 + $0x134] ss:$8 sps:$4 sm:$0xff]  }
  0x24   : > { %2372 = vmatpush1.bf16.msra.mxu1 %v4793_v30  ;;  %v4890_v23 = vld [vmem:[%s6229_s1 + $0x434] ss:$8 sps:$4 sm:$0xff]   ;;  %v4884_v24 = vld [vmem:[%s6229_s1 + $0x130] ss:$8 sps:$4 sm:$0xff]   ;;  %v4898_v29 = vld [vmem:[%s6229_s1 + $0x144] ss:$8 sps:$4 sm:$0xff]  }
  0x25   : > { %2951 = vmatpush1.bf16.msra.mxu0 %v4794_v31  ;;  %2373 = vmatprep.subr.bf16.mxu1 %v4795_v32  ;;  %v4871_v25 = vld [vmem:[%s5463_s17 + $0xb0] ss:$44 sps:$4 sm:$0xff]   ;;  %v4875_v26 = vld [vmem:[%s5463_s17 + $0xc8] ss:$44 sps:$4 sm:$0xff]   ;;  %v4879_v28 = vld [vmem:[%s5463_s17 + $0x10c] ss:$44 sps:$4 sm:$0xff]  }
  0x26   : > { %2952 = vmatprep.subr.bf16.mxu0 %v4797_v33  ;;  %v4888_v27 = vld [vmem:[%s6229_s1 + $0x430] ss:$8 sps:$4 sm:$0xff]   ;;  %v4902_v30 = vld [vmem:[%s6229_s1 + $0x444] ss:$8 sps:$4 sm:$0xff]   ;;  %v4896_v32 = vld [vmem:[%s6229_s1 + $0x140] ss:$8 sps:$4 sm:$0xff]  }
  0x27   : > { %v4881_v31 = vld [vmem:[%s5463_s17 + $0x124] ss:$44 sps:$4 sm:$0xff]   ;;  %v4900_v33 = vld [vmem:[%s6229_s1 + $0x440] ss:$8 sps:$4 sm:$0xff]   ;;  %vm3772_vm2 = vcmask 523268  }
  0x28   : > { %2374 = vmatpush1.bf16.msra.mxu1 %v4799_v34  ;;  %v4910_v34 = vld [vmem:[%s6229_s1 + $0x154] ss:$8 sps:$4 sm:$0xff]   ;;  %v4895_v49 = vld [vmem:[%s5463_s17 + $0x160] ss:$44 sps:$4 sm:$0xff]   ;;  %v4936_v51 = vld [vmem:[%s6229_s1 + $0x470] ss:$8 sps:$4 sm:$0xff]  }
  0x29   : > { %2953 = vmatpush1.bf16.msra.mxu0 %v4800_v35  ;;  %2375 = vmatprep.subr.bf16.mxu1 %v4801_v36  ;;  %v4914_v35 = vld [vmem:[%s6229_s1 + $0x454] ss:$8 sps:$4 sm:$0xff]   ;;  %v4908_v36 = vld [vmem:[%s6229_s1 + $0x150] ss:$8 sps:$4 sm:$0xff]   ;;  %vm6059_vm3 = vmor %vm3772_vm2, %vm3771_vm1 }
  0x2a   : > { %2954 = vmatprep.subr.bf16.mxu0 %v4803_v37  ;;  %v4912_v37 = vld [vmem:[%s6229_s1 + $0x450] ss:$8 sps:$4 sm:$0xff]  }
  0x2c   : > { %2376 = vmatpush1.bf16.msra.mxu1 %v4805_v38  ;;  %v4883_v38 = vld [vmem:[%s5463_s17 + $0x108] ss:$44 sps:$4 sm:$0xff]  }
  0x2d   : > { %2955 = vmatpush1.bf16.msra.mxu0 %v4806_v39  ;;  %2377 = vmatprep.subr.bf16.mxu1 %v4807_v40  ;;  %v4922_v39 = vld [vmem:[%s6229_s1 + $0x164] ss:$8 sps:$4 sm:$0xff]  }
  0x2e   : > { %2956 = vmatprep.subr.bf16.mxu0 %v4809_v41  ;;  %v4926_v40 = vld [vmem:[%s6229_s1 + $0x464] ss:$8 sps:$4 sm:$0xff]  }
  0x2f   : > { %v4887_v41 = vld [vmem:[%s5463_s17 + $0x120] ss:$44 sps:$4 sm:$0xff]  }
  0x30   : > { %2378 = vmatpush1.bf16.msra.mxu1 %v4811_v42  ;;  %v4891_v42 = vld [vmem:[%s5463_s17 + $0x164] ss:$44 sps:$4 sm:$0xff]  }
  0x31   : > { %2957 = vmatpush1.bf16.msra.mxu0 %v4812_v43  ;;  %2379 = vmatprep.subr.bf16.mxu1 %v4813_v44  ;;  %v4893_v43 = vld [vmem:[%s5463_s17 + $0x17c] ss:$44 sps:$4 sm:$0xff]  }
  0x32   : > { %2958 = vmatprep.subr.bf16.mxu0 %v4815_v45  ;;  %v4920_v44 = vld [vmem:[%s6229_s1 + $0x160] ss:$8 sps:$4 sm:$0xff]  }
  0x33   : > { %v4924_v45 = vld [vmem:[%s6229_s1 + $0x460] ss:$8 sps:$4 sm:$0xff]  }
  0x34   : > { %2380 = vmatpush1.bf16.msra.mxu1 %v4817_v46  ;;  %v4934_v46 = vld [vmem:[%s6229_s1 + $0x174] ss:$8 sps:$4 sm:$0xff]  }
  0x35   : > { %2959 = vmatpush1.bf16.msra.mxu0 %v4818_v47  ;;  %2381 = vmatprep.subr.bf16.mxu1 %v4819_v48  ;;  %v4938_v47 = vld [vmem:[%s6229_s1 + $0x474] ss:$8 sps:$4 sm:$0xff]   ;;  %v4932_v48 = vld [vmem:[%s6229_s1 + $0x170] ss:$8 sps:$4 sm:$0xff]  }
  0x36   : > { %2960 = vmatprep.subr.bf16.mxu0 %v4821_v50  ;;  %v4899_v50 = vld [vmem:[%s5463_s17 + $0x178] ss:$44 sps:$4 sm:$0xff]  }
  0x38   : > { %2382 = vmatpush1.bf16.msra.mxu1 %v4823_v52  ;;  %v4903_v52 = vld [vmem:[%s5463_s17 + $0x1bc] ss:$44 sps:$4 sm:$0xff]  }
  0x39   : > { %2961 = vmatpush1.bf16.msra.mxu0 %v4824_v53  ;;  %2383 = vmatprep.subr.bf16.mxu1 %v4825_v54  ;;  %v4946_v53 = vld [vmem:[%s6229_s1 + $0x184] ss:$8 sps:$4 sm:$0xff]  }
  0x3a   : > { %2962 = vmatprep.subr.bf16.mxu0 %v4827_v55  ;;  %v4950_v54 = vld [vmem:[%s6229_s1 + $0x484] ss:$8 sps:$4 sm:$0xff]   ;;  %v4905_v55 = vld [vmem:[%s5463_s17 + $0x1d4] ss:$44 sps:$4 sm:$0xff]  }
  0x3c   : > { %2384 = vmatpush1.bf16.msra.mxu1 %v4829_v56  ;;  %v4944_v56 = vld [vmem:[%s6229_s1 + $0x180] ss:$8 sps:$4 sm:$0xff]  }
  0x3d   : > { %2963 = vmatpush1.bf16.msra.mxu0 %v4830_v57  ;;  %2385 = vmatprep.subr.bf16.mxu1 %v4831_v58  ;;  %v4948_v57 = vld [vmem:[%s6229_s1 + $0x480] ss:$8 sps:$4 sm:$0xff]   ;;  %v4958_v58 = vld [vmem:[%s6229_s1 + $0x194] ss:$8 sps:$4 sm:$0xff]  }
  0x3e   : > { %2964 = vmatprep.subr.bf16.mxu0 %v4833_v59  ;;  %v4962_v59 = vld [vmem:[%s6229_s1 + $0x494] ss:$8 sps:$4 sm:$0xff]  }
  0x40   : > { %2386 = vmatpush1.bf16.msra.mxu1 %v4835_v60  ;;  %v4956_v60 = vld [vmem:[%s6229_s1 + $0x190] ss:$8 sps:$4 sm:$0xff]  }
  0x41   : > { %2965 = vmatpush1.bf16.msra.mxu0 %v4836_v61  ;;  %2387 = vmatprep.subr.bf16.mxu1 %v4837_v62  ;;  %v4960_v61 = vld [vmem:[%s6229_s1 + $0x490] ss:$8 sps:$4 sm:$0xff]  }
  0x42   : > { %2966 = vmatprep.subr.bf16.mxu0 %v4839_v63  ;;  %v4907_v62 = vld [vmem:[%s5463_s17 + $0x1b8] ss:$44 sps:$4 sm:$0xff]  }
  0x43   : > { %v4970_v63 = vld [vmem:[%s6229_s1 + $0x1a4] ss:$8 sps:$4 sm:$0xff]  }
  0x44   : > { %2388 = vmatpush1.bf16.msra.mxu1 %v4841_v0  ;;  %v4974_v0 = vld [vmem:[%s6229_s1 + $0x4a4] ss:$8 sps:$4 sm:$0xff]  }
  0x45   : > { %2967 = vmatpush1.bf16.msra.mxu0 %v4842_v1  ;;  %2550 = vmatprep.subr.bf16.mxu1 %v4851_v2  ;;  %v4911_v1 = vld [vmem:[%s5463_s17 + $0x1d0] ss:$44 sps:$4 sm:$0xff]   ;;  %v4915_v2 = vld [vmem:[%s5463_s17 + $0x214] ss:$44 sps:$4 sm:$0xff]  }
  0x46   : > { %3129 = vmatprep.subr.bf16.mxu0 %v4854_v4  ;;  %v4968_v4 = vld [vmem:[%s6229_s1 + $0x1a0] ss:$8 sps:$4 sm:$0xff]  }
  0x47   : > { %2390 = vmatmul.mubr.bf16.vlgmr.msra.gmra.mrb[0].mxu1 %v4843_v3  ;;  %v4917_v3 = vld [vmem:[%s5463_s17 + $0x22c] ss:$44 sps:$4 sm:$0xff]  }
  0x48   : > { %2969 = vmatmul.mubr.bf16.vlgmr.msra.gmra.mrb[0].mxu0 %v4846_v5  ;;  %2551 = vmatpush1.bf16.msra.mxu1 %v4849_v6  ;;  %v4972_v5 = vld [vmem:[%s6229_s1 + $0x4a0] ss:$8 sps:$4 sm:$0xff]   ;;  %v4982_v6 = vld [vmem:[%s6229_s1 + $0x1b4] ss:$8 sps:$4 sm:$0xff]  }
  0x49   : > { %3130 = vmatpush1.bf16.msra.mxu0 %v4852_v7  ;;  %2399 = vmatprep.mubr.bf16.mxu1 %v4855_v8  ;;  %v4986_v7 = vld [vmem:[%s6229_s1 + $0x4b4] ss:$8 sps:$4 sm:$0xff]   ;;  %v4980_v8 = vld [vmem:[%s6229_s1 + $0x1b0] ss:$8 sps:$4 sm:$0xff]  }
  0x4a   : > { %2978 = vmatprep.mubr.bf16.mxu0 %v4857_v9  ;;  %2552 = vmatprep.subr.bf16.mxu1 %v4862_v10  ;;  %v4919_v9 = vld [vmem:[%s5463_s17 + $0x210] ss:$44 sps:$4 sm:$0xff]   ;;  %v4923_v10 = vld [vmem:[%s5463_s17 + $0x228] ss:$44 sps:$4 sm:$0xff]  }
  0x4b   : > { %3131 = vmatprep.subr.bf16.mxu0 %v4866_v11  ;;  %v4984_v11 = vld [vmem:[%s6229_s1 + $0x4b0] ss:$8 sps:$4 sm:$0xff]  }
  0x4c   : > { %2553 = vmatpush1.bf16.msra.mxu1 %v4860_v12  ;;  %v4927_v12 = vld [vmem:[%s5463_s17 + $0x26c] ss:$44 sps:$4 sm:$0xff]  }
  0x4d   : > { %3132 = vmatpush1.bf16.msra.mxu0 %v4864_v13  ;;  %2554 = vmatprep.subr.bf16.mxu1 %v4874_v14  ;;  %v4994_v13 = vld [vmem:[%s6229_s1 + $0x1c4] ss:$8 sps:$4 sm:$0xff]  }
  0x4e   : > { %3133 = vmatprep.subr.bf16.mxu0 %v4878_v15  ;;  %v4929_v14 = vld [vmem:[%s5463_s17 + $0x284] ss:$44 sps:$4 sm:$0xff]  }
  0x4f   : > { %2400 = vmatmul.mubr.bf16.gmra.mrb[4].mxu1 %v4859_v16  ;;  %v4998_v15 = vld [vmem:[%s6229_s1 + $0x4c4] ss:$8 sps:$4 sm:$0xff]   ;;  %v4992_v16 = vld [vmem:[%s6229_s1 + $0x1c0] ss:$8 sps:$4 sm:$0xff]  }
  0x50   : > { %2979 = vmatmul.mubr.bf16.gmra.mrb[4].mxu0 %v4863_v17  ;;  %2409 = vmatprep.mubr.bf16.mxu1 %v4867_v18  ;;  %v4996_v17 = vld [vmem:[%s6229_s1 + $0x4c0] ss:$8 sps:$4 sm:$0xff]   ;;  %v5004_v18 = vld [vmem:[%s6229_s1 + $0x1d0] ss:$8 sps:$4 sm:$0xff]  }
  0x51   : > { %2988 = vmatprep.mubr.bf16.mxu0 %v4869_v19  ;;  %2555 = vmatpush1.bf16.msra.mxu1 %v4872_v20  ;;  %v5006_v19 = vld [vmem:[%s6229_s1 + $0x1d4] ss:$8 sps:$4 sm:$0xff]   ;;  %v5008_v20 = vld [vmem:[%s6229_s1 + $0x4d0] ss:$8 sps:$4 sm:$0xff]  }
  0x52   : > { %3134 = vmatpush1.bf16.msra.mxu0 %v4876_v21  ;;  %2556 = vmatprep.subr.bf16.mxu1 %v4886_v22  ;;  %v5010_v21 = vld [vmem:[%s6229_s1 + $0x4d4] ss:$8 sps:$4 sm:$0xff]  }
  0x53   : > { %3135 = vmatprep.subr.bf16.mxu0 %v4890_v23  ;;  %v4931_v22 = vld [vmem:[%s5463_s17 + $0x268] ss:$44 sps:$4 sm:$0xff]   ;;  %v4935_v23 = vld [vmem:[%s5463_s17 + $0x280] ss:$44 sps:$4 sm:$0xff]  }
  0x55   : > { %2557 = vmatpush1.bf16.msra.mxu1 %v4884_v24  ;;  %v4939_v24 = vld [vmem:[%s5463_s17 + $0x2c4] ss:$44 sps:$4 sm:$0xff]  }
  0x56   : > { %3136 = vmatpush1.bf16.msra.mxu0 %v4888_v27  ;;  %2558 = vmatprep.subr.bf16.mxu1 %v4898_v29  ;;  %v5016_v27 = vld [vmem:[%s6229_s1 + $0x1e0] ss:$8 sps:$4 sm:$0xff]   ;;  %v5022_v29 = vld [vmem:[%s6229_s1 + $0x4e4] ss:$8 sps:$4 sm:$0xff]  }
  0x57   : > { %3137 = vmatprep.subr.bf16.mxu0 %v4902_v30  ;;  %2410 = vmatmul.mubr.bf16.gmra.mrb[8].mxu1 %v4871_v25  ;;  %v4941_v25 = vld [vmem:[%s5463_s17 + $0x2dc] ss:$44 sps:$4 sm:$0xff]   ;;  %v4943_v30 = vld [vmem:[%s5463_s17 + $0x2c0] ss:$44 sps:$4 sm:$0xff]  }
  0x58   : > { %2989 = vmatmul.mubr.bf16.gmra.mrb[8].mxu0 %v4875_v26  ;;  %2419 = vmatprep.mubr.bf16.mxu1 %v4879_v28  ;;  %v5018_v26 = vld [vmem:[%s6229_s1 + $0x1e4] ss:$8 sps:$4 sm:$0xff]   ;;  %v5020_v28 = vld [vmem:[%s6229_s1 + $0x4e0] ss:$8 sps:$4 sm:$0xff]  }
  0x59   : > { %2998 = vmatprep.mubr.bf16.mxu0 %v4881_v31  ;;  %2559 = vmatpush1.bf16.msra.mxu1 %v4896_v32  ;;  %v4947_v31 = vld [vmem:[%s5463_s17 + $0x2d8] ss:$44 sps:$4 sm:$0xff]  }
  0x5a   : > { %3138 = vmatpush1.bf16.msra.mxu0 %v4900_v33  ;;  %2560 = vmatprep.subr.bf16.mxu1 %v4910_v34  ;;  %v5028_v32 = vld [vmem:[%s6229_s1 + $0x1f0] ss:$8 sps:$4 sm:$0xff]   ;;  %v4951_v33 = vld [vmem:[%s5463_s17 + $0x31c] ss:$44 sps:$4 sm:$0xff]  }
  0x5b   : > { %3139 = vmatprep.subr.bf16.mxu0 %v4914_v35  ;;  %v5030_v34 = vld [vmem:[%s6229_s1 + $0x1f4] ss:$8 sps:$4 sm:$0xff]   ;;  %v5032_v35 = vld [vmem:[%s6229_s1 + $0x4f0] ss:$8 sps:$4 sm:$0xff]  }
  0x5d   : > { %2561 = vmatpush1.bf16.msra.mxu1 %v4908_v36  ;;  %v5034_v36 = vld [vmem:[%s6229_s1 + $0x4f4] ss:$8 sps:$4 sm:$0xff]  }
  0x5e   : > { %3140 = vmatpush1.bf16.msra.mxu0 %v4912_v37  ;;  %2562 = vmatprep.subr.bf16.mxu1 %v4922_v39  ;;  %v4953_v37 = vld [vmem:[%s5463_s17 + $0x334] ss:$44 sps:$4 sm:$0xff]   ;;  %v5046_v39 = vld [vmem:[%s6229_s1 + $0x504] ss:$8 sps:$4 sm:$0xff]  }
  0x5f   : > { %3141 = vmatprep.subr.bf16.mxu0 %v4926_v40  ;;  %2420 = vmatmul.mubr.bf16.gmra.mrb[12].mxu1 %v4883_v38  ;;  %v5043_v38 = vld [vmem:[%s6229_s1 + $0x204] ss:$8 sps:$4 sm:$0xff]  }
  0x60   : > { %2999 = vmatmul.mubr.bf16.gmra.mrb[12].mxu0 %v4887_v41  ;;  %2429 = vmatprep.mubr.bf16.mxu1 %v4891_v42  ;;  %v4955_v40 = vld [vmem:[%s5463_s17 + $0x318] ss:$44 sps:$4 sm:$0xff]   ;;  %v4959_v41 = vld [vmem:[%s5463_s17 + $0x330] ss:$44 sps:$4 sm:$0xff]   ;;  %v4963_v42 = vld [vmem:[%s5463_s17 + $0x374] ss:$44 sps:$4 sm:$0xff]  }
  0x61   : > { %3008 = vmatprep.mubr.bf16.mxu0 %v4893_v43  ;;  %2563 = vmatpush1.bf16.msra.mxu1 %v4920_v44  ;;  %v4965_v43 = vld [vmem:[%s5463_s17 + $0x38c] ss:$44 sps:$4 sm:$0xff]   ;;  %v4967_v44 = vld [vmem:[%s5463_s17 + $0x370] ss:$44 sps:$4 sm:$0xff]  }
  0x62   : > { %3142 = vmatpush1.bf16.msra.mxu0 %v4924_v45  ;;  %2564 = vmatprep.subr.bf16.mxu1 %v4934_v46  ;;  %v4971_v45 = vld [vmem:[%s5463_s17 + $0x388] ss:$44 sps:$4 sm:$0xff]   ;;  %v4975_v46 = vld [vmem:[%s5463_s17 + $0x3cc] ss:$44 sps:$4 sm:$0xff]  }
  0x63   : > { %3143 = vmatprep.subr.bf16.mxu0 %v4938_v47  ;;  %v4977_v47 = vld [vmem:[%s5463_s17 + $0x3e4] ss:$44 sps:$4 sm:$0xff]  }
  0x65   : > { %2565 = vmatpush1.bf16.msra.mxu1 %v4932_v48  ;;  %v4979_v48 = vld [vmem:[%s5463_s17 + $0x3c8] ss:$44 sps:$4 sm:$0xff]  }
  0x66   : > { %3144 = vmatpush1.bf16.msra.mxu0 %v4936_v51  ;;  %2566 = vmatprep.subr.bf16.mxu1 %v4946_v53  ;;  %v4989_v51 = vld [vmem:[%s5463_s17 + $0x43c] ss:$44 sps:$4 sm:$0xff]   ;;  %v4995_v53 = vld [vmem:[%s5463_s17 + $0x438] ss:$44 sps:$4 sm:$0xff]  }
  0x67   : > { %3145 = vmatprep.subr.bf16.mxu0 %v4950_v54  ;;  %2430 = vmatmul.mubr.bf16.gmra.mrb[16].mxu1 %v4895_v49  ;;  %v4983_v49 = vld [vmem:[%s5463_s17 + $0x3e0] ss:$44 sps:$4 sm:$0xff]   ;;  %v4999_v54 = vld [vmem:[%s5463_s17 + $0x47c] ss:$44 sps:$4 sm:$0xff]  }
  0x68   : > { %3009 = vmatmul.mubr.bf16.gmra.mrb[16].mxu0 %v4899_v50  ;;  %2439 = vmatprep.mubr.bf16.mxu1 %v4903_v52  ;;  %v4987_v50 = vld [vmem:[%s5463_s17 + $0x424] ss:$44 sps:$4 sm:$0xff]   ;;  %v4991_v52 = vld [vmem:[%s5463_s17 + $0x420] ss:$44 sps:$4 sm:$0xff]  }
  0x69   : > { %3018 = vmatprep.mubr.bf16.mxu0 %v4905_v55  ;;  %2567 = vmatpush1.bf16.msra.mxu1 %v4944_v56  ;;  %v5001_v55 = vld [vmem:[%s5463_s17 + $0x494] ss:$44 sps:$4 sm:$0xff]   ;;  %v5003_v56 = vld [vmem:[%s5463_s17 + $0x478] ss:$44 sps:$4 sm:$0xff]  }
  0x6a   : > { %3146 = vmatpush1.bf16.msra.mxu0 %v4948_v57  ;;  %2568 = vmatprep.subr.bf16.mxu1 %v4958_v58  ;;  %v5007_v57 = vld [vmem:[%s5463_s17 + $0x490] ss:$44 sps:$4 sm:$0xff]   ;;  %v5011_v58 = vld [vmem:[%s5463_s17 + $0x4d4] ss:$44 sps:$4 sm:$0xff]  }
  0x6b   : > { %3147 = vmatprep.subr.bf16.mxu0 %v4962_v59  ;;  %v5013_v59 = vld [vmem:[%s5463_s17 + $0x4ec] ss:$44 sps:$4 sm:$0xff]  }
  0x6d   : > { %2569 = vmatpush1.bf16.msra.mxu1 %v4956_v60  ;;  %v5015_v60 = vld [vmem:[%s5463_s17 + $0x4d0] ss:$44 sps:$4 sm:$0xff]  }
  0x6e   : > { %3148 = vmatpush1.bf16.msra.mxu0 %v4960_v61  ;;  %2570 = vmatprep.subr.bf16.mxu1 %v4970_v63  ;;  %v5019_v61 = vld [vmem:[%s5463_s17 + $0x4e8] ss:$44 sps:$4 sm:$0xff]   ;;  %v5025_v63 = vld [vmem:[%s5463_s17 + $0x544] ss:$44 sps:$4 sm:$0xff]  }
  0x6f   : > { %3149 = vmatprep.subr.bf16.mxu0 %v4974_v0  ;;  %2440 = vmatmul.mubr.bf16.gmra.mrb[20].mxu1 %v4907_v62  ;;  %v5023_v62 = vld [vmem:[%s5463_s17 + $0x52c] ss:$44 sps:$4 sm:$0xff]   ;;  %v5027_v0 = vld [vmem:[%s5463_s17 + $0x528] ss:$44 sps:$4 sm:$0xff]  }
  0x70   : > { %3019 = vmatmul.mubr.bf16.gmra.mrb[20].mxu0 %v4911_v1  ;;  %2449 = vmatprep.mubr.bf16.mxu1 %v4915_v2  ;;  %v5031_v1 = vld [vmem:[%s5463_s17 + $0x540] ss:$44 sps:$4 sm:$0xff]  }
  0x71   : > { %3028 = vmatprep.mubr.bf16.mxu0 %v4917_v3  ;;  %2571 = vmatpush1.bf16.msra.mxu1 %v4968_v4  ;;  %v5037_v2 = vld [vmem:[%s5463_s17 + $0xc] ss:$44 sps:$4 sm:$0xff]   ;;  %v5040_v3 = vld [vmem:[%s5463_s17 + $0x24] ss:$44 sps:$4 sm:$0xff]   ;;  %v5035_v4 = vld [vmem:[%s5463_s17 + $0x8] ss:$44 sps:$4 sm:$0xff]  }
  0x72   : > { %3150 = vmatpush1.bf16.msra.mxu0 %v4972_v5  ;;  %2572 = vmatprep.subr.bf16.mxu1 %v4982_v6  ;;  %v5038_v5 = vld [vmem:[%s5463_s17 + $0x20] ss:$44 sps:$4 sm:$0xff]  }
  0x73   : > { %3151 = vmatprep.subr.bf16.mxu0 %v4986_v7  ;;  %v5041_v6 = vld [vmem:[%s6229_s1 + $0x200] ss:$8 sps:$4 sm:$0xff]  }
  0x74   : > { %v5044_v7 = vld [vmem:[%s6229_s1 + $0x500] ss:$8 sps:$4 sm:$0xff]  }
  0x75   : > { %2573 = vmatpush1.bf16.msra.mxu1 %v4980_v8  ;;  %v5047_v8 = vld [vmem:[%s5463_s17 + $0x64] ss:$44 sps:$4 sm:$0xff]  }
  0x76   : > { %3152 = vmatpush1.bf16.msra.mxu0 %v4984_v11  ;;  %2574 = vmatprep.subr.bf16.mxu1 %v4994_v13  ;;  %v5085_v11 = vld [vmem:[%s6229_s1 + $0x514] ss:$8 sps:$4 sm:$0xff]   ;;  %v5063_v13 = vld [vmem:[%s6229_s1 + $0x224] ss:$8 sps:$4 sm:$0xff]  }
  0x77   : > { %3153 = vmatprep.subr.bf16.mxu0 %v4998_v15  ;;  %2450 = vmatmul.mubr.bf16.gmra.mrb[24].mxu1 %v4919_v9  ;;  %v5049_v9 = vld [vmem:[%s5463_s17 + $0x7c] ss:$44 sps:$4 sm:$0xff]   ;;  %v5051_v15 = vld [vmem:[%s5463_s17 + $0x60] ss:$44 sps:$4 sm:$0xff]  }
  0x78   : > { %3029 = vmatmul.mubr.bf16.gmra.mrb[24].mxu0 %v4923_v10  ;;  %2459 = vmatprep.mubr.bf16.mxu1 %v4927_v12  ;;  %v5054_v10 = vld [vmem:[%s6229_s1 + $0x214] ss:$8 sps:$4 sm:$0xff]   ;;  %v5052_v12 = vld [vmem:[%s6229_s1 + $0x210] ss:$8 sps:$4 sm:$0xff]  }
  0x79   : > { %3038 = vmatprep.mubr.bf16.mxu0 %v4929_v14  ;;  %2575 = vmatpush1.bf16.msra.mxu1 %v4992_v16  ;;  %v5083_v14 = vld [vmem:[%s6229_s1 + $0x510] ss:$8 sps:$4 sm:$0xff]  }
  0x7a   : > { %3154 = vmatpush1.bf16.msra.mxu0 %v4996_v17  ;;  %2576 = vmatprep.subr.bf16.mxu1 %v5006_v19  ;;  %v5055_v16 = vld [vmem:[%s5463_s17 + $0x78] ss:$44 sps:$4 sm:$0xff]   ;;  %v5058_v19 = vld [vmem:[%s5463_s17 + $0xd4] ss:$44 sps:$4 sm:$0xff]  }
  0x7b   : > { %3155 = vmatprep.subr.bf16.mxu0 %v5010_v21  ;;  %v5124_v17 = vld [vmem:[%s6229_s1 + $0x524] ss:$8 sps:$4 sm:$0xff]   ;;  %v5072_v21 = vld [vmem:[%s6229_s1 + $0x234] ss:$8 sps:$4 sm:$0xff]  }
  0x7d   : > { %2577 = vmatpush1.bf16.msra.mxu1 %v5004_v18  ;;  %v5056_v18 = vld [vmem:[%s5463_s17 + $0xbc] ss:$44 sps:$4 sm:$0xff]  }
  0x7e   : > { %3156 = vmatpush1.bf16.msra.mxu0 %v5008_v20  ;;  %2578 = vmatprep.subr.bf16.mxu1 %v5018_v26  ;;  %v5061_v20 = vld [vmem:[%s6229_s1 + $0x220] ss:$8 sps:$4 sm:$0xff]   ;;  %v5161_v26 = vld [vmem:[%s6229_s1 + $0x530] ss:$8 sps:$4 sm:$0xff]  }
  0x7f   : > { %2460 = vmatmul.mubr.bf16.gmra.mrb[28].mxu1 %v4931_v22  ;;  %3157 = vmatprep.subr.bf16.mxu0 %v5022_v29  ;;  %v5122_v22 = vld [vmem:[%s6229_s1 + $0x520] ss:$8 sps:$4 sm:$0xff]  }
  0x80   : > { %3039 = vmatmul.mubr.bf16.gmra.mrb[28].mxu0 %v4935_v23  ;;  %2469 = vmatprep.mubr.bf16.mxu1 %v4939_v24  ;;  %v5163_v23 = vld [vmem:[%s6229_s1 + $0x534] ss:$8 sps:$4 sm:$0xff]   ;;  %v5070_v24 = vld [vmem:[%s6229_s1 + $0x230] ss:$8 sps:$4 sm:$0xff]  }
  0x81   : > { %3048 = vmatprep.mubr.bf16.mxu0 %v4941_v25  ;;  %2579 = vmatpush1.bf16.msra.mxu1 %v5016_v27  ;;  %v5081_v25 = vld [vmem:[%s6229_s1 + $0x244] ss:$8 sps:$4 sm:$0xff]   ;;  %v5065_v29 = vld [vmem:[%s5463_s17 + $0x114] ss:$44 sps:$4 sm:$0xff]  }
  0x82   : > { %3158 = vmatpush1.bf16.msra.mxu0 %v5020_v28  ;;  %2580 = vmatprep.subr.bf16.mxu1 %v5030_v34  ;;  %v5060_v27 = vld [vmem:[%s5463_s17 + $0xb8] ss:$44 sps:$4 sm:$0xff]   ;;  %v5064_v28 = vld [vmem:[%s5463_s17 + $0xd0] ss:$44 sps:$4 sm:$0xff]  }
  0x83   : > { %3159 = vmatprep.subr.bf16.mxu0 %v5034_v36  ;;  %v5102_v34 = vld [vmem:[%s6229_s1 + $0x264] ss:$8 sps:$4 sm:$0xff]   ;;  %v5073_v36 = vld [vmem:[%s5463_s17 + $0x128] ss:$44 sps:$4 sm:$0xff]  }
  0x85   : > { %2581 = vmatpush1.bf16.msra.mxu1 %v5028_v32  ;;  %v5093_v32 = vld [vmem:[%s6229_s1 + $0x254] ss:$8 sps:$4 sm:$0xff]  }
  0x86   : > { %3160 = vmatpush1.bf16.msra.mxu0 %v5032_v35  ;;  %2743 = vmatprep.subr.bf16.mxu1 %v5043_v38  ;;  %v5069_v35 = vld [vmem:[%s5463_s17 + $0x110] ss:$44 sps:$4 sm:$0xff]  }
  0x87   : > { %2470 = vmatmul.mubr.bf16.gmra.mrb[32].mxu1 %v4943_v30  ;;  %3322 = vmatprep.subr.bf16.mxu0 %v5046_v39  ;;  %v5067_v30 = vld [vmem:[%s5463_s17 + $0x12c] ss:$44 sps:$4 sm:$0xff]   ;;  %v5076_v38 = vld [vmem:[%s5463_s17 + $0x184] ss:$44 sps:$4 sm:$0xff]   ;;  %v5100_v39 = vld [vmem:[%s6229_s1 + $0x260] ss:$8 sps:$4 sm:$0xff]  }
  0x88   : > { %3049 = vmatmul.mubr.bf16.gmra.mrb[32].mxu0 %v4947_v31  ;;  %2479 = vmatprep.mubr.bf16.mxu1 %v4951_v33  ;;  %v5079_v31 = vld [vmem:[%s6229_s1 + $0x240] ss:$8 sps:$4 sm:$0xff]   ;;  %v5091_v33 = vld [vmem:[%s6229_s1 + $0x250] ss:$8 sps:$4 sm:$0xff]  }
  0x89   : > { %3058 = vmatprep.mubr.bf16.mxu0 %v4953_v37  ;;  %v5074_v37 = vld [vmem:[%s5463_s17 + $0x16c] ss:$44 sps:$4 sm:$0xff]  }
  0x8f   : > { %2480 = vmatmul.mubr.bf16.gmra.mrb[36].mxu1 %v4955_v40  ;;  %v5111_v40 = vld [vmem:[%s6229_s1 + $0x274] ss:$8 sps:$4 sm:$0xff]  }
  0x90   : > { %3059 = vmatmul.mubr.bf16.gmra.mrb[36].mxu0 %v4959_v41  ;;  %2489 = vmatprep.mubr.bf16.mxu1 %v4963_v42  ;;  %v5109_v41 = vld [vmem:[%s6229_s1 + $0x270] ss:$8 sps:$4 sm:$0xff]   ;;  %v5120_v42 = vld [vmem:[%s6229_s1 + $0x284] ss:$8 sps:$4 sm:$0xff]  }
  0x91   : > { %3068 = vmatprep.mubr.bf16.mxu0 %v4965_v43  ;;  %v5078_v43 = vld [vmem:[%s5463_s17 + $0x168] ss:$44 sps:$4 sm:$0xff]  }
  0x97   : > { %2490 = vmatmul.mubr.bf16.gmra.mrb[40].mxu1 %v4967_v44  ;;  %v5082_v44 = vld [vmem:[%s5463_s17 + $0x180] ss:$44 sps:$4 sm:$0xff]  }
  0x98   : > { %3069 = vmatmul.mubr.bf16.gmra.mrb[40].mxu0 %v4971_v45  ;;  %2499 = vmatprep.mubr.bf16.mxu1 %v4975_v46  ;;  %v5086_v45 = vld [vmem:[%s5463_s17 + $0x1c4] ss:$44 sps:$4 sm:$0xff]   ;;  %v5088_v46 = vld [vmem:[%s5463_s17 + $0x1dc] ss:$44 sps:$4 sm:$0xff]  }
  0x99   : > { %3078 = vmatprep.mubr.bf16.mxu0 %v4977_v47  ;;  %v5118_v47 = vld [vmem:[%s6229_s1 + $0x280] ss:$8 sps:$4 sm:$0xff]  }
  0x9f   : > { %2500 = vmatmul.mubr.bf16.gmra.mrb[44].mxu1 %v4979_v48  ;;  %v5132_v48 = vld [vmem:[%s6229_s1 + $0x294] ss:$8 sps:$4 sm:$0xff]  }
  0xa0   : > { %3079 = vmatmul.mubr.bf16.gmra.mrb[44].mxu0 %v4983_v49  ;;  %2509 = vmatprep.mubr.bf16.mxu1 %v4987_v50  ;;  %v5130_v49 = vld [vmem:[%s6229_s1 + $0x290] ss:$8 sps:$4 sm:$0xff]   ;;  %v5141_v50 = vld [vmem:[%s6229_s1 + $0x2a4] ss:$8 sps:$4 sm:$0xff]  }
  0xa1   : > { %3088 = vmatprep.mubr.bf16.mxu0 %v4989_v51  ;;  %v5090_v51 = vld [vmem:[%s5463_s17 + $0x1c0] ss:$44 sps:$4 sm:$0xff]  }
  0xa7   : > { %2510 = vmatmul.mubr.bf16.gmra.mrb[48].mxu1 %v4991_v52  ;;  %v5094_v52 = vld [vmem:[%s5463_s17 + $0x1d8] ss:$44 sps:$4 sm:$0xff]  }
  0xa8   : > { %3089 = vmatmul.mubr.bf16.gmra.mrb[48].mxu0 %v4995_v53  ;;  %2519 = vmatprep.mubr.bf16.mxu1 %v4999_v54  ;;  %v5095_v53 = vld [vmem:[%s5463_s17 + $0x21c] ss:$44 sps:$4 sm:$0xff]   ;;  %v5097_v54 = vld [vmem:[%s5463_s17 + $0x234] ss:$44 sps:$4 sm:$0xff]  }
  0xa9   : > { %3098 = vmatprep.mubr.bf16.mxu0 %v5001_v55  ;;  %v5139_v55 = vld [vmem:[%s6229_s1 + $0x2a0] ss:$8 sps:$4 sm:$0xff]  }
  0xaf   : > { %2520 = vmatmul.mubr.bf16.gmra.mrb[52].mxu1 %v5003_v56  ;;  %v5150_v56 = vld [vmem:[%s6229_s1 + $0x2b4] ss:$8 sps:$4 sm:$0xff]  }
  0xb0   : > { %3099 = vmatmul.mubr.bf16.gmra.mrb[52].mxu0 %v5007_v57  ;;  %2529 = vmatprep.mubr.bf16.mxu1 %v5011_v58  ;;  %v5148_v57 = vld [vmem:[%s6229_s1 + $0x2b0] ss:$8 sps:$4 sm:$0xff]   ;;  %v5159_v58 = vld [vmem:[%s6229_s1 + $0x2c4] ss:$8 sps:$4 sm:$0xff]  }
  0xb1   : > { %3108 = vmatprep.mubr.bf16.mxu0 %v5013_v59  ;;  %v5099_v59 = vld [vmem:[%s5463_s17 + $0x218] ss:$44 sps:$4 sm:$0xff]  }
  0xb7   : > { %2530 = vmatmul.mubr.bf16.gmra.mrb[56].mxu1 %v5015_v60  ;;  %v5103_v60 = vld [vmem:[%s5463_s17 + $0x230] ss:$44 sps:$4 sm:$0xff]  }
  0xb8   : > { %3109 = vmatmul.mubr.bf16.gmra.mrb[56].mxu0 %v5019_v61  ;;  %2539 = vmatprep.mubr.bf16.mxu1 %v5023_v62  ;;  %v5104_v61 = vld [vmem:[%s5463_s17 + $0x274] ss:$44 sps:$4 sm:$0xff]   ;;  %v5106_v62 = vld [vmem:[%s5463_s17 + $0x28c] ss:$44 sps:$4 sm:$0xff]  }
  0xb9   : > { %3118 = vmatprep.mubr.bf16.mxu0 %v5025_v63  ;;  %v5157_v63 = vld [vmem:[%s6229_s1 + $0x2c0] ss:$8 sps:$4 sm:$0xff]  }
  0xbf   : > { %2540 = vmatmul.mubr.bf16.gmra.mrb[60].mxu1 %v5027_v0  ;;  %v5171_v0 = vld [vmem:[%s6229_s1 + $0x2d4] ss:$8 sps:$4 sm:$0xff]  }
  0xc0   : > { %3119 = vmatmul.mubr.bf16.gmra.mrb[60].mxu0 %v5031_v1  ;;  %2582 = vmatprep.mubr.bf16.mxu1 %v5037_v2  ;;  %v5169_v1 = vld [vmem:[%s6229_s1 + $0x2d0] ss:$8 sps:$4 sm:$0xff]   ;;  %v5180_v2 = vld [vmem:[%s6229_s1 + $0x2e4] ss:$8 sps:$4 sm:$0xff]  }
  0xc1   : > { %3161 = vmatprep.mubr.bf16.mxu0 %v5040_v3  ;;  %v5108_v3 = vld [vmem:[%s5463_s17 + $0x270] ss:$44 sps:$4 sm:$0xff]  }
  0xc7   : > { %2583 = vmatmul.mubr.bf16.vlgmr.msra.gmra.mrb[0].mxu1 %v5035_v4  ;;  %v5112_v4 = vld [vmem:[%s5463_s17 + $0x288] ss:$44 sps:$4 sm:$0xff]  }
  0xc8   : > { %3162 = vmatmul.mubr.bf16.vlgmr.msra.gmra.mrb[0].mxu0 %v5038_v5  ;;  %2744 = vmatpush1.bf16.msra.mxu1 %v5041_v6  ;;  %v5113_v5 = vld [vmem:[%s5463_s17 + $0x2cc] ss:$44 sps:$4 sm:$0xff]   ;;  %v5115_v6 = vld [vmem:[%s5463_s17 + $0x2e4] ss:$44 sps:$4 sm:$0xff]  }
  0xc9   : > { %3323 = vmatpush1.bf16.msra.mxu0 %v5044_v7  ;;  %2592 = vmatprep.mubr.bf16.mxu1 %v5047_v8  ;;  %v5178_v7 = vld [vmem:[%s6229_s1 + $0x2e0] ss:$8 sps:$4 sm:$0xff]   ;;  %v5189_v8 = vld [vmem:[%s6229_s1 + $0x2f4] ss:$8 sps:$4 sm:$0xff]  }
  0xca   : > { %3171 = vmatprep.mubr.bf16.mxu0 %v5049_v9  ;;  %2745 = vmatprep.subr.bf16.mxu1 %v5054_v10  ;;  %v5187_v9 = vld [vmem:[%s6229_s1 + $0x2f0] ss:$8 sps:$4 sm:$0xff]   ;;  %v5117_v10 = vld [vmem:[%s5463_s17 + $0x2c8] ss:$44 sps:$4 sm:$0xff]  }
  0xcb   : > { %3324 = vmatprep.subr.bf16.mxu0 %v5085_v11  ;;  %v5121_v11 = vld [vmem:[%s5463_s17 + $0x2e0] ss:$44 sps:$4 sm:$0xff]  }
  0xcc   : > { %2746 = vmatpush1.bf16.msra.mxu1 %v5052_v12  ;;  %v5125_v12 = vld [vmem:[%s5463_s17 + $0x324] ss:$44 sps:$4 sm:$0xff]  }
  0xcd   : > { %3325 = vmatpush1.bf16.msra.mxu0 %v5083_v14  ;;  %2747 = vmatprep.subr.bf16.mxu1 %v5063_v13  ;;  %v5127_v13 = vld [vmem:[%s5463_s17 + $0x33c] ss:$44 sps:$4 sm:$0xff]   ;;  %v5129_v14 = vld [vmem:[%s5463_s17 + $0x320] ss:$44 sps:$4 sm:$0xff]  }
  0xce   : > { %3326 = vmatprep.subr.bf16.mxu0 %v5124_v17  ;;  %v5136_v17 = vld [vmem:[%s5463_s17 + $0x394] ss:$44 sps:$4 sm:$0xff]  }
  0xcf   : > { %2593 = vmatmul.mubr.bf16.gmra.mrb[4].mxu1 %v5051_v15  ;;  %v5133_v15 = vld [vmem:[%s5463_s17 + $0x338] ss:$44 sps:$4 sm:$0xff]  }
  0xd0   : > { %3172 = vmatmul.mubr.bf16.gmra.mrb[4].mxu0 %v5055_v16  ;;  %2602 = vmatprep.mubr.bf16.mxu1 %v5056_v18  ;;  %v5134_v16 = vld [vmem:[%s5463_s17 + $0x37c] ss:$44 sps:$4 sm:$0xff]   ;;  %v5138_v18 = vld [vmem:[%s5463_s17 + $0x378] ss:$44 sps:$4 sm:$0xff]  }
  0xd1   : > { %3181 = vmatprep.mubr.bf16.mxu0 %v5058_v19  ;;  %2748 = vmatpush1.bf16.msra.mxu1 %v5061_v20  ;;  %v5142_v19 = vld [vmem:[%s5463_s17 + $0x390] ss:$44 sps:$4 sm:$0xff]   ;;  %v5143_v20 = vld [vmem:[%s5463_s17 + $0x3d4] ss:$44 sps:$4 sm:$0xff]  }
  0xd2   : > { %3327 = vmatpush1.bf16.msra.mxu0 %v5122_v22  ;;  %2749 = vmatprep.subr.bf16.mxu1 %v5072_v21  ;;  %v5145_v21 = vld [vmem:[%s5463_s17 + $0x3ec] ss:$44 sps:$4 sm:$0xff]   ;;  %v5147_v22 = vld [vmem:[%s5463_s17 + $0x3d0] ss:$44 sps:$4 sm:$0xff]  }
  0xd3   : > { %3328 = vmatprep.subr.bf16.mxu0 %v5163_v23  ;;  %v5151_v23 = vld [vmem:[%s5463_s17 + $0x3e8] ss:$44 sps:$4 sm:$0xff]  }
  0xd5   : > { %2750 = vmatpush1.bf16.msra.mxu1 %v5070_v24  ;;  %v5152_v24 = vld [vmem:[%s5463_s17 + $0x42c] ss:$44 sps:$4 sm:$0xff]  }
  0xd6   : > { %3329 = vmatpush1.bf16.msra.mxu0 %v5161_v26  ;;  %2751 = vmatprep.subr.bf16.mxu1 %v5081_v25  ;;  %v5154_v25 = vld [vmem:[%s5463_s17 + $0x444] ss:$44 sps:$4 sm:$0xff]   ;;  %v5156_v26 = vld [vmem:[%s5463_s17 + $0x428] ss:$44 sps:$4 sm:$0xff]  }
  0xd7   : > { %2603 = vmatmul.mubr.bf16.gmra.mrb[8].mxu1 %v5060_v27  ;;  %v5160_v27 = vld [vmem:[%s5463_s17 + $0x440] ss:$44 sps:$4 sm:$0xff]  }
  0xd8   : > { %3182 = vmatmul.mubr.bf16.gmra.mrb[8].mxu0 %v5064_v28  ;;  %2612 = vmatprep.mubr.bf16.mxu1 %v5065_v29  ;;  %v5164_v28 = vld [vmem:[%s5463_s17 + $0x484] ss:$44 sps:$4 sm:$0xff]   ;;  %v5166_v29 = vld [vmem:[%s5463_s17 + $0x49c] ss:$44 sps:$4 sm:$0xff]  }
  0xd9   : > { %3191 = vmatprep.mubr.bf16.mxu0 %v5067_v30  ;;  %2752 = vmatpush1.bf16.msra.mxu1 %v5079_v31  ;;  %v5168_v30 = vld [vmem:[%s5463_s17 + $0x480] ss:$44 sps:$4 sm:$0xff]   ;;  %v5172_v31 = vld [vmem:[%s5463_s17 + $0x498] ss:$44 sps:$4 sm:$0xff]  }
  0xda   : > { %2753 = vmatprep.subr.bf16.mxu1 %v5093_v32  ;;  %v5173_v32 = vld [vmem:[%s5463_s17 + $0x4dc] ss:$44 sps:$4 sm:$0xff]  }
  0xdd   : > { %2754 = vmatpush1.bf16.msra.mxu1 %v5091_v33  ;;  %v5175_v33 = vld [vmem:[%s5463_s17 + $0x4f4] ss:$44 sps:$4 sm:$0xff]  }
  0xde   : > { %2755 = vmatprep.subr.bf16.mxu1 %v5102_v34  ;;  %v5177_v34 = vld [vmem:[%s5463_s17 + $0x4d8] ss:$44 sps:$4 sm:$0xff]  }
  0xdf   : > { %2613 = vmatmul.mubr.bf16.gmra.mrb[12].mxu1 %v5069_v35  ;;  %v5181_v35 = vld [vmem:[%s5463_s17 + $0x4f0] ss:$44 sps:$4 sm:$0xff]  }
  0xe0   : > { %3192 = vmatmul.mubr.bf16.gmra.mrb[12].mxu0 %v5073_v36  ;;  %2622 = vmatprep.mubr.bf16.mxu1 %v5074_v37  ;;  %v5182_v36 = vld [vmem:[%s5463_s17 + $0x534] ss:$44 sps:$4 sm:$0xff]   ;;  %v5184_v37 = vld [vmem:[%s5463_s17 + $0x54c] ss:$44 sps:$4 sm:$0xff]  }
  0xe1   : > { %3201 = vmatprep.mubr.bf16.mxu0 %v5076_v38  ;;  %2756 = vmatpush1.bf16.msra.mxu1 %v5100_v39  ;;  %v5186_v38 = vld [vmem:[%s5463_s17 + $0x530] ss:$44 sps:$4 sm:$0xff]   ;;  %v5190_v39 = vld [vmem:[%s5463_s17 + $0x548] ss:$44 sps:$4 sm:$0xff]  }
  0xe2   : > { %2757 = vmatprep.subr.bf16.mxu1 %v5111_v40  ;;  %v5193_v40 = vld [vmem:[%s5463_s17 + $0x14] ss:$44 sps:$4 sm:$0xff]  }
  0xe5   : > { %2758 = vmatpush1.bf16.msra.mxu1 %v5109_v41  ;;  %v5279_v41 = vmov 0  }
  0xe6   : > { %2759 = vmatprep.subr.bf16.mxu1 %v5120_v42  ;;  %v5191_v42 = vld [vmem:[%s5463_s17 + $0x10] ss:$44 sps:$4 sm:$0xff]  }
  0xe7   : > { %2623 = vmatmul.mubr.bf16.gmra.mrb[16].mxu1 %v5078_v43  ;;  %v5194_v43 = vld [vmem:[%s5463_s17 + $0x28] ss:$44 sps:$4 sm:$0xff]  }
  0xe8   : > { %3202 = vmatmul.mubr.bf16.gmra.mrb[16].mxu0 %v5082_v44  ;;  %2632 = vmatprep.mubr.bf16.mxu1 %v5086_v45  ;;  %v5195_v44 = vld [vmem:[%s5463_s17 + $0x6c] ss:$44 sps:$4 sm:$0xff]   ;;  %v5197_v45 = vld [vmem:[%s5463_s17 + $0x68] ss:$44 sps:$4 sm:$0xff]  }
  0xe9   : > { %3211 = vmatprep.mubr.bf16.mxu0 %v5088_v46  ;;  %2760 = vmatpush1.bf16.msra.mxu1 %v5118_v47  ;;  %v5198_v46 = vld [vmem:[%s5463_s17 + $0x80] ss:$44 sps:$4 sm:$0xff]   ;;  %v5199_v47 = vld [vmem:[%s5463_s17 + $0xc4] ss:$44 sps:$4 sm:$0xff]  }
  0xea   : > { %2761 = vmatprep.subr.bf16.mxu1 %v5132_v48  ;;  %v5201_v48 = vld [vmem:[%s5463_s17 + $0xc0] ss:$44 sps:$4 sm:$0xff]  }
  0xed   : > { %2762 = vmatpush1.bf16.msra.mxu1 %v5130_v49  ;;  %v5202_v49 = vld [vmem:[%s5463_s17 + $0xd8] ss:$44 sps:$4 sm:$0xff]  }
  0xee   : > { %2763 = vmatprep.subr.bf16.mxu1 %v5141_v50  ;;  %v5203_v50 = vld [vmem:[%s5463_s17 + $0x11c] ss:$44 sps:$4 sm:$0xff]  }
  0xef   : > { %2633 = vmatmul.mubr.bf16.gmra.mrb[20].mxu1 %v5090_v51  ;;  %v5205_v51 = vld [vmem:[%s5463_s17 + $0x118] ss:$44 sps:$4 sm:$0xff]  }
  0xf0   : > { %3212 = vmatmul.mubr.bf16.gmra.mrb[20].mxu0 %v5094_v52  ;;  %2642 = vmatprep.mubr.bf16.mxu1 %v5095_v53  ;;  %v5206_v52 = vld [vmem:[%s5463_s17 + $0x130] ss:$44 sps:$4 sm:$0xff]   ;;  %v5207_v53 = vld [vmem:[%s5463_s17 + $0x174] ss:$44 sps:$4 sm:$0xff]  }
  0xf1   : > { %3221 = vmatprep.mubr.bf16.mxu0 %v5097_v54  ;;  %2764 = vmatpush1.bf16.msra.mxu1 %v5139_v55  ;;  %v5209_v54 = vld [vmem:[%s5463_s17 + $0x170] ss:$44 sps:$4 sm:$0xff]   ;;  %v5210_v55 = vld [vmem:[%s5463_s17 + $0x188] ss:$44 sps:$4 sm:$0xff]  }
  0xf2   : > { %2765 = vmatprep.subr.bf16.mxu1 %v5150_v56  ;;  %v5211_v56 = vld [vmem:[%s5463_s17 + $0x1cc] ss:$44 sps:$4 sm:$0xff]  }
  0xf5   : > { %2766 = vmatpush1.bf16.msra.mxu1 %v5148_v57  ;;  %v5213_v57 = vld [vmem:[%s5463_s17 + $0x1c8] ss:$44 sps:$4 sm:$0xff]  }
  0xf6   : > { %2767 = vmatprep.subr.bf16.mxu1 %v5159_v58  ;;  %v5214_v58 = vld [vmem:[%s5463_s17 + $0x1e0] ss:$44 sps:$4 sm:$0xff]  }
  0xf7   : > { %2643 = vmatmul.mubr.bf16.gmra.mrb[24].mxu1 %v5099_v59  ;;  %v5215_v59 = vld [vmem:[%s5463_s17 + $0x224] ss:$44 sps:$4 sm:$0xff]  }
  0xf8   : > { %3222 = vmatmul.mubr.bf16.gmra.mrb[24].mxu0 %v5103_v60  ;;  %2652 = vmatprep.mubr.bf16.mxu1 %v5104_v61  ;;  %v5217_v60 = vld [vmem:[%s5463_s17 + $0x220] ss:$44 sps:$4 sm:$0xff]   ;;  %v5218_v61 = vld [vmem:[%s5463_s17 + $0x238] ss:$44 sps:$4 sm:$0xff]  }
  0xf9   : > { %3231 = vmatprep.mubr.bf16.mxu0 %v5106_v62  ;;  %2768 = vmatpush1.bf16.msra.mxu1 %v5157_v63  ;;  %v5219_v62 = vld [vmem:[%s5463_s17 + $0x27c] ss:$44 sps:$4 sm:$0xff]   ;;  %v5221_v63 = vld [vmem:[%s5463_s17 + $0x278] ss:$44 sps:$4 sm:$0xff]  }
  0xfa   : > { %2769 = vmatprep.subr.bf16.mxu1 %v5171_v0  ;;  %v5222_v0 = vld [vmem:[%s5463_s17 + $0x290] ss:$44 sps:$4 sm:$0xff]  }
  0xfd   : > { %2770 = vmatpush1.bf16.msra.mxu1 %v5169_v1  ;;  %v5223_v1 = vld [vmem:[%s5463_s17 + $0x2d4] ss:$44 sps:$4 sm:$0xff]  }
  0xfe   : > { %2771 = vmatprep.subr.bf16.mxu1 %v5180_v2  ;;  %v5225_v2 = vld [vmem:[%s5463_s17 + $0x2d0] ss:$44 sps:$4 sm:$0xff]  }
  0xff   : > { %2653 = vmatmul.mubr.bf16.gmra.mrb[28].mxu1 %v5108_v3  ;;  %v5226_v3 = vld [vmem:[%s5463_s17 + $0x2e8] ss:$44 sps:$4 sm:$0xff]  }
 0x100   : > { %3232 = vmatmul.mubr.bf16.gmra.mrb[28].mxu0 %v5112_v4  ;;  %2662 = vmatprep.mubr.bf16.mxu1 %v5113_v5  ;;  %v5227_v4 = vld [vmem:[%s5463_s17 + $0x32c] ss:$44 sps:$4 sm:$0xff]   ;;  %v5229_v5 = vld [vmem:[%s5463_s17 + $0x328] ss:$44 sps:$4 sm:$0xff]  }
 0x101   : > { %3241 = vmatprep.mubr.bf16.mxu0 %v5115_v6  ;;  %2772 = vmatpush1.bf16.msra.mxu1 %v5178_v7  ;;  %v5230_v6 = vld [vmem:[%s5463_s17 + $0x340] ss:$44 sps:$4 sm:$0xff]   ;;  %v5231_v7 = vld [vmem:[%s5463_s17 + $0x384] ss:$44 sps:$4 sm:$0xff]  }
 0x102   : > { %2773 = vmatprep.subr.bf16.mxu1 %v5189_v8  ;;  %v5233_v8 = vld [vmem:[%s5463_s17 + $0x380] ss:$44 sps:$4 sm:$0xff]  }
 0x105   : > { %2774 = vmatpush1.bf16.msra.mxu1 %v5187_v9  ;;  %v5234_v9 = vld [vmem:[%s5463_s17 + $0x398] ss:$44 sps:$4 sm:$0xff]  }
 0x107   : > { %2663 = vmatmul.mubr.bf16.gmra.mrb[32].mxu1 %v5117_v10  ;;  %v5235_v10 = vld [vmem:[%s5463_s17 + $0x3dc] ss:$44 sps:$4 sm:$0xff]  }
 0x108   : > { %3242 = vmatmul.mubr.bf16.gmra.mrb[32].mxu0 %v5121_v11  ;;  %2672 = vmatprep.mubr.bf16.mxu1 %v5125_v12  ;;  %v5237_v11 = vld [vmem:[%s5463_s17 + $0x3d8] ss:$44 sps:$4 sm:$0xff]   ;;  %v5238_v12 = vld [vmem:[%s5463_s17 + $0x3f0] ss:$44 sps:$4 sm:$0xff]  }
 0x109   : > { %3251 = vmatprep.mubr.bf16.mxu0 %v5127_v13  ;;  %v5239_v13 = vld [vmem:[%s5463_s17 + $0x434] ss:$44 sps:$4 sm:$0xff]  }
 0x10f   : > { %2673 = vmatmul.mubr.bf16.gmra.mrb[36].mxu1 %v5129_v14  ;;  %v5241_v14 = vld [vmem:[%s5463_s17 + $0x430] ss:$44 sps:$4 sm:$0xff]  }
 0x110   : > { %3252 = vmatmul.mubr.bf16.gmra.mrb[36].mxu0 %v5133_v15  ;;  %2682 = vmatprep.mubr.bf16.mxu1 %v5134_v16  ;;  %v5242_v15 = vld [vmem:[%s5463_s17 + $0x448] ss:$44 sps:$4 sm:$0xff]   ;;  %v5243_v16 = vld [vmem:[%s5463_s17 + $0x48c] ss:$44 sps:$4 sm:$0xff]  }
 0x111   : > { %3261 = vmatprep.mubr.bf16.mxu0 %v5136_v17  ;;  %v5245_v17 = vld [vmem:[%s5463_s17 + $0x488] ss:$44 sps:$4 sm:$0xff]  }
 0x117   : > { %2683 = vmatmul.mubr.bf16.gmra.mrb[40].mxu1 %v5138_v18  ;;  %v5246_v18 = vld [vmem:[%s5463_s17 + $0x4a0] ss:$44 sps:$4 sm:$0xff]  }
 0x118   : > { %3262 = vmatmul.mubr.bf16.gmra.mrb[40].mxu0 %v5142_v19  ;;  %2692 = vmatprep.mubr.bf16.mxu1 %v5143_v20  ;;  %v5247_v19 = vld [vmem:[%s5463_s17 + $0x4e4] ss:$44 sps:$4 sm:$0xff]   ;;  %v5249_v20 = vld [vmem:[%s5463_s17 + $0x4e0] ss:$44 sps:$4 sm:$0xff]  }
 0x119   : > { %3271 = vmatprep.mubr.bf16.mxu0 %v5145_v21  ;;  %v5250_v21 = vld [vmem:[%s5463_s17 + $0x4f8] ss:$44 sps:$4 sm:$0xff]  }
 0x11f   : > { %2693 = vmatmul.mubr.bf16.gmra.mrb[44].mxu1 %v5147_v22  ;;  %v5251_v22 = vld [vmem:[%s5463_s17 + $0x53c] ss:$44 sps:$4 sm:$0xff]  }
 0x120   : > { %3272 = vmatmul.mubr.bf16.gmra.mrb[44].mxu0 %v5151_v23  ;;  %2702 = vmatprep.mubr.bf16.mxu1 %v5152_v24  ;;  %v5253_v23 = vld [vmem:[%s5463_s17 + $0x538] ss:$44 sps:$4 sm:$0xff]   ;;  %v5254_v24 = vld [vmem:[%s5463_s17 + $0x550] ss:$44 sps:$4 sm:$0xff]   ;;  %s4304_s17 = sshll.u32 %s6239_s12, 8 }
 0x121   : > { %3281 = vmatprep.mubr.bf16.mxu0 %v5154_v25  ;;  %v578_v25 = vlaneseq  ;;  %s6057_s26 = scalar_lea.vmem %s6231_s3, %s4304_s17 }
 0x127   : > { %2703 = vmatmul.mubr.bf16.gmra.mrb[48].mxu1 %v5156_v26  ;;  %v579_v26 = vshrl.u32 %v578_v25, 7 }
 0x128   : > { %3282 = vmatmul.mubr.bf16.gmra.mrb[48].mxu0 %v5160_v27  ;;  %2712 = vmatprep.mubr.bf16.mxu1 %v5164_v28  ;;  %v576_v28 = vld [vmem:[%s6230_s2] sm:$0x3] }
 0x129   : > { %3291 = vmatprep.mubr.bf16.mxu0 %v5166_v29  ;;  %v580_v27 = vsub.s32 0, %v579_v26  ;;  %v584_v29 = vsub.s32 1, %v579_v26 }
 0x12f   : > { %2713 = vmatmul.mubr.bf16.gmra.mrb[52].mxu1 %v5168_v30  ;;  %v6045_v30 = vrot.slane %v576_v28, %v580_v27 }
 0x130   : > { %3292 = vmatmul.mubr.bf16.gmra.mrb[52].mxu0 %v5172_v31  ;;  %2722 = vmatprep.mubr.bf16.mxu1 %v5173_v32  ;;  %v6047_v31 = vrot.slane %v576_v28, %v584_v29 }
 0x131   : > { %3301 = vmatprep.mubr.bf16.mxu0 %v5175_v33 }
 0x137   : > { %2723 = vmatmul.mubr.bf16.gmra.mrb[56].mxu1 %v5177_v34 }
 0x138   : > { %3302 = vmatmul.mubr.bf16.gmra.mrb[56].mxu0 %v5181_v35  ;;  %2732 = vmatprep.mubr.bf16.mxu1 %v5182_v36 }
 0x139   : > { %3311 = vmatprep.mubr.bf16.mxu0 %v5184_v37 }
 0x13f   : > { %2733 = vmatmul.mubr.bf16.gmra.mrb[60].mxu1 %v5186_v38 }
 0x140   : > { %3312 = vmatmul.mubr.bf16.gmra.mrb[60].mxu0 %v5190_v39  ;;  %2775 = vmatprep.mubr.bf16.mxu1 %v5193_v40 }
 0x141   : > { %3354 = vmatprep.mubr.bf16.mxu0 %v5279_v41 }
 0x147   : > { %2776 = vmatmul.mubr.bf16.vlgmr.msra.gmra.mrb[0].mxu1 %v5191_v42 }
 0x148   : > { %4254 = vmatmul.mubr.msk.bf16.vlgmr.msra.gmra.mrb[0].mxu0 %vm2308_vm0, %v5194_v43  ;;  %2785 = vmatprep.mubr.bf16.mxu1 %v5195_v44 }
 0x149   : > { %3364 = vmatprep.mubr.bf16.mxu0 %v5279_v41 }
 0x14f   : > { %2786 = vmatmul.mubr.bf16.gmra.mrb[4].mxu1 %v5197_v45 }
 0x150   : > { %4255 = vmatmul.mubr.msk.bf16.gmra.mrb[4].mxu0 %vm2308_vm0, %v5198_v46  ;;  %2795 = vmatprep.mubr.bf16.mxu1 %v5199_v47 }
 0x151   : > { %3374 = vmatprep.mubr.bf16.mxu0 %v5279_v41 }
 0x157   : > { %2796 = vmatmul.mubr.bf16.gmra.mrb[8].mxu1 %v5201_v48 }
 0x158   : > { %4256 = vmatmul.mubr.msk.bf16.gmra.mrb[8].mxu0 %vm2308_vm0, %v5202_v49  ;;  %2805 = vmatprep.mubr.bf16.mxu1 %v5203_v50 }
 0x159   : > { %3384 = vmatprep.mubr.bf16.mxu0 %v5279_v41 }
 0x15f   : > { %2806 = vmatmul.mubr.bf16.gmra.mrb[12].mxu1 %v5205_v51 }
 0x160   : > { %4257 = vmatmul.mubr.msk.bf16.gmra.mrb[12].mxu0 %vm2308_vm0, %v5206_v52  ;;  %2815 = vmatprep.mubr.bf16.mxu1 %v5207_v53 }
 0x161   : > { %3394 = vmatprep.mubr.bf16.mxu0 %v5279_v41 }
 0x167   : > { %2816 = vmatmul.mubr.bf16.gmra.mrb[16].mxu1 %v5209_v54 }
 0x168   : > { %4258 = vmatmul.mubr.msk.bf16.gmra.mrb[16].mxu0 %vm2308_vm0, %v5210_v55  ;;  %2825 = vmatprep.mubr.bf16.mxu1 %v5211_v56 }
 0x169   : > { %3404 = vmatprep.mubr.bf16.mxu0 %v5279_v41 }
 0x16f   : > { %2826 = vmatmul.mubr.bf16.gmra.mrb[20].mxu1 %v5213_v57 }
 0x170   : > { %4259 = vmatmul.mubr.msk.bf16.gmra.mrb[20].mxu0 %vm2308_vm0, %v5214_v58  ;;  %2835 = vmatprep.mubr.bf16.mxu1 %v5215_v59 }
 0x171   : > { %3414 = vmatprep.mubr.bf16.mxu0 %v5279_v41 }
 0x177   : > { %2836 = vmatmul.mubr.bf16.gmra.mrb[24].mxu1 %v5217_v60 }
 0x178   : > { %4260 = vmatmul.mubr.msk.bf16.gmra.mrb[24].mxu0 %vm2308_vm0, %v5218_v61  ;;  %2845 = vmatprep.mubr.bf16.mxu1 %v5219_v62 }
 0x179   : > { %3424 = vmatprep.mubr.bf16.mxu0 %v5279_v41 }
 0x17f   : > { %2846 = vmatmul.mubr.bf16.gmra.mrb[28].mxu1 %v5221_v63 }
 0x180   : > { %4261 = vmatmul.mubr.msk.bf16.gmra.mrb[28].mxu0 %vm2308_vm0, %v5222_v0  ;;  %2855 = vmatprep.mubr.bf16.mxu1 %v5223_v1 }
 0x181   : > { %3434 = vmatprep.mubr.bf16.mxu0 %v5279_v41 }
 0x187   : > { %2856 = vmatmul.mubr.bf16.gmra.mrb[32].mxu1 %v5225_v2 }
 0x188   : > { %4262 = vmatmul.mubr.msk.bf16.gmra.mrb[32].mxu0 %vm2308_vm0, %v5226_v3  ;;  %2865 = vmatprep.mubr.bf16.mxu1 %v5227_v4 }
 0x189   : > { %3444 = vmatprep.mubr.bf16.mxu0 %v5279_v41 }
 0x18f   : > { %2866 = vmatmul.mubr.bf16.gmra.mrb[36].mxu1 %v5229_v5 }
 0x190   : > { %4263 = vmatmul.mubr.msk.bf16.gmra.mrb[36].mxu0 %vm2308_vm0, %v5230_v6  ;;  %2875 = vmatprep.mubr.bf16.mxu1 %v5231_v7 }
 0x191   : > { %3454 = vmatprep.mubr.bf16.mxu0 %v5279_v41 }
 0x197   : > { %2876 = vmatmul.mubr.bf16.gmra.mrb[40].mxu1 %v5233_v8 }
 0x198   : > { %4264 = vmatmul.mubr.msk.bf16.gmra.mrb[40].mxu0 %vm2308_vm0, %v5234_v9  ;;  %2885 = vmatprep.mubr.bf16.mxu1 %v5235_v10 }
 0x199   : > { %3464 = vmatprep.mubr.bf16.mxu0 %v5279_v41 }
 0x19f   : > { %2886 = vmatmul.mubr.bf16.gmra.mrb[44].mxu1 %v5237_v11 }
 0x1a0   : > { %4265 = vmatmul.mubr.msk.bf16.gmra.mrb[44].mxu0 %vm2308_vm0, %v5238_v12  ;;  %2895 = vmatprep.mubr.bf16.mxu1 %v5239_v13 }
 0x1a1   : > { %3474 = vmatprep.mubr.bf16.mxu0 %v5279_v41 }
 0x1a7   : > { %2896 = vmatmul.mubr.bf16.gmra.mrb[48].mxu1 %v5241_v14 }
 0x1a8   : > { %4266 = vmatmul.mubr.msk.bf16.gmra.mrb[48].mxu0 %vm2308_vm0, %v5242_v15  ;;  %2905 = vmatprep.mubr.bf16.mxu1 %v5243_v16 }
 0x1a9   : > { %3484 = vmatprep.mubr.bf16.mxu0 %v5279_v41 }
 0x1af   : > { %2906 = vmatmul.mubr.bf16.gmra.mrb[52].mxu1 %v5245_v17 }
 0x1b0   : > { %4267 = vmatmul.mubr.msk.bf16.gmra.mrb[52].mxu0 %vm2308_vm0, %v5246_v18  ;;  %2915 = vmatprep.mubr.bf16.mxu1 %v5247_v19 }
 0x1b1   : > { %3494 = vmatprep.mubr.bf16.mxu0 %v5279_v41 }
 0x1b7   : > { %2916 = vmatmul.mubr.bf16.gmra.mrb[56].mxu1 %v5249_v20 }
 0x1b8   : > { %4268 = vmatmul.mubr.msk.bf16.gmra.mrb[56].mxu0 %vm2308_vm0, %v5250_v21  ;;  %2925 = vmatprep.mubr.bf16.mxu1 %v5251_v22 }
 0x1b9   : > { %3504 = vmatprep.mubr.bf16.mxu0 %v5279_v41 }
 0x1bf   : > { %2926 = vmatmul.mubr.bf16.gmra.mrb[60].mxu1 %v5253_v23 }
 0x1c0   : > { %4269 = vmatmul.mubr.msk.bf16.gmra.mrb[60].mxu0 %vm2308_vm0, %v5254_v24 }
 0x21a   : > { %v2777_v32 = vpop.f32.mrb[0].mxu1 }
 0x21b   : > { %v3356_v33 = vpop.f32.mrb[0].mxu0  ;;  %v4337_v34 = vadd.f32 %v2777_v32, %v6045_v30  ;;  %v2779_v35 = vpop.f32.mrb[1].mxu1 }
 0x21c   : > { %v3358_v36 = vpop.f32.mrb[1].mxu0  ;;  %v4339_v37 = vadd.f32 %v2779_v35, %v6047_v31  ;;  %v2781_v38 = vpop.f32.mrb[2].mxu1 }
 0x21d   : > { %v3360_v39 = vpop.f32.mrb[2].mxu0  ;;  %v4338_v40 = vadd.f32 %v4337_v34, %v3356_v33  ;;  %v4341_v41 = vadd.f32 %v2781_v38, %v6045_v30  ;;  %v2783_v42 = vpop.f32.mrb[3].mxu1 }
 0x21e   : > { %v3362_v43 = vpop.f32.mrb[3].mxu0  ;;  %v4340_v44 = vadd.f32 %v4339_v37, %v3358_v36  ;;  %v4343_v45 = vadd.f32 %v2783_v42, %v6047_v31 }
 0x21f   : > { %v3515_v46 = vmax.f32 %v4338_v40, 0.0  ;;  %v4342_v47 = vadd.f32 %v4341_v41, %v3360_v39 }
 0x220   : > { %v3516_v48 = vmax.f32 %v4340_v44, 0.0  ;;  %v4344_v49 = vadd.f32 %v4343_v45, %v3362_v43 }
 0x221   : > { %v3517_v51 = vmax.f32 %v4342_v47, 0.0 }
 0x222   : > { %v4305_v52 = vpack.c.bf16 %v3516_v48, %v3515_v46  ;;  %v3518_v53 = vmax.f32 %v4344_v49, 0.0  ;;  %v2787_v54 = vpop.f32.mrb[4].mxu1 }
 0x223   : > { %v3366_v55 = vpop.f32.mrb[4].mxu0  ;;  %v4345_v56 = vadd.f32 %v2787_v54, %v6045_v30  ;;  %v2789_v57 = vpop.f32.mrb[5].mxu1 }
 0x224   : > { %v3368_v58 = vpop.f32.mrb[5].mxu0  ;;  %3774 = vst.msk [vmem:[%s6057_s26] sm:$0xff] %vm6059_vm3, %v4305_v52  ;;  %v4306_v59 = vpack.c.bf16 %v3518_v53, %v3517_v51  ;;  %v4347_v60 = vadd.f32 %v2789_v57, %v6047_v31  ;;  %v2791_v61 = vpop.f32.mrb[6].mxu1 }
 0x225   : > { %v3370_v62 = vpop.f32.mrb[6].mxu0  ;;  %v4346_v63 = vadd.f32 %v4345_v56, %v3366_v55  ;;  %v4349_v0 = vadd.f32 %v2791_v61, %v6045_v30  ;;  %v2793_v1 = vpop.f32.mrb[7].mxu1 }
 0x226   : > { %v3372_v2 = vpop.f32.mrb[7].mxu0  ;;  %3775 = vst.msk [vmem:[%s6057_s26 + $0x8] sm:$0xff] %vm6059_vm3, %v4306_v59  ;;  %v4348_v3 = vadd.f32 %v4347_v60, %v3368_v58  ;;  %v4351_v4 = vadd.f32 %v2793_v1, %v6047_v31 }
 0x227   : > { %v3519_v5 = vmax.f32 %v4346_v63, 0.0  ;;  %v4350_v6 = vadd.f32 %v4349_v0, %v3370_v62 }
 0x228   : > { %v3520_v7 = vmax.f32 %v4348_v3, 0.0  ;;  %v4352_v8 = vadd.f32 %v4351_v4, %v3372_v2 }
 0x229   : > { %v3521_v9 = vmax.f32 %v4350_v6, 0.0 }
 0x22a   : > { %v4307_v10 = vpack.c.bf16 %v3520_v7, %v3519_v5  ;;  %v3522_v11 = vmax.f32 %v4352_v8, 0.0  ;;  %v2797_v12 = vpop.f32.mrb[8].mxu1 }
 0x22b   : > { %v3376_v13 = vpop.f32.mrb[8].mxu0  ;;  %v4353_v14 = vadd.f32 %v2797_v12, %v6045_v30  ;;  %v2799_v15 = vpop.f32.mrb[9].mxu1 }
 0x22c   : > { %v3378_v16 = vpop.f32.mrb[9].mxu0  ;;  %3776 = vst.msk [vmem:[%s6057_s26 + $0x10] sm:$0xff] %vm6059_vm3, %v4307_v10  ;;  %v4308_v17 = vpack.c.bf16 %v3522_v11, %v3521_v9  ;;  %v4355_v18 = vadd.f32 %v2799_v15, %v6047_v31  ;;  %v2801_v19 = vpop.f32.mrb[10].mxu1 }
 0x22d   : > { %v3380_v20 = vpop.f32.mrb[10].mxu0  ;;  %v4354_v21 = vadd.f32 %v4353_v14, %v3376_v13  ;;  %v4357_v22 = vadd.f32 %v2801_v19, %v6045_v30  ;;  %v2803_v23 = vpop.f32.mrb[11].mxu1 }
 0x22e   : > { %v3382_v24 = vpop.f32.mrb[11].mxu0  ;;  %3777 = vst.msk [vmem:[%s6057_s26 + $0x18] sm:$0xff] %vm6059_vm3, %v4308_v17  ;;  %v4356_v25 = vadd.f32 %v4355_v18, %v3378_v16  ;;  %v4359_v26 = vadd.f32 %v2803_v23, %v6047_v31 }
 0x22f   : > { %v3523_v27 = vmax.f32 %v4354_v21, 0.0  ;;  %v4358_v28 = vadd.f32 %v4357_v22, %v3380_v20 }
 0x230   : > { %v3524_v29 = vmax.f32 %v4356_v25, 0.0  ;;  %v4360_v32 = vadd.f32 %v4359_v26, %v3382_v24 }
 0x231   : > { %v3525_v33 = vmax.f32 %v4358_v28, 0.0 }
 0x232   : > { %v4309_v34 = vpack.c.bf16 %v3524_v29, %v3523_v27  ;;  %v3526_v35 = vmax.f32 %v4360_v32, 0.0  ;;  %v2807_v36 = vpop.f32.mrb[12].mxu1 }
 0x233   : > { %v3386_v37 = vpop.f32.mrb[12].mxu0  ;;  %v4361_v38 = vadd.f32 %v2807_v36, %v6045_v30  ;;  %v2809_v39 = vpop.f32.mrb[13].mxu1 }
 0x234   : > { %v3388_v40 = vpop.f32.mrb[13].mxu0  ;;  %3778 = vst.msk [vmem:[%s6057_s26 + $0x20] sm:$0xff] %vm6059_vm3, %v4309_v34  ;;  %v4310_v41 = vpack.c.bf16 %v3526_v35, %v3525_v33  ;;  %v4363_v42 = vadd.f32 %v2809_v39, %v6047_v31  ;;  %v2811_v43 = vpop.f32.mrb[14].mxu1 }
 0x235   : > { %v3390_v44 = vpop.f32.mrb[14].mxu0  ;;  %v4362_v45 = vadd.f32 %v4361_v38, %v3386_v37  ;;  %v4365_v46 = vadd.f32 %v2811_v43, %v6045_v30  ;;  %v2813_v47 = vpop.f32.mrb[15].mxu1 }
 0x236   : > { %v3392_v48 = vpop.f32.mrb[15].mxu0  ;;  %3779 = vst.msk [vmem:[%s6057_s26 + $0x28] sm:$0xff] %vm6059_vm3, %v4310_v41  ;;  %v4364_v49 = vadd.f32 %v4363_v42, %v3388_v40  ;;  %v4367_v51 = vadd.f32 %v2813_v47, %v6047_v31 }
 0x237   : > { %v3527_v52 = vmax.f32 %v4362_v45, 0.0  ;;  %v4366_v53 = vadd.f32 %v4365_v46, %v3390_v44 }
 0x238   : > { %v3528_v54 = vmax.f32 %v4364_v49, 0.0  ;;  %v4368_v55 = vadd.f32 %v4367_v51, %v3392_v48 }
 0x239   : > { %v3529_v56 = vmax.f32 %v4366_v53, 0.0 }
 0x23a   : > { %v4311_v57 = vpack.c.bf16 %v3528_v54, %v3527_v52  ;;  %v3530_v58 = vmax.f32 %v4368_v55, 0.0  ;;  %v2817_v59 = vpop.f32.mrb[16].mxu1 }
 0x23b   : > { %v3396_v60 = vpop.f32.mrb[16].mxu0  ;;  %v4369_v61 = vadd.f32 %v2817_v59, %v6045_v30  ;;  %v2819_v62 = vpop.f32.mrb[17].mxu1 }
 0x23c   : > { %v3398_v63 = vpop.f32.mrb[17].mxu0  ;;  %3780 = vst.msk [vmem:[%s6057_s26 + $0x30] sm:$0xff] %vm6059_vm3, %v4311_v57  ;;  %v4312_v0 = vpack.c.bf16 %v3530_v58, %v3529_v56  ;;  %v4371_v1 = vadd.f32 %v2819_v62, %v6047_v31  ;;  %v2821_v2 = vpop.f32.mrb[18].mxu1 }
 0x23d   : > { %v3400_v3 = vpop.f32.mrb[18].mxu0  ;;  %v4370_v4 = vadd.f32 %v4369_v61, %v3396_v60  ;;  %v4373_v5 = vadd.f32 %v2821_v2, %v6045_v30  ;;  %v2823_v6 = vpop.f32.mrb[19].mxu1 }
 0x23e   : > { %v3402_v7 = vpop.f32.mrb[19].mxu0  ;;  %3781 = vst.msk [vmem:[%s6057_s26 + $0x38] sm:$0xff] %vm6059_vm3, %v4312_v0  ;;  %v4372_v8 = vadd.f32 %v4371_v1, %v3398_v63  ;;  %v4375_v9 = vadd.f32 %v2823_v6, %v6047_v31 }
 0x23f   : > { %v3531_v10 = vmax.f32 %v4370_v4, 0.0  ;;  %v4374_v11 = vadd.f32 %v4373_v5, %v3400_v3 }
 0x240   : > { %v3532_v12 = vmax.f32 %v4372_v8, 0.0  ;;  %v4376_v13 = vadd.f32 %v4375_v9, %v3402_v7 }
 0x241   : > { %v3533_v14 = vmax.f32 %v4374_v11, 0.0 }
 0x242   : > { %v4313_v15 = vpack.c.bf16 %v3532_v12, %v3531_v10  ;;  %v3534_v16 = vmax.f32 %v4376_v13, 0.0  ;;  %v2827_v17 = vpop.f32.mrb[20].mxu1 }
 0x243   : > { %v3406_v18 = vpop.f32.mrb[20].mxu0  ;;  %v4377_v19 = vadd.f32 %v2827_v17, %v6045_v30  ;;  %v2829_v20 = vpop.f32.mrb[21].mxu1 }
 0x244   : > { %v3408_v21 = vpop.f32.mrb[21].mxu0  ;;  %3782 = vst.msk [vmem:[%s6057_s26 + $0x40] sm:$0xff] %vm6059_vm3, %v4313_v15  ;;  %v4314_v22 = vpack.c.bf16 %v3534_v16, %v3533_v14  ;;  %v4379_v23 = vadd.f32 %v2829_v20, %v6047_v31  ;;  %v2831_v24 = vpop.f32.mrb[22].mxu1 }
 0x245   : > { %v3410_v25 = vpop.f32.mrb[22].mxu0  ;;  %v4378_v26 = vadd.f32 %v4377_v19, %v3406_v18  ;;  %v4381_v27 = vadd.f32 %v2831_v24, %v6045_v30  ;;  %v2833_v28 = vpop.f32.mrb[23].mxu1 }
 0x246   : > { %v3412_v29 = vpop.f32.mrb[23].mxu0  ;;  %3783 = vst.msk [vmem:[%s6057_s26 + $0x48] sm:$0xff] %vm6059_vm3, %v4314_v22  ;;  %v4380_v32 = vadd.f32 %v4379_v23, %v3408_v21  ;;  %v4383_v33 = vadd.f32 %v2833_v28, %v6047_v31 }
 0x247   : > { %v3535_v34 = vmax.f32 %v4378_v26, 0.0  ;;  %v4382_v35 = vadd.f32 %v4381_v27, %v3410_v25 }
 0x248   : > { %v3536_v36 = vmax.f32 %v4380_v32, 0.0  ;;  %v4384_v37 = vadd.f32 %v4383_v33, %v3412_v29 }
 0x249   : > { %v3537_v38 = vmax.f32 %v4382_v35, 0.0 }
 0x24a   : > { %v4315_v39 = vpack.c.bf16 %v3536_v36, %v3535_v34  ;;  %v3538_v40 = vmax.f32 %v4384_v37, 0.0  ;;  %v2837_v41 = vpop.f32.mrb[24].mxu1 }
 0x24b   : > { %v3416_v42 = vpop.f32.mrb[24].mxu0  ;;  %v4385_v43 = vadd.f32 %v2837_v41, %v6045_v30  ;;  %v2839_v44 = vpop.f32.mrb[25].mxu1 }
 0x24c   : > { %v3418_v45 = vpop.f32.mrb[25].mxu0  ;;  %3784 = vst.msk [vmem:[%s6057_s26 + $0x50] sm:$0xff] %vm6059_vm3, %v4315_v39  ;;  %v4316_v46 = vpack.c.bf16 %v3538_v40, %v3537_v38  ;;  %v4387_v47 = vadd.f32 %v2839_v44, %v6047_v31  ;;  %v2841_v48 = vpop.f32.mrb[26].mxu1 }
 0x24d   : > { %v3420_v49 = vpop.f32.mrb[26].mxu0  ;;  %v4386_v51 = vadd.f32 %v4385_v43, %v3416_v42  ;;  %v4389_v52 = vadd.f32 %v2841_v48, %v6045_v30  ;;  %v2843_v53 = vpop.f32.mrb[27].mxu1 }
 0x24e   : > { %v3422_v54 = vpop.f32.mrb[27].mxu0  ;;  %3785 = vst.msk [vmem:[%s6057_s26 + $0x58] sm:$0xff] %vm6059_vm3, %v4316_v46  ;;  %v4388_v55 = vadd.f32 %v4387_v47, %v3418_v45  ;;  %v4391_v56 = vadd.f32 %v2843_v53, %v6047_v31 }
 0x24f   : > { %v3539_v57 = vmax.f32 %v4386_v51, 0.0  ;;  %v4390_v58 = vadd.f32 %v4389_v52, %v3420_v49 }
 0x250   : > { %v3540_v59 = vmax.f32 %v4388_v55, 0.0  ;;  %v4392_v60 = vadd.f32 %v4391_v56, %v3422_v54 }
 0x251   : > { %v3541_v61 = vmax.f32 %v4390_v58, 0.0 }
 0x252   : > { %v4317_v62 = vpack.c.bf16 %v3540_v59, %v3539_v57  ;;  %v3542_v63 = vmax.f32 %v4392_v60, 0.0  ;;  %v2847_v0 = vpop.f32.mrb[28].mxu1 }
 0x253   : > { %v3426_v1 = vpop.f32.mrb[28].mxu0  ;;  %v4393_v2 = vadd.f32 %v2847_v0, %v6045_v30  ;;  %v2849_v3 = vpop.f32.mrb[29].mxu1 }
 0x254   : > { %v3428_v4 = vpop.f32.mrb[29].mxu0  ;;  %3786 = vst.msk [vmem:[%s6057_s26 + $0x60] sm:$0xff] %vm6059_vm3, %v4317_v62  ;;  %v4318_v5 = vpack.c.bf16 %v3542_v63, %v3541_v61  ;;  %v4395_v6 = vadd.f32 %v2849_v3, %v6047_v31  ;;  %v2851_v7 = vpop.f32.mrb[30].mxu1 }
 0x255   : > { %v3430_v8 = vpop.f32.mrb[30].mxu0  ;;  %v4394_v9 = vadd.f32 %v4393_v2, %v3426_v1  ;;  %v4397_v10 = vadd.f32 %v2851_v7, %v6045_v30  ;;  %v2853_v11 = vpop.f32.mrb[31].mxu1 }
 0x256   : > { %v3432_v12 = vpop.f32.mrb[31].mxu0  ;;  %3787 = vst.msk [vmem:[%s6057_s26 + $0x68] sm:$0xff] %vm6059_vm3, %v4318_v5  ;;  %v4396_v13 = vadd.f32 %v4395_v6, %v3428_v4  ;;  %v4399_v14 = vadd.f32 %v2853_v11, %v6047_v31 }
 0x257   : > { %v3543_v15 = vmax.f32 %v4394_v9, 0.0  ;;  %v4398_v16 = vadd.f32 %v4397_v10, %v3430_v8 }
 0x258   : > { %v3544_v17 = vmax.f32 %v4396_v13, 0.0  ;;  %v4400_v18 = vadd.f32 %v4399_v14, %v3432_v12 }
 0x259   : > { %v3545_v19 = vmax.f32 %v4398_v16, 0.0 }
 0x25a   : > { %v4319_v20 = vpack.c.bf16 %v3544_v17, %v3543_v15  ;;  %v3546_v21 = vmax.f32 %v4400_v18, 0.0  ;;  %v2857_v22 = vpop.f32.mrb[32].mxu1 }
 0x25b   : > { %v3436_v23 = vpop.f32.mrb[32].mxu0  ;;  %v4401_v24 = vadd.f32 %v2857_v22, %v6045_v30  ;;  %v2859_v25 = vpop.f32.mrb[33].mxu1 }
 0x25c   : > { %v3438_v26 = vpop.f32.mrb[33].mxu0  ;;  %3788 = vst.msk [vmem:[%s6057_s26 + $0x70] sm:$0xff] %vm6059_vm3, %v4319_v20  ;;  %v4320_v27 = vpack.c.bf16 %v3546_v21, %v3545_v19  ;;  %v4403_v28 = vadd.f32 %v2859_v25, %v6047_v31  ;;  %v2861_v29 = vpop.f32.mrb[34].mxu1 }
 0x25d   : > { %v3440_v32 = vpop.f32.mrb[34].mxu0  ;;  %v4402_v33 = vadd.f32 %v4401_v24, %v3436_v23  ;;  %v4405_v34 = vadd.f32 %v2861_v29, %v6045_v30  ;;  %v2863_v35 = vpop.f32.mrb[35].mxu1 }
 0x25e   : > { %v3442_v36 = vpop.f32.mrb[35].mxu0  ;;  %3789 = vst.msk [vmem:[%s6057_s26 + $0x78] sm:$0xff] %vm6059_vm3, %v4320_v27  ;;  %v4404_v37 = vadd.f32 %v4403_v28, %v3438_v26  ;;  %v4407_v38 = vadd.f32 %v2863_v35, %v6047_v31 }
 0x25f   : > { %v3547_v39 = vmax.f32 %v4402_v33, 0.0  ;;  %v4406_v40 = vadd.f32 %v4405_v34, %v3440_v32 }
 0x260   : > { %v3548_v41 = vmax.f32 %v4404_v37, 0.0  ;;  %v4408_v42 = vadd.f32 %v4407_v38, %v3442_v36 }
 0x261   : > { %v3549_v43 = vmax.f32 %v4406_v40, 0.0 }
 0x262   : > { %v4321_v44 = vpack.c.bf16 %v3548_v41, %v3547_v39  ;;  %v3550_v45 = vmax.f32 %v4408_v42, 0.0  ;;  %v2867_v46 = vpop.f32.mrb[36].mxu1 }
 0x263   : > { %v3446_v47 = vpop.f32.mrb[36].mxu0  ;;  %v4409_v48 = vadd.f32 %v2867_v46, %v6045_v30  ;;  %v2869_v49 = vpop.f32.mrb[37].mxu1 }
 0x264   : > { %v3448_v51 = vpop.f32.mrb[37].mxu0  ;;  %3790 = vst.msk [vmem:[%s6057_s26 + $0x80] sm:$0xff] %vm6059_vm3, %v4321_v44  ;;  %v4322_v52 = vpack.c.bf16 %v3550_v45, %v3549_v43  ;;  %v4411_v53 = vadd.f32 %v2869_v49, %v6047_v31  ;;  %v2871_v54 = vpop.f32.mrb[38].mxu1 }
 0x265   : > { %v3450_v55 = vpop.f32.mrb[38].mxu0  ;;  %v4410_v56 = vadd.f32 %v4409_v48, %v3446_v47  ;;  %v4413_v57 = vadd.f32 %v2871_v54, %v6045_v30  ;;  %v2873_v58 = vpop.f32.mrb[39].mxu1 }
 0x266   : > { %v3452_v59 = vpop.f32.mrb[39].mxu0  ;;  %3791 = vst.msk [vmem:[%s6057_s26 + $0x88] sm:$0xff] %vm6059_vm3, %v4322_v52  ;;  %v4412_v60 = vadd.f32 %v4411_v53, %v3448_v51  ;;  %v4415_v61 = vadd.f32 %v2873_v58, %v6047_v31 }
 0x267   : > { %v3551_v62 = vmax.f32 %v4410_v56, 0.0  ;;  %v4414_v63 = vadd.f32 %v4413_v57, %v3450_v55 }
 0x268   : > { %v3552_v0 = vmax.f32 %v4412_v60, 0.0  ;;  %v4416_v1 = vadd.f32 %v4415_v61, %v3452_v59 }
 0x269   : > { %v3553_v2 = vmax.f32 %v4414_v63, 0.0 }
 0x26a   : > { %v4323_v3 = vpack.c.bf16 %v3552_v0, %v3551_v62  ;;  %v3554_v4 = vmax.f32 %v4416_v1, 0.0  ;;  %v2877_v5 = vpop.f32.mrb[40].mxu1 }
 0x26b   : > { %v3456_v6 = vpop.f32.mrb[40].mxu0  ;;  %v4417_v7 = vadd.f32 %v2877_v5, %v6045_v30  ;;  %v2879_v8 = vpop.f32.mrb[41].mxu1 }
 0x26c   : > { %v3458_v9 = vpop.f32.mrb[41].mxu0  ;;  %3792 = vst.msk [vmem:[%s6057_s26 + $0x90] sm:$0xff] %vm6059_vm3, %v4323_v3  ;;  %v4324_v10 = vpack.c.bf16 %v3554_v4, %v3553_v2  ;;  %v4419_v11 = vadd.f32 %v2879_v8, %v6047_v31  ;;  %v2881_v12 = vpop.f32.mrb[42].mxu1 }
 0x26d   : > { %v3460_v13 = vpop.f32.mrb[42].mxu0  ;;  %v4418_v14 = vadd.f32 %v4417_v7, %v3456_v6  ;;  %v4421_v15 = vadd.f32 %v2881_v12, %v6045_v30  ;;  %v2883_v16 = vpop.f32.mrb[43].mxu1 }
 0x26e   : > { %v3462_v17 = vpop.f32.mrb[43].mxu0  ;;  %3793 = vst.msk [vmem:[%s6057_s26 + $0x98] sm:$0xff] %vm6059_vm3, %v4324_v10  ;;  %v4420_v18 = vadd.f32 %v4419_v11, %v3458_v9  ;;  %v4423_v19 = vadd.f32 %v2883_v16, %v6047_v31 }
 0x26f   : > { %v3555_v20 = vmax.f32 %v4418_v14, 0.0  ;;  %v4422_v21 = vadd.f32 %v4421_v15, %v3460_v13 }
 0x270   : > { %v3556_v22 = vmax.f32 %v4420_v18, 0.0  ;;  %v4424_v23 = vadd.f32 %v4423_v19, %v3462_v17 }
 0x271   : > { %v3557_v24 = vmax.f32 %v4422_v21, 0.0 }
 0x272   : > { %v4325_v25 = vpack.c.bf16 %v3556_v22, %v3555_v20  ;;  %v3558_v26 = vmax.f32 %v4424_v23, 0.0  ;;  %v2887_v27 = vpop.f32.mrb[44].mxu1 }
 0x273   : > { %v3466_v28 = vpop.f32.mrb[44].mxu0  ;;  %v4425_v29 = vadd.f32 %v2887_v27, %v6045_v30  ;;  %v2889_v32 = vpop.f32.mrb[45].mxu1 }
 0x274   : > { %v3468_v33 = vpop.f32.mrb[45].mxu0  ;;  %3794 = vst.msk [vmem:[%s6057_s26 + $0xa0] sm:$0xff] %vm6059_vm3, %v4325_v25  ;;  %v4326_v34 = vpack.c.bf16 %v3558_v26, %v3557_v24  ;;  %v4427_v35 = vadd.f32 %v2889_v32, %v6047_v31  ;;  %v2891_v36 = vpop.f32.mrb[46].mxu1 }
 0x275   : > { %v3470_v37 = vpop.f32.mrb[46].mxu0  ;;  %v4426_v38 = vadd.f32 %v4425_v29, %v3466_v28  ;;  %v4429_v39 = vadd.f32 %v2891_v36, %v6045_v30  ;;  %v2893_v40 = vpop.f32.mrb[47].mxu1 }
 0x276   : > { %v3472_v41 = vpop.f32.mrb[47].mxu0  ;;  %3795 = vst.msk [vmem:[%s6057_s26 + $0xa8] sm:$0xff] %vm6059_vm3, %v4326_v34  ;;  %v4428_v42 = vadd.f32 %v4427_v35, %v3468_v33  ;;  %v4431_v43 = vadd.f32 %v2893_v40, %v6047_v31 }
 0x277   : > { %v3559_v44 = vmax.f32 %v4426_v38, 0.0  ;;  %v4430_v45 = vadd.f32 %v4429_v39, %v3470_v37 }
 0x278   : > { %v3560_v46 = vmax.f32 %v4428_v42, 0.0  ;;  %v4432_v47 = vadd.f32 %v4431_v43, %v3472_v41 }
 0x279   : > { %v3561_v48 = vmax.f32 %v4430_v45, 0.0 }
 0x27a   : > { %v4327_v49 = vpack.c.bf16 %v3560_v46, %v3559_v44  ;;  %v3562_v51 = vmax.f32 %v4432_v47, 0.0  ;;  %v2897_v52 = vpop.f32.mrb[48].mxu1 }
 0x27b   : > { %v3476_v53 = vpop.f32.mrb[48].mxu0  ;;  %v4433_v54 = vadd.f32 %v2897_v52, %v6045_v30  ;;  %v2899_v55 = vpop.f32.mrb[49].mxu1 }
 0x27c   : > { %v3478_v56 = vpop.f32.mrb[49].mxu0  ;;  %3796 = vst.msk [vmem:[%s6057_s26 + $0xb0] sm:$0xff] %vm6059_vm3, %v4327_v49  ;;  %v4328_v57 = vpack.c.bf16 %v3562_v51, %v3561_v48  ;;  %v4435_v58 = vadd.f32 %v2899_v55, %v6047_v31  ;;  %v2901_v59 = vpop.f32.mrb[50].mxu1 }
 0x27d   : > { %v3480_v60 = vpop.f32.mrb[50].mxu0  ;;  %v4434_v61 = vadd.f32 %v4433_v54, %v3476_v53  ;;  %v4437_v62 = vadd.f32 %v2901_v59, %v6045_v30  ;;  %v2903_v63 = vpop.f32.mrb[51].mxu1 }
 0x27e   : > { %v3482_v0 = vpop.f32.mrb[51].mxu0  ;;  %3797 = vst.msk [vmem:[%s6057_s26 + $0xb8] sm:$0xff] %vm6059_vm3, %v4328_v57  ;;  %v4436_v1 = vadd.f32 %v4435_v58, %v3478_v56  ;;  %v4439_v2 = vadd.f32 %v2903_v63, %v6047_v31 }
 0x27f   : > { %v3563_v3 = vmax.f32 %v4434_v61, 0.0  ;;  %v4438_v4 = vadd.f32 %v4437_v62, %v3480_v60 }
 0x280   : > { %v3564_v5 = vmax.f32 %v4436_v1, 0.0  ;;  %v4440_v6 = vadd.f32 %v4439_v2, %v3482_v0 }
 0x281   : > { %v3565_v7 = vmax.f32 %v4438_v4, 0.0 }
 0x282   : > { %v4329_v8 = vpack.c.bf16 %v3564_v5, %v3563_v3  ;;  %v3566_v9 = vmax.f32 %v4440_v6, 0.0  ;;  %v2907_v10 = vpop.f32.mrb[52].mxu1 }
 0x283   : > { %v3486_v11 = vpop.f32.mrb[52].mxu0  ;;  %v4441_v12 = vadd.f32 %v2907_v10, %v6045_v30  ;;  %v2909_v13 = vpop.f32.mrb[53].mxu1 }
 0x284   : > { %v3488_v14 = vpop.f32.mrb[53].mxu0  ;;  %3798 = vst.msk [vmem:[%s6057_s26 + $0xc0] sm:$0xff] %vm6059_vm3, %v4329_v8  ;;  %v4330_v15 = vpack.c.bf16 %v3566_v9, %v3565_v7  ;;  %v4443_v16 = vadd.f32 %v2909_v13, %v6047_v31  ;;  %v2911_v17 = vpop.f32.mrb[54].mxu1 }
 0x285   : > { %v3490_v18 = vpop.f32.mrb[54].mxu0  ;;  %v4442_v19 = vadd.f32 %v4441_v12, %v3486_v11  ;;  %v4445_v20 = vadd.f32 %v2911_v17, %v6045_v30  ;;  %v2913_v21 = vpop.f32.mrb[55].mxu1 }
 0x286   : > { %v3492_v22 = vpop.f32.mrb[55].mxu0  ;;  %3799 = vst.msk [vmem:[%s6057_s26 + $0xc8] sm:$0xff] %vm6059_vm3, %v4330_v15  ;;  %v4444_v23 = vadd.f32 %v4443_v16, %v3488_v14  ;;  %v4447_v24 = vadd.f32 %v2913_v21, %v6047_v31 }
 0x287   : > { %v3567_v25 = vmax.f32 %v4442_v19, 0.0  ;;  %v4446_v26 = vadd.f32 %v4445_v20, %v3490_v18 }
 0x288   : > { %v3568_v27 = vmax.f32 %v4444_v23, 0.0  ;;  %v4448_v28 = vadd.f32 %v4447_v24, %v3492_v22 }
 0x289   : > { %v3569_v29 = vmax.f32 %v4446_v26, 0.0 }
 0x28a   : > { %v4331_v32 = vpack.c.bf16 %v3568_v27, %v3567_v25  ;;  %v3570_v33 = vmax.f32 %v4448_v28, 0.0  ;;  %v2917_v34 = vpop.f32.mrb[56].mxu1 }
 0x28b   : > { %v3496_v35 = vpop.f32.mrb[56].mxu0  ;;  %v4449_v36 = vadd.f32 %v2917_v34, %v6045_v30  ;;  %v2919_v37 = vpop.f32.mrb[57].mxu1 }
 0x28c   : > { %v3498_v38 = vpop.f32.mrb[57].mxu0  ;;  %3800 = vst.msk [vmem:[%s6057_s26 + $0xd0] sm:$0xff] %vm6059_vm3, %v4331_v32  ;;  %v4332_v39 = vpack.c.bf16 %v3570_v33, %v3569_v29  ;;  %v4451_v40 = vadd.f32 %v2919_v37, %v6047_v31  ;;  %v2921_v41 = vpop.f32.mrb[58].mxu1 }
 0x28d   : > { %v3500_v42 = vpop.f32.mrb[58].mxu0  ;;  %v4450_v43 = vadd.f32 %v4449_v36, %v3496_v35  ;;  %v4453_v44 = vadd.f32 %v2921_v41, %v6045_v30  ;;  %v2923_v45 = vpop.f32.mrb[59].mxu1 }
 0x28e   : > { %v3502_v46 = vpop.f32.mrb[59].mxu0  ;;  %3801 = vst.msk [vmem:[%s6057_s26 + $0xd8] sm:$0xff] %vm6059_vm3, %v4332_v39  ;;  %v4452_v47 = vadd.f32 %v4451_v40, %v3498_v38  ;;  %v4455_v48 = vadd.f32 %v2923_v45, %v6047_v31 }
 0x28f   : > { %v3571_v49 = vmax.f32 %v4450_v43, 0.0  ;;  %v4454_v51 = vadd.f32 %v4453_v44, %v3500_v42 }
 0x290   : > { %v3572_v52 = vmax.f32 %v4452_v47, 0.0  ;;  %v4456_v53 = vadd.f32 %v4455_v48, %v3502_v46 }
 0x291   : > { %v3573_v54 = vmax.f32 %v4454_v51, 0.0 }
 0x292   : > { %v4333_v55 = vpack.c.bf16 %v3572_v52, %v3571_v49  ;;  %v3574_v56 = vmax.f32 %v4456_v53, 0.0  ;;  %v2927_v57 = vpop.f32.mrb[60].mxu1 }
 0x293   : > { %v3506_v58 = vpop.f32.mrb[60].mxu0  ;;  %v4457_v59 = vadd.f32 %v2927_v57, %v6045_v30  ;;  %v2929_v60 = vpop.f32.mrb[61].mxu1 }
 0x294   : > { %v3508_v61 = vpop.f32.mrb[61].mxu0  ;;  %3802 = vst.msk [vmem:[%s6057_s26 + $0xe0] sm:$0xff] %vm6059_vm3, %v4333_v55  ;;  %v4334_v62 = vpack.c.bf16 %v3574_v56, %v3573_v54  ;;  %v4459_v63 = vadd.f32 %v2929_v60, %v6047_v31  ;;  %v2931_v0 = vpop.f32.mrb[62].mxu1 }
 0x295   : > { %v3510_v1 = vpop.f32.mrb[62].mxu0  ;;  %v4458_v2 = vadd.f32 %v4457_v59, %v3506_v58  ;;  %v4461_v3 = vadd.f32 %v2931_v0, %v6045_v30  ;;  %v2933_v4 = vpop.f32.mrb[63].mxu1 }
 0x296   : > { %v3512_v5 = vpop.f32.mrb[63].mxu0  ;;  %3803 = vst.msk [vmem:[%s6057_s26 + $0xe8] sm:$0xff] %vm6059_vm3, %v4334_v62  ;;  %v4460_v6 = vadd.f32 %v4459_v63, %v3508_v61  ;;  %v4463_v7 = vadd.f32 %v2933_v4, %v6047_v31 }
 0x297   : > { %v3575_v8 = vmax.f32 %v4458_v2, 0.0  ;;  %v4462_v9 = vadd.f32 %v4461_v3, %v3510_v1 }
 0x298   : > { %v3576_v10 = vmax.f32 %v4460_v6, 0.0  ;;  %v4464_v11 = vadd.f32 %v4463_v7, %v3512_v5 }
 0x299   : > { %v3577_v12 = vmax.f32 %v4462_v9, 0.0 }
 0x29a   : > { %v4335_v13 = vpack.c.bf16 %v3576_v10, %v3575_v8  ;;  %v3578_v14 = vmax.f32 %v4464_v11, 0.0 }
 0x29c   : > { %3804 = vst.msk [vmem:[%s6057_s26 + $0xf0] sm:$0xff] %vm6059_vm3, %v4335_v13  ;;  %v4336_v15 = vpack.c.bf16 %v3578_v14, %v3577_v12 }
 0x29e   : > { %3805 = vst.msk [vmem:[%s6057_s26 + $0xf8] sm:$0xff] %vm6059_vm3, %v4336_v15 }
 0x29f PF: > { %s13_s14 = sadd.s32 1, %s5277_s14   ;;  %s6234_s12 = smov %s5273_s13 }
 0x2a0   : > { %p10_p5 = scmp.ge.s32.totalorder %s13_s14, 4   ;;  %s6235_s13 = smov %s6237_s15 }
 0x2a2   :  { %12 = sbr.rel (!%p10_p5) target bundleno = 2 (0x2), region = 62 }

// kernel: inception_d_forward.10
= control target key start
LH: loop header
LB: loop body
LE: loop exit
PB: predicated region body
PF: predicated region fallthrough
CT: control target
= control target key end

     0   :  { %s3349_s12 = smov 0   ;;  %s3351_s13 = smov 0   ;;  %s4148_s0 = inlined_call_operand.vmem [shape: bf16[2,49,1728], index: 0, kind: input, shape index: {}]   ;;  %s4149_s1 = inlined_call_operand.vmem [shape: bf16[1728,192], index: 1, kind: input, shape index: {}]   ;;  %s4150_s2 = inlined_call_operand.vmem [shape: f32[1,192], index: 2, kind: input, shape index: {}]   ;;  %s4151_s3 = inlined_call_operand.vmem [shape: f32[2,49,192], index: 3, kind: output, shape index: {}]  }
   0x1   :  { %s3353_s14 = smov 0  }
   0x2 LB: > { %s25_s15 = sadd.s32 1, %s3323_s13  ;;  %p2467_p0 = scmp.ge.s32.totalorder %s3327_s14, 1  ;;  %s3327_s14 = sphi %s3353_s14, %s13_s14   ;;  %s3323_s13 = sphi %s3351_s13, %s4153_s13   ;;  %s3319_s12 = sphi %s3349_s12, %s4152_s12  }
   0x3   : > { %p27_p1 = scmp.ge.s32.totalorder %s25_s15, 2  ;;  %p159_p2 = scmp.lt.s32.totalorder %s3327_s14, 3 }
   0x5   : > { %s4155_s15 = smov (%p27_p1, %s25_s15), 0  ;;  %p160_p3 = pnand %p2467_p0, %p159_p2 }
   0x6   : > { %v2904_v0 = vld [vmem:[%s4149_s1 + $0x4] ss:$8 sps:$4 sm:$0xff] (!%p160_p3)   ;;  %v2908_v2 = vld [vmem:[%s4149_s1] ss:$8 sps:$4 sm:$0xff] (!%p160_p3)   ;;  %v2910_v4 = vld [vmem:[%s4149_s1 + $0x14] ss:$8 sps:$4 sm:$0xff] (!%p160_p3)  }
   0x7   : > { %163 = sbr.rel (%p160_p3) target bundleno = 476 (0x1dc), region = 32  ;;  %v2906_v1 = vld [vmem:[%s4149_s1 + $0x304] ss:$8 sps:$4 sm:$0xff] (!%p160_p3)   ;;  %1841 = vmatprep.subr.bf16.mxu1 (!%p160_p3), %v2904_v0  ;;  %v2909_v3 = vld [vmem:[%s4149_s1 + $0x300] ss:$8 sps:$4 sm:$0xff] (!%p160_p3)   ;;  %p194_p4 = scmp.lt.s32.totalorder (!%p160_p3), %s3319_s12, 1 }
   0x8   : > { %2054 = vmatprep.subr.bf16.mxu0 (!%p160_p3), %v2906_v1  ;;  %1842 = vmatpush1.bf16.msra.mxu1 (!%p160_p3), %v2908_v2  ;;  %v2912_v5 = vld [vmem:[%s4149_s1 + $0x314] ss:$8 sps:$4 sm:$0xff] (!%p160_p3)   ;;  %v2914_v6 = vld [vmem:[%s4149_s1 + $0x10] ss:$8 sps:$4 sm:$0xff] (!%p160_p3)   ;;  %v2916_v8 = vld [vmem:[%s4149_s1 + $0x24] ss:$8 sps:$4 sm:$0xff] (!%p160_p3)  }
   0x9   : > { %2055 = vmatpush1.bf16.msra.mxu0 (!%p160_p3), %v2909_v3  ;;  %1843 = vmatprep.subr.bf16.mxu1 (!%p160_p3), %v2910_v4  ;;  %v2915_v7 = vld [vmem:[%s4149_s1 + $0x310] ss:$8 sps:$4 sm:$0xff] (!%p160_p3)   ;;  %v2918_v9 = vld [vmem:[%s4149_s1 + $0x324] ss:$8 sps:$4 sm:$0xff] (!%p160_p3)   ;;  %v2920_v10 = vld [vmem:[%s4149_s1 + $0x20] ss:$8 sps:$4 sm:$0xff] (!%p160_p3)  }
   0xa   : > { %2056 = vmatprep.subr.bf16.mxu0 (!%p160_p3), %v2912_v5  ;;  %v2921_v11 = vld [vmem:[%s4149_s1 + $0x320] ss:$8 sps:$4 sm:$0xff] (!%p160_p3)   ;;  %v2922_v12 = vld [vmem:[%s4149_s1 + $0x34] ss:$8 sps:$4 sm:$0xff] (!%p160_p3)   ;;  %v2926_v14 = vld [vmem:[%s4149_s1 + $0x30] ss:$8 sps:$4 sm:$0xff] (!%p160_p3)  }
   0xb   : > { %v2924_v13 = vld [vmem:[%s4149_s1 + $0x334] ss:$8 sps:$4 sm:$0xff] (!%p160_p3)   ;;  %v2927_v15 = vld [vmem:[%s4149_s1 + $0x330] ss:$8 sps:$4 sm:$0xff] (!%p160_p3)   ;;  %v2928_v16 = vld [vmem:[%s4149_s1 + $0x44] ss:$8 sps:$4 sm:$0xff] (!%p160_p3)  }
   0xc   : > { %1844 = vmatpush1.bf16.msra.mxu1 (!%p160_p3), %v2914_v6  ;;  %v2930_v17 = vld [vmem:[%s4149_s1 + $0x344] ss:$8 sps:$4 sm:$0xff] (!%p160_p3)   ;;  %v2932_v18 = vld [vmem:[%s4149_s1 + $0x40] ss:$8 sps:$4 sm:$0xff] (!%p160_p3)   ;;  %v2934_v20 = vld [vmem:[%s4149_s1 + $0x54] ss:$8 sps:$4 sm:$0xff] (!%p160_p3)  }
   0xd   : > { %2057 = vmatpush1.bf16.msra.mxu0 (!%p160_p3), %v2915_v7  ;;  %1845 = vmatprep.subr.bf16.mxu1 (!%p160_p3), %v2916_v8  ;;  %v2933_v19 = vld [vmem:[%s4149_s1 + $0x340] ss:$8 sps:$4 sm:$0xff] (!%p160_p3)   ;;  %v2936_v21 = vld [vmem:[%s4149_s1 + $0x354] ss:$8 sps:$4 sm:$0xff] (!%p160_p3)   ;;  %v2938_v22 = vld [vmem:[%s4149_s1 + $0x50] ss:$8 sps:$4 sm:$0xff] (!%p160_p3)  }
   0xe   : > { %2058 = vmatprep.subr.bf16.mxu0 %v2918_v9  ;;  %v2939_v23 = vld [vmem:[%s4149_s1 + $0x350] ss:$8 sps:$4 sm:$0xff]   ;;  %v2940_v24 = vld [vmem:[%s4149_s1 + $0x64] ss:$8 sps:$4 sm:$0xff]   ;;  %v2944_v26 = vld [vmem:[%s4149_s1 + $0x60] ss:$8 sps:$4 sm:$0xff]  }
   0xf   : > { %v2942_v25 = vld [vmem:[%s4149_s1 + $0x364] ss:$8 sps:$4 sm:$0xff]   ;;  %v2945_v27 = vld [vmem:[%s4149_s1 + $0x360] ss:$8 sps:$4 sm:$0xff]   ;;  %v2946_v28 = vld [vmem:[%s4149_s1 + $0x74] ss:$8 sps:$4 sm:$0xff]  }
  0x10   : > { %1846 = vmatpush1.bf16.msra.mxu1 %v2920_v10  ;;  %v2948_v29 = vld [vmem:[%s4149_s1 + $0x374] ss:$8 sps:$4 sm:$0xff]   ;;  %v2950_v30 = vld [vmem:[%s4149_s1 + $0x70] ss:$8 sps:$4 sm:$0xff]   ;;  %v2952_v32 = vld [vmem:[%s4149_s1 + $0x84] ss:$8 sps:$4 sm:$0xff]  }
  0x11   : > { %2059 = vmatpush1.bf16.msra.mxu0 %v2921_v11  ;;  %1847 = vmatprep.subr.bf16.mxu1 %v2922_v12  ;;  %v2951_v31 = vld [vmem:[%s4149_s1 + $0x370] ss:$8 sps:$4 sm:$0xff]   ;;  %v2954_v33 = vld [vmem:[%s4149_s1 + $0x384] ss:$8 sps:$4 sm:$0xff]   ;;  %v2956_v34 = vld [vmem:[%s4149_s1 + $0x80] ss:$8 sps:$4 sm:$0xff]  }
  0x12   : > { %2060 = vmatprep.subr.bf16.mxu0 %v2924_v13  ;;  %v2957_v35 = vld [vmem:[%s4149_s1 + $0x380] ss:$8 sps:$4 sm:$0xff]   ;;  %v2958_v36 = vld [vmem:[%s4149_s1 + $0x94] ss:$8 sps:$4 sm:$0xff]   ;;  %s4157_s12 = smov (!%p194_p4, %s3319_s12), 1  ;;  %vm1828_vm0 = vcmask 523264  }
  0x13   : > { %v2960_v37 = vld [vmem:[%s4149_s1 + $0x394] ss:$8 sps:$4 sm:$0xff]   ;;  %v2962_v38 = vld [vmem:[%s4149_s1 + $0x90] ss:$8 sps:$4 sm:$0xff]   ;;  %v2964_v40 = vld [vmem:[%s4149_s1 + $0xa4] ss:$8 sps:$4 sm:$0xff]  }
  0x14   : > { %1848 = vmatpush1.bf16.msra.mxu1 %v2926_v14  ;;  %v2963_v39 = vld [vmem:[%s4149_s1 + $0x390] ss:$8 sps:$4 sm:$0xff]   ;;  %s2878_s29 = smul.u32 392, %s4157_s12  ;;  %v2966_v41 = vld [vmem:[%s4149_s1 + $0x3a4] ss:$8 sps:$4 sm:$0xff]   ;;  %vm2365_vm1 = vcmask 516096  }
  0x15   : > { %2061 = vmatpush1.bf16.msra.mxu0 %v2927_v15  ;;  %1849 = vmatprep.subr.bf16.mxu1 %v2928_v16  ;;  %v2968_v42 = vld [vmem:[%s4149_s1 + $0xa0] ss:$8 sps:$4 sm:$0xff]   ;;  %v2970_v44 = vld [vmem:[%s4149_s1 + $0xb4] ss:$8 sps:$4 sm:$0xff]   ;;  %v2974_v46 = vld [vmem:[%s4149_s1 + $0xb0] ss:$8 sps:$4 sm:$0xff]  }
  0x16   : > { %2062 = vmatprep.subr.bf16.mxu0 %v2930_v17  ;;  %v2969_v43 = vld [vmem:[%s4149_s1 + $0x3a0] ss:$8 sps:$4 sm:$0xff]   ;;  %s3512_s17 = scalar_lea.vmem %s4148_s0, %s2878_s29  ;;  %v2972_v45 = vld [vmem:[%s4149_s1 + $0x3b4] ss:$8 sps:$4 sm:$0xff]   ;;  %v2975_v47 = vld [vmem:[%s4149_s1 + $0x3b0] ss:$8 sps:$4 sm:$0xff]  }
  0x17   : > { %v3002_v48 = vld [vmem:[%s3512_s17 + $0x4] ss:$56 sps:$4 sm:$0xff]   ;;  %v2980_v52 = vld [vmem:[%s4149_s1 + $0xc0] ss:$8 sps:$4 sm:$0xff]   ;;  %v2986_v56 = vld [vmem:[%s4149_s1 + $0xd0] ss:$8 sps:$4 sm:$0xff]  }
  0x18   : > { %1850 = vmatpush1.bf16.msra.mxu1 %v2932_v18  ;;  %v2976_v49 = vld [vmem:[%s4149_s1 + $0xc4] ss:$8 sps:$4 sm:$0xff]   ;;  %1873 = vmatprep.mubr.bf16.mxu1 %v3002_v48  ;;  %v3008_v51 = vld [vmem:[%s3512_s17 + $0x1c] ss:$56 sps:$4 sm:$0xff]   ;;  %v2981_v53 = vld [vmem:[%s4149_s1 + $0x3c0] ss:$8 sps:$4 sm:$0xff]  }
  0x19   : > { %2063 = vmatpush1.bf16.msra.mxu0 %v2933_v19  ;;  %1851 = vmatprep.subr.bf16.mxu1 %v2934_v20  ;;  %v2978_v50 = vld [vmem:[%s4149_s1 + $0x3c4] ss:$8 sps:$4 sm:$0xff]   ;;  %v2982_v54 = vld [vmem:[%s4149_s1 + $0xd4] ss:$8 sps:$4 sm:$0xff]   ;;  %v2987_v57 = vld [vmem:[%s4149_s1 + $0x3d0] ss:$8 sps:$4 sm:$0xff]  }
  0x1a   : > { %2064 = vmatprep.subr.bf16.mxu0 %v2936_v21  ;;  %v2984_v55 = vld [vmem:[%s4149_s1 + $0x3d4] ss:$8 sps:$4 sm:$0xff]   ;;  %2086 = vmatprep.mubr.bf16.mxu0 %v3008_v51  ;;  %v2988_v58 = vld [vmem:[%s4149_s1 + $0xe4] ss:$8 sps:$4 sm:$0xff]   ;;  %v2992_v60 = vld [vmem:[%s4149_s1 + $0xe0] ss:$8 sps:$4 sm:$0xff]  }
  0x1b   : > { %v2990_v59 = vld [vmem:[%s4149_s1 + $0x3e4] ss:$8 sps:$4 sm:$0xff]   ;;  %v2993_v61 = vld [vmem:[%s4149_s1 + $0x3e0] ss:$8 sps:$4 sm:$0xff]   ;;  %v2994_v62 = vld [vmem:[%s4149_s1 + $0xf4] ss:$8 sps:$4 sm:$0xff]  }
  0x1c   : > { %1852 = vmatpush1.bf16.msra.mxu1 %v2938_v22  ;;  %v2996_v63 = vld [vmem:[%s4149_s1 + $0x3f4] ss:$8 sps:$4 sm:$0xff]   ;;  %v2998_v0 = vld [vmem:[%s4149_s1 + $0xf0] ss:$8 sps:$4 sm:$0xff]   ;;  %v3005_v2 = vld [vmem:[%s4149_s1 + $0x104] ss:$8 sps:$4 sm:$0xff]  }
  0x1d   : > { %2065 = vmatpush1.bf16.msra.mxu0 %v2939_v23  ;;  %1853 = vmatprep.subr.bf16.mxu1 %v2940_v24  ;;  %v2999_v1 = vld [vmem:[%s4149_s1 + $0x3f0] ss:$8 sps:$4 sm:$0xff]   ;;  %v3011_v3 = vld [vmem:[%s4149_s1 + $0x404] ss:$8 sps:$4 sm:$0xff]   ;;  %v3003_v5 = vld [vmem:[%s4149_s1 + $0x100] ss:$8 sps:$4 sm:$0xff]  }
  0x1e   : > { %2066 = vmatprep.subr.bf16.mxu0 %v2942_v25  ;;  %v3000_v4 = vld [vmem:[%s3512_s17] ss:$56 sps:$4 sm:$0xff]   ;;  %v3014_v8 = vld [vmem:[%s4149_s1 + $0x114] ss:$8 sps:$4 sm:$0xff]   ;;  %v3020_v12 = vld [vmem:[%s4149_s1 + $0x124] ss:$8 sps:$4 sm:$0xff]  }
  0x1f   : > { %v3006_v6 = vld [vmem:[%s3512_s17 + $0x18] ss:$56 sps:$4 sm:$0xff]   ;;  %v3009_v7 = vld [vmem:[%s4149_s1 + $0x400] ss:$8 sps:$4 sm:$0xff]   ;;  %v3017_v9 = vld [vmem:[%s4149_s1 + $0x414] ss:$8 sps:$4 sm:$0xff]  }
  0x20   : > { %1854 = vmatpush1.bf16.msra.mxu1 %v2944_v26  ;;  %v3012_v10 = vld [vmem:[%s4149_s1 + $0x110] ss:$8 sps:$4 sm:$0xff]   ;;  %v3023_v13 = vld [vmem:[%s4149_s1 + $0x424] ss:$8 sps:$4 sm:$0xff]   ;;  %v3018_v14 = vld [vmem:[%s4149_s1 + $0x120] ss:$8 sps:$4 sm:$0xff]  }
  0x21   : > { %2067 = vmatpush1.bf16.msra.mxu0 %v2945_v27  ;;  %1855 = vmatprep.subr.bf16.mxu1 %v2946_v28  ;;  %v3015_v11 = vld [vmem:[%s4149_s1 + $0x410] ss:$8 sps:$4 sm:$0xff]   ;;  %v3021_v15 = vld [vmem:[%s4149_s1 + $0x420] ss:$8 sps:$4 sm:$0xff]   ;;  %v3026_v16 = vld [vmem:[%s4149_s1 + $0x134] ss:$8 sps:$4 sm:$0xff]  }
  0x22   : > { %2068 = vmatprep.subr.bf16.mxu0 %v2948_v29  ;;  %v3066_v17 = vld [vmem:[%s3512_s17 + $0x74] ss:$56 sps:$4 sm:$0xff]   ;;  %v3024_v19 = vld [vmem:[%s4149_s1 + $0x130] ss:$8 sps:$4 sm:$0xff]   ;;  %v3077_v25 = vld [vmem:[%s3512_s17 + $0x88] ss:$56 sps:$4 sm:$0xff]  }
  0x23   : > { %v3029_v18 = vld [vmem:[%s4149_s1 + $0x434] ss:$8 sps:$4 sm:$0xff]   ;;  %v3027_v20 = vld [vmem:[%s4149_s1 + $0x430] ss:$8 sps:$4 sm:$0xff]   ;;  %v3071_v21 = vld [vmem:[%s3512_s17 + $0x8c] ss:$56 sps:$4 sm:$0xff]  }
  0x24   : > { %1856 = vmatpush1.bf16.msra.mxu1 %v2950_v30  ;;  %v3032_v22 = vld [vmem:[%s4149_s1 + $0x144] ss:$8 sps:$4 sm:$0xff]   ;;  %v3076_v24 = vld [vmem:[%s3512_s17 + $0x70] ss:$56 sps:$4 sm:$0xff]   ;;  %v3038_v28 = vld [vmem:[%s4149_s1 + $0x154] ss:$8 sps:$4 sm:$0xff]  }
  0x25   : > { %2069 = vmatpush1.bf16.msra.mxu0 %v2951_v31  ;;  %1857 = vmatprep.subr.bf16.mxu1 %v2952_v32  ;;  %v3035_v23 = vld [vmem:[%s4149_s1 + $0x444] ss:$8 sps:$4 sm:$0xff]   ;;  %v3030_v26 = vld [vmem:[%s4149_s1 + $0x140] ss:$8 sps:$4 sm:$0xff]   ;;  %v3041_v30 = vld [vmem:[%s4149_s1 + $0x454] ss:$8 sps:$4 sm:$0xff]  }
  0x26   : > { %2070 = vmatprep.subr.bf16.mxu0 %v2954_v33  ;;  %v3033_v27 = vld [vmem:[%s4149_s1 + $0x440] ss:$8 sps:$4 sm:$0xff]   ;;  %v3084_v29 = vld [vmem:[%s3512_s17 + $0xe4] ss:$56 sps:$4 sm:$0xff]   ;;  %v3036_v31 = vld [vmem:[%s4149_s1 + $0x150] ss:$8 sps:$4 sm:$0xff]  }
  0x27   : > { %v3039_v32 = vld [vmem:[%s4149_s1 + $0x450] ss:$8 sps:$4 sm:$0xff]   ;;  %v3089_v33 = vld [vmem:[%s3512_s17 + $0xfc] ss:$56 sps:$4 sm:$0xff]   ;;  %v3059_v51 = vld [vmem:[%s4149_s1 + $0x484] ss:$8 sps:$4 sm:$0xff]  }
  0x28   : > { %1858 = vmatpush1.bf16.msra.mxu1 %v2956_v34  ;;  %v3044_v34 = vld [vmem:[%s4149_s1 + $0x164] ss:$8 sps:$4 sm:$0xff]   ;;  %v3048_v48 = vld [vmem:[%s4149_s1 + $0x170] ss:$8 sps:$4 sm:$0xff]   ;;  %s2879_s4 = smul.u32 112, %s4157_s12 }
  0x29   : > { %2071 = vmatpush1.bf16.msra.mxu0 %v2957_v35  ;;  %1859 = vmatprep.subr.bf16.mxu1 %v2958_v36  ;;  %v3047_v35 = vld [vmem:[%s4149_s1 + $0x464] ss:$8 sps:$4 sm:$0xff]   ;;  %v3094_v36 = vld [vmem:[%s3512_s17 + $0xe0] ss:$56 sps:$4 sm:$0xff]  }
  0x2a   : > { %2072 = vmatprep.subr.bf16.mxu0 %v2960_v37  ;;  %v3095_v37 = vld [vmem:[%s3512_s17 + $0xf8] ss:$56 sps:$4 sm:$0xff]   ;;  %s4109_s7 = scalar_lea.vmem %s4151_s3, %s2879_s4 }
  0x2c   : > { %1860 = vmatpush1.bf16.msra.mxu1 %v2962_v38  ;;  %v3042_v38 = vld [vmem:[%s4149_s1 + $0x160] ss:$8 sps:$4 sm:$0xff]  }
  0x2d   : > { %2073 = vmatpush1.bf16.msra.mxu0 %v2963_v39  ;;  %1861 = vmatprep.subr.bf16.mxu1 %v2964_v40  ;;  %v3045_v39 = vld [vmem:[%s4149_s1 + $0x460] ss:$8 sps:$4 sm:$0xff]   ;;  %v258_v40 = vld [vmem:[%s3512_s17 + $0x150] sm:$0x11] }
  0x2e   : > { %2074 = vmatprep.subr.bf16.mxu0 %v2966_v41  ;;  %v3050_v41 = vld [vmem:[%s4149_s1 + $0x174] ss:$8 sps:$4 sm:$0xff]  }
  0x30   : > { %1862 = vmatpush1.bf16.msra.mxu1 %v2968_v42  ;;  %v3053_v42 = vld [vmem:[%s4149_s1 + $0x474] ss:$8 sps:$4 sm:$0xff]  }
  0x31   : > { %2075 = vmatpush1.bf16.msra.mxu0 %v2969_v43  ;;  %1863 = vmatprep.subr.bf16.mxu1 %v2970_v44  ;;  %v2513_v43 = vcombine.high %v258_v40, %v258_v40  ;;  %v261_v44 = vld [vmem:[%s3512_s17 + $0x168] sm:$0x11] }
  0x32   : > { %2076 = vmatprep.subr.bf16.mxu0 %v2972_v45  ;;  %v2519_v45 = vcombine.high %v261_v44, %v261_v44 }
  0x34   : > { %1864 = vmatpush1.bf16.msra.mxu1 %v2974_v46  ;;  %v2512_v46 = vcombine.low %v258_v40, %v258_v40  ;;  %v3202_v40 = vld [vmem:[%s3512_s17 + $0xec] ss:$56 sps:$4 sm:$0xff]  }
  0x35   : > { %2077 = vmatpush1.bf16.msra.mxu0 %v2975_v47  ;;  %1865 = vmatprep.subr.bf16.mxu1 %v2976_v49  ;;  %v2518_v47 = vcombine.low %v261_v44, %v261_v44  ;;  %v3051_v49 = vld [vmem:[%s4149_s1 + $0x470] ss:$8 sps:$4 sm:$0xff]   ;;  %v3150_v44 = vld [vmem:[%s4149_s1 + $0x244] ss:$8 sps:$4 sm:$0xff]  }
  0x36   : > { %2078 = vmatprep.subr.bf16.mxu0 %v2978_v50  ;;  %v3056_v50 = vld [vmem:[%s4149_s1 + $0x184] ss:$8 sps:$4 sm:$0xff]  }
  0x38   : > { %1866 = vmatpush1.bf16.msra.mxu1 %v2980_v52  ;;  %v3054_v52 = vld [vmem:[%s4149_s1 + $0x180] ss:$8 sps:$4 sm:$0xff]  }
  0x39   : > { %2079 = vmatpush1.bf16.msra.mxu0 %v2981_v53  ;;  %1867 = vmatprep.subr.bf16.mxu1 %v2982_v54  ;;  %v3120_v53 = vld [vmem:[%s3512_s17 + $0xc] ss:$56 sps:$4 sm:$0xff]   ;;  %v3057_v54 = vld [vmem:[%s4149_s1 + $0x480] ss:$8 sps:$4 sm:$0xff]  }
  0x3a   : > { %2080 = vmatprep.subr.bf16.mxu0 %v2984_v55  ;;  %v3062_v55 = vld [vmem:[%s4149_s1 + $0x194] ss:$8 sps:$4 sm:$0xff]  }
  0x3c   : > { %1868 = vmatpush1.bf16.msra.mxu1 %v2986_v56  ;;  %v3065_v56 = vld [vmem:[%s4149_s1 + $0x494] ss:$8 sps:$4 sm:$0xff]  }
  0x3d   : > { %2081 = vmatpush1.bf16.msra.mxu0 %v2987_v57  ;;  %1869 = vmatprep.subr.bf16.mxu1 %v2988_v58  ;;  %v3126_v57 = vld [vmem:[%s3512_s17 + $0x24] ss:$56 sps:$4 sm:$0xff]   ;;  %v3060_v58 = vld [vmem:[%s4149_s1 + $0x190] ss:$8 sps:$4 sm:$0xff]  }
  0x3e   : > { %2082 = vmatprep.subr.bf16.mxu0 %v2990_v59  ;;  %v3063_v59 = vld [vmem:[%s4149_s1 + $0x490] ss:$8 sps:$4 sm:$0xff]  }
  0x40   : > { %1870 = vmatpush1.bf16.msra.mxu1 %v2992_v60  ;;  %v3070_v60 = vld [vmem:[%s4149_s1 + $0x1a4] ss:$8 sps:$4 sm:$0xff]  }
  0x41   : > { %2083 = vmatpush1.bf16.msra.mxu0 %v2993_v61  ;;  %1871 = vmatprep.subr.bf16.mxu1 %v2994_v62  ;;  %v3075_v61 = vld [vmem:[%s4149_s1 + $0x4a4] ss:$8 sps:$4 sm:$0xff]   ;;  %v3068_v62 = vld [vmem:[%s4149_s1 + $0x1a0] ss:$8 sps:$4 sm:$0xff]  }
  0x42   : > { %2084 = vmatprep.subr.bf16.mxu0 %v2996_v63  ;;  %v3073_v63 = vld [vmem:[%s4149_s1 + $0x4a0] ss:$8 sps:$4 sm:$0xff]  }
  0x44   : > { %1872 = vmatpush1.bf16.msra.mxu1 %v2998_v0  ;;  %v3080_v0 = vld [vmem:[%s4149_s1 + $0x1b4] ss:$8 sps:$4 sm:$0xff]  }
  0x45   : > { %2085 = vmatpush1.bf16.msra.mxu0 %v2999_v1  ;;  %1912 = vmatprep.subr.bf16.mxu1 %v3005_v2  ;;  %v3083_v1 = vld [vmem:[%s4149_s1 + $0x4b4] ss:$8 sps:$4 sm:$0xff]   ;;  %v3078_v2 = vld [vmem:[%s4149_s1 + $0x1b0] ss:$8 sps:$4 sm:$0xff]  }
  0x46   : > { %2125 = vmatprep.subr.bf16.mxu0 %v3011_v3  ;;  %v3081_v3 = vld [vmem:[%s4149_s1 + $0x4b0] ss:$8 sps:$4 sm:$0xff]  }
  0x47   : > { %1874 = vmatmul.mubr.bf16.vlgmr.msra.gmra.mrb[0].mxu1 %v3000_v4  ;;  %v3088_v4 = vld [vmem:[%s4149_s1 + $0x1c4] ss:$8 sps:$4 sm:$0xff]  }
  0x48   : > { %2087 = vmatmul.mubr.bf16.vlgmr.msra.gmra.mrb[0].mxu0 %v3006_v6  ;;  %1913 = vmatpush1.bf16.msra.mxu1 %v3003_v5  ;;  %v3093_v5 = vld [vmem:[%s4149_s1 + $0x4c4] ss:$8 sps:$4 sm:$0xff]   ;;  %v3086_v6 = vld [vmem:[%s4149_s1 + $0x1c0] ss:$8 sps:$4 sm:$0xff]  }
  0x49   : > { %2126 = vmatpush1.bf16.msra.mxu0 %v3009_v7  ;;  %1914 = vmatprep.subr.bf16.mxu1 %v3014_v8  ;;  %v3091_v7 = vld [vmem:[%s4149_s1 + $0x4c0] ss:$8 sps:$4 sm:$0xff]   ;;  %v3098_v8 = vld [vmem:[%s4149_s1 + $0x1d4] ss:$8 sps:$4 sm:$0xff]  }
  0x4a   : > { %2127 = vmatprep.subr.bf16.mxu0 %v3017_v9  ;;  %1883 = vmatprep.mubr.bf16.mxu1 %v3066_v17  ;;  %v3101_v9 = vld [vmem:[%s4149_s1 + $0x4d4] ss:$8 sps:$4 sm:$0xff]  }
  0x4b   : > { %2096 = vmatprep.mubr.bf16.mxu0 %v3071_v21  ;;  %v3117_v17 = vld [vmem:[%s4149_s1 + $0x4f4] ss:$8 sps:$4 sm:$0xff]   ;;  %v3129_v21 = vld [vmem:[%s4149_s1 + $0x504] ss:$8 sps:$4 sm:$0xff]  }
  0x4c   : > { %1915 = vmatpush1.bf16.msra.mxu1 %v3012_v10  ;;  %v3096_v10 = vld [vmem:[%s4149_s1 + $0x1d0] ss:$8 sps:$4 sm:$0xff]  }
  0x4d   : > { %2128 = vmatpush1.bf16.msra.mxu0 %v3015_v11  ;;  %1916 = vmatprep.subr.bf16.mxu1 %v3020_v12  ;;  %v3099_v11 = vld [vmem:[%s4149_s1 + $0x4d0] ss:$8 sps:$4 sm:$0xff]   ;;  %v3105_v12 = vld [vmem:[%s4149_s1 + $0x1e4] ss:$8 sps:$4 sm:$0xff]  }
  0x4e   : > { %2129 = vmatprep.subr.bf16.mxu0 %v3023_v13  ;;  %v3109_v13 = vld [vmem:[%s4149_s1 + $0x4e4] ss:$8 sps:$4 sm:$0xff]  }
  0x4f   : > { %1884 = vmatmul.mubr.bf16.gmra.mrb[4].mxu1 %v3076_v24  ;;  %v3124_v24 = vld [vmem:[%s3512_s17 + $0x20] ss:$56 sps:$4 sm:$0xff]  }
  0x50   : > { %1917 = vmatpush1.bf16.msra.mxu1 %v3018_v14  ;;  %2097 = vmatmul.mubr.bf16.gmra.mrb[4].mxu0 %v3077_v25  ;;  %v3103_v14 = vld [vmem:[%s4149_s1 + $0x1e0] ss:$8 sps:$4 sm:$0xff]  }
  0x51   : > { %2130 = vmatpush1.bf16.msra.mxu0 %v3021_v15  ;;  %1918 = vmatprep.subr.bf16.mxu1 %v3026_v16  ;;  %v3107_v15 = vld [vmem:[%s4149_s1 + $0x4e0] ss:$8 sps:$4 sm:$0xff]   ;;  %v3114_v16 = vld [vmem:[%s4149_s1 + $0x1f4] ss:$8 sps:$4 sm:$0xff]  }
  0x52   : > { %2131 = vmatprep.subr.bf16.mxu0 %v3029_v18  ;;  %1893 = vmatprep.mubr.bf16.mxu1 %v3084_v29  ;;  %v3112_v18 = vld [vmem:[%s4149_s1 + $0x1f0] ss:$8 sps:$4 sm:$0xff]   ;;  %v3127_v25 = vld [vmem:[%s4149_s1 + $0x500] ss:$8 sps:$4 sm:$0xff]   ;;  %v3186_v29 = vld [vmem:[%s3512_s17 + $0x94] ss:$56 sps:$4 sm:$0xff]  }
  0x53   : > { %2106 = vmatprep.mubr.bf16.mxu0 %v3089_v33  ;;  %v3141_v33 = vld [vmem:[%s4149_s1 + $0x524] ss:$8 sps:$4 sm:$0xff]  }
  0x54   : > { %1919 = vmatpush1.bf16.msra.mxu1 %v3024_v19  ;;  %v3115_v19 = vld [vmem:[%s4149_s1 + $0x4f0] ss:$8 sps:$4 sm:$0xff]  }
  0x55   : > { %2132 = vmatpush1.bf16.msra.mxu0 %v3027_v20  ;;  %1920 = vmatprep.subr.bf16.mxu1 %v3032_v22  ;;  %v3123_v20 = vld [vmem:[%s4149_s1 + $0x204] ss:$8 sps:$4 sm:$0xff]   ;;  %v3118_v22 = vld [vmem:[%s3512_s17 + $0x8] ss:$56 sps:$4 sm:$0xff]  }
  0x56   : > { %2133 = vmatprep.subr.bf16.mxu0 %v3035_v23  ;;  %v3121_v23 = vld [vmem:[%s4149_s1 + $0x200] ss:$8 sps:$4 sm:$0xff]  }
  0x57   : > { %1894 = vmatmul.mubr.bf16.gmra.mrb[8].mxu1 %v3094_v36  ;;  %v3192_v36 = vld [vmem:[%s3512_s17 + $0x90] ss:$56 sps:$4 sm:$0xff]  }
  0x58   : > { %1921 = vmatpush1.bf16.msra.mxu1 %v3030_v26  ;;  %2107 = vmatmul.mubr.bf16.gmra.mrb[8].mxu0 %v3095_v37  ;;  %v3132_v26 = vld [vmem:[%s4149_s1 + $0x214] ss:$8 sps:$4 sm:$0xff]   ;;  %v3139_v37 = vld [vmem:[%s4149_s1 + $0x520] ss:$8 sps:$4 sm:$0xff]  }
  0x59   : > { %2134 = vmatpush1.bf16.msra.mxu0 %v3033_v27  ;;  %1922 = vmatprep.subr.bf16.mxu1 %v3038_v28  ;;  %v3135_v27 = vld [vmem:[%s4149_s1 + $0x514] ss:$8 sps:$4 sm:$0xff]  }
  0x5a   : > { %2135 = vmatprep.subr.bf16.mxu0 %v3041_v30  ;;  %1903 = vmatprep.mubr.bf16.mxu1 %v2513_v43  ;;  %v3184_v28 = vld [vmem:[%s3512_s17 + $0x7c] ss:$56 sps:$4 sm:$0xff]   ;;  %v3130_v30 = vld [vmem:[%s4149_s1 + $0x210] ss:$8 sps:$4 sm:$0xff]  }
  0x5b   : > { %2116 = vmatprep.mubr.bf16.mxu0 %v2519_v45  ;;  %v3145_v43 = vld [vmem:[%s4149_s1 + $0x530] ss:$8 sps:$4 sm:$0xff]   ;;  %v3153_v45 = vld [vmem:[%s4149_s1 + $0x544] ss:$8 sps:$4 sm:$0xff]  }
  0x5c   : > { %1923 = vmatpush1.bf16.msra.mxu1 %v3036_v31  ;;  %v3133_v31 = vld [vmem:[%s4149_s1 + $0x510] ss:$8 sps:$4 sm:$0xff]  }
  0x5d   : > { %2136 = vmatpush1.bf16.msra.mxu0 %v3039_v32  ;;  %1924 = vmatprep.subr.bf16.mxu1 %v3044_v34  ;;  %v3138_v32 = vld [vmem:[%s4149_s1 + $0x224] ss:$8 sps:$4 sm:$0xff]   ;;  %v3136_v34 = vld [vmem:[%s4149_s1 + $0x220] ss:$8 sps:$4 sm:$0xff]  }
  0x5e   : > { %2137 = vmatprep.subr.bf16.mxu0 %v3047_v35  ;;  %v3188_v35 = vld [vmem:[%s3512_s17 + $0x78] ss:$56 sps:$4 sm:$0xff]  }
  0x5f   : > { %1904 = vmatmul.mubr.bf16.gmra.mrb[12].mxu1 %v2512_v46  ;;  %v3148_v46 = vld [vmem:[%s4149_s1 + $0x240] ss:$8 sps:$4 sm:$0xff]  }
  0x60   : > { %1925 = vmatpush1.bf16.msra.mxu1 %v3042_v38  ;;  %2117 = vmatmul.mubr.bf16.gmra.mrb[12].mxu0 %v2518_v47  ;;  %v3144_v38 = vld [vmem:[%s4149_s1 + $0x234] ss:$8 sps:$4 sm:$0xff]   ;;  %v3151_v47 = vld [vmem:[%s4149_s1 + $0x540] ss:$8 sps:$4 sm:$0xff]  }
  0x61   : > { %2138 = vmatpush1.bf16.msra.mxu0 %v3045_v39  ;;  %1926 = vmatprep.subr.bf16.mxu1 %v3050_v41  ;;  %v3147_v39 = vld [vmem:[%s4149_s1 + $0x534] ss:$8 sps:$4 sm:$0xff]  }
  0x62   : > { %2139 = vmatprep.subr.bf16.mxu0 %v3053_v42  ;;  %1944 = vmatprep.mubr.bf16.mxu1 %v3120_v53  ;;  %v3204_v41 = vld [vmem:[%s3512_s17 + $0x104] ss:$56 sps:$4 sm:$0xff]   ;;  %v3142_v42 = vld [vmem:[%s4149_s1 + $0x230] ss:$8 sps:$4 sm:$0xff]  }
  0x63   : > { %2157 = vmatprep.mubr.bf16.mxu0 %v3126_v57  ;;  %v3159_v53 = vld [vmem:[%s4149_s1 + $0x554] ss:$8 sps:$4 sm:$0xff]   ;;  %v3157_v57 = vld [vmem:[%s4149_s1 + $0x550] ss:$8 sps:$4 sm:$0xff]  }
  0x64   : > { %1927 = vmatpush1.bf16.msra.mxu1 %v3048_v48  ;;  %v3206_v48 = vld [vmem:[%s3512_s17 + $0xe8] ss:$56 sps:$4 sm:$0xff]  }
  0x65   : > { %2140 = vmatpush1.bf16.msra.mxu0 %v3051_v49  ;;  %1928 = vmatprep.subr.bf16.mxu1 %v3056_v50  ;;  %v3210_v49 = vld [vmem:[%s3512_s17 + $0x100] ss:$56 sps:$4 sm:$0xff]  }
  0x66   : > { %2141 = vmatprep.subr.bf16.mxu0 %v3059_v51  ;;  %v259_v50 = vld [vmem:[%s3512_s17 + $0x158] sm:$0x11]  ;;  %v262_v51 = vld [vmem:[%s3512_s17 + $0x170] sm:$0x11] }
  0x68   : > { %1929 = vmatpush1.bf16.msra.mxu1 %v3054_v52  ;;  %v3156_v52 = vld [vmem:[%s4149_s1 + $0x254] ss:$8 sps:$4 sm:$0xff]  }
  0x69   : > { %2142 = vmatpush1.bf16.msra.mxu0 %v3057_v54  ;;  %1930 = vmatprep.subr.bf16.mxu1 %v3062_v55  ;;  %v2515_v54 = vcombine.high %v259_v50, %v259_v50  ;;  %v2521_v55 = vcombine.high %v262_v51, %v262_v51 }
  0x6a   : > { %2143 = vmatprep.subr.bf16.mxu0 %v3065_v56  ;;  %v3154_v56 = vld [vmem:[%s4149_s1 + $0x250] ss:$8 sps:$4 sm:$0xff]  }
  0x6c   : > { %1931 = vmatpush1.bf16.msra.mxu1 %v3060_v58  ;;  %v3162_v58 = vld [vmem:[%s4149_s1 + $0x264] ss:$8 sps:$4 sm:$0xff]  }
  0x6d   : > { %2144 = vmatpush1.bf16.msra.mxu0 %v3063_v59  ;;  %1932 = vmatprep.subr.bf16.mxu1 %v3070_v60  ;;  %v3165_v59 = vld [vmem:[%s4149_s1 + $0x564] ss:$8 sps:$4 sm:$0xff]   ;;  %v3160_v60 = vld [vmem:[%s4149_s1 + $0x260] ss:$8 sps:$4 sm:$0xff]  }
  0x6e   : > { %2145 = vmatprep.subr.bf16.mxu0 %v3075_v61  ;;  %v2514_v61 = vcombine.low %v259_v50, %v259_v50  ;;  %v3259_v50 = vld [vmem:[%s4149_s1 + $0x634] ss:$8 sps:$4 sm:$0xff]  }
  0x70   : > { %1933 = vmatpush1.bf16.msra.mxu1 %v3068_v62  ;;  %v2520_v62 = vcombine.low %v262_v51, %v262_v51  ;;  %v3260_v51 = vld [vmem:[%s3512_s17 + $0xf4] ss:$56 sps:$4 sm:$0xff]  }
  0x71   : > { %2146 = vmatpush1.bf16.msra.mxu0 %v3073_v63  ;;  %1934 = vmatprep.subr.bf16.mxu1 %v3080_v0  ;;  %v3163_v63 = vld [vmem:[%s4149_s1 + $0x560] ss:$8 sps:$4 sm:$0xff]   ;;  %v3168_v0 = vld [vmem:[%s4149_s1 + $0x274] ss:$8 sps:$4 sm:$0xff]  }
  0x72   : > { %2147 = vmatprep.subr.bf16.mxu0 %v3083_v1  ;;  %v3171_v1 = vld [vmem:[%s4149_s1 + $0x574] ss:$8 sps:$4 sm:$0xff]  }
  0x74   : > { %1935 = vmatpush1.bf16.msra.mxu1 %v3078_v2  ;;  %v3238_v2 = vld [vmem:[%s3512_s17 + $0x14] ss:$56 sps:$4 sm:$0xff]  }
  0x75   : > { %2148 = vmatpush1.bf16.msra.mxu0 %v3081_v3  ;;  %1936 = vmatprep.subr.bf16.mxu1 %v3088_v4  ;;  %v3241_v3 = vld [vmem:[%s3512_s17 + $0x2c] ss:$56 sps:$4 sm:$0xff]   ;;  %v3166_v4 = vld [vmem:[%s4149_s1 + $0x270] ss:$8 sps:$4 sm:$0xff]  }
  0x76   : > { %2149 = vmatprep.subr.bf16.mxu0 %v3093_v5  ;;  %v3169_v5 = vld [vmem:[%s4149_s1 + $0x570] ss:$8 sps:$4 sm:$0xff]  }
  0x78   : > { %1937 = vmatpush1.bf16.msra.mxu1 %v3086_v6  ;;  %v3174_v6 = vld [vmem:[%s4149_s1 + $0x284] ss:$8 sps:$4 sm:$0xff]  }
  0x79   : > { %2150 = vmatpush1.bf16.msra.mxu0 %v3091_v7  ;;  %1938 = vmatprep.subr.bf16.mxu1 %v3098_v8  ;;  %v3177_v7 = vld [vmem:[%s4149_s1 + $0x584] ss:$8 sps:$4 sm:$0xff]   ;;  %v3172_v8 = vld [vmem:[%s4149_s1 + $0x280] ss:$8 sps:$4 sm:$0xff]  }
  0x7a   : > { %2151 = vmatprep.subr.bf16.mxu0 %v3101_v9  ;;  %v3175_v9 = vld [vmem:[%s4149_s1 + $0x580] ss:$8 sps:$4 sm:$0xff]  }
  0x7c   : > { %1939 = vmatpush1.bf16.msra.mxu1 %v3096_v10  ;;  %v3180_v10 = vld [vmem:[%s4149_s1 + $0x294] ss:$8 sps:$4 sm:$0xff]  }
  0x7d   : > { %2152 = vmatpush1.bf16.msra.mxu0 %v3099_v11  ;;  %1940 = vmatprep.subr.bf16.mxu1 %v3105_v12  ;;  %v3183_v11 = vld [vmem:[%s4149_s1 + $0x594] ss:$8 sps:$4 sm:$0xff]   ;;  %v3178_v12 = vld [vmem:[%s4149_s1 + $0x290] ss:$8 sps:$4 sm:$0xff]  }
  0x7e   : > { %2153 = vmatprep.subr.bf16.mxu0 %v3109_v13  ;;  %v3181_v13 = vld [vmem:[%s4149_s1 + $0x590] ss:$8 sps:$4 sm:$0xff]  }
  0x80   : > { %1941 = vmatpush1.bf16.msra.mxu1 %v3103_v14  ;;  %v3191_v14 = vld [vmem:[%s4149_s1 + $0x2a4] ss:$8 sps:$4 sm:$0xff]  }
  0x81   : > { %2154 = vmatpush1.bf16.msra.mxu0 %v3107_v15  ;;  %1942 = vmatprep.subr.bf16.mxu1 %v3114_v16  ;;  %v3195_v15 = vld [vmem:[%s4149_s1 + $0x5a4] ss:$8 sps:$4 sm:$0xff]   ;;  %v3189_v16 = vld [vmem:[%s4149_s1 + $0x2a0] ss:$8 sps:$4 sm:$0xff]  }
  0x82   : > { %2155 = vmatprep.subr.bf16.mxu0 %v3117_v17  ;;  %v3193_v17 = vld [vmem:[%s4149_s1 + $0x5a0] ss:$8 sps:$4 sm:$0xff]  }
  0x84   : > { %1943 = vmatpush1.bf16.msra.mxu1 %v3112_v18  ;;  %v3198_v18 = vld [vmem:[%s4149_s1 + $0x2b4] ss:$8 sps:$4 sm:$0xff]  }
  0x85   : > { %2156 = vmatpush1.bf16.msra.mxu0 %v3115_v19  ;;  %1983 = vmatprep.subr.bf16.mxu1 %v3123_v20  ;;  %v3201_v19 = vld [vmem:[%s4149_s1 + $0x5b4] ss:$8 sps:$4 sm:$0xff]   ;;  %v3196_v20 = vld [vmem:[%s4149_s1 + $0x2b0] ss:$8 sps:$4 sm:$0xff]  }
  0x86   : > { %2196 = vmatprep.subr.bf16.mxu0 %v3129_v21  ;;  %v3199_v21 = vld [vmem:[%s4149_s1 + $0x5b0] ss:$8 sps:$4 sm:$0xff]  }
  0x87   : > { %1945 = vmatmul.mubr.bf16.vlgmr.msra.gmra.mrb[0].mxu1 %v3118_v22  ;;  %v3209_v22 = vld [vmem:[%s4149_s1 + $0x2c4] ss:$8 sps:$4 sm:$0xff]  }
  0x88   : > { %2158 = vmatmul.mubr.bf16.vlgmr.msra.gmra.mrb[0].mxu0 %v3124_v24  ;;  %1984 = vmatpush1.bf16.msra.mxu1 %v3121_v23  ;;  %v3213_v23 = vld [vmem:[%s4149_s1 + $0x5c4] ss:$8 sps:$4 sm:$0xff]   ;;  %v3207_v24 = vld [vmem:[%s4149_s1 + $0x2c0] ss:$8 sps:$4 sm:$0xff]  }
  0x89   : > { %2197 = vmatpush1.bf16.msra.mxu0 %v3127_v25  ;;  %1985 = vmatprep.subr.bf16.mxu1 %v3132_v26  ;;  %v3211_v25 = vld [vmem:[%s4149_s1 + $0x5c0] ss:$8 sps:$4 sm:$0xff]   ;;  %v3216_v26 = vld [vmem:[%s4149_s1 + $0x2d4] ss:$8 sps:$4 sm:$0xff]  }
  0x8a   : > { %2198 = vmatprep.subr.bf16.mxu0 %v3135_v27  ;;  %1954 = vmatprep.mubr.bf16.mxu1 %v3184_v28  ;;  %v3219_v27 = vld [vmem:[%s4149_s1 + $0x5d4] ss:$8 sps:$4 sm:$0xff]   ;;  %v3214_v28 = vld [vmem:[%s4149_s1 + $0x2d0] ss:$8 sps:$4 sm:$0xff]  }
  0x8b   : > { %2167 = vmatprep.mubr.bf16.mxu0 %v3186_v29  ;;  %v3217_v29 = vld [vmem:[%s4149_s1 + $0x5d0] ss:$8 sps:$4 sm:$0xff]  }
  0x8c   : > { %1986 = vmatpush1.bf16.msra.mxu1 %v3130_v30  ;;  %v3225_v30 = vld [vmem:[%s4149_s1 + $0x2e4] ss:$8 sps:$4 sm:$0xff]  }
  0x8d   : > { %2199 = vmatpush1.bf16.msra.mxu0 %v3133_v31  ;;  %1987 = vmatprep.subr.bf16.mxu1 %v3138_v32  ;;  %v3229_v31 = vld [vmem:[%s4149_s1 + $0x5e4] ss:$8 sps:$4 sm:$0xff]   ;;  %v3223_v32 = vld [vmem:[%s4149_s1 + $0x2e0] ss:$8 sps:$4 sm:$0xff]  }
  0x8e   : > { %2200 = vmatprep.subr.bf16.mxu0 %v3141_v33  ;;  %v3227_v33 = vld [vmem:[%s4149_s1 + $0x5e0] ss:$8 sps:$4 sm:$0xff]  }
  0x8f   : > { %1955 = vmatmul.mubr.bf16.gmra.mrb[4].mxu1 %v3188_v35  ;;  %v3235_v35 = vld [vmem:[%s4149_s1 + $0x5f4] ss:$8 sps:$4 sm:$0xff]  }
  0x90   : > { %2168 = vmatmul.mubr.bf16.gmra.mrb[4].mxu0 %v3192_v36  ;;  %1988 = vmatpush1.bf16.msra.mxu1 %v3136_v34  ;;  %v3232_v34 = vld [vmem:[%s4149_s1 + $0x2f4] ss:$8 sps:$4 sm:$0xff]   ;;  %v3230_v36 = vld [vmem:[%s4149_s1 + $0x2f0] ss:$8 sps:$4 sm:$0xff]  }
  0x91   : > { %2201 = vmatpush1.bf16.msra.mxu0 %v3139_v37  ;;  %1989 = vmatprep.subr.bf16.mxu1 %v3144_v38  ;;  %v3233_v37 = vld [vmem:[%s4149_s1 + $0x5f0] ss:$8 sps:$4 sm:$0xff]   ;;  %v3244_v38 = vld [vmem:[%s4149_s1 + $0x604] ss:$8 sps:$4 sm:$0xff]  }
  0x92   : > { %2202 = vmatprep.subr.bf16.mxu0 %v3147_v39  ;;  %1964 = vmatprep.mubr.bf16.mxu1 %v3202_v40  ;;  %v3236_v39 = vld [vmem:[%s3512_s17 + $0x10] ss:$56 sps:$4 sm:$0xff]  }
  0x93   : > { %2177 = vmatprep.mubr.bf16.mxu0 %v3204_v41  ;;  %v3239_v40 = vld [vmem:[%s3512_s17 + $0x28] ss:$56 sps:$4 sm:$0xff]  }
  0x94   : > { %1990 = vmatpush1.bf16.msra.mxu1 %v3142_v42  ;;  %v3242_v41 = vld [vmem:[%s4149_s1 + $0x600] ss:$8 sps:$4 sm:$0xff]   ;;  %v3247_v42 = vld [vmem:[%s4149_s1 + $0x614] ss:$8 sps:$4 sm:$0xff]  }
  0x95   : > { %2203 = vmatpush1.bf16.msra.mxu0 %v3145_v43  ;;  %1991 = vmatprep.subr.bf16.mxu1 %v3150_v44  ;;  %v3248_v43 = vld [vmem:[%s3512_s17 + $0x84] ss:$56 sps:$4 sm:$0xff]  }
  0x96   : > { %2204 = vmatprep.subr.bf16.mxu0 %v3153_v45  ;;  %v3250_v44 = vld [vmem:[%s3512_s17 + $0x9c] ss:$56 sps:$4 sm:$0xff]   ;;  %v3245_v45 = vld [vmem:[%s4149_s1 + $0x610] ss:$8 sps:$4 sm:$0xff]  }
  0x97   : > { %1965 = vmatmul.mubr.bf16.gmra.mrb[8].mxu1 %v3206_v48  ;;  %v3253_v48 = vld [vmem:[%s3512_s17 + $0x98] ss:$56 sps:$4 sm:$0xff]  }
  0x98   : > { %2178 = vmatmul.mubr.bf16.gmra.mrb[8].mxu0 %v3210_v49  ;;  %1992 = vmatpush1.bf16.msra.mxu1 %v3148_v46  ;;  %v3256_v46 = vld [vmem:[%s4149_s1 + $0x624] ss:$8 sps:$4 sm:$0xff]   ;;  %v3254_v49 = vld [vmem:[%s4149_s1 + $0x620] ss:$8 sps:$4 sm:$0xff]  }
  0x99   : > { %2205 = vmatpush1.bf16.msra.mxu0 %v3151_v47  ;;  %1993 = vmatprep.subr.bf16.mxu1 %v3156_v52  ;;  %v3252_v47 = vld [vmem:[%s3512_s17 + $0x80] ss:$56 sps:$4 sm:$0xff]   ;;  %v3262_v52 = vld [vmem:[%s3512_s17 + $0x10c] ss:$56 sps:$4 sm:$0xff]  }
  0x9a   : > { %2206 = vmatprep.subr.bf16.mxu0 %v3159_v53  ;;  %1974 = vmatprep.mubr.bf16.mxu1 %v2515_v54  ;;  %v3257_v53 = vld [vmem:[%s4149_s1 + $0x630] ss:$8 sps:$4 sm:$0xff]   ;;  %v3268_v54 = vld [vmem:[%s4149_s1 + $0x644] ss:$8 sps:$4 sm:$0xff]  }
  0x9b   : > { %2187 = vmatprep.mubr.bf16.mxu0 %v2521_v55  ;;  %v3264_v55 = vld [vmem:[%s3512_s17 + $0xf0] ss:$56 sps:$4 sm:$0xff]  }
  0x9c   : > { %1994 = vmatpush1.bf16.msra.mxu1 %v3154_v56  ;;  %v3265_v56 = vld [vmem:[%s3512_s17 + $0x108] ss:$56 sps:$4 sm:$0xff]  }
  0x9d   : > { %2207 = vmatpush1.bf16.msra.mxu0 %v3157_v57  ;;  %1995 = vmatprep.subr.bf16.mxu1 %v3162_v58  ;;  %v260_v57 = vld [vmem:[%s3512_s17 + $0x160] sm:$0x11]  ;;  %v263_v58 = vld [vmem:[%s3512_s17 + $0x178] sm:$0x11] }
  0x9e   : > { %2208 = vmatprep.subr.bf16.mxu0 %v3165_v59  ;;  %v3266_v59 = vld [vmem:[%s4149_s1 + $0x640] ss:$8 sps:$4 sm:$0xff]  }
  0x9f   : > { %1975 = vmatmul.mubr.bf16.gmra.mrb[12].mxu1 %v2514_v61  ;;  %v2517_v61 = vcombine.high %v260_v57, %v260_v57 }
  0xa0   : > { %2188 = vmatmul.mubr.bf16.gmra.mrb[12].mxu0 %v2520_v62  ;;  %1996 = vmatpush1.bf16.msra.mxu1 %v3160_v60  ;;  %v3271_v60 = vld [vmem:[%s4149_s1 + $0x654] ss:$8 sps:$4 sm:$0xff]   ;;  %v2523_v62 = vcombine.high %v263_v58, %v263_v58 }
  0xa1   : > { %2209 = vmatpush1.bf16.msra.mxu0 %v3163_v63  ;;  %1997 = vmatprep.subr.bf16.mxu1 %v3168_v0  ;;  %v3269_v63 = vld [vmem:[%s4149_s1 + $0x650] ss:$8 sps:$4 sm:$0xff]   ;;  %v3278_v0 = vld [vmem:[%s4149_s1 + $0x664] ss:$8 sps:$4 sm:$0xff]  }
  0xa2   : > { %2210 = vmatprep.subr.bf16.mxu0 %v3171_v1  ;;  %2015 = vmatprep.mubr.bf16.mxu1 %v3238_v2  ;;  %v2516_v1 = vcombine.low %v260_v57, %v260_v57  ;;  %v2522_v2 = vcombine.low %v263_v58, %v263_v58 }
  0xa3   : > { %2228 = vmatprep.mubr.bf16.mxu0 %v3241_v3  ;;  %v3276_v3 = vld [vmem:[%s4149_s1 + $0x660] ss:$8 sps:$4 sm:$0xff]  }
  0xa4   : > { %1998 = vmatpush1.bf16.msra.mxu1 %v3166_v4  ;;  %v3281_v4 = vld [vmem:[%s4149_s1 + $0x674] ss:$8 sps:$4 sm:$0xff]  }
  0xa5   : > { %2211 = vmatpush1.bf16.msra.mxu0 %v3169_v5  ;;  %1999 = vmatprep.subr.bf16.mxu1 %v3174_v6  ;;  %v3296_v5 = vld [vmem:[%s3512_s17 + $0x34] ss:$56 sps:$4 sm:$0xff]  }
  0xa6   : > { %2212 = vmatprep.subr.bf16.mxu0 %v3177_v7  ;;  %v3299_v6 = vld [vmem:[%s3512_s17 + $0x114] ss:$56 sps:$4 sm:$0xff]   ;;  %v3279_v7 = vld [vmem:[%s4149_s1 + $0x670] ss:$8 sps:$4 sm:$0xff]  }
  0xa8   : > { %2000 = vmatpush1.bf16.msra.mxu1 %v3172_v8  ;;  %v3284_v8 = vld [vmem:[%s4149_s1 + $0x684] ss:$8 sps:$4 sm:$0xff]  }
  0xa9   : > { %2213 = vmatpush1.bf16.msra.mxu0 %v3175_v9  ;;  %2001 = vmatprep.subr.bf16.mxu1 %v3180_v10  ;;  %v3282_v9 = vld [vmem:[%s4149_s1 + $0x680] ss:$8 sps:$4 sm:$0xff]   ;;  %v3287_v10 = vld [vmem:[%s4149_s1 + $0x694] ss:$8 sps:$4 sm:$0xff]  }
  0xaa   : > { %2214 = vmatprep.subr.bf16.mxu0 %v3183_v11  ;;  %v3285_v11 = vld [vmem:[%s4149_s1 + $0x690] ss:$8 sps:$4 sm:$0xff]  }
  0xac   : > { %2002 = vmatpush1.bf16.msra.mxu1 %v3178_v12  ;;  %v3290_v12 = vld [vmem:[%s4149_s1 + $0x6a4] ss:$8 sps:$4 sm:$0xff]  }
  0xad   : > { %2215 = vmatpush1.bf16.msra.mxu0 %v3181_v13  ;;  %2003 = vmatprep.subr.bf16.mxu1 %v3191_v14  ;;  %v3288_v13 = vld [vmem:[%s4149_s1 + $0x6a0] ss:$8 sps:$4 sm:$0xff]   ;;  %v3293_v14 = vld [vmem:[%s4149_s1 + $0x6b4] ss:$8 sps:$4 sm:$0xff]  }
  0xae   : > { %2216 = vmatprep.subr.bf16.mxu0 %v3195_v15  ;;  %v3291_v15 = vld [vmem:[%s4149_s1 + $0x6b0] ss:$8 sps:$4 sm:$0xff]  }
  0xb0   : > { %2004 = vmatpush1.bf16.msra.mxu1 %v3189_v16  ;;  %v264_v16 = vld [vmem:[%s3512_s17 + $0x180] sm:$0x11] }
  0xb1   : > { %2217 = vmatpush1.bf16.msra.mxu0 %v3193_v17  ;;  %2005 = vmatprep.subr.bf16.mxu1 %v3198_v18  ;;  %v3294_v17 = vld [vmem:[%s3512_s17 + $0x30] ss:$56 sps:$4 sm:$0xff]  }
  0xb2   : > { %2218 = vmatprep.subr.bf16.mxu0 %v3201_v19  ;;  %v3297_v18 = vld [vmem:[%s3512_s17 + $0x110] ss:$56 sps:$4 sm:$0xff]   ;;  %v3300_v19 = vld [vmem:[%s3512_s17 + $0xa4] ss:$56 sps:$4 sm:$0xff]  }
  0xb4   : > { %2006 = vmatpush1.bf16.msra.mxu1 %v3196_v20  ;;  %v2525_v20 = vcombine.high %v264_v16, %v264_v16 }
  0xb5   : > { %2219 = vmatpush1.bf16.msra.mxu0 %v3199_v21  ;;  %2007 = vmatprep.subr.bf16.mxu1 %v3209_v22  ;;  %v3303_v21 = vld [vmem:[%s3512_s17 + $0xa0] ss:$56 sps:$4 sm:$0xff]   ;;  %v2524_v22 = vcombine.low %v264_v16, %v264_v16 }
  0xb6   : > { %2220 = vmatprep.subr.bf16.mxu0 %v3213_v23 }
  0xb8   : > { %2008 = vmatpush1.bf16.msra.mxu1 %v3207_v24 }
  0xb9   : > { %2221 = vmatpush1.bf16.msra.mxu0 %v3211_v25  ;;  %2009 = vmatprep.subr.bf16.mxu1 %v3216_v26  ;;  %v483_v26 = vlaneseq }
  0xba   : > { %2222 = vmatprep.subr.bf16.mxu0 %v3219_v27 }
  0xbc   : > { %2010 = vmatpush1.bf16.msra.mxu1 %v3214_v28  ;;  %v484_v28 = vshrl.u32 %v483_v26, 7 }
  0xbd   : > { %2223 = vmatpush1.bf16.msra.mxu0 %v3217_v29  ;;  %2011 = vmatprep.subr.bf16.mxu1 %v3225_v30 }
  0xbe   : > { %2224 = vmatprep.subr.bf16.mxu0 %v3229_v31 }
  0xc0   : > { %2012 = vmatpush1.bf16.msra.mxu1 %v3223_v32  ;;  %v485_v32 = vsub.s32 0, %v484_v28 }
  0xc1   : > { %2225 = vmatpush1.bf16.msra.mxu0 %v3227_v33  ;;  %2013 = vmatprep.subr.bf16.mxu1 %v3232_v34  ;;  %v481_v34 = vld [vmem:[%s4150_s2] sm:$0x3] }
  0xc2   : > { %2226 = vmatprep.subr.bf16.mxu0 %v3235_v35  ;;  %v489_v35 = vsub.s32 1, %v484_v28 }
  0xc4   : > { %2014 = vmatpush1.bf16.msra.mxu1 %v3230_v36  ;;  %v4091_v36 = vrot.slane %v481_v34, %v485_v32 }
  0xc5   : > { %2227 = vmatpush1.bf16.msra.mxu0 %v3233_v37  ;;  %2748 = vmatprep.subr.bf16.mxu1 %v3244_v38  ;;  %v4093_v37 = vrot.slane %v481_v34, %v489_v35 }
  0xc6   : > { %2267 = vmatprep.subr.bf16.mxu0 %v3244_v38 }
  0xc7   : > { %2016 = vmatmul.mubr.bf16.vlgmr.msra.gmra.mrb[0].mxu1 %v3236_v39 }
  0xc8   : > { %2229 = vmatmul.mubr.bf16.vlgmr.msra.gmra.mrb[0].mxu0 %v3239_v40  ;;  %2760 = vmatpush1.bf16.msra.mxu1 %v3242_v41 }
  0xc9   : > { %2268 = vmatpush1.bf16.msra.mxu0 %v3242_v41  ;;  %2749 = vmatprep.subr.bf16.mxu1 %v3247_v42 }
  0xca   : > { %2269 = vmatprep.subr.bf16.mxu0 %v3247_v42  ;;  %2025 = vmatprep.mubr.bf16.mxu1 %v3248_v43 }
  0xcb   : > { %2238 = vmatprep.mubr.bf16.mxu0 %v3250_v44 }
  0xcc   : > { %2761 = vmatpush1.bf16.msra.mxu1 %v3245_v45 }
  0xcd   : > { %2270 = vmatpush1.bf16.msra.mxu0 %v3245_v45  ;;  %2750 = vmatprep.subr.bf16.mxu1 %v3256_v46 }
  0xce   : > { %2271 = vmatprep.subr.bf16.mxu0 %v3256_v46 }
  0xcf   : > { %2026 = vmatmul.mubr.bf16.gmra.mrb[4].mxu1 %v3252_v47 }
  0xd0   : > { %2239 = vmatmul.mubr.bf16.gmra.mrb[4].mxu0 %v3253_v48  ;;  %2762 = vmatpush1.bf16.msra.mxu1 %v3254_v49 }
  0xd1   : > { %2272 = vmatpush1.bf16.msra.mxu0 %v3254_v49  ;;  %2751 = vmatprep.subr.bf16.mxu1 %v3259_v50 }
  0xd2   : > { %2273 = vmatprep.subr.bf16.mxu0 %v3259_v50  ;;  %2035 = vmatprep.mubr.bf16.mxu1 %v3260_v51 }
  0xd3   : > { %2248 = vmatprep.mubr.bf16.mxu0 %v3262_v52 }
  0xd4   : > { %2763 = vmatpush1.bf16.msra.mxu1 %v3257_v53 }
  0xd5   : > { %2274 = vmatpush1.bf16.msra.mxu0 %v3257_v53  ;;  %2752 = vmatprep.subr.bf16.mxu1 %v3268_v54 }
  0xd6   : > { %2275 = vmatprep.subr.bf16.mxu0 %v3268_v54 }
  0xd7   : > { %2036 = vmatmul.mubr.bf16.gmra.mrb[8].mxu1 %v3264_v55 }
  0xd8   : > { %2249 = vmatmul.mubr.bf16.gmra.mrb[8].mxu0 %v3265_v56  ;;  %2764 = vmatpush1.bf16.msra.mxu1 %v3266_v59 }
  0xd9   : > { %2276 = vmatpush1.bf16.msra.mxu0 %v3266_v59  ;;  %2753 = vmatprep.subr.bf16.mxu1 %v3271_v60 }
  0xda   : > { %2277 = vmatprep.subr.bf16.mxu0 %v3271_v60  ;;  %2045 = vmatprep.mubr.bf16.mxu1 %v2517_v61 }
  0xdb   : > { %2258 = vmatprep.mubr.bf16.mxu0 %v2523_v62 }
  0xdc   : > { %2765 = vmatpush1.bf16.msra.mxu1 %v3269_v63 }
  0xdd   : > { %2278 = vmatpush1.bf16.msra.mxu0 %v3269_v63  ;;  %2754 = vmatprep.subr.bf16.mxu1 %v3278_v0 }
  0xde   : > { %2279 = vmatprep.subr.bf16.mxu0 %v3278_v0 }
  0xdf   : > { %2046 = vmatmul.mubr.bf16.gmra.mrb[12].mxu1 %v2516_v1 }
  0xe0   : > { %2259 = vmatmul.mubr.bf16.gmra.mrb[12].mxu0 %v2522_v2  ;;  %2766 = vmatpush1.bf16.msra.mxu1 %v3276_v3 }
  0xe1   : > { %2280 = vmatpush1.bf16.msra.mxu0 %v3276_v3  ;;  %2755 = vmatprep.subr.bf16.mxu1 %v3281_v4 }
  0xe2   : > { %2281 = vmatprep.subr.bf16.mxu0 %v3281_v4  ;;  %2742 = vmatprep.mubr.msk.bf16.mxu0 %vm1828_vm0, %v3296_v5 }
  0xe3   : > { %2744 = vmatprep.mubr.msk.bf16.mxu1 %vm1828_vm0, %v3299_v6 }
  0xe4   : > { %2767 = vmatpush1.bf16.msra.mxu1 %v3279_v7 }
  0xe5   : > { %2282 = vmatpush1.bf16.msra.mxu0 %v3279_v7  ;;  %2756 = vmatprep.subr.bf16.mxu1 %v3284_v8 }
  0xe6   : > { %2283 = vmatprep.subr.bf16.mxu0 %v3284_v8 }
  0xe8   : > { %2768 = vmatpush1.bf16.msra.mxu1 %v3282_v9 }
  0xe9   : > { %2284 = vmatpush1.bf16.msra.mxu0 %v3282_v9  ;;  %2757 = vmatprep.subr.bf16.mxu1 %v3287_v10 }
  0xea   : > { %2285 = vmatprep.subr.bf16.mxu0 %v3287_v10 }
  0xec   : > { %2769 = vmatpush1.bf16.msra.mxu1 %v3285_v11 }
  0xed   : > { %2286 = vmatpush1.bf16.msra.mxu0 %v3285_v11  ;;  %2758 = vmatprep.subr.bf16.mxu1 %v3290_v12 }
  0xee   : > { %2287 = vmatprep.subr.bf16.mxu0 %v3290_v12 }
  0xf0   : > { %2770 = vmatpush1.bf16.msra.mxu1 %v3288_v13 }
  0xf1   : > { %2288 = vmatpush1.bf16.msra.mxu0 %v3288_v13  ;;  %2759 = vmatprep.subr.bf16.mxu1 %v3293_v14 }
  0xf2   : > { %2289 = vmatprep.subr.bf16.mxu0 %v3293_v14 }
  0xf4   : > { %2771 = vmatpush1.bf16.msra.mxu1 %v3291_v15 }
  0xf5   : > { %2290 = vmatpush1.bf16.msra.mxu0 %v3291_v15 }
  0xf7   : > { %2320 = vmatmul.mubr.bf16.vlgmr.msra.gmra.mrb[16].mxu1 %v3297_v18 }
  0xf8   : > { %2300 = vmatmul.mubr.bf16.vlgmr.msra.gmra.mrb[0].mxu0 %v3294_v17  ;;  %2745 = vmatprep.mubr.msk.bf16.mxu1 %vm1828_vm0, %v2525_v20 }
  0xf9   : > { %2743 = vmatprep.mubr.msk.bf16.mxu0 %vm1828_vm0, %v3300_v19 }
  0xff   : > { %2330 = vmatmul.mubr.bf16.gmra.mrb[20].mxu1 %v2524_v22 }
 0x100   : > { %2310 = vmatmul.mubr.bf16.gmra.mrb[4].mxu0 %v3303_v21 }
 0x19a   : > { %v2017_v23 = vpop.f32.mrb[0].mxu1 }
 0x19b   : > { %v2019_v24 = vpop.f32.mrb[1].mxu1  ;;  %v2772_v2 = vadd.f32 %v2017_v23, %v4091_v36 }
 0x19c   : > { %v2021_v25 = vpop.f32.mrb[2].mxu1  ;;  %v2774_v3 = vadd.f32 %v2019_v24, %v4093_v37 }
 0x19d   : > { %v2023_v27 = vpop.f32.mrb[3].mxu1  ;;  %v2776_v6 = vadd.f32 %v2021_v25, %v4091_v36 }
 0x19e   : > { %v2778_v11 = vadd.f32 %v2023_v27, %v4093_v37 }
 0x1a2   : > { %v4080_v29 = vpop.f32.mrb[4].mxu1 }
 0x1a3   : > { %v4082_v30 = vpop.f32.mrb[5].mxu1  ;;  %v2780_v34 = vadd.f32 %v4080_v29, %v4091_v36 }
 0x1a4   : > { %v4084_v31 = vpop.f32.mrb[6].mxu1  ;;  %v2782_v35 = vadd.f32 %v4082_v30, %v4093_v37 }
 0x1a5   : > { %v4086_v33 = vpop.f32.mrb[7].mxu1 }
 0x1a6   : > { %v2786_v29 = vadd.f32 %v4086_v33, %v4093_v37 }
 0x1aa   : > { %v2037_v38 = vpop.f32.mrb[8].mxu1 }
 0x1ab   : > { %v2250_v39 = vpop.f32.mrb[8].mxu0  ;;  %v2788_v40 = vadd.f32 %v2037_v38, %v4091_v36  ;;  %v2039_v41 = vpop.f32.mrb[9].mxu1 }
 0x1ac   : > { %v2252_v42 = vpop.f32.mrb[9].mxu0  ;;  %v2791_v43 = vadd.f32 %v2039_v41, %v4093_v37  ;;  %v2041_v44 = vpop.f32.mrb[10].mxu1 }
 0x1ad   : > { %v2254_v45 = vpop.f32.mrb[10].mxu0  ;;  %v2789_v46 = vadd.f32 %v2788_v40, %v2250_v39  ;;  %v2794_v47 = vadd.f32 %v2041_v44, %v4091_v36  ;;  %v2043_v48 = vpop.f32.mrb[11].mxu1  ;;  %v2784_v40 = vadd.f32 %v4084_v31, %v4091_v36 }
 0x1ae   : > { %v2256_v49 = vpop.f32.mrb[11].mxu0  ;;  %v2792_v50 = vadd.f32 %v2791_v43, %v2252_v42  ;;  %v2797_v51 = vadd.f32 %v2043_v48, %v4093_v37 }
 0x1af   : > { %v2795_v52 = vadd.f32 %v2794_v47, %v2254_v45 }
 0x1b0   : > { %v2798_v53 = vadd.f32 %v2797_v51, %v2256_v49 }
 0x1b2   : > { %v2047_v54 = vpop.f32.mrb[12].mxu1 }
 0x1b3   : > { %v2260_v55 = vpop.f32.mrb[12].mxu0  ;;  %v2800_v56 = vadd.f32 %v2047_v54, %v4091_v36  ;;  %v2049_v57 = vpop.f32.mrb[13].mxu1 }
 0x1b4   : > { %v2262_v58 = vpop.f32.mrb[13].mxu0  ;;  %v2803_v59 = vadd.f32 %v2049_v57, %v4093_v37  ;;  %v2051_v60 = vpop.f32.mrb[14].mxu1 }
 0x1b5   : > { %v2264_v61 = vpop.f32.mrb[14].mxu0  ;;  %v2801_v62 = vadd.f32 %v2800_v56, %v2260_v55  ;;  %v2052_v63 = vpop.f32.mrb[15].mxu1 }
 0x1b6   : > { %v2265_v0 = vpop.f32.mrb[15].mxu0  ;;  %v2804_v1 = vadd.f32 %v2803_v59, %v2262_v58 }
 0x1ca   : > { %v2321_v5 = vpop.f32.mrb[16].mxu1 }
 0x1cb   : > { %v2301_v4 = vpop.f32.mrb[0].mxu0  ;;  %v2790_v8 = vadd.f32 %v2789_v46, %v2321_v5  ;;  %v2323_v10 = vpop.f32.mrb[17].mxu1 }
 0x1cc   : > { %v2773_v7 = vadd.f32 %v2772_v2, %v2301_v4  ;;  %v2303_v9 = vpop.f32.mrb[1].mxu0  ;;  %v2793_v13 = vadd.f32 %v2792_v50, %v2323_v10  ;;  %v2325_v15 = vpop.f32.mrb[18].mxu1 }
 0x1cd   : > { %v2775_v12 = vadd.f32 %v2774_v3, %v2303_v9  ;;  %v2305_v14 = vpop.f32.mrb[2].mxu0  ;;  %v2346_v17 = vmax.f32 %v2790_v8, 0.0  ;;  %v2796_v19 = vadd.f32 %v2795_v52, %v2325_v15  ;;  %v2327_v21 = vpop.f32.mrb[19].mxu1 }
 0x1ce   : > { %v2338_v16 = vmax.f32 %v2773_v7, 0.0  ;;  %v2777_v18 = vadd.f32 %v2776_v6, %v2305_v14  ;;  %v2307_v20 = vpop.f32.mrb[3].mxu0  ;;  %v2347_v23 = vmax.f32 %v2793_v13, 0.0  ;;  %v2799_v25 = vadd.f32 %v2798_v53, %v2327_v21 }
 0x1cf   : > { %v2339_v22 = vmax.f32 %v2775_v12, 0.0  ;;  %v2779_v24 = vadd.f32 %v2778_v11, %v2307_v20  ;;  %2360 = vst [vmem:[%s4109_s7 + $0x40] sm:$0xff] %v2346_v17  ;;  %v2348_v27 = vmax.f32 %v2796_v19, 0.0 }
 0x1d0   : > { %2352 = vst [vmem:[%s4109_s7] sm:$0xff] %v2338_v16  ;;  %v2340_v26 = vmax.f32 %v2777_v18, 0.0  ;;  %2361 = vst.msk [vmem:[%s4109_s7 + $0x48] sm:$0xff] %vm1828_vm0, %v2347_v23  ;;  %v2349_v32 = vmax.f32 %v2799_v25, 0.0 }
 0x1d1   : > { %2353 = vst.msk [vmem:[%s4109_s7 + $0x8] sm:$0xff] %vm1828_vm0, %v2339_v22  ;;  %v2341_v28 = vmax.f32 %v2779_v24, 0.0  ;;  %2362 = vst [vmem:[%s4109_s7 + $0x50] sm:$0xff] %v2348_v27 }
 0x1d2   : > { %2354 = vst [vmem:[%s4109_s7 + $0x10] sm:$0xff] %v2340_v26  ;;  %2363 = vst.msk [vmem:[%s4109_s7 + $0x58] sm:$0xff] %vm1828_vm0, %v2349_v32  ;;  %v2331_v39 = vpop.f32.mrb[20].mxu1 }
 0x1d3   : > { %2355 = vst.msk [vmem:[%s4109_s7 + $0x18] sm:$0xff] %vm1828_vm0, %v2341_v28  ;;  %v2311_v38 = vpop.f32.mrb[4].mxu0  ;;  %v2802_v42 = vadd.f32 %v2801_v62, %v2331_v39  ;;  %v2333_v44 = vpop.f32.mrb[21].mxu1 }
 0x1d4   : > { %v2781_v41 = vadd.f32 %v2780_v34, %v2311_v38  ;;  %v2313_v43 = vpop.f32.mrb[5].mxu0  ;;  %v2805_v30 = vadd.f32 %v2804_v1, %v2333_v44  ;;  %v2335_v47 = vpop.f32.mrb[22].mxu1 }
 0x1d5   : > { %v2783_v45 = vadd.f32 %v2782_v35, %v2313_v43  ;;  %v2315_v46 = vpop.f32.mrb[6].mxu0  ;;  %v2350_v49 = vmax.f32 %v2802_v42, 0.0  ;;  %v2336_v50 = vpop.f32.mrb[23].mxu1 }
 0x1d6   : > { %v2342_v48 = vmax.f32 %v2781_v41, 0.0  ;;  %v2785_v31 = vadd.f32 %v2784_v40, %v2315_v46  ;;  %v2317_v36 = vpop.f32.mrb[7].mxu0  ;;  %v2351_v52 = vmax.f32 %v2805_v30, 0.0 }
 0x1d7   : > { %v2343_v51 = vmax.f32 %v2783_v45, 0.0  ;;  %v2787_v53 = vadd.f32 %v2786_v29, %v2317_v36  ;;  %2364 = vst [vmem:[%s4109_s7 + $0x60] sm:$0x1] %v2350_v49 }
 0x1d8   : > { %2356 = vst [vmem:[%s4109_s7 + $0x20] sm:$0xff] %v2342_v48  ;;  %v2344_v33 = vmax.f32 %v2785_v31, 0.0  ;;  %2366 = vst.msk [vmem:[%s4109_s7 + $0x68] sm:$0x1] %vm2365_vm1, %v2351_v52 }
 0x1d9   : > { %2357 = vst.msk [vmem:[%s4109_s7 + $0x28] sm:$0xff] %vm1828_vm0, %v2343_v51  ;;  %v2345_v37 = vmax.f32 %v2787_v53, 0.0 }
 0x1da   : > { %2358 = vst [vmem:[%s4109_s7 + $0x30] sm:$0xff] %v2344_v33 }
 0x1db   : > { %2359 = vst.msk [vmem:[%s4109_s7 + $0x38] sm:$0xff] %vm1828_vm0, %v2345_v37 }
 0x1dc PF: > { %s13_s14 = sadd.s32 1, %s3327_s14   ;;  %s4152_s12 = smov %s3323_s13 }
 0x1dd   : > { %p10_p5 = scmp.ge.s32.totalorder %s13_s14, 4   ;;  %s4153_s13 = smov %s4155_s15 }
 0x1df   :  { %12 = sbr.rel (!%p10_p5) target bundleno = 2 (0x2), region = 62 }

// kernel: inception_d_forward.7
= control target key start
LH: loop header
LB: loop body
LE: loop exit
PB: predicated region body
PF: predicated region fallthrough
CT: control target
= control target key end

     0   :  { %s5149_s12 = smov 0   ;;  %s5151_s13 = smov 0   ;;  %s6556_s0 = inlined_call_operand.vmem [shape: bf16[2,49,1728], index: 0, kind: input, shape index: {}]   ;;  %s6557_s1 = inlined_call_operand.vmem [shape: bf16[1728,320], index: 1, kind: input, shape index: {}]   ;;  %s6558_s2 = inlined_call_operand.vmem [shape: f32[1,320], index: 2, kind: input, shape index: {}]   ;;  %s6559_s3 = inlined_call_operand.vmem [shape: f32[2,49,320], index: 3, kind: output, shape index: {}]  }
   0x1   :  { %s5153_s14 = smov 0  }
   0x2 LB: > { %s25_s15 = sadd.s32 1, %s5122_s13  ;;  %p3798_p0 = scmp.ge.s32.totalorder %s5126_s14, 1  ;;  %s5126_s14 = sphi %s5153_s14, %s13_s14   ;;  %s5122_s13 = sphi %s5151_s13, %s6561_s13   ;;  %s5118_s12 = sphi %s5149_s12, %s6560_s12  }
   0x3   : > { %p27_p1 = scmp.ge.s32.totalorder %s25_s15, 2  ;;  %p159_p2 = scmp.lt.s32.totalorder %s5126_s14, 3 }
   0x5   : > { %s6563_s15 = smov (%p27_p1, %s25_s15), 0  ;;  %p160_p3 = pnand %p3798_p0, %p159_p2 }
   0x6   : > { %v4588_v0 = vld [vmem:[%s6557_s1 + $0x4] ss:$12 sps:$4 sm:$0xff] (!%p160_p3)   ;;  %v4592_v2 = vld [vmem:[%s6557_s1] ss:$12 sps:$4 sm:$0xff] (!%p160_p3)   ;;  %v4594_v4 = vld [vmem:[%s6557_s1 + $0x1c] ss:$12 sps:$4 sm:$0xff] (!%p160_p3)  }
   0x7   : > { %163 = sbr.rel (%p160_p3) target bundleno = 595 (0x253), region = 32  ;;  %v4590_v1 = vld [vmem:[%s6557_s1 + $0x184] ss:$12 sps:$4 sm:$0xff] (!%p160_p3)   ;;  %2710 = vmatprep.subr.bf16.mxu1 (!%p160_p3), %v4588_v0  ;;  %v4593_v3 = vld [vmem:[%s6557_s1 + $0x180] ss:$12 sps:$4 sm:$0xff] (!%p160_p3)   ;;  %p194_p4 = scmp.lt.s32.totalorder (!%p160_p3), %s5118_s12, 1 }
   0x8   : > { %2781 = vmatprep.subr.bf16.mxu0 (!%p160_p3), %v4590_v1  ;;  %2711 = vmatpush1.bf16.msra.mxu1 (!%p160_p3), %v4592_v2  ;;  %v4596_v5 = vld [vmem:[%s6557_s1 + $0x19c] ss:$12 sps:$4 sm:$0xff] (!%p160_p3)   ;;  %v4598_v6 = vld [vmem:[%s6557_s1 + $0x18] ss:$12 sps:$4 sm:$0xff] (!%p160_p3)   ;;  %v4600_v8 = vld [vmem:[%s6557_s1 + $0x34] ss:$12 sps:$4 sm:$0xff] (!%p160_p3)  }
   0x9   : > { %2782 = vmatpush1.bf16.msra.mxu0 (!%p160_p3), %v4593_v3  ;;  %2712 = vmatprep.subr.bf16.mxu1 (!%p160_p3), %v4594_v4  ;;  %v4599_v7 = vld [vmem:[%s6557_s1 + $0x198] ss:$12 sps:$4 sm:$0xff] (!%p160_p3)   ;;  %v4602_v9 = vld [vmem:[%s6557_s1 + $0x1b4] ss:$12 sps:$4 sm:$0xff] (!%p160_p3)   ;;  %v4604_v10 = vld [vmem:[%s6557_s1 + $0x30] ss:$12 sps:$4 sm:$0xff] (!%p160_p3)  }
   0xa   : > { %2783 = vmatprep.subr.bf16.mxu0 (!%p160_p3), %v4596_v5  ;;  %v4605_v11 = vld [vmem:[%s6557_s1 + $0x1b0] ss:$12 sps:$4 sm:$0xff] (!%p160_p3)   ;;  %v4606_v12 = vld [vmem:[%s6557_s1 + $0x4c] ss:$12 sps:$4 sm:$0xff] (!%p160_p3)   ;;  %v4610_v14 = vld [vmem:[%s6557_s1 + $0x48] ss:$12 sps:$4 sm:$0xff] (!%p160_p3)  }
   0xb   : > { %v4608_v13 = vld [vmem:[%s6557_s1 + $0x1cc] ss:$12 sps:$4 sm:$0xff] (!%p160_p3)   ;;  %v4611_v15 = vld [vmem:[%s6557_s1 + $0x1c8] ss:$12 sps:$4 sm:$0xff] (!%p160_p3)   ;;  %v4612_v16 = vld [vmem:[%s6557_s1 + $0x64] ss:$12 sps:$4 sm:$0xff] (!%p160_p3)  }
   0xc   : > { %2713 = vmatpush1.bf16.msra.mxu1 (!%p160_p3), %v4598_v6  ;;  %v4614_v17 = vld [vmem:[%s6557_s1 + $0x1e4] ss:$12 sps:$4 sm:$0xff] (!%p160_p3)   ;;  %v4616_v18 = vld [vmem:[%s6557_s1 + $0x60] ss:$12 sps:$4 sm:$0xff] (!%p160_p3)   ;;  %v4618_v20 = vld [vmem:[%s6557_s1 + $0x7c] ss:$12 sps:$4 sm:$0xff] (!%p160_p3)  }
   0xd   : > { %2784 = vmatpush1.bf16.msra.mxu0 (!%p160_p3), %v4599_v7  ;;  %2714 = vmatprep.subr.bf16.mxu1 (!%p160_p3), %v4600_v8  ;;  %v4617_v19 = vld [vmem:[%s6557_s1 + $0x1e0] ss:$12 sps:$4 sm:$0xff] (!%p160_p3)   ;;  %v4620_v21 = vld [vmem:[%s6557_s1 + $0x1fc] ss:$12 sps:$4 sm:$0xff] (!%p160_p3)   ;;  %v4622_v22 = vld [vmem:[%s6557_s1 + $0x78] ss:$12 sps:$4 sm:$0xff] (!%p160_p3)  }
   0xe   : > { %2785 = vmatprep.subr.bf16.mxu0 %v4602_v9  ;;  %v4623_v23 = vld [vmem:[%s6557_s1 + $0x1f8] ss:$12 sps:$4 sm:$0xff]   ;;  %v4624_v24 = vld [vmem:[%s6557_s1 + $0x94] ss:$12 sps:$4 sm:$0xff]   ;;  %v4628_v26 = vld [vmem:[%s6557_s1 + $0x90] ss:$12 sps:$4 sm:$0xff]  }
   0xf   : > { %v4626_v25 = vld [vmem:[%s6557_s1 + $0x214] ss:$12 sps:$4 sm:$0xff]   ;;  %v4629_v27 = vld [vmem:[%s6557_s1 + $0x210] ss:$12 sps:$4 sm:$0xff]   ;;  %v4630_v28 = vld [vmem:[%s6557_s1 + $0xac] ss:$12 sps:$4 sm:$0xff]  }
  0x10   : > { %2715 = vmatpush1.bf16.msra.mxu1 %v4604_v10  ;;  %v4632_v29 = vld [vmem:[%s6557_s1 + $0x22c] ss:$12 sps:$4 sm:$0xff]   ;;  %v4634_v30 = vld [vmem:[%s6557_s1 + $0xa8] ss:$12 sps:$4 sm:$0xff]   ;;  %v4636_v32 = vld [vmem:[%s6557_s1 + $0xc4] ss:$12 sps:$4 sm:$0xff]  }
  0x11   : > { %2786 = vmatpush1.bf16.msra.mxu0 %v4605_v11  ;;  %2716 = vmatprep.subr.bf16.mxu1 %v4606_v12  ;;  %v4635_v31 = vld [vmem:[%s6557_s1 + $0x228] ss:$12 sps:$4 sm:$0xff]   ;;  %v4638_v33 = vld [vmem:[%s6557_s1 + $0x244] ss:$12 sps:$4 sm:$0xff]   ;;  %v4640_v34 = vld [vmem:[%s6557_s1 + $0xc0] ss:$12 sps:$4 sm:$0xff]  }
  0x12   : > { %2787 = vmatprep.subr.bf16.mxu0 %v4608_v13  ;;  %v4641_v35 = vld [vmem:[%s6557_s1 + $0x240] ss:$12 sps:$4 sm:$0xff]   ;;  %v4642_v36 = vld [vmem:[%s6557_s1 + $0xdc] ss:$12 sps:$4 sm:$0xff]   ;;  %s6565_s12 = smov (!%p194_p4, %s5118_s12), 1  ;;  %vm2697_vm0 = vcmask 523264  }
  0x13   : > { %v4644_v37 = vld [vmem:[%s6557_s1 + $0x25c] ss:$12 sps:$4 sm:$0xff]   ;;  %v4646_v38 = vld [vmem:[%s6557_s1 + $0xd8] ss:$12 sps:$4 sm:$0xff]   ;;  %v4648_v40 = vld [vmem:[%s6557_s1 + $0xf4] ss:$12 sps:$4 sm:$0xff]  }
  0x14   : > { %2717 = vmatpush1.bf16.msra.mxu1 %v4610_v14  ;;  %v4647_v39 = vld [vmem:[%s6557_s1 + $0x258] ss:$12 sps:$4 sm:$0xff]   ;;  %s4561_s29 = smul.u32 392, %s6565_s12  ;;  %v4650_v41 = vld [vmem:[%s6557_s1 + $0x274] ss:$12 sps:$4 sm:$0xff]   ;;  %vm3696_vm1 = vcmask 516096  }
  0x15   : > { %2788 = vmatpush1.bf16.msra.mxu0 %v4611_v15  ;;  %2718 = vmatprep.subr.bf16.mxu1 %v4612_v16  ;;  %v4652_v42 = vld [vmem:[%s6557_s1 + $0xf0] ss:$12 sps:$4 sm:$0xff]   ;;  %v4654_v44 = vld [vmem:[%s6557_s1 + $0x10c] ss:$12 sps:$4 sm:$0xff]   ;;  %v4658_v46 = vld [vmem:[%s6557_s1 + $0x108] ss:$12 sps:$4 sm:$0xff]  }
  0x16   : > { %2789 = vmatprep.subr.bf16.mxu0 %v4614_v17  ;;  %v4653_v43 = vld [vmem:[%s6557_s1 + $0x270] ss:$12 sps:$4 sm:$0xff]   ;;  %s5312_s17 = scalar_lea.vmem %s6556_s0, %s4561_s29  ;;  %v4656_v45 = vld [vmem:[%s6557_s1 + $0x28c] ss:$12 sps:$4 sm:$0xff]   ;;  %v4659_v47 = vld [vmem:[%s6557_s1 + $0x288] ss:$12 sps:$4 sm:$0xff]  }
  0x17   : > { %v4660_v48 = vld [vmem:[%s6557_s1 + $0x124] ss:$12 sps:$4 sm:$0xff]   ;;  %v4664_v52 = vld [vmem:[%s6557_s1 + $0x120] ss:$12 sps:$4 sm:$0xff]   ;;  %v4666_v54 = vld [vmem:[%s6557_s1 + $0x13c] ss:$12 sps:$4 sm:$0xff]  }
  0x18   : > { %2719 = vmatpush1.bf16.msra.mxu1 %v4616_v18  ;;  %v5327_v49 = vld [vmem:[%s5312_s17 + $0x4] ss:$56 sps:$4 sm:$0xff]   ;;  %v4665_v53 = vld [vmem:[%s6557_s1 + $0x2a0] ss:$12 sps:$4 sm:$0xff]   ;;  %v4682_v0 = vld [vmem:[%s6557_s1 + $0x168] ss:$12 sps:$4 sm:$0xff]  }
  0x19   : > { %2790 = vmatpush1.bf16.msra.mxu0 %v4617_v19  ;;  %2720 = vmatprep.subr.bf16.mxu1 %v4618_v20  ;;  %v4662_v50 = vld [vmem:[%s6557_s1 + $0x2a4] ss:$12 sps:$4 sm:$0xff]   ;;  %v4668_v55 = vld [vmem:[%s6557_s1 + $0x2bc] ss:$12 sps:$4 sm:$0xff]   ;;  %v4672_v58 = vld [vmem:[%s6557_s1 + $0x154] ss:$12 sps:$4 sm:$0xff]  }
  0x1a   : > { %2791 = vmatprep.subr.bf16.mxu0 %v4620_v21  ;;  %v4689_v51 = vld [vmem:[%s5312_s17 + $0xc] ss:$56 sps:$4 sm:$0xff]   ;;  %2742 = vmatprep.mubr.bf16.mxu1 %v5327_v49  ;;  %v4674_v59 = vld [vmem:[%s6557_s1 + $0x2d4] ss:$12 sps:$4 sm:$0xff]   ;;  %v4676_v60 = vld [vmem:[%s6557_s1 + $0x150] ss:$12 sps:$4 sm:$0xff]  }
  0x1b   : > { %2813 = vmatprep.mubr.bf16.mxu0 %v4689_v51  ;;  %v4670_v56 = vld [vmem:[%s6557_s1 + $0x138] ss:$12 sps:$4 sm:$0xff]   ;;  %v4677_v61 = vld [vmem:[%s6557_s1 + $0x2d0] ss:$12 sps:$4 sm:$0xff]   ;;  %v4683_v1 = vld [vmem:[%s6557_s1 + $0x2e8] ss:$12 sps:$4 sm:$0xff]  }
  0x1c   : > { %2721 = vmatpush1.bf16.msra.mxu1 %v4622_v22  ;;  %v4671_v57 = vld [vmem:[%s6557_s1 + $0x2b8] ss:$12 sps:$4 sm:$0xff]   ;;  %v5386_v5 = vld [vmem:[%s5312_s17 + $0x8] ss:$56 sps:$4 sm:$0xff]   ;;  %v5401_v10 = vld [vmem:[%s5312_s17 + $0x74] ss:$56 sps:$4 sm:$0xff]  }
  0x1d   : > { %2792 = vmatpush1.bf16.msra.mxu0 %v4623_v23  ;;  %2722 = vmatprep.subr.bf16.mxu1 %v4624_v24  ;;  %v4678_v62 = vld [vmem:[%s6557_s1 + $0x16c] ss:$12 sps:$4 sm:$0xff]   ;;  %v4692_v2 = vld [vmem:[%s6557_s1 + $0x304] ss:$12 sps:$4 sm:$0xff]   ;;  %v4698_v8 = vld [vmem:[%s6557_s1 + $0x31c] ss:$12 sps:$4 sm:$0xff]  }
  0x1e   : > { %2793 = vmatprep.subr.bf16.mxu0 %v4626_v25  ;;  %v4680_v63 = vld [vmem:[%s6557_s1 + $0x2ec] ss:$12 sps:$4 sm:$0xff]   ;;  %v4695_v3 = vld [vmem:[%s6557_s1 + $0x904] ss:$12 sps:$4 sm:$0xff]   ;;  %v4701_v9 = vld [vmem:[%s6557_s1 + $0x91c] ss:$12 sps:$4 sm:$0xff]  }
  0x1f   : > { %v5383_v4 = vld [vmem:[%s5312_s17] ss:$56 sps:$4 sm:$0xff]   ;;  %v4702_v15 = vld [vmem:[%s6557_s1 + $0x330] ss:$12 sps:$4 sm:$0xff]   ;;  %v4708_v20 = vld [vmem:[%s6557_s1 + $0x348] ss:$12 sps:$4 sm:$0xff]  }
  0x20   : > { %2723 = vmatpush1.bf16.msra.mxu1 %v4628_v26  ;;  %v4690_v6 = vld [vmem:[%s6557_s1 + $0x300] ss:$12 sps:$4 sm:$0xff]   ;;  %v4696_v11 = vld [vmem:[%s6557_s1 + $0x318] ss:$12 sps:$4 sm:$0xff]   ;;  %v4705_v16 = vld [vmem:[%s6557_s1 + $0x930] ss:$12 sps:$4 sm:$0xff]  }
  0x21   : > { %2794 = vmatpush1.bf16.msra.mxu0 %v4629_v27  ;;  %2724 = vmatprep.subr.bf16.mxu1 %v4630_v28  ;;  %v4693_v7 = vld [vmem:[%s6557_s1 + $0x900] ss:$12 sps:$4 sm:$0xff]   ;;  %v4699_v12 = vld [vmem:[%s6557_s1 + $0x918] ss:$12 sps:$4 sm:$0xff]   ;;  %v5425_v17 = vld [vmem:[%s5312_s17 + $0x70] ss:$56 sps:$4 sm:$0xff]  }
  0x22   : > { %2795 = vmatprep.subr.bf16.mxu0 %v4632_v29  ;;  %v4704_v13 = vld [vmem:[%s6557_s1 + $0x334] ss:$12 sps:$4 sm:$0xff]   ;;  %v4710_v18 = vld [vmem:[%s6557_s1 + $0x34c] ss:$12 sps:$4 sm:$0xff]   ;;  %v5440_v22 = vld [vmem:[%s5312_s17 + $0xe4] ss:$56 sps:$4 sm:$0xff]  }
  0x23   : > { %v4707_v14 = vld [vmem:[%s6557_s1 + $0x934] ss:$12 sps:$4 sm:$0xff]   ;;  %v4713_v19 = vld [vmem:[%s6557_s1 + $0x94c] ss:$12 sps:$4 sm:$0xff]   ;;  %v4716_v24 = vld [vmem:[%s6557_s1 + $0x364] ss:$12 sps:$4 sm:$0xff]  }
  0x24   : > { %2725 = vmatpush1.bf16.msra.mxu1 %v4634_v30  ;;  %v4711_v21 = vld [vmem:[%s6557_s1 + $0x948] ss:$12 sps:$4 sm:$0xff]   ;;  %v4719_v25 = vld [vmem:[%s6557_s1 + $0x964] ss:$12 sps:$4 sm:$0xff]   ;;  %v4714_v26 = vld [vmem:[%s6557_s1 + $0x360] ss:$12 sps:$4 sm:$0xff]  }
  0x25   : > { %2796 = vmatpush1.bf16.msra.mxu0 %v4635_v31  ;;  %2726 = vmatprep.subr.bf16.mxu1 %v4636_v32  ;;  %v5444_v23 = vld [vmem:[%s5312_s17 + $0x7c] ss:$56 sps:$4 sm:$0xff]   ;;  %v5457_v27 = vld [vmem:[%s5312_s17 + $0xe0] ss:$56 sps:$4 sm:$0xff]   ;;  %v4749_v51 = vld [vmem:[%s6557_s1 + $0x9c4] ss:$12 sps:$4 sm:$0xff]  }
  0x26   : > { %2797 = vmatprep.subr.bf16.mxu0 %v4638_v33  ;;  %v5461_v28 = vld [vmem:[%s5312_s17 + $0x78] ss:$56 sps:$4 sm:$0xff]   ;;  %v4717_v30 = vld [vmem:[%s6557_s1 + $0x960] ss:$12 sps:$4 sm:$0xff]   ;;  %v4722_v31 = vld [vmem:[%s6557_s1 + $0x37c] ss:$12 sps:$4 sm:$0xff]  }
  0x27   : > { %v258_v29 = vld [vmem:[%s5312_s17 + $0x150] sm:$0x11]  ;;  %v4725_v32 = vld [vmem:[%s6557_s1 + $0x97c] ss:$12 sps:$4 sm:$0xff]   ;;  %v4720_v33 = vld [vmem:[%s6557_s1 + $0x378] ss:$12 sps:$4 sm:$0xff]  }
  0x28   : > { %2727 = vmatpush1.bf16.msra.mxu1 %v4640_v34  ;;  %v4723_v34 = vld [vmem:[%s6557_s1 + $0x978] ss:$12 sps:$4 sm:$0xff]   ;;  %s4562_s27 = smul.u32 168, %s6565_s12 }
  0x29   : > { %2798 = vmatpush1.bf16.msra.mxu0 %v4641_v35  ;;  %2728 = vmatprep.subr.bf16.mxu1 %v4642_v36  ;;  %v5479_v35 = vcombine.high %v258_v29, %v258_v29  ;;  %v5484_v36 = vld [vmem:[%s5312_s17 + $0xec] ss:$56 sps:$4 sm:$0xff]  }
  0x2a   : > { %2799 = vmatprep.subr.bf16.mxu0 %v4644_v37  ;;  %v4731_v37 = vld [vmem:[%s6557_s1 + $0x394] ss:$12 sps:$4 sm:$0xff]   ;;  %s6471_s29 = scalar_lea.vmem %s6559_s3, %s4562_s27 }
  0x2c   : > { %2729 = vmatpush1.bf16.msra.mxu1 %v4646_v38  ;;  %v4734_v38 = vld [vmem:[%s6557_s1 + $0x994] ss:$12 sps:$4 sm:$0xff]  }
  0x2d   : > { %2800 = vmatpush1.bf16.msra.mxu0 %v4647_v39  ;;  %2730 = vmatprep.subr.bf16.mxu1 %v4648_v40  ;;  %v5495_v39 = vld [vmem:[%s5312_s17 + $0xe8] ss:$56 sps:$4 sm:$0xff]   ;;  %v4729_v40 = vld [vmem:[%s6557_s1 + $0x390] ss:$12 sps:$4 sm:$0xff]  }
  0x2e   : > { %2801 = vmatprep.subr.bf16.mxu0 %v4650_v41  ;;  %v5500_v41 = vcombine.low %v258_v29, %v258_v29  ;;  %v4802_v29 = vld [vmem:[%s6557_s1 + $0x110] ss:$12 sps:$4 sm:$0xff]  }
  0x30   : > { %2731 = vmatpush1.bf16.msra.mxu1 %v4652_v42  ;;  %v4732_v42 = vld [vmem:[%s6557_s1 + $0x990] ss:$12 sps:$4 sm:$0xff]  }
  0x31   : > { %2802 = vmatpush1.bf16.msra.mxu0 %v4653_v43  ;;  %2732 = vmatprep.subr.bf16.mxu1 %v4654_v44  ;;  %v4737_v43 = vld [vmem:[%s6557_s1 + $0x3ac] ss:$12 sps:$4 sm:$0xff]  }
  0x32   : > { %2803 = vmatprep.subr.bf16.mxu0 %v4656_v45  ;;  %v4740_v44 = vld [vmem:[%s6557_s1 + $0x9ac] ss:$12 sps:$4 sm:$0xff]   ;;  %v4735_v45 = vld [vmem:[%s6557_s1 + $0x3a8] ss:$12 sps:$4 sm:$0xff]  }
  0x34   : > { %2733 = vmatpush1.bf16.msra.mxu1 %v4658_v46  ;;  %v4775_v46 = vld [vmem:[%s5312_s17 + $0x34] ss:$56 sps:$4 sm:$0xff]  }
  0x35   : > { %2804 = vmatpush1.bf16.msra.mxu0 %v4659_v47  ;;  %2734 = vmatprep.subr.bf16.mxu1 %v4660_v48  ;;  %v4738_v47 = vld [vmem:[%s6557_s1 + $0x9a8] ss:$12 sps:$4 sm:$0xff]   ;;  %v259_v48 = vld [vmem:[%s5312_s17 + $0x158] sm:$0x11] }
  0x36   : > { %2805 = vmatprep.subr.bf16.mxu0 %v4662_v50  ;;  %v4746_v50 = vld [vmem:[%s6557_s1 + $0x3c4] ss:$12 sps:$4 sm:$0xff]  }
  0x38   : > { %2735 = vmatpush1.bf16.msra.mxu1 %v4664_v52  ;;  %v5527_v52 = vcombine.high %v259_v48, %v259_v48 }
  0x39   : > { %2806 = vmatpush1.bf16.msra.mxu0 %v4665_v53  ;;  %2736 = vmatprep.subr.bf16.mxu1 %v4666_v54  ;;  %v4744_v53 = vld [vmem:[%s6557_s1 + $0x3c0] ss:$12 sps:$4 sm:$0xff]   ;;  %v5533_v54 = vcombine.low %v259_v48, %v259_v48 }
  0x3a   : > { %2807 = vmatprep.subr.bf16.mxu0 %v4668_v55  ;;  %v4747_v55 = vld [vmem:[%s6557_s1 + $0x9c0] ss:$12 sps:$4 sm:$0xff]  }
  0x3b   : > { %v4819_v48 = vld [vmem:[%s6557_s1 + $0x80] ss:$12 sps:$4 sm:$0xff]  }
  0x3c   : > { %2737 = vmatpush1.bf16.msra.mxu1 %v4670_v56  ;;  %v4752_v56 = vld [vmem:[%s6557_s1 + $0x3dc] ss:$12 sps:$4 sm:$0xff]  }
  0x3d   : > { %2808 = vmatpush1.bf16.msra.mxu0 %v4671_v57  ;;  %2738 = vmatprep.subr.bf16.mxu1 %v4672_v58  ;;  %v4755_v57 = vld [vmem:[%s6557_s1 + $0x9dc] ss:$12 sps:$4 sm:$0xff]   ;;  %v4750_v58 = vld [vmem:[%s6557_s1 + $0x3d8] ss:$12 sps:$4 sm:$0xff]  }
  0x3e   : > { %2809 = vmatprep.subr.bf16.mxu0 %v4674_v59  ;;  %v4753_v59 = vld [vmem:[%s6557_s1 + $0x9d8] ss:$12 sps:$4 sm:$0xff]  }
  0x40   : > { %2739 = vmatpush1.bf16.msra.mxu1 %v4676_v60  ;;  %v4762_v60 = vld [vmem:[%s6557_s1 + $0x3f4] ss:$12 sps:$4 sm:$0xff]  }
  0x41   : > { %2810 = vmatpush1.bf16.msra.mxu0 %v4677_v61  ;;  %2740 = vmatprep.subr.bf16.mxu1 %v4678_v62  ;;  %v4765_v61 = vld [vmem:[%s6557_s1 + $0x9f4] ss:$12 sps:$4 sm:$0xff]  }
  0x42   : > { %2811 = vmatprep.subr.bf16.mxu0 %v4680_v63  ;;  %v5559_v62 = vld [vmem:[%s5312_s17 + $0x14] ss:$56 sps:$4 sm:$0xff]   ;;  %v4760_v63 = vld [vmem:[%s6557_s1 + $0x3f0] ss:$12 sps:$4 sm:$0xff]  }
  0x44   : > { %2741 = vmatpush1.bf16.msra.mxu1 %v4682_v0  ;;  %v4763_v0 = vld [vmem:[%s6557_s1 + $0x9f0] ss:$12 sps:$4 sm:$0xff]  }
  0x45   : > { %2812 = vmatpush1.bf16.msra.mxu0 %v4683_v1  ;;  %3136 = vmatprep.subr.bf16.mxu1 %v4695_v3  ;;  %v4769_v1 = vld [vmem:[%s6557_s1 + $0x40c] ss:$12 sps:$4 sm:$0xff]   ;;  %v4767_v3 = vld [vmem:[%s6557_s1 + $0x408] ss:$12 sps:$4 sm:$0xff]  }
  0x46   : > { %2852 = vmatprep.subr.bf16.mxu0 %v4692_v2  ;;  %v4772_v2 = vld [vmem:[%s6557_s1 + $0xa0c] ss:$12 sps:$4 sm:$0xff]  }
  0x47   : > { %2743 = vmatmul.mubr.bf16.vlgmr.msra.gmra.mrb[0].mxu1 %v5383_v4 }
  0x48   : > { %2814 = vmatmul.mubr.bf16.vlgmr.msra.gmra.mrb[0].mxu0 %v5386_v5  ;;  %3137 = vmatpush1.bf16.msra.mxu1 %v4693_v7  ;;  %v4780_v7 = vld [vmem:[%s6557_s1 + $0x424] ss:$12 sps:$4 sm:$0xff]  }
  0x49   : > { %2853 = vmatpush1.bf16.msra.mxu0 %v4690_v6  ;;  %3138 = vmatprep.subr.bf16.mxu1 %v4701_v9  ;;  %v4770_v6 = vld [vmem:[%s6557_s1 + $0xa08] ss:$12 sps:$4 sm:$0xff]  }
  0x4a   : > { %2854 = vmatprep.subr.bf16.mxu0 %v4698_v8  ;;  %2752 = vmatprep.mubr.bf16.mxu1 %v5401_v10  ;;  %v4781_v8 = vld [vmem:[%s6557_s1 + $0xc8] ss:$12 sps:$4 sm:$0xff]  }
  0x4b   : > { %2823 = vmatprep.mubr.bf16.mxu0 %v5444_v23  ;;  %v4773_v9 = vld [vmem:[%s5312_s17 + $0x30] ss:$56 sps:$4 sm:$0xff]  }
  0x4c   : > { %3139 = vmatpush1.bf16.msra.mxu1 %v4699_v12  ;;  %v4783_v12 = vld [vmem:[%s6557_s1 + $0x8] ss:$12 sps:$4 sm:$0xff]  }
  0x4d   : > { %2855 = vmatpush1.bf16.msra.mxu0 %v4696_v11  ;;  %3140 = vmatprep.subr.bf16.mxu1 %v4707_v14  ;;  %v4778_v11 = vld [vmem:[%s6557_s1 + $0x420] ss:$12 sps:$4 sm:$0xff]  }
  0x4e   : > { %2856 = vmatprep.subr.bf16.mxu0 %v4704_v13  ;;  %v4786_v13 = vld [vmem:[%s6557_s1 + $0x43c] ss:$12 sps:$4 sm:$0xff]   ;;  %v4787_v14 = vld [vmem:[%s6557_s1 + $0xe0] ss:$12 sps:$4 sm:$0xff]  }
  0x4f   : > { %2753 = vmatmul.mubr.bf16.gmra.mrb[4].mxu1 %v5425_v17 }
  0x50   : > { %3141 = vmatpush1.bf16.msra.mxu1 %v4705_v16  ;;  %2762 = vmatprep.mubr.bf16.mxu1 %v5440_v22  ;;  %v4784_v16 = vld [vmem:[%s6557_s1 + $0x438] ss:$12 sps:$4 sm:$0xff]  }
  0x51   : > { %2857 = vmatpush1.bf16.msra.mxu0 %v4702_v15  ;;  %3142 = vmatprep.subr.bf16.mxu1 %v4713_v19  ;;  %v4789_v15 = vld [vmem:[%s5312_s17 + $0xa4] ss:$56 sps:$4 sm:$0xff]   ;;  %v4794_v19 = vld [vmem:[%s6557_s1 + $0x454] ss:$12 sps:$4 sm:$0xff]  }
  0x52   : > { %2858 = vmatprep.subr.bf16.mxu0 %v4710_v18  ;;  %2824 = vmatmul.mubr.bf16.gmra.mrb[4].mxu0 %v5461_v28  ;;  %v4788_v18 = vld [vmem:[%s6557_s1 + $0x20] ss:$12 sps:$4 sm:$0xff]  }
  0x53   : > { %2833 = vmatprep.mubr.bf16.mxu0 %v5484_v36 }
  0x54   : > { %3143 = vmatpush1.bf16.msra.mxu1 %v4711_v21  ;;  %v4792_v21 = vld [vmem:[%s6557_s1 + $0x450] ss:$12 sps:$4 sm:$0xff]  }
  0x55   : > { %2859 = vmatpush1.bf16.msra.mxu0 %v4708_v20  ;;  %3144 = vmatprep.subr.bf16.mxu1 %v4719_v25  ;;  %v4796_v20 = vld [vmem:[%s6557_s1 + $0xf8] ss:$12 sps:$4 sm:$0xff]  }
  0x56   : > { %2860 = vmatprep.subr.bf16.mxu0 %v4716_v24  ;;  %v4795_v24 = vld [vmem:[%s5312_s17 + $0xa0] ss:$56 sps:$4 sm:$0xff]  }
  0x57   : > { %2763 = vmatmul.mubr.bf16.gmra.mrb[8].mxu1 %v5457_v27  ;;  %v4798_v25 = vld [vmem:[%s6557_s1 + $0x38] ss:$12 sps:$4 sm:$0xff]  }
  0x58   : > { %3145 = vmatpush1.bf16.msra.mxu1 %v4717_v30  ;;  %2772 = vmatprep.mubr.bf16.mxu1 %v5479_v35  ;;  %v4804_v30 = vld [vmem:[%s5312_s17 + $0x114] ss:$56 sps:$4 sm:$0xff]  }
  0x59   : > { %2861 = vmatpush1.bf16.msra.mxu0 %v4714_v26  ;;  %3146 = vmatprep.subr.bf16.mxu1 %v4725_v32  ;;  %v4801_v26 = vld [vmem:[%s6557_s1 + $0x46c] ss:$12 sps:$4 sm:$0xff]   ;;  %v4803_v32 = vld [vmem:[%s6557_s1 + $0x50] ss:$12 sps:$4 sm:$0xff]  }
  0x5a   : > { %2862 = vmatprep.subr.bf16.mxu0 %v4722_v31  ;;  %2834 = vmatmul.mubr.bf16.gmra.mrb[8].mxu0 %v5495_v39  ;;  %v4799_v31 = vld [vmem:[%s6557_s1 + $0x468] ss:$12 sps:$4 sm:$0xff]  }
  0x5b   : > { %2843 = vmatprep.mubr.bf16.mxu0 %v5527_v52 }
  0x5c   : > { %3147 = vmatpush1.bf16.msra.mxu1 %v4723_v34  ;;  %v5637_v34 = vld [vmem:[%s5312_s17 + $0x10] ss:$56 sps:$4 sm:$0xff]  }
  0x5d   : > { %2863 = vmatpush1.bf16.msra.mxu0 %v4720_v33  ;;  %3148 = vmatprep.subr.bf16.mxu1 %v4734_v38  ;;  %v4811_v33 = vld [vmem:[%s6557_s1 + $0x484] ss:$12 sps:$4 sm:$0xff]   ;;  %v4809_v38 = vld [vmem:[%s6557_s1 + $0x480] ss:$12 sps:$4 sm:$0xff]  }
  0x5e   : > { %2864 = vmatprep.subr.bf16.mxu0 %v4731_v37  ;;  %v4813_v37 = vld [vmem:[%s6557_s1 + $0x128] ss:$12 sps:$4 sm:$0xff]  }
  0x5f   : > { %2773 = vmatmul.mubr.bf16.gmra.mrb[12].mxu1 %v5500_v41 }
  0x60   : > { %3149 = vmatpush1.bf16.msra.mxu1 %v4732_v42  ;;  %4181 = vmatprep.mubr.msk.bf16.mxu1 %vm2697_vm0, %v4775_v46  ;;  %v4814_v42 = vld [vmem:[%s6557_s1 + $0x68] ss:$12 sps:$4 sm:$0xff]  }
  0x61   : > { %2865 = vmatpush1.bf16.msra.mxu0 %v4729_v40  ;;  %3150 = vmatprep.subr.bf16.mxu1 %v4740_v44  ;;  %v4812_v40 = vld [vmem:[%s5312_s17 + $0x110] ss:$56 sps:$4 sm:$0xff]  }
  0x62   : > { %2866 = vmatprep.subr.bf16.mxu0 %v4737_v43  ;;  %2844 = vmatmul.mubr.bf16.gmra.mrb[12].mxu0 %v5533_v54  ;;  %v264_v43 = vld [vmem:[%s5312_s17 + $0x180] sm:$0x11]  ;;  %v4817_v44 = vld [vmem:[%s6557_s1 + $0x49c] ss:$12 sps:$4 sm:$0xff]  }
  0x63   : > { %2884 = vmatprep.mubr.bf16.mxu0 %v5559_v62  ;;  %v5657_v46 = vcombine.high %v264_v43, %v264_v43 }
  0x64   : > { %3151 = vmatpush1.bf16.msra.mxu1 %v4738_v47  ;;  %v4815_v47 = vld [vmem:[%s6557_s1 + $0x498] ss:$12 sps:$4 sm:$0xff]  }
  0x65   : > { %2867 = vmatpush1.bf16.msra.mxu0 %v4735_v45  ;;  %3152 = vmatprep.subr.bf16.mxu1 %v4749_v51  ;;  %v4818_v45 = vld [vmem:[%s6557_s1 + $0x140] ss:$12 sps:$4 sm:$0xff]   ;;  %v4825_v51 = vld [vmem:[%s6557_s1 + $0x158] ss:$12 sps:$4 sm:$0xff]  }
  0x66   : > { %2868 = vmatprep.subr.bf16.mxu0 %v4746_v50  ;;  %v4823_v50 = vld [vmem:[%s6557_s1 + $0x4b4] ss:$12 sps:$4 sm:$0xff]  }
  0x68   : > { %3153 = vmatpush1.bf16.msra.mxu1 %v4747_v55  ;;  %v5677_v55 = vcombine.low %v264_v43, %v264_v43  ;;  %v4874_v43 = vld [vmem:[%s6557_s1 + $0x230] ss:$12 sps:$4 sm:$0xff]  }
  0x69   : > { %2869 = vmatpush1.bf16.msra.mxu0 %v4744_v53  ;;  %3154 = vmatprep.subr.bf16.mxu1 %v4755_v57  ;;  %v4821_v53 = vld [vmem:[%s6557_s1 + $0x4b0] ss:$12 sps:$4 sm:$0xff]  }
  0x6a   : > { %2870 = vmatprep.subr.bf16.mxu0 %v4752_v56  ;;  %v4826_v56 = vld [vmem:[%s6557_s1 + $0x98] ss:$12 sps:$4 sm:$0xff]  }
  0x6b   : > { %v5683_v57 = vld [vmem:[%s5312_s17 + $0x84] ss:$56 sps:$4 sm:$0xff]  }
  0x6c   : > { %3155 = vmatpush1.bf16.msra.mxu1 %v4753_v59  ;;  %v4830_v59 = vld [vmem:[%s6557_s1 + $0x170] ss:$12 sps:$4 sm:$0xff]  }
  0x6d   : > { %2871 = vmatpush1.bf16.msra.mxu0 %v4750_v58  ;;  %3156 = vmatprep.subr.bf16.mxu1 %v4765_v61  ;;  %v4829_v58 = vld [vmem:[%s6557_s1 + $0x4cc] ss:$12 sps:$4 sm:$0xff]  }
  0x6e   : > { %2872 = vmatprep.subr.bf16.mxu0 %v4762_v60  ;;  %v4827_v60 = vld [vmem:[%s6557_s1 + $0x4c8] ss:$12 sps:$4 sm:$0xff]   ;;  %v5697_v61 = vld [vmem:[%s5312_s17 + $0x80] ss:$56 sps:$4 sm:$0xff]  }
  0x70   : > { %3157 = vmatpush1.bf16.msra.mxu1 %v4763_v0  ;;  %v4834_v0 = vld [vmem:[%s6557_s1 + $0x4e4] ss:$12 sps:$4 sm:$0xff]  }
  0x71   : > { %2873 = vmatpush1.bf16.msra.mxu0 %v4760_v63  ;;  %3158 = vmatprep.subr.bf16.mxu1 %v4772_v2  ;;  %v4831_v63 = vld [vmem:[%s6557_s1 + $0xb0] ss:$12 sps:$4 sm:$0xff]   ;;  %v4832_v2 = vld [vmem:[%s6557_s1 + $0x4e0] ss:$12 sps:$4 sm:$0xff]  }
  0x72   : > { %2874 = vmatprep.subr.bf16.mxu0 %v4769_v1  ;;  %v4835_v1 = vld [vmem:[%s6557_s1 + $0x248] ss:$12 sps:$4 sm:$0xff]  }
  0x74   : > { %3159 = vmatpush1.bf16.msra.mxu1 %v4770_v6  ;;  %v5717_v6 = vld [vmem:[%s5312_s17 + $0xf4] ss:$56 sps:$4 sm:$0xff]  }
  0x75   : > { %2875 = vmatpush1.bf16.msra.mxu0 %v4767_v3  ;;  %4191 = vmatprep.subr.bf16.mxu1 %v4781_v8  ;;  %v4836_v3 = vld [vmem:[%s6557_s1 + $0x188] ss:$12 sps:$4 sm:$0xff]   ;;  %v4837_v8 = vld [vmem:[%s6557_s1 + $0x4f8] ss:$12 sps:$4 sm:$0xff]  }
  0x76   : > { %2876 = vmatprep.subr.bf16.mxu0 %v4780_v7  ;;  %v4840_v7 = vld [vmem:[%s6557_s1 + $0x260] ss:$12 sps:$4 sm:$0xff]  }
  0x77   : > { %3169 = vmatmul.mubr.bf16.vlgmr.msra.gmra.mrb[16].mxu1 %v4773_v9  ;;  %v5731_v9 = vld [vmem:[%s5312_s17 + $0xf0] ss:$56 sps:$4 sm:$0xff]  }
  0x78   : > { %4192 = vmatpush3.bf16.msra.mxu1 %v4783_v12  ;;  %4182 = vmatprep.mubr.msk.bf16.mxu1 %vm2697_vm0, %v4789_v15  ;;  %v4844_v12 = vld [vmem:[%s6557_s1 + $0x514] ss:$12 sps:$4 sm:$0xff]  }
  0x79   : > { %2877 = vmatpush1.bf16.msra.mxu0 %v4778_v11  ;;  %4193 = vmatprep.subr.bf16.mxu1 %v4787_v14  ;;  %v4841_v11 = vld [vmem:[%s6557_s1 + $0x1a0] ss:$12 sps:$4 sm:$0xff]   ;;  %v4846_v14 = vld [vmem:[%s6557_s1 + $0x1b8] ss:$12 sps:$4 sm:$0xff]  }
  0x7a   : > { %2878 = vmatprep.subr.bf16.mxu0 %v4786_v13  ;;  %v4845_v13 = vld [vmem:[%s6557_s1 + $0x278] ss:$12 sps:$4 sm:$0xff]  }
  0x7b   : > { %v260_v15 = vld [vmem:[%s5312_s17 + $0x160] sm:$0x11] }
  0x7c   : > { %4194 = vmatpush3.bf16.msra.mxu1 %v4788_v18  ;;  %v5754_v18 = vcombine.high %v260_v15, %v260_v15 }
  0x7d   : > { %2879 = vmatpush1.bf16.msra.mxu0 %v4784_v16  ;;  %4195 = vmatprep.subr.bf16.mxu1 %v4796_v20  ;;  %v4849_v16 = vld [vmem:[%s6557_s1 + $0x52c] ss:$12 sps:$4 sm:$0xff]   ;;  %v4847_v20 = vld [vmem:[%s6557_s1 + $0x528] ss:$12 sps:$4 sm:$0xff]  }
  0x7e   : > { %2880 = vmatprep.subr.bf16.mxu0 %v4794_v19  ;;  %v5760_v19 = vcombine.low %v260_v15, %v260_v15  ;;  %v4917_v15 = vld [vmem:[%s6557_s1 + $0x398] ss:$12 sps:$4 sm:$0xff]  }
  0x7f   : > { %3179 = vmatmul.mubr.bf16.gmra.mrb[20].mxu1 %v4795_v24  ;;  %v4854_v24 = vld [vmem:[%s6557_s1 + $0x544] ss:$12 sps:$4 sm:$0xff]  }
  0x80   : > { %4196 = vmatpush3.bf16.msra.mxu1 %v4798_v25  ;;  %4183 = vmatprep.mubr.msk.bf16.mxu1 %vm2697_vm0, %v4804_v30  ;;  %v4852_v25 = vld [vmem:[%s6557_s1 + $0x540] ss:$12 sps:$4 sm:$0xff]   ;;  %v4859_v30 = vld [vmem:[%s6557_s1 + $0x55c] ss:$12 sps:$4 sm:$0xff]  }
  0x81   : > { %2881 = vmatpush1.bf16.msra.mxu0 %v4792_v21  ;;  %4197 = vmatprep.subr.bf16.mxu1 %v4802_v29  ;;  %v4851_v21 = vld [vmem:[%s6557_s1 + $0x1d0] ss:$12 sps:$4 sm:$0xff]  }
  0x82   : > { %2882 = vmatprep.subr.bf16.mxu0 %v4801_v26  ;;  %v4856_v26 = vld [vmem:[%s6557_s1 + $0x1e8] ss:$12 sps:$4 sm:$0xff]  }
  0x83   : > { %v5784_v29 = vld [vmem:[%s5312_s17 + $0x1c] ss:$56 sps:$4 sm:$0xff]  }
  0x84   : > { %4198 = vmatpush3.bf16.msra.mxu1 %v4803_v32  ;;  %v4861_v32 = vld [vmem:[%s6557_s1 + $0x200] ss:$12 sps:$4 sm:$0xff]  }
  0x85   : > { %2883 = vmatpush1.bf16.msra.mxu0 %v4799_v31  ;;  %4199 = vmatprep.subr.bf16.mxu1 %v4813_v37  ;;  %v4857_v31 = vld [vmem:[%s6557_s1 + $0x558] ss:$12 sps:$4 sm:$0xff]   ;;  %v4864_v37 = vld [vmem:[%s6557_s1 + $0x570] ss:$12 sps:$4 sm:$0xff]  }
  0x86   : > { %2923 = vmatprep.subr.bf16.mxu0 %v4811_v33  ;;  %v4866_v33 = vld [vmem:[%s6557_s1 + $0x574] ss:$12 sps:$4 sm:$0xff]  }
  0x87   : > { %3189 = vmatmul.mubr.bf16.gmra.mrb[24].mxu1 %v4812_v40  ;;  %v4872_v40 = vld [vmem:[%s6557_s1 + $0x58c] ss:$12 sps:$4 sm:$0xff]  }
  0x88   : > { %2885 = vmatmul.mubr.bf16.vlgmr.msra.gmra.mrb[0].mxu0 %v5637_v34  ;;  %4200 = vmatpush3.bf16.msra.mxu1 %v4814_v42  ;;  %v4870_v42 = vld [vmem:[%s6557_s1 + $0x588] ss:$12 sps:$4 sm:$0xff]  }
  0x89   : > { %2924 = vmatpush1.bf16.msra.mxu0 %v4809_v38  ;;  %4201 = vmatprep.subr.bf16.mxu1 %v4818_v45  ;;  %v4869_v38 = vld [vmem:[%s6557_s1 + $0x218] ss:$12 sps:$4 sm:$0xff]   ;;  %v4880_v45 = vld [vmem:[%s6557_s1 + $0x3c8] ss:$12 sps:$4 sm:$0xff]  }
  0x8a   : > { %2925 = vmatprep.subr.bf16.mxu0 %v4817_v44  ;;  %4184 = vmatprep.mubr.msk.bf16.mxu1 %vm2697_vm0, %v5657_v46  ;;  %v4879_v44 = vld [vmem:[%s6557_s1 + $0x5a4] ss:$12 sps:$4 sm:$0xff]  }
  0x8b   : > { %2894 = vmatprep.mubr.bf16.mxu0 %v5683_v57 }
  0x8c   : > { %4202 = vmatpush3.bf16.msra.mxu1 %v4819_v48  ;;  %v4882_v48 = vld [vmem:[%s6557_s1 + $0x308] ss:$12 sps:$4 sm:$0xff]  }
  0x8d   : > { %2926 = vmatpush1.bf16.msra.mxu0 %v4815_v47  ;;  %4203 = vmatprep.subr.bf16.mxu1 %v4825_v51  ;;  %v5097_v47 = vld [vmem:[%s5312_s17 + $0xc] ss:$56 sps:$4 sm:$0xff]  }
  0x8e   : > { %2927 = vmatprep.subr.bf16.mxu0 %v4823_v50  ;;  %v4885_v50 = vld [vmem:[%s6557_s1 + $0x5bc] ss:$12 sps:$4 sm:$0xff]   ;;  %v4886_v51 = vld [vmem:[%s6557_s1 + $0x3e0] ss:$12 sps:$4 sm:$0xff]  }
  0x8f   : > { %3199 = vmatmul.mubr.bf16.gmra.mrb[28].mxu1 %v5677_v55 }
  0x90   : > { %4204 = vmatpush3.bf16.msra.mxu1 %v4826_v56  ;;  %3239 = vmatprep.mubr.bf16.mxu1 %v5327_v49  ;;  %v4839_v49 = vld [vmem:[%s6557_s1 + $0x4fc] ss:$12 sps:$4 sm:$0xff]   ;;  %v4887_v56 = vld [vmem:[%s6557_s1 + $0x320] ss:$12 sps:$4 sm:$0xff]  }
  0x91   : > { %2928 = vmatpush1.bf16.msra.mxu0 %v4821_v53  ;;  %4205 = vmatprep.subr.bf16.mxu1 %v4830_v59  ;;  %v4883_v53 = vld [vmem:[%s6557_s1 + $0x5b8] ss:$12 sps:$4 sm:$0xff]  }
  0x92   : > { %2929 = vmatprep.subr.bf16.mxu0 %v4829_v58  ;;  %2895 = vmatmul.mubr.bf16.gmra.mrb[4].mxu0 %v5697_v61  ;;  %v4891_v58 = vld [vmem:[%s6557_s1 + $0x5d4] ss:$12 sps:$4 sm:$0xff]   ;;  %v4892_v59 = vld [vmem:[%s6557_s1 + $0x3f8] ss:$12 sps:$4 sm:$0xff]  }
  0x93   : > { %2904 = vmatprep.mubr.bf16.mxu0 %v5717_v6 }
  0x94   : > { %4206 = vmatpush3.bf16.msra.mxu1 %v4831_v63  ;;  %v4897_v63 = vld [vmem:[%s6557_s1 + $0x5ec] ss:$12 sps:$4 sm:$0xff]  }
  0x95   : > { %2930 = vmatpush1.bf16.msra.mxu0 %v4827_v60  ;;  %4231 = vmatprep.subr.bf16.mxu1 %v4835_v1  ;;  %v4894_v60 = vld [vmem:[%s6557_s1 + $0x338] ss:$12 sps:$4 sm:$0xff]   ;;  %v4899_v1 = vld [vmem:[%s6557_s1 + $0x350] ss:$12 sps:$4 sm:$0xff]  }
  0x96   : > { %2931 = vmatprep.subr.bf16.mxu0 %v4834_v0  ;;  %v4895_v0 = vld [vmem:[%s6557_s1 + $0x5e8] ss:$12 sps:$4 sm:$0xff]  }
  0x97   : > { %3240 = vmatmul.mubr.bf16.vlgmr.msra.gmra.mrb[32].mxu1 %v5383_v4  ;;  %v4842_v4 = vld [vmem:[%s6557_s1 + $0x510] ss:$12 sps:$4 sm:$0xff]  }
  0x98   : > { %4232 = vmatpush3.bf16.msra.mxu1 %v4836_v3  ;;  %3247 = vmatprep.mubr.bf16.mxu1 %v5401_v10  ;;  %v4850_v10 = vld [vmem:[%s6557_s1 + $0x290] ss:$12 sps:$4 sm:$0xff]  }
  0x99   : > { %2932 = vmatpush1.bf16.msra.mxu0 %v4832_v2  ;;  %4233 = vmatprep.subr.bf16.mxu1 %v4840_v7  ;;  %v4905_v2 = vld [vmem:[%s6557_s1 + $0x604] ss:$12 sps:$4 sm:$0xff]   ;;  %v4907_v7 = vld [vmem:[%s6557_s1 + $0x368] ss:$12 sps:$4 sm:$0xff]  }
  0x9a   : > { %2933 = vmatprep.subr.bf16.mxu0 %v4839_v49  ;;  %2905 = vmatmul.mubr.bf16.gmra.mrb[8].mxu0 %v5731_v9  ;;  %v5882_v3 = vld [vmem:[%s5312_s17 + $0x18] ss:$56 sps:$4 sm:$0xff]   ;;  %v4903_v49 = vld [vmem:[%s6557_s1 + $0x600] ss:$12 sps:$4 sm:$0xff]  }
  0x9b   : > { %2914 = vmatprep.mubr.bf16.mxu0 %v5754_v18 }
  0x9c   : > { %4234 = vmatpush3.bf16.msra.mxu1 %v4841_v11  ;;  %v5901_v11 = vld [vmem:[%s5312_s17 + $0x8c] ss:$56 sps:$4 sm:$0xff]  }
  0x9d   : > { %2934 = vmatpush1.bf16.msra.mxu0 %v4837_v8  ;;  %4235 = vmatprep.subr.bf16.mxu1 %v4845_v13  ;;  %v4910_v8 = vld [vmem:[%s6557_s1 + $0x61c] ss:$12 sps:$4 sm:$0xff]   ;;  %v4912_v13 = vld [vmem:[%s6557_s1 + $0x380] ss:$12 sps:$4 sm:$0xff]  }
  0x9e   : > { %2935 = vmatprep.subr.bf16.mxu0 %v4844_v12  ;;  %v4908_v12 = vld [vmem:[%s6557_s1 + $0x618] ss:$12 sps:$4 sm:$0xff]  }
  0x9f   : > { %3248 = vmatmul.mubr.bf16.gmra.mrb[36].mxu1 %v5425_v17  ;;  %v4855_v17 = vld [vmem:[%s6557_s1 + $0x2a8] ss:$12 sps:$4 sm:$0xff]  }
  0xa0   : > { %4236 = vmatpush3.bf16.msra.mxu1 %v4846_v14  ;;  %3255 = vmatprep.mubr.bf16.mxu1 %v5440_v22  ;;  %v4860_v22 = vld [vmem:[%s6557_s1 + $0x2c0] ss:$12 sps:$4 sm:$0xff]   ;;  %v4913_v14 = vld [vmem:[%s6557_s1 + $0x630] ss:$12 sps:$4 sm:$0xff]  }
  0xa1   : > { %2936 = vmatpush1.bf16.msra.mxu0 %v4842_v4  ;;  %4237 = vmatprep.subr.bf16.mxu1 %v4850_v10  ;;  %v4915_v4 = vld [vmem:[%s6557_s1 + $0x634] ss:$12 sps:$4 sm:$0xff]   ;;  %v4920_v10 = vld [vmem:[%s6557_s1 + $0x64c] ss:$12 sps:$4 sm:$0xff]  }
  0xa2   : > { %2937 = vmatprep.subr.bf16.mxu0 %v4849_v16  ;;  %2915 = vmatmul.mubr.bf16.gmra.mrb[12].mxu0 %v5760_v19  ;;  %v5926_v16 = vld [vmem:[%s5312_s17 + $0x88] ss:$56 sps:$4 sm:$0xff]  }
  0xa3   : > { %2955 = vmatprep.mubr.bf16.mxu0 %v5784_v29 }
  0xa4   : > { %4238 = vmatpush3.bf16.msra.mxu1 %v4851_v21  ;;  %v4918_v21 = vld [vmem:[%s6557_s1 + $0x648] ss:$12 sps:$4 sm:$0xff]  }
  0xa5   : > { %2938 = vmatpush1.bf16.msra.mxu0 %v4847_v20  ;;  %4239 = vmatprep.subr.bf16.mxu1 %v4855_v17  ;;  %v5935_v20 = vld [vmem:[%s5312_s17 + $0xfc] ss:$56 sps:$4 sm:$0xff]   ;;  %v4925_v17 = vld [vmem:[%s6557_s1 + $0x664] ss:$12 sps:$4 sm:$0xff]  }
  0xa6   : > { %2939 = vmatprep.subr.bf16.mxu0 %v4854_v24  ;;  %v4922_v24 = vld [vmem:[%s6557_s1 + $0x3b0] ss:$12 sps:$4 sm:$0xff]  }
  0xa7   : > { %3256 = vmatmul.mubr.bf16.gmra.mrb[40].mxu1 %v5457_v27  ;;  %v4867_v27 = vld [vmem:[%s6557_s1 + $0x2d8] ss:$12 sps:$4 sm:$0xff]  }
  0xa8   : > { %4240 = vmatpush3.bf16.msra.mxu1 %v4856_v26  ;;  %3263 = vmatprep.mubr.bf16.mxu1 %v5479_v35  ;;  %v4873_v35 = vld [vmem:[%s6557_s1 + $0x2f0] ss:$12 sps:$4 sm:$0xff]   ;;  %v4927_v26 = vld [vmem:[%s6557_s1 + $0x488] ss:$12 sps:$4 sm:$0xff]  }
  0xa9   : > { %2940 = vmatpush1.bf16.msra.mxu0 %v4852_v25  ;;  %4241 = vmatprep.subr.bf16.mxu1 %v4860_v22  ;;  %v4923_v25 = vld [vmem:[%s6557_s1 + $0x660] ss:$12 sps:$4 sm:$0xff]   ;;  %v4930_v22 = vld [vmem:[%s6557_s1 + $0x67c] ss:$12 sps:$4 sm:$0xff]  }
  0xaa   : > { %2941 = vmatprep.subr.bf16.mxu0 %v4859_v30  ;;  %v5960_v30 = vld [vmem:[%s5312_s17 + $0xf8] ss:$56 sps:$4 sm:$0xff]  }
  0xac   : > { %4242 = vmatpush3.bf16.msra.mxu1 %v4861_v32  ;;  %v4928_v32 = vld [vmem:[%s6557_s1 + $0x678] ss:$12 sps:$4 sm:$0xff]  }
  0xad   : > { %2942 = vmatpush1.bf16.msra.mxu0 %v4857_v31  ;;  %4243 = vmatprep.subr.bf16.mxu1 %v4867_v27  ;;  %v261_v31 = vld [vmem:[%s5312_s17 + $0x168] sm:$0x11] }
  0xae   : > { %2943 = vmatprep.subr.bf16.mxu0 %v4866_v33  ;;  %v5972_v33 = vcombine.high %v261_v31, %v261_v31  ;;  %v4932_v27 = vld [vmem:[%s6557_s1 + $0x4a0] ss:$12 sps:$4 sm:$0xff]  }
  0xaf   : > { %3264 = vmatmul.mubr.bf16.gmra.mrb[44].mxu1 %v5500_v41  ;;  %v4877_v41 = vld [vmem:[%s6557_s1 + $0x5a0] ss:$12 sps:$4 sm:$0xff]  }
  0xb0   : > { %4244 = vmatpush3.bf16.msra.mxu1 %v4869_v38  ;;  %3303 = vmatprep.mubr.bf16.mxu1 %v5097_v47  ;;  %v4936_v38 = vld [vmem:[%s6557_s1 + $0x578] ss:$12 sps:$4 sm:$0xff]  }
  0xb1   : > { %2944 = vmatpush1.bf16.msra.mxu0 %v4864_v37  ;;  %4245 = vmatprep.subr.bf16.mxu1 %v4873_v35  ;;  %v4935_v37 = vld [vmem:[%s6557_s1 + $0x694] ss:$12 sps:$4 sm:$0xff]   ;;  %v4937_v35 = vld [vmem:[%s6557_s1 + $0x4b8] ss:$12 sps:$4 sm:$0xff]  }
  0xb2   : > { %2945 = vmatprep.subr.bf16.mxu0 %v4872_v40  ;;  %v5990_v40 = vcombine.low %v261_v31, %v261_v31  ;;  %v4945_v47 = vld [vmem:[%s6557_s1 + $0x6c4] ss:$12 sps:$4 sm:$0xff]  }
  0xb3   : > { %v5029_v31 = vld [vmem:[%s5312_s17 + $0x90] ss:$56 sps:$4 sm:$0xff]  }
  0xb4   : > { %4246 = vmatpush3.bf16.msra.mxu1 %v4874_v43  ;;  %v4938_v43 = vld [vmem:[%s6557_s1 + $0x6a8] ss:$12 sps:$4 sm:$0xff]  }
  0xb5   : > { %2946 = vmatpush1.bf16.msra.mxu0 %v4870_v42  ;;  %4271 = vmatprep.subr.bf16.mxu1 %v4880_v45  ;;  %v4941_v42 = vld [vmem:[%s6557_s1 + $0x590] ss:$12 sps:$4 sm:$0xff]  }
  0xb6   : > { %2947 = vmatprep.subr.bf16.mxu0 %v4879_v44  ;;  %v6005_v44 = vld [vmem:[%s5312_s17 + $0x24] ss:$56 sps:$4 sm:$0xff]  }
  0xb7   : > { %3304 = vmatmul.mubr.bf16.vlgmr.msra.gmra.mrb[48].mxu1 %v5386_v5  ;;  %v4889_v5 = vld [vmem:[%s6557_s1 + $0x5d0] ss:$12 sps:$4 sm:$0xff]  }
  0xb8   : > { %4272 = vmatpush3.bf16.msra.mxu1 %v4882_v48  ;;  %3311 = vmatprep.mubr.bf16.mxu1 %v5444_v23  ;;  %v4898_v23 = vld [vmem:[%s6557_s1 + $0x410] ss:$12 sps:$4 sm:$0xff]   ;;  %v4947_v48 = vld [vmem:[%s6557_s1 + $0x4e8] ss:$12 sps:$4 sm:$0xff]  }
  0xb9   : > { %2948 = vmatpush1.bf16.msra.mxu0 %v4877_v41  ;;  %4273 = vmatprep.subr.bf16.mxu1 %v4886_v51  ;;  %v4942_v45 = vld [vmem:[%s6557_s1 + $0x4d0] ss:$12 sps:$4 sm:$0xff]   ;;  %v4946_v41 = vld [vmem:[%s6557_s1 + $0x5a8] ss:$12 sps:$4 sm:$0xff]   ;;  %v4948_v51 = vld [vmem:[%s6557_s1 + $0x6d8] ss:$12 sps:$4 sm:$0xff]  }
  0xba   : > { %2949 = vmatprep.subr.bf16.mxu0 %v4885_v50  ;;  %v4950_v50 = vld [vmem:[%s6557_s1 + $0x6dc] ss:$12 sps:$4 sm:$0xff]  }
  0xbc   : > { %4274 = vmatpush3.bf16.msra.mxu1 %v4887_v56  ;;  %v4957_v56 = vld [vmem:[%s6557_s1 + $0x6f4] ss:$12 sps:$4 sm:$0xff]  }
  0xbd   : > { %2950 = vmatpush1.bf16.msra.mxu0 %v4883_v53  ;;  %4275 = vmatprep.subr.bf16.mxu1 %v4892_v59  ;;  %v4952_v53 = vld [vmem:[%s6557_s1 + $0x500] ss:$12 sps:$4 sm:$0xff]   ;;  %v4960_v59 = vld [vmem:[%s6557_s1 + $0x518] ss:$12 sps:$4 sm:$0xff]  }
  0xbe   : > { %2951 = vmatprep.subr.bf16.mxu0 %v4891_v58  ;;  %v4955_v58 = vld [vmem:[%s6557_s1 + $0x6f0] ss:$12 sps:$4 sm:$0xff]  }
  0xbf   : > { %3312 = vmatmul.mubr.bf16.gmra.mrb[52].mxu1 %v5461_v28  ;;  %v4906_v28 = vld [vmem:[%s6557_s1 + $0x428] ss:$12 sps:$4 sm:$0xff]  }
  0xc0   : > { %4276 = vmatpush3.bf16.msra.mxu1 %v4894_v60  ;;  %3319 = vmatprep.mubr.bf16.mxu1 %v5484_v36  ;;  %v4911_v36 = vld [vmem:[%s6557_s1 + $0x440] ss:$12 sps:$4 sm:$0xff]   ;;  %v4961_v60 = vld [vmem:[%s6557_s1 + $0x708] ss:$12 sps:$4 sm:$0xff]  }
  0xc1   : > { %2952 = vmatpush1.bf16.msra.mxu0 %v4889_v5  ;;  %4277 = vmatprep.subr.bf16.mxu1 %v4898_v23  ;;  %v4963_v5 = vld [vmem:[%s6557_s1 + $0x70c] ss:$12 sps:$4 sm:$0xff]   ;;  %v4970_v23 = vld [vmem:[%s6557_s1 + $0x724] ss:$12 sps:$4 sm:$0xff]  }
  0xc2   : > { %2953 = vmatprep.subr.bf16.mxu0 %v4897_v63  ;;  %v4965_v63 = vld [vmem:[%s6557_s1 + $0x530] ss:$12 sps:$4 sm:$0xff]  }
  0xc4   : > { %4278 = vmatpush3.bf16.msra.mxu1 %v4899_v1  ;;  %v4973_v1 = vld [vmem:[%s6557_s1 + $0x608] ss:$12 sps:$4 sm:$0xff]  }
  0xc5   : > { %2954 = vmatpush1.bf16.msra.mxu0 %v4895_v0  ;;  %4279 = vmatprep.subr.bf16.mxu1 %v4906_v28  ;;  %v4968_v0 = vld [vmem:[%s6557_s1 + $0x720] ss:$12 sps:$4 sm:$0xff]   ;;  %v4974_v28 = vld [vmem:[%s6557_s1 + $0x738] ss:$12 sps:$4 sm:$0xff]  }
  0xc6   : > { %2994 = vmatprep.subr.bf16.mxu0 %v4905_v2  ;;  %v4976_v2 = vld [vmem:[%s6557_s1 + $0x73c] ss:$12 sps:$4 sm:$0xff]  }
  0xc7   : > { %3320 = vmatmul.mubr.bf16.gmra.mrb[56].mxu1 %v5495_v39  ;;  %v4916_v39 = vld [vmem:[%s6557_s1 + $0x458] ss:$12 sps:$4 sm:$0xff]  }
  0xc8   : > { %2956 = vmatmul.mubr.bf16.vlgmr.msra.gmra.mrb[0].mxu0 %v5882_v3  ;;  %4280 = vmatpush3.bf16.msra.mxu1 %v4907_v7  ;;  %v4982_v7 = vld [vmem:[%s6557_s1 + $0x754] ss:$12 sps:$4 sm:$0xff]  }
  0xc9   : > { %2995 = vmatpush1.bf16.msra.mxu0 %v4903_v49  ;;  %4281 = vmatprep.subr.bf16.mxu1 %v4911_v36  ;;  %v4978_v49 = vld [vmem:[%s6557_s1 + $0x620] ss:$12 sps:$4 sm:$0xff]   ;;  %v4985_v36 = vld [vmem:[%s6557_s1 + $0x638] ss:$12 sps:$4 sm:$0xff]  }
  0xca   : > { %2996 = vmatprep.subr.bf16.mxu0 %v4910_v8  ;;  %3327 = vmatprep.mubr.bf16.mxu1 %v5527_v52  ;;  %v4921_v52 = vld [vmem:[%s6557_s1 + $0x470] ss:$12 sps:$4 sm:$0xff]  }
  0xcb   : > { %2965 = vmatprep.mubr.bf16.mxu0 %v5901_v11  ;;  %v4980_v8 = vld [vmem:[%s6557_s1 + $0x750] ss:$12 sps:$4 sm:$0xff]  }
  0xcc   : > { %4282 = vmatpush3.bf16.msra.mxu1 %v4912_v13  ;;  %v4986_v13 = vld [vmem:[%s6557_s1 + $0x768] ss:$12 sps:$4 sm:$0xff]  }
  0xcd   : > { %2997 = vmatpush1.bf16.msra.mxu0 %v4908_v12  ;;  %4283 = vmatprep.subr.bf16.mxu1 %v4916_v39  ;;  %v4988_v12 = vld [vmem:[%s6557_s1 + $0x76c] ss:$12 sps:$4 sm:$0xff]   ;;  %v4996_v39 = vld [vmem:[%s6557_s1 + $0x784] ss:$12 sps:$4 sm:$0xff]  }
  0xce   : > { %2998 = vmatprep.subr.bf16.mxu0 %v4915_v4  ;;  %v4990_v4 = vld [vmem:[%s6557_s1 + $0x650] ss:$12 sps:$4 sm:$0xff]  }
  0xcf   : > { %3328 = vmatmul.mubr.bf16.gmra.mrb[60].mxu1 %v5533_v54  ;;  %v4926_v54 = vld [vmem:[%s6557_s1 + $0x548] ss:$12 sps:$4 sm:$0xff]  }
  0xd0   : > { %2966 = vmatmul.mubr.bf16.gmra.mrb[4].mxu0 %v5926_v16  ;;  %4284 = vmatpush3.bf16.msra.mxu1 %v4917_v15  ;;  %v4991_v15 = vld [vmem:[%s5312_s17 + $0x20] ss:$56 sps:$4 sm:$0xff]  }
  0xd1   : > { %2999 = vmatpush1.bf16.msra.mxu0 %v4913_v14  ;;  %4285 = vmatprep.subr.bf16.mxu1 %v4921_v52  ;;  %v4997_v14 = vld [vmem:[%s6557_s1 + $0x728] ss:$12 sps:$4 sm:$0xff]  }
  0xd2   : > { %3000 = vmatprep.subr.bf16.mxu0 %v4920_v10  ;;  %3367 = vmatprep.mubr.bf16.mxu1 %v5559_v62  ;;  %v4931_v62 = vld [vmem:[%s6557_s1 + $0x560] ss:$12 sps:$4 sm:$0xff]   ;;  %v4998_v10 = vld [vmem:[%s6557_s1 + $0x668] ss:$12 sps:$4 sm:$0xff]  }
  0xd3   : > { %2975 = vmatprep.mubr.bf16.mxu0 %v5935_v20  ;;  %v5001_v52 = vld [vmem:[%s6557_s1 + $0x79c] ss:$12 sps:$4 sm:$0xff]  }
  0xd4   : > { %4286 = vmatpush3.bf16.msra.mxu1 %v4922_v24  ;;  %v5003_v24 = vld [vmem:[%s6557_s1 + $0x680] ss:$12 sps:$4 sm:$0xff]  }
  0xd5   : > { %3001 = vmatpush1.bf16.msra.mxu0 %v4918_v21  ;;  %4311 = vmatprep.subr.bf16.mxu1 %v4926_v54  ;;  %v4999_v21 = vld [vmem:[%s6557_s1 + $0x798] ss:$12 sps:$4 sm:$0xff]   ;;  %v5024_v54 = vld [vmem:[%s5312_s17 + $0x94] ss:$56 sps:$4 sm:$0xff]  }
  0xd6   : > { %3002 = vmatprep.subr.bf16.mxu0 %v4925_v17  ;;  %v5006_v17 = vld [vmem:[%s6557_s1 + $0x7b4] ss:$12 sps:$4 sm:$0xff]  }
  0xd7   : > { %3368 = vmatmul.mubr.bf16.vlgmr.msra.gmra.mrb[64].mxu1 %v5637_v34  ;;  %v4933_v34 = vld [vmem:[%s6557_s1 + $0x690] ss:$12 sps:$4 sm:$0xff]  }
  0xd8   : > { %2976 = vmatmul.mubr.bf16.gmra.mrb[8].mxu0 %v5960_v30  ;;  %4312 = vmatpush3.bf16.msra.mxu1 %v4927_v26  ;;  %v5004_v26 = vld [vmem:[%s6557_s1 + $0x7b0] ss:$12 sps:$4 sm:$0xff]  }
  0xd9   : > { %3003 = vmatpush1.bf16.msra.mxu0 %v4923_v25  ;;  %4313 = vmatprep.subr.bf16.mxu1 %v4931_v62  ;;  %v5007_v25 = vld [vmem:[%s6557_s1 + $0x758] ss:$12 sps:$4 sm:$0xff]   ;;  %v5012_v62 = vld [vmem:[%s6557_s1 + $0x770] ss:$12 sps:$4 sm:$0xff]  }
  0xda   : > { %3004 = vmatprep.subr.bf16.mxu0 %v4930_v22  ;;  %3375 = vmatprep.mubr.bf16.mxu1 %v5683_v57  ;;  %v4940_v57 = vld [vmem:[%s6557_s1 + $0x6ac] ss:$12 sps:$4 sm:$0xff]  }
  0xdb   : > { %2985 = vmatprep.mubr.bf16.mxu0 %v5972_v33  ;;  %v5011_v22 = vld [vmem:[%s6557_s1 + $0x7cc] ss:$12 sps:$4 sm:$0xff]  }
  0xdc   : > { %4314 = vmatpush3.bf16.msra.mxu1 %v4932_v27  ;;  %v5037_v27 = vld [vmem:[%s5312_s17 + $0x104] ss:$56 sps:$4 sm:$0xff]  }
  0xdd   : > { %3005 = vmatpush1.bf16.msra.mxu0 %v4928_v32  ;;  %4315 = vmatprep.subr.bf16.mxu1 %v4936_v38  ;;  %v5009_v32 = vld [vmem:[%s6557_s1 + $0x7c8] ss:$12 sps:$4 sm:$0xff]  }
  0xde   : > { %3006 = vmatprep.subr.bf16.mxu0 %v4935_v37  ;;  %v5016_v37 = vld [vmem:[%s6557_s1 + $0x7e4] ss:$12 sps:$4 sm:$0xff]   ;;  %v5017_v38 = vld [vmem:[%s6557_s1 + $0x848] ss:$12 sps:$4 sm:$0xff]  }
  0xdf   : > { %3376 = vmatmul.mubr.bf16.gmra.mrb[68].mxu1 %v5697_v61  ;;  %v4943_v61 = vld [vmem:[%s6557_s1 + $0x6c0] ss:$12 sps:$4 sm:$0xff]  }
  0xe0   : > { %2986 = vmatmul.mubr.bf16.gmra.mrb[12].mxu0 %v5990_v40  ;;  %4316 = vmatpush3.bf16.msra.mxu1 %v4937_v35  ;;  %v5021_v35 = vld [vmem:[%s6557_s1 + $0x7fc] ss:$12 sps:$4 sm:$0xff]  }
  0xe1   : > { %3007 = vmatpush1.bf16.msra.mxu0 %v4933_v34  ;;  %4317 = vmatprep.subr.bf16.mxu1 %v4941_v42  ;;  %v5014_v34 = vld [vmem:[%s6557_s1 + $0x7e0] ss:$12 sps:$4 sm:$0xff]  }
  0xe2   : > { %3008 = vmatprep.subr.bf16.mxu0 %v4940_v57  ;;  %3383 = vmatprep.mubr.bf16.mxu1 %v5717_v6  ;;  %v4951_v6 = vld [vmem:[%s6557_s1 + $0x5c0] ss:$12 sps:$4 sm:$0xff]  }
  0xe3   : > { %3026 = vmatprep.mubr.bf16.mxu0 %v6005_v44  ;;  %v5022_v57 = vld [vmem:[%s6557_s1 + $0x860] ss:$12 sps:$4 sm:$0xff]  }
  0xe4   : > { %4318 = vmatpush3.bf16.msra.mxu1 %v4942_v45  ;;  %v5042_v42 = vld [vmem:[%s5312_s17 + $0x100] ss:$56 sps:$4 sm:$0xff]  }
  0xe5   : > { %3009 = vmatpush1.bf16.msra.mxu0 %v4938_v43  ;;  %4319 = vmatprep.subr.bf16.mxu1 %v4946_v41  ;;  %v262_v43 = vld [vmem:[%s5312_s17 + $0x170] sm:$0x11]  ;;  %v5023_v45 = vld [vmem:[%s6557_s1 + $0x7a0] ss:$12 sps:$4 sm:$0xff]  }
  0xe6   : > { %3010 = vmatprep.subr.bf16.mxu0 %v4945_v47  ;;  %v5028_v47 = vld [vmem:[%s6557_s1 + $0x814] ss:$12 sps:$4 sm:$0xff]   ;;  %v3852_v41 = vcombine.high %v262_v43, %v262_v43 }
  0xe7   : > { %3384 = vmatmul.mubr.bf16.gmra.mrb[72].mxu1 %v5731_v9  ;;  %v4958_v9 = vld [vmem:[%s6557_s1 + $0x5d8] ss:$12 sps:$4 sm:$0xff]  }
  0xe8   : > { %4320 = vmatpush3.bf16.msra.mxu1 %v4947_v48  ;;  %3391 = vmatprep.mubr.bf16.mxu1 %v5754_v18  ;;  %v4964_v18 = vld [vmem:[%s6557_s1 + $0x5f0] ss:$12 sps:$4 sm:$0xff]  }
  0xe9   : > { %3011 = vmatpush1.bf16.msra.mxu0 %v4943_v61  ;;  %4321 = vmatprep.subr.bf16.mxu1 %v4951_v6  ;;  %v5030_v61 = vld [vmem:[%s6557_s1 + $0x878] ss:$12 sps:$4 sm:$0xff]  }
  0xea   : > { %3012 = vmatprep.subr.bf16.mxu0 %v4950_v50  ;;  %v5026_v50 = vld [vmem:[%s6557_s1 + $0x810] ss:$12 sps:$4 sm:$0xff]   ;;  %v5031_v6 = vld [vmem:[%s6557_s1 + $0x7b8] ss:$12 sps:$4 sm:$0xff]  }
  0xec   : > { %4322 = vmatpush3.bf16.msra.mxu1 %v4952_v53 }
  0xed   : > { %3013 = vmatpush1.bf16.msra.mxu0 %v4948_v51  ;;  %4323 = vmatprep.subr.bf16.mxu1 %v4958_v9 }
  0xee   : > { %3014 = vmatprep.subr.bf16.mxu0 %v4957_v56  ;;  %v5034_v56 = vld [vmem:[%s6557_s1 + $0x82c] ss:$12 sps:$4 sm:$0xff]  }
  0xef   : > { %3392 = vmatmul.mubr.bf16.gmra.mrb[76].mxu1 %v5760_v19  ;;  %v4971_v19 = vld [vmem:[%s6557_s1 + $0x6c8] ss:$12 sps:$4 sm:$0xff]  }
  0xf0   : > { %4324 = vmatpush3.bf16.msra.mxu1 %v4960_v59  ;;  %3431 = vmatprep.mubr.bf16.mxu1 %v5784_v29  ;;  %v4977_v29 = vld [vmem:[%s6557_s1 + $0x6e0] ss:$12 sps:$4 sm:$0xff]   ;;  %v3851_v59 = vcombine.low %v262_v43, %v262_v43  ;;  %v5083_v43 = vld [vmem:[%s6557_s1 + $0x950] ss:$12 sps:$4 sm:$0xff]  }
  0xf1   : > { %3015 = vmatpush1.bf16.msra.mxu0 %v4955_v58  ;;  %4325 = vmatprep.subr.bf16.mxu1 %v4964_v18  ;;  %v5035_v58 = vld [vmem:[%s6557_s1 + $0x890] ss:$12 sps:$4 sm:$0xff]  }
  0xf2   : > { %3016 = vmatprep.subr.bf16.mxu0 %v4963_v5  ;;  %v5032_v5 = vld [vmem:[%s6557_s1 + $0x828] ss:$12 sps:$4 sm:$0xff]   ;;  %v5036_v18 = vld [vmem:[%s6557_s1 + $0x7d0] ss:$12 sps:$4 sm:$0xff]  }
  0xf4   : > { %4326 = vmatpush3.bf16.msra.mxu1 %v4965_v63  ;;  %v5041_v63 = vld [vmem:[%s6557_s1 + $0x844] ss:$12 sps:$4 sm:$0xff]  }
  0xf5   : > { %3017 = vmatpush1.bf16.msra.mxu0 %v4961_v60  ;;  %4351 = vmatprep.subr.bf16.mxu1 %v4971_v19  ;;  %v5064_v60 = vld [vmem:[%s5312_s17 + $0x2c] ss:$56 sps:$4 sm:$0xff]  }
  0xf6   : > { %3018 = vmatprep.subr.bf16.mxu0 %v4970_v23  ;;  %v5043_v23 = vld [vmem:[%s6557_s1 + $0x8a8] ss:$12 sps:$4 sm:$0xff]  }
  0xf7   : > { %3432 = vmatmul.mubr.bf16.vlgmr.msra.gmra.mrb[80].mxu1 %v5882_v3  ;;  %v4983_v3 = vld [vmem:[%s6557_s1 + $0x6f8] ss:$12 sps:$4 sm:$0xff]  }
  0xf8   : > { %4352 = vmatpush3.bf16.msra.mxu1 %v4973_v1  ;;  %3439 = vmatprep.mubr.bf16.mxu1 %v5901_v11  ;;  %v4989_v11 = vld [vmem:[%s6557_s1 + $0x710] ss:$12 sps:$4 sm:$0xff]   ;;  %v5039_v1 = vld [vmem:[%s6557_s1 + $0x840] ss:$12 sps:$4 sm:$0xff]  }
  0xf9   : > { %3019 = vmatpush1.bf16.msra.mxu0 %v4968_v0  ;;  %4353 = vmatprep.subr.bf16.mxu1 %v4977_v29 }
  0xfa   : > { %3020 = vmatprep.subr.bf16.mxu0 %v4976_v2  ;;  %v5044_v2 = vld [vmem:[%s6557_s1 + $0x7e8] ss:$12 sps:$4 sm:$0xff]  }
  0xfc   : > { %4354 = vmatpush3.bf16.msra.mxu1 %v4978_v49  ;;  %v5048_v49 = vld [vmem:[%s6557_s1 + $0x8c0] ss:$12 sps:$4 sm:$0xff]  }
  0xfd   : > { %3021 = vmatpush1.bf16.msra.mxu0 %v4974_v28  ;;  %4355 = vmatprep.subr.bf16.mxu1 %v4983_v3  ;;  %v5047_v28 = vld [vmem:[%s6557_s1 + $0x85c] ss:$12 sps:$4 sm:$0xff]   ;;  %v5045_v3 = vld [vmem:[%s6557_s1 + $0x858] ss:$12 sps:$4 sm:$0xff]  }
  0xfe   : > { %3022 = vmatprep.subr.bf16.mxu0 %v4982_v7 }
  0xff   : > { %3440 = vmatmul.mubr.bf16.gmra.mrb[84].mxu1 %v5926_v16  ;;  %v4994_v16 = vld [vmem:[%s6557_s1 + $0x780] ss:$12 sps:$4 sm:$0xff]  }
 0x100   : > { %4356 = vmatpush3.bf16.msra.mxu1 %v4985_v36  ;;  %3447 = vmatprep.mubr.bf16.mxu1 %v5935_v20  ;;  %v5002_v20 = vld [vmem:[%s6557_s1 + $0x740] ss:$12 sps:$4 sm:$0xff]  }
 0x101   : > { %3023 = vmatpush1.bf16.msra.mxu0 %v4980_v8  ;;  %4357 = vmatprep.subr.bf16.mxu1 %v4989_v11  ;;  %v5049_v8 = vld [vmem:[%s6557_s1 + $0x800] ss:$12 sps:$4 sm:$0xff]  }
 0x102   : > { %3024 = vmatprep.subr.bf16.mxu0 %v4988_v12  ;;  %v5053_v36 = vld [vmem:[%s6557_s1 + $0x874] ss:$12 sps:$4 sm:$0xff]   ;;  %v5055_v12 = vld [vmem:[%s6557_s1 + $0x8d8] ss:$12 sps:$4 sm:$0xff]  }
 0x104   : > { %4358 = vmatpush3.bf16.msra.mxu1 %v4990_v4  ;;  %v5051_v4 = vld [vmem:[%s6557_s1 + $0x870] ss:$12 sps:$4 sm:$0xff]  }
 0x105   : > { %3025 = vmatpush1.bf16.msra.mxu0 %v4986_v13  ;;  %4359 = vmatprep.subr.bf16.mxu1 %v4997_v14 }
 0x106   : > { %3065 = vmatprep.subr.bf16.mxu0 %v4996_v39  ;;  %v5056_v39 = vld [vmem:[%s6557_s1 + $0x818] ss:$12 sps:$4 sm:$0xff]  }
 0x107   : > { %3448 = vmatmul.mubr.bf16.gmra.mrb[88].mxu1 %v5960_v30  ;;  %v5008_v30 = vld [vmem:[%s6557_s1 + $0x698] ss:$12 sps:$4 sm:$0xff]  }
 0x108   : > { %3027 = vmatmul.mubr.bf16.vlgmr.msra.gmra.mrb[0].mxu0 %v4991_v15  ;;  %4360 = vmatpush3.bf16.msra.mxu1 %v4998_v10 }
 0x109   : > { %3066 = vmatpush1.bf16.msra.mxu0 %v4994_v16  ;;  %4361 = vmatprep.subr.bf16.mxu1 %v5002_v20  ;;  %v5060_v16 = vld [vmem:[%s6557_s1 + $0x8f0] ss:$12 sps:$4 sm:$0xff]  }
 0x10a   : > { %3067 = vmatprep.subr.bf16.mxu0 %v5001_v52  ;;  %3455 = vmatprep.mubr.bf16.mxu1 %v5972_v33  ;;  %v5013_v33 = vld [vmem:[%s6557_s1 + $0x6b0] ss:$12 sps:$4 sm:$0xff]   ;;  %v5057_v52 = vld [vmem:[%s6557_s1 + $0x888] ss:$12 sps:$4 sm:$0xff]  }
 0x10b   : > { %3036 = vmatprep.mubr.bf16.mxu0 %v5024_v54  ;;  %v5061_v20 = vld [vmem:[%s6557_s1 + $0x830] ss:$12 sps:$4 sm:$0xff]  }
 0x10c   : > { %4362 = vmatpush3.bf16.msra.mxu1 %v5003_v24 }
 0x10d   : > { %3068 = vmatpush1.bf16.msra.mxu0 %v4999_v21  ;;  %4363 = vmatprep.subr.bf16.mxu1 %v5007_v25  ;;  %v5067_v21 = vld [vmem:[%s6557_s1 + $0x8a4] ss:$12 sps:$4 sm:$0xff]   ;;  %v5065_v25 = vld [vmem:[%s6557_s1 + $0x8a0] ss:$12 sps:$4 sm:$0xff]  }
 0x10e   : > { %3069 = vmatprep.subr.bf16.mxu0 %v5006_v17  ;;  %v5062_v17 = vld [vmem:[%s5312_s17 + $0x28] ss:$56 sps:$4 sm:$0xff]  }
 0x10f   : > { %3456 = vmatmul.mubr.bf16.gmra.mrb[92].mxu1 %v5990_v40  ;;  %v5018_v40 = vld [vmem:[%s6557_s1 + $0x788] ss:$12 sps:$4 sm:$0xff]  }
 0x110   : > { %3037 = vmatmul.mubr.bf16.gmra.mrb[4].mxu0 %v5029_v31  ;;  %4364 = vmatpush3.bf16.msra.mxu1 %v5008_v30 }
 0x111   : > { %3070 = vmatpush1.bf16.msra.mxu0 %v5004_v26  ;;  %4365 = vmatprep.subr.bf16.mxu1 %v5012_v62  ;;  %v5068_v26 = vld [vmem:[%s6557_s1 + $0x908] ss:$12 sps:$4 sm:$0xff]  }
 0x112   : > { %3071 = vmatprep.subr.bf16.mxu0 %v5011_v22  ;;  %3495 = vmatprep.mubr.bf16.mxu1 %v6005_v44  ;;  %v5019_v44 = vld [vmem:[%s6557_s1 + $0x7f8] ss:$12 sps:$4 sm:$0xff]   ;;  %v5128_v22 = vmov 0   ;;  %v5071_v62 = vld [vmem:[%s6557_s1 + $0x8bc] ss:$12 sps:$4 sm:$0xff]  }
 0x113   : > { %3046 = vmatprep.mubr.bf16.mxu0 %v5037_v27 }
 0x114   : > { %4366 = vmatpush3.bf16.msra.mxu1 %v5013_v33  ;;  %v5069_v33 = vld [vmem:[%s6557_s1 + $0x8b8] ss:$12 sps:$4 sm:$0xff]  }
 0x115   : > { %3072 = vmatpush1.bf16.msra.mxu0 %v5009_v32  ;;  %4391 = vmatprep.subr.bf16.mxu1 %v5017_v38  ;;  %v5073_v32 = vld [vmem:[%s5312_s17 + $0x9c] ss:$56 sps:$4 sm:$0xff]   ;;  %v5078_v38 = vld [vmem:[%s5312_s17 + $0x98] ss:$56 sps:$4 sm:$0xff]  }
 0x116   : > { %3073 = vmatprep.subr.bf16.mxu0 %v5016_v37  ;;  %v5077_v37 = vld [vmem:[%s6557_s1 + $0x8d4] ss:$12 sps:$4 sm:$0xff]  }
 0x117   : > { %3496 = vmatmul.mubr.bf16.vlgmr.msra.gmra.mrb[96].mxu1 %v4991_v15  ;;  %v5059_v15 = vld [vmem:[%s6557_s1 + $0x88c] ss:$12 sps:$4 sm:$0xff]  }
 0x118   : > { %3047 = vmatmul.mubr.bf16.gmra.mrb[8].mxu0 %v5042_v42  ;;  %4392 = vmatpush3.bf16.msra.mxu1 %v5018_v40  ;;  %v5079_v40 = vld [vmem:[%s6557_s1 + $0x938] ss:$12 sps:$4 sm:$0xff]  }
 0x119   : > { %3074 = vmatpush1.bf16.msra.mxu0 %v5014_v34  ;;  %4393 = vmatprep.subr.bf16.mxu1 %v5022_v57  ;;  %v5075_v34 = vld [vmem:[%s6557_s1 + $0x8d0] ss:$12 sps:$4 sm:$0xff]   ;;  %v5084_v57 = vld [vmem:[%s5312_s17 + $0x10c] ss:$56 sps:$4 sm:$0xff]  }
 0x11a   : > { %3075 = vmatprep.subr.bf16.mxu0 %v5021_v35  ;;  %v6206_v48 = vpop.f32.mrb[0].mxu1  ;;  %3503 = vmatprep.mubr.bf16.mxu1 %v5024_v54  ;;  %v5082_v35 = vld [vmem:[%s6557_s1 + $0x8ec] ss:$12 sps:$4 sm:$0xff]  }
 0x11b   : > { %3056 = vmatprep.mubr.bf16.mxu0 %v3852_v41  ;;  %v6214_v51 = vpop.f32.mrb[1].mxu1 }
 0x11c   : > { %v6216_v53 = vpop.f32.mrb[2].mxu1  ;;  %4394 = vmatpush3.bf16.msra.mxu1 %v5023_v45  ;;  %v263_v45 = vld [vmem:[%s5312_s17 + $0x178] sm:$0x11] }
 0x11d   : > { %3076 = vmatpush1.bf16.msra.mxu0 %v5019_v44  ;;  %v6221_v9 = vpop.f32.mrb[3].mxu1  ;;  %4395 = vmatprep.subr.bf16.mxu1 %v5030_v61  ;;  %v5086_v44 = vld [vmem:[%s5312_s17 + $0x108] ss:$56 sps:$4 sm:$0xff]  }
 0x11e   : > { %3077 = vmatprep.subr.bf16.mxu0 %v5028_v47  ;;  %v5087_v47 = vld [vmem:[%s6557_s1 + $0x968] ss:$12 sps:$4 sm:$0xff]   ;;  %v5088_v61 = vld [vmem:[%s6557_s1 + $0x980] ss:$12 sps:$4 sm:$0xff]  }
 0x11f   : > { %3504 = vmatmul.mubr.bf16.gmra.mrb[100].mxu1 %v5029_v31 }
 0x120   : > { %3057 = vmatmul.mubr.bf16.gmra.mrb[12].mxu0 %v3851_v59  ;;  %4396 = vmatpush3.bf16.msra.mxu1 %v5031_v6 }
 0x121   : > { %3078 = vmatpush1.bf16.msra.mxu0 %v5026_v50  ;;  %4397 = vmatprep.subr.bf16.mxu1 %v5035_v58 }
 0x122   : > { %3079 = vmatprep.subr.bf16.mxu0 %v5034_v56  ;;  %3511 = vmatprep.mubr.bf16.mxu1 %v5037_v27  ;;  %v6239_v19 = vpop.f32.mrb[4].mxu1  ;;  %v5072_v27 = vld [vmem:[%s6557_s1 + $0x920] ss:$12 sps:$4 sm:$0xff]   ;;  %v3853_v56 = vcombine.low %v263_v45, %v263_v45 }
 0x123   : > { %3097 = vmatprep.mubr.bf16.mxu0 %v5064_v60  ;;  %v6241_v0 = vpop.f32.mrb[5].mxu1 }
 0x124   : > { %4398 = vmatpush3.bf16.msra.mxu1 %v5036_v18  ;;  %v6249_v29 = vpop.f32.mrb[6].mxu1  ;;  %v5092_v18 = vld [vmem:[%s6557_s1 + $0x9b0] ss:$12 sps:$4 sm:$0xff]  }
 0x125   : > { %3080 = vmatpush1.bf16.msra.mxu0 %v5032_v5  ;;  %4399 = vmatprep.subr.bf16.mxu1 %v5043_v23  ;;  %v6257_v7 = vpop.f32.mrb[7].mxu1 }
 0x126   : > { %3081 = vmatprep.subr.bf16.mxu0 %v5041_v63  ;;  %v5098_v63 = vld [vmem:[%s5312_s17 + $0xa4] ss:$56 sps:$4 sm:$0xff]  }
 0x127   : > { %3512 = vmatmul.mubr.bf16.gmra.mrb[104].mxu1 %v5042_v42  ;;  %v5080_v42 = vld [vmem:[%s6557_s1 + $0x8e8] ss:$12 sps:$4 sm:$0xff]  }
 0x128   : > { %4400 = vmatpush3.bf16.msra.mxu1 %v5044_v2  ;;  %3519 = vmatprep.mubr.bf16.mxu1 %v3852_v41  ;;  %v3854_v41 = vcombine.high %v263_v45, %v263_v45  ;;  %v5093_v2 = vld [vmem:[%s6557_s1 + $0x9c8] ss:$12 sps:$4 sm:$0xff]  }
 0x129   : > { %3082 = vmatpush1.bf16.msra.mxu0 %v5039_v1  ;;  %4401 = vmatprep.subr.bf16.mxu1 %v5048_v49  ;;  %v5094_v49 = vld [vmem:[%s6557_s1 + $0x9e0] ss:$12 sps:$4 sm:$0xff]  }
 0x12a   : > { %3083 = vmatprep.subr.bf16.mxu0 %v5047_v28  ;;  %v6271_v11 = vpop.f32.mrb[8].mxu1 }
 0x12b   : > { %v6273_v13 = vpop.f32.mrb[9].mxu1 }
 0x12c   : > { %4402 = vmatpush3.bf16.msra.mxu1 %v5049_v8  ;;  %v6281_v14 = vpop.f32.mrb[10].mxu1 }
 0x12d   : > { %3084 = vmatpush1.bf16.msra.mxu0 %v5045_v3  ;;  %4403 = vmatprep.subr.bf16.mxu1 %v5055_v12  ;;  %v6289_v10 = vpop.f32.mrb[11].mxu1  ;;  %v5095_v12 = vld [vmem:[%s6557_s1 + $0x9f8] ss:$12 sps:$4 sm:$0xff]  }
 0x12e   : > { %3085 = vmatprep.subr.bf16.mxu0 %v5053_v36 }
 0x12f   : > { %3520 = vmatmul.mubr.bf16.gmra.mrb[108].mxu1 %v3851_v59  ;;  %v5091_v59 = vld [vmem:[%s6557_s1 + $0x998] ss:$12 sps:$4 sm:$0xff]  }
 0x130   : > { %4404 = vmatpush3.bf16.msra.mxu1 %v5056_v39  ;;  %3559 = vmatprep.mubr.bf16.mxu1 %v5064_v60  ;;  %v5096_v39 = vld [vmem:[%s6557_s1 + $0xa10] ss:$12 sps:$4 sm:$0xff]  }
 0x131   : > { %3086 = vmatpush1.bf16.msra.mxu0 %v5051_v4  ;;  %4405 = vmatprep.subr.bf16.mxu1 %v5060_v16  ;;  %v5099_v16 = vld [vmem:[%s5312_s17 + $0x34] ss:$56 sps:$4 sm:$0xff]  }
 0x132   : > { %3087 = vmatprep.subr.bf16.mxu0 %v5059_v15  ;;  %v6300_v24 = vpop.f32.mrb[12].mxu1 }
 0x133   : > { %v6303_v54 = vpop.f32.mrb[13].mxu1 }
 0x134   : > { %4406 = vmatpush3.bf16.msra.mxu1 %v5061_v20  ;;  %v2778_v30 = vpop.f32.mrb[14].mxu1 }
 0x135   : > { %3088 = vmatpush1.bf16.msra.mxu0 %v5057_v52  ;;  %4431 = vmatprep.subr.bf16.mxu1 %v5128_v22  ;;  %v2779_v31 = vpop.f32.mrb[15].mxu1 }
 0x136   : > { %3089 = vmatprep.subr.bf16.mxu0 %v5067_v21 }
 0x137   : > { %3560 = vmatmul.mubr.bf16.vlgmr.msra.gmra.mrb[112].mxu1 %v5062_v17 }
 0x138   : > { %4443 = vmatpush1.bf16.msra.mxu1 %v5068_v26  ;;  %3567 = vmatprep.mubr.bf16.mxu1 %v5073_v32 }
 0x139   : > { %3090 = vmatpush1.bf16.msra.mxu0 %v5065_v25  ;;  %4432 = vmatprep.subr.bf16.mxu1 %v5128_v22  ;;  %v5101_v25 = vld [vmem:[%s5312_s17 + $0x114] ss:$56 sps:$4 sm:$0xff]  }
 0x13a   : > { %3091 = vmatprep.subr.bf16.mxu0 %v5071_v62 }
 0x13c   : > { %4444 = vmatpush1.bf16.msra.mxu1 %v5072_v27 }
 0x13d   : > { %3092 = vmatpush1.bf16.msra.mxu0 %v5069_v33  ;;  %4433 = vmatprep.subr.bf16.mxu1 %v5128_v22 }
 0x13e   : > { %3093 = vmatprep.subr.bf16.mxu0 %v5077_v37 }
 0x13f   : > { %3568 = vmatmul.mubr.bf16.gmra.mrb[116].mxu1 %v5078_v38 }
 0x140   : > { %4445 = vmatpush1.bf16.msra.mxu1 %v5079_v40  ;;  %3575 = vmatprep.mubr.bf16.mxu1 %v5084_v57 }
 0x141   : > { %3094 = vmatpush1.bf16.msra.mxu0 %v5075_v34  ;;  %4434 = vmatprep.subr.bf16.mxu1 %v5128_v22 }
 0x142   : > { %3095 = vmatprep.subr.bf16.mxu0 %v5082_v35 }
 0x144   : > { %4446 = vmatpush1.bf16.msra.mxu1 %v5083_v43 }
 0x145   : > { %3096 = vmatpush1.bf16.msra.mxu0 %v5080_v42  ;;  %4435 = vmatprep.subr.bf16.mxu1 %v5128_v22  ;;  %v5103_v42 = vld [vmem:[%s5312_s17 + $0x30] ss:$56 sps:$4 sm:$0xff]  }
 0x146   : > { %3591 = vmatprep.subr.bf16.mxu0 %v5128_v22 }
 0x147   : > { %3576 = vmatmul.mubr.bf16.gmra.mrb[120].mxu1 %v5086_v44 }
 0x148   : > { %3098 = vmatmul.mubr.bf16.vlgmr.msra.gmra.mrb[0].mxu0 %v5062_v17  ;;  %4447 = vmatpush1.bf16.msra.mxu1 %v5087_v47  ;;  %v5100_v17 = vld [vmem:[%s5312_s17 + $0xa0] ss:$56 sps:$4 sm:$0xff]  }
 0x149   : > { %3592 = vmatpush1.bf16.msra.mxu0 %v5068_v26  ;;  %4436 = vmatprep.subr.bf16.mxu1 %v5128_v22 }
 0x14a   : > { %3593 = vmatprep.subr.bf16.mxu0 %v5128_v22  ;;  %v6357_v50 = vpop.f32.mrb[16].mxu1  ;;  %3107 = vmatprep.mubr.bf16.mxu0 %v5073_v32 }
 0x14b   : > { %3583 = vmatprep.mubr.bf16.mxu1 %v3854_v41  ;;  %v6359_v6 = vpop.f32.mrb[17].mxu1 }
 0x14c   : > { %v6361_v58 = vpop.f32.mrb[18].mxu1  ;;  %4448 = vmatpush1.bf16.msra.mxu1 %v5088_v61 }
 0x14d   : > { %3594 = vmatpush1.bf16.msra.mxu0 %v5072_v27  ;;  %v6366_v5 = vpop.f32.mrb[19].mxu1  ;;  %4437 = vmatprep.subr.bf16.mxu1 %v5128_v22  ;;  %v5102_v27 = vld [vmem:[%s5312_s17 + $0x110] ss:$56 sps:$4 sm:$0xff]  }
 0x14e   : > { %3595 = vmatprep.subr.bf16.mxu0 %v5128_v22 }
 0x14f   : > { %3584 = vmatmul.mubr.bf16.gmra.mrb[124].mxu1 %v3853_v56 }
 0x150   : > { %3108 = vmatmul.mubr.bf16.gmra.mrb[4].mxu0 %v5078_v38  ;;  %4449 = vmatpush1.bf16.msra.mxu1 %v5091_v59 }
 0x151   : > { %3596 = vmatpush1.bf16.msra.mxu0 %v5079_v40  ;;  %4438 = vmatprep.subr.bf16.mxu1 %v5128_v22 }
 0x152   : > { %3597 = vmatprep.subr.bf16.mxu0 %v5128_v22  ;;  %v6375_v60 = vpop.f32.mrb[20].mxu1  ;;  %3117 = vmatprep.mubr.bf16.mxu0 %v5084_v57 }
 0x153   : > { %4186 = vmatprep.mubr.msk.bf16.mxu1 %vm2697_vm0, %v5098_v63  ;;  %v6379_v23 = vpop.f32.mrb[21].mxu1 }
 0x154   : > { %v6381_v1 = vpop.f32.mrb[22].mxu1  ;;  %4450 = vmatpush1.bf16.msra.mxu1 %v5092_v18 }
 0x155   : > { %3598 = vmatpush1.bf16.msra.mxu0 %v5083_v43  ;;  %v6386_v28 = vpop.f32.mrb[23].mxu1  ;;  %4439 = vmatprep.subr.bf16.mxu1 %v5128_v22 }
 0x156   : > { %3599 = vmatprep.subr.bf16.mxu0 %v5128_v22 }
 0x158   : > { %3118 = vmatmul.mubr.bf16.gmra.mrb[8].mxu0 %v5086_v44  ;;  %4451 = vmatpush1.bf16.msra.mxu1 %v5093_v2 }
 0x159   : > { %3600 = vmatpush1.bf16.msra.mxu0 %v5087_v47  ;;  %4440 = vmatprep.subr.bf16.mxu1 %v5128_v22 }
 0x15a   : > { %3601 = vmatprep.subr.bf16.mxu0 %v5128_v22  ;;  %v6395_v3 = vpop.f32.mrb[24].mxu1  ;;  %3127 = vmatprep.mubr.bf16.mxu0 %v3854_v41 }
 0x15b   : > { %v6397_v8 = vpop.f32.mrb[25].mxu1 }
 0x15c   : > { %v6399_v36 = vpop.f32.mrb[26].mxu1  ;;  %4452 = vmatpush1.bf16.msra.mxu1 %v5094_v49 }
 0x15d   : > { %3602 = vmatpush1.bf16.msra.mxu0 %v5088_v61  ;;  %v6404_v4 = vpop.f32.mrb[27].mxu1  ;;  %4441 = vmatprep.subr.bf16.mxu1 %v5128_v22  ;;  %v699_v61 = vlaneseq }
 0x15e   : > { %3603 = vmatprep.subr.bf16.mxu0 %v5128_v22 }
 0x160   : > { %3128 = vmatmul.mubr.bf16.gmra.mrb[12].mxu0 %v3853_v56  ;;  %4453 = vmatpush1.bf16.msra.mxu1 %v5095_v12  ;;  %v6431_v56 = vshrl.u32 %v699_v61, 7 }
 0x161   : > { %3604 = vmatpush1.bf16.msra.mxu0 %v5091_v59  ;;  %4442 = vmatprep.subr.bf16.mxu1 %v5128_v22 }
 0x162   : > { %3605 = vmatprep.subr.bf16.mxu0 %v5128_v22  ;;  %v6413_v15 = vpop.f32.mrb[28].mxu1  ;;  %4185 = vmatprep.mubr.msk.bf16.mxu0 %vm2697_vm0, %v5099_v16 }
 0x163   : > { %v6417_v52 = vpop.f32.mrb[29].mxu1 }
 0x164   : > { %v3204_v20 = vpop.f32.mrb[30].mxu1  ;;  %4454 = vmatpush1.bf16.msra.mxu1 %v5096_v39 }
 0x165   : > { %3606 = vmatpush1.bf16.msra.mxu0 %v5092_v18  ;;  %v3205_v21 = vpop.f32.mrb[31].mxu1  ;;  %v709_v18 = vsub.s32 2, %v6431_v56 }
 0x166   : > { %3607 = vmatprep.subr.bf16.mxu0 %v5128_v22 }
 0x167   : > { %3632 = vmatmul.mubr.bf16.vlgmr.msra.gmra.mrb[128].mxu1 %v5100_v17 }
 0x168   : > { %4187 = vmatprep.mubr.msk.bf16.mxu1 %vm2697_vm0, %v5101_v25 }
 0x169   : > { %3608 = vmatpush1.bf16.msra.mxu0 %v5093_v2 }
 0x16a   : > { %3609 = vmatprep.subr.bf16.mxu0 %v5128_v22  ;;  %v4207_v26 = vpop.f32.mrb[32].mxu1 }
 0x16b   : > { %v4208_v30 = vpop.f32.mrb[33].mxu1 }
 0x16c   : > { %v4209_v62 = vadd.f32 %v4208_v30, %v4207_v26  ;;  %v4210_v31 = vpop.f32.mrb[34].mxu1 }
 0x16d   : > { %3610 = vmatpush1.bf16.msra.mxu0 %v5094_v49  ;;  %v4211_v32 = vpop.f32.mrb[35].mxu1 }
 0x16e   : > { %3611 = vmatprep.subr.bf16.mxu0 %v5128_v22  ;;  %v4212_v33 = vadd.f32 %v4211_v32, %v4210_v31 }
 0x16f   : > { %3640 = vmatmul.mubr.bf16.gmra.mrb[132].mxu1 %v5102_v27 }
 0x170   : > { %4188 = vmatprep.mubr.msk.bf16.mxu1 %vm2697_vm0, %v5657_v46 }
 0x171   : > { %3612 = vmatpush1.bf16.msra.mxu0 %v5095_v12 }
 0x172   : > { %3613 = vmatprep.subr.bf16.mxu0 %v5128_v22  ;;  %v4213_v37 = vpop.f32.mrb[36].mxu1 }
 0x173   : > { %v4214_v38 = vpop.f32.mrb[37].mxu1 }
 0x174   : > { %v4215_v34 = vadd.f32 %v4214_v38, %v4213_v37  ;;  %v4216_v40 = vpop.f32.mrb[38].mxu1 }
 0x175   : > { %3614 = vmatpush1.bf16.msra.mxu0 %v5096_v39  ;;  %v4217_v35 = vpop.f32.mrb[39].mxu1 }
 0x176   : > { %v4218_v57 = vadd.f32 %v4217_v35, %v4216_v40 }
 0x177   : > { %3648 = vmatmul.mubr.bf16.gmra.mrb[136].mxu1 %v5677_v55  ;;  %v6437_v55 = vld [vmem:[%s6558_s2] sm:$0x7] }
 0x178   : > { %3624 = vmatmul.mubr.bf16.vlgmr.msra.gmra.mrb[16].mxu0 %v5103_v42  ;;  %v710_v12 = vrot.slane %v6437_v55, %v709_v18 }
 0x17a   : > { %v4219_v43 = vpop.f32.mrb[40].mxu1  ;;  %v3242_v20 = vadd.f32 %v4209_v62, %v710_v12  ;;  %v3245_v26 = vadd.f32 %v4212_v33, %v710_v12  ;;  %v3250_v38 = vadd.f32 %v4215_v34, %v710_v12 }
 0x17b   : > { %v4220_v44 = vpop.f32.mrb[41].mxu1 }
 0x17c   : > { %v4221_v45 = vadd.f32 %v4220_v44, %v4219_v43  ;;  %v4222_v47 = vpop.f32.mrb[42].mxu1  ;;  %v3253_v43 = vadd.f32 %v4218_v57, %v710_v12 }
 0x17d   : > { %v4223_v41 = vpop.f32.mrb[43].mxu1 }
 0x17e   : > { %v4224_v46 = vadd.f32 %v4223_v41, %v4222_v47  ;;  %v3258_v62 = vadd.f32 %v4221_v45, %v710_v12 }
 0x180   : > { %v3261_v33 = vadd.f32 %v4224_v46, %v710_v12 }
 0x182   : > { %v4225_v22 = vpop.f32.mrb[44].mxu1 }
 0x183   : > { %v4226_v59 = vpop.f32.mrb[45].mxu1 }
 0x184   : > { %v4227_v63 = vadd.f32 %v4226_v59, %v4225_v22  ;;  %v4228_v2 = vpop.f32.mrb[46].mxu1 }
 0x185   : > { %v4229_v49 = vpop.f32.mrb[47].mxu1 }
 0x186   : > { %v3266_v34 = vadd.f32 %v4227_v63, %v710_v12 }
 0x18a   : > { %v4247_v39 = vpop.f32.mrb[48].mxu1 }
 0x18b   : > { %v4248_v16 = vpop.f32.mrb[49].mxu1 }
 0x18c   : > { %v4249_v21 = vadd.f32 %v4248_v16, %v4247_v39  ;;  %v4250_v17 = vpop.f32.mrb[50].mxu1 }
 0x18d   : > { %v4251_v25 = vpop.f32.mrb[51].mxu1 }
 0x18e   : > { %v3306_v30 = vadd.f32 %v4249_v21, %v3242_v20  ;;  %v4252_v31 = vadd.f32 %v4251_v25, %v4250_v17 }
 0x190   : > { %v3309_v32 = vadd.f32 %v4252_v31, %v3245_v26 }
 0x192   : > { %v4253_v27 = vpop.f32.mrb[52].mxu1 }
 0x193   : > { %v4254_v37 = vpop.f32.mrb[53].mxu1 }
 0x194   : > { %v4255_v40 = vadd.f32 %v4254_v37, %v4253_v27  ;;  %v4256_v35 = vpop.f32.mrb[54].mxu1 }
 0x195   : > { %v4257_v42 = vpop.f32.mrb[55].mxu1 }
 0x196   : > { %v3314_v44 = vadd.f32 %v4255_v40, %v3250_v38  ;;  %v4258_v47 = vadd.f32 %v4257_v42, %v4256_v35 }
 0x198   : > { %v3317_v41 = vadd.f32 %v4258_v47, %v3253_v43 }
 0x19a   : > { %v4259_v61 = vpop.f32.mrb[56].mxu1 }
 0x19b   : > { %v4260_v22 = vpop.f32.mrb[57].mxu1 }
 0x19c   : > { %v4261_v59 = vadd.f32 %v4260_v22, %v4259_v61  ;;  %v4262_v18 = vpop.f32.mrb[58].mxu1 }
 0x19d   : > { %v4263_v2 = vpop.f32.mrb[59].mxu1 }
 0x19e   : > { %v3322_v49 = vadd.f32 %v4261_v59, %v3258_v62  ;;  %v4264_v39 = vadd.f32 %v4263_v2, %v4262_v18 }
 0x1a0   : > { %v3325_v16 = vadd.f32 %v4264_v39, %v3261_v33 }
 0x1a2   : > { %v4265_v20 = vpop.f32.mrb[60].mxu1 }
 0x1a3   : > { %v4266_v21 = vpop.f32.mrb[61].mxu1 }
 0x1a4   : > { %v4267_v17 = vadd.f32 %v4266_v21, %v4265_v20  ;;  %v4268_v25 = vpop.f32.mrb[62].mxu1 }
 0x1a5   : > { %v4269_v26 = vpop.f32.mrb[63].mxu1 }
 0x1a6   : > { %v3330_v57 = vadd.f32 %v4267_v17, %v3266_v34 }
 0x1aa   : > { %v4287_v31 = vpop.f32.mrb[64].mxu1 }
 0x1ab   : > { %v4288_v27 = vpop.f32.mrb[65].mxu1 }
 0x1ac   : > { %v4289_v37 = vadd.f32 %v4288_v27, %v4287_v31  ;;  %v4290_v38 = vpop.f32.mrb[66].mxu1 }
 0x1ad   : > { %v4291_v40 = vpop.f32.mrb[67].mxu1 }
 0x1ae   : > { %v3370_v45 = vadd.f32 %v4289_v37, %v3306_v30  ;;  %v4292_v35 = vadd.f32 %v4291_v40, %v4290_v38 }
 0x1b0   : > { %v3373_v42 = vadd.f32 %v4292_v35, %v3309_v32 }
 0x1b2   : > { %v4293_v43 = vpop.f32.mrb[68].mxu1 }
 0x1b3   : > { %v4294_v46 = vpop.f32.mrb[69].mxu1 }
 0x1b4   : > { %v4295_v47 = vadd.f32 %v4294_v46, %v4293_v43  ;;  %v4296_v61 = vpop.f32.mrb[70].mxu1 }
 0x1b5   : > { %v4297_v22 = vpop.f32.mrb[71].mxu1 }
 0x1b6   : > { %v3378_v62 = vadd.f32 %v4295_v47, %v3314_v44  ;;  %v4298_v59 = vadd.f32 %v4297_v22, %v4296_v61 }
 0x1b8   : > { %v3381_v63 = vadd.f32 %v4298_v59, %v3317_v41 }
 0x1ba   : > { %v4299_v12 = vpop.f32.mrb[72].mxu1 }
 0x1bb   : > { %v4300_v18 = vpop.f32.mrb[73].mxu1 }
 0x1bc   : > { %v4301_v2 = vadd.f32 %v4300_v18, %v4299_v12  ;;  %v4302_v33 = vpop.f32.mrb[74].mxu1 }
 0x1bd   : > { %v4303_v39 = vpop.f32.mrb[75].mxu1 }
 0x1be   : > { %v3386_v20 = vadd.f32 %v4301_v2, %v3322_v49  ;;  %v4304_v21 = vadd.f32 %v4303_v39, %v4302_v33 }
 0x1c0   : > { %v3389_v34 = vadd.f32 %v4304_v21, %v3325_v16 }
 0x1c2   : > { %v4305_v17 = vpop.f32.mrb[76].mxu1 }
 0x1c3   : > { %v4306_v30 = vpop.f32.mrb[77].mxu1 }
 0x1c4   : > { %v4307_v25 = vadd.f32 %v4306_v30, %v4305_v17  ;;  %v4308_v32 = vpop.f32.mrb[78].mxu1 }
 0x1c5   : > { %v4309_v26 = vpop.f32.mrb[79].mxu1 }
 0x1c6   : > { %v3394_v31 = vadd.f32 %v4307_v25, %v3330_v57 }
 0x1ca   : > { %v4327_v27 = vpop.f32.mrb[80].mxu1 }
 0x1cb   : > { %v4328_v37 = vpop.f32.mrb[81].mxu1 }
 0x1cc   : > { %v4329_v38 = vadd.f32 %v4328_v37, %v4327_v27  ;;  %v4330_v44 = vpop.f32.mrb[82].mxu1 }
 0x1cd   : > { %v4331_v40 = vpop.f32.mrb[83].mxu1 }
 0x1ce   : > { %v3434_v41 = vadd.f32 %v4329_v38, %v3370_v45  ;;  %v4332_v35 = vadd.f32 %v4331_v40, %v4330_v44 }
 0x1d0   : > { %v3437_v43 = vadd.f32 %v4332_v35, %v3373_v42 }
 0x1d2   : > { %v4333_v46 = vpop.f32.mrb[84].mxu1 }
 0x1d3   : > { %v4334_v47 = vpop.f32.mrb[85].mxu1 }
 0x1d4   : > { %v4335_v61 = vadd.f32 %v4334_v47, %v4333_v46  ;;  %v4336_v49 = vpop.f32.mrb[86].mxu1 }
 0x1d5   : > { %v4337_v22 = vpop.f32.mrb[87].mxu1 }
 0x1d6   : > { %v3442_v16 = vadd.f32 %v4335_v61, %v3378_v62  ;;  %v4338_v59 = vadd.f32 %v4337_v22, %v4336_v49 }
 0x1d8   : > { %v3445_v12 = vadd.f32 %v4338_v59, %v3381_v63 }
 0x1da   : > { %v4339_v18 = vpop.f32.mrb[88].mxu1 }
 0x1db   : > { %v4340_v2 = vpop.f32.mrb[89].mxu1 }
 0x1dc   : > { %v4341_v33 = vadd.f32 %v4340_v2, %v4339_v18  ;;  %v4342_v57 = vpop.f32.mrb[90].mxu1 }
 0x1dd   : > { %v4343_v39 = vpop.f32.mrb[91].mxu1 }
 0x1de   : > { %v3450_v21 = vadd.f32 %v4341_v33, %v3386_v20  ;;  %v4344_v17 = vadd.f32 %v4343_v39, %v4342_v57 }
 0x1e0   : > { %v3453_v30 = vadd.f32 %v4344_v17, %v3389_v34 }
 0x1e2   : > { %v4345_v25 = vpop.f32.mrb[92].mxu1 }
 0x1e3   : > { %v4346_v45 = vpop.f32.mrb[93].mxu1 }
 0x1e4   : > { %v4347_v32 = vadd.f32 %v4346_v45, %v4345_v25  ;;  %v4348_v42 = vpop.f32.mrb[94].mxu1 }
 0x1e5   : > { %v4349_v26 = vpop.f32.mrb[95].mxu1 }
 0x1e6   : > { %v3458_v27 = vadd.f32 %v4347_v32, %v3394_v31 }
 0x1ea   : > { %v4367_v37 = vpop.f32.mrb[96].mxu1 }
 0x1eb   : > { %v4368_v38 = vpop.f32.mrb[97].mxu1 }
 0x1ec   : > { %v4369_v44 = vadd.f32 %v4368_v38, %v4367_v37  ;;  %v4370_v62 = vpop.f32.mrb[98].mxu1 }
 0x1ed   : > { %v4371_v40 = vpop.f32.mrb[99].mxu1 }
 0x1ee   : > { %v3498_v63 = vadd.f32 %v4369_v44, %v3434_v41  ;;  %v4372_v35 = vadd.f32 %v4371_v40, %v4370_v62 }
 0x1f0   : > { %v3501_v46 = vadd.f32 %v4372_v35, %v3437_v43 }
 0x1f2   : > { %v4373_v47 = vpop.f32.mrb[100].mxu1 }
 0x1f3   : > { %v4374_v61 = vpop.f32.mrb[101].mxu1 }
 0x1f4   : > { %v4375_v49 = vadd.f32 %v4374_v61, %v4373_v47  ;;  %v4376_v20 = vpop.f32.mrb[102].mxu1 }
 0x1f5   : > { %v4377_v22 = vpop.f32.mrb[103].mxu1 }
 0x1f6   : > { %v3506_v34 = vadd.f32 %v4375_v49, %v3442_v16  ;;  %v4378_v59 = vadd.f32 %v4377_v22, %v4376_v20 }
 0x1f8   : > { %v3509_v18 = vadd.f32 %v4378_v59, %v3445_v12 }
 0x1fa   : > { %v4379_v2 = vpop.f32.mrb[104].mxu1 }
 0x1fb   : > { %v4380_v33 = vpop.f32.mrb[105].mxu1 }
 0x1fc   : > { %v4381_v57 = vadd.f32 %v4380_v33, %v4379_v2  ;;  %v4382_v31 = vpop.f32.mrb[106].mxu1 }
 0x1fd   : > { %v4383_v39 = vpop.f32.mrb[107].mxu1 }
 0x1fe   : > { %v3514_v17 = vadd.f32 %v4381_v57, %v3450_v21  ;;  %v4384_v25 = vadd.f32 %v4383_v39, %v4382_v31  ;;  %v701_v21 = vsub.s32 0, %v6431_v56 }
 0x200   : > { %v3517_v45 = vadd.f32 %v4384_v25, %v3453_v30  ;;  %v705_v30 = vsub.s32 1, %v6431_v56  ;;  %v6449_v22 = vrot.slane %v6437_v55, %v701_v21 }
 0x202   : > { %v4385_v32 = vpop.f32.mrb[108].mxu1  ;;  %v6452_v2 = vrot.slane %v6437_v55, %v705_v30  ;;  %v2745_v57 = vadd.f32 %v6206_v48, %v6449_v22  ;;  %v2749_v25 = vadd.f32 %v6216_v53, %v6449_v22 }
 0x203   : > { %v4386_v41 = vpop.f32.mrb[109].mxu1 }
 0x204   : > { %v4387_v42 = vadd.f32 %v4386_v41, %v4385_v32  ;;  %v4388_v43 = vpop.f32.mrb[110].mxu1  ;;  %v2747_v56 = vadd.f32 %v6214_v51, %v6452_v2 }
 0x205   : > { %v4389_v26 = vpop.f32.mrb[111].mxu1 }
 0x206   : > { %v6440_v37 = vadd.f32 %v4387_v42, %v3458_v27 }
 0x20a   : > { %v4407_v38 = vpop.f32.mrb[112].mxu1 }
 0x20b   : > { %v4408_v44 = vpop.f32.mrb[113].mxu1 }
 0x20c   : > { %v4409_v16 = vadd.f32 %v4408_v44, %v4407_v38  ;;  %v4410_v62 = vpop.f32.mrb[114].mxu1 }
 0x20d   : > { %v4411_v12 = vpop.f32.mrb[115].mxu1 }
 0x20e   : > { %v4412_v40 = vadd.f32 %v4411_v12, %v4410_v62  ;;  %v6442_v35 = vadd.f32 %v4409_v16, %v3498_v63 }
 0x210   : > { %v6444_v47 = vadd.f32 %v4412_v40, %v3501_v46 }
 0x212   : > { %v4413_v61 = vpop.f32.mrb[116].mxu1 }
 0x213   : > { %v4414_v49 = vpop.f32.mrb[117].mxu1 }
 0x214   : > { %v4415_v20 = vadd.f32 %v4414_v49, %v4413_v61  ;;  %v4416_v27 = vpop.f32.mrb[118].mxu1  ;;  %v2755_v61 = vadd.f32 %v6239_v19, %v6449_v22 }
 0x215   : > { %v4417_v59 = vpop.f32.mrb[119].mxu1 }
 0x216   : > { %v4418_v63 = vadd.f32 %v4417_v59, %v4416_v27  ;;  %v6454_v33 = vadd.f32 %v4415_v20, %v3506_v34  ;;  %v2751_v34 = vadd.f32 %v6221_v9, %v6452_v2 }
 0x218   : > { %v6456_v46 = vadd.f32 %v4418_v63, %v3509_v18  ;;  %v2761_v63 = vadd.f32 %v6257_v7, %v6452_v2 }
 0x21a   : > { %v4419_v39 = vpop.f32.mrb[120].mxu1 }
 0x21b   : > { %v3099_v31 = vpop.f32.mrb[0].mxu0  ;;  %v4420_v41 = vpop.f32.mrb[121].mxu1 }
 0x21c   : > { %v4456_v32 = vadd.f32 %v3099_v31, %v2745_v57  ;;  %v3101_v55 = vpop.f32.mrb[1].mxu0  ;;  %v4421_v42 = vadd.f32 %v4420_v41, %v4419_v39  ;;  %v4422_v26 = vpop.f32.mrb[122].mxu1 }
 0x21d   : > { %v4459_v18 = vadd.f32 %v3101_v55, %v2747_v56  ;;  %v3103_v43 = vpop.f32.mrb[2].mxu0  ;;  %v4423_v44 = vpop.f32.mrb[123].mxu1 }
 0x21e   : > { %v4457_v48 = vadd.f32 %v4456_v32, %v6357_v50  ;;  %v4462_v38 = vadd.f32 %v3103_v43, %v2749_v25  ;;  %v3105_v51 = vpop.f32.mrb[3].mxu0  ;;  %v4424_v9 = vadd.f32 %v4423_v44, %v4422_v26  ;;  %v6474_v62 = vadd.f32 %v4421_v42, %v3514_v17 }
 0x21f   : > { %v4460_v53 = vadd.f32 %v4459_v18, %v6359_v6  ;;  %v4465_v16 = vadd.f32 %v3105_v51, %v2751_v34  ;;  %v2757_v6 = vadd.f32 %v6241_v0, %v6452_v2  ;;  %v2767_v26 = vadd.f32 %v6273_v13, %v6452_v2 }
 0x220   : > { %v3655_v12 = vmax.f32 %v4457_v48, 0.0  ;;  %v4463_v50 = vadd.f32 %v4462_v38, %v6361_v58  ;;  %v6478_v30 = vadd.f32 %v4424_v9, %v3517_v45  ;;  %v2759_v58 = vadd.f32 %v6249_v29, %v6449_v22 }
 0x221   : > { %v3656_v40 = vmax.f32 %v4460_v53, 0.0  ;;  %v4466_v21 = vadd.f32 %v4465_v16, %v6366_v5 }
 0x222   : > { %3676 = vst [vmem:[%s6471_s29] sm:$0xff] %v3655_v12  ;;  %v3658_v49 = vmax.f32 %v4463_v50, 0.0  ;;  %v4425_v27 = vpop.f32.mrb[124].mxu1 }
 0x223   : > { %3677 = vst [vmem:[%s6471_s29 + $0x8] sm:$0xff] %v3656_v40  ;;  %v3659_v17 = vmax.f32 %v4466_v21, 0.0  ;;  %v3109_v20 = vpop.f32.mrb[4].mxu0  ;;  %v4426_v45 = vpop.f32.mrb[125].mxu1 }
 0x224   : > { %3679 = vst [vmem:[%s6471_s29 + $0x18] sm:$0xff] %v3658_v49  ;;  %v4468_v5 = vadd.f32 %v3109_v20, %v2755_v61  ;;  %v3111_v59 = vpop.f32.mrb[5].mxu0  ;;  %v4427_v57 = vadd.f32 %v4426_v45, %v4425_v27  ;;  %v4428_v0 = vpop.f32.mrb[126].mxu1 }
 0x225   : > { %3680 = vst [vmem:[%s6471_s29 + $0x20] sm:$0xff] %v3659_v17  ;;  %v4471_v19 = vadd.f32 %v3111_v59, %v2757_v6  ;;  %v3113_v56 = vpop.f32.mrb[6].mxu0  ;;  %v4429_v32 = vpop.f32.mrb[127].mxu1 }
 0x226   : > { %v4469_v31 = vadd.f32 %v4468_v5, %v6375_v60  ;;  %v4474_v39 = vadd.f32 %v3113_v56, %v2759_v58  ;;  %v3115_v25 = vpop.f32.mrb[7].mxu0  ;;  %v6495_v41 = vadd.f32 %v4427_v57, %v6440_v37  ;;  %v2765_v60 = vadd.f32 %v6271_v11, %v6449_v22 }
 0x227   : > { %v4472_v29 = vadd.f32 %v4471_v19, %v6379_v23  ;;  %v4477_v55 = vadd.f32 %v3115_v25, %v2761_v63  ;;  %v2769_v37 = vadd.f32 %v6281_v14, %v6449_v22 }
 0x228   : > { %v3661_v7 = vmax.f32 %v4469_v31, 0.0  ;;  %v4475_v34 = vadd.f32 %v4474_v39, %v6381_v1 }
 0x229   : > { %v3662_v18 = vmax.f32 %v4472_v29, 0.0  ;;  %v4478_v42 = vadd.f32 %v4477_v55, %v6386_v28  ;;  %v2771_v28 = vadd.f32 %v6289_v10, %v6452_v2  ;;  %v2775_v10 = vadd.f32 %v6300_v24, %v6449_v22 }
 0x22a   : > { %3682 = vst [vmem:[%s6471_s29 + $0x30] sm:$0xff] %v3661_v7  ;;  %v3664_v43 = vmax.f32 %v4475_v34, 0.0 }
 0x22b   : > { %3683 = vst [vmem:[%s6471_s29 + $0x38] sm:$0xff] %v3662_v18  ;;  %v3665_v23 = vmax.f32 %v4478_v42, 0.0  ;;  %v3119_v48 = vpop.f32.mrb[8].mxu0 }
 0x22c   : > { %3685 = vst [vmem:[%s6471_s29 + $0x48] sm:$0xff] %v3664_v43  ;;  %v4480_v38 = vadd.f32 %v3119_v48, %v2765_v60  ;;  %v3121_v1 = vpop.f32.mrb[9].mxu0 }
 0x22d   : > { %3686 = vst [vmem:[%s6471_s29 + $0x50] sm:$0xff] %v3665_v23  ;;  %v4483_v11 = vadd.f32 %v3121_v1, %v2767_v26  ;;  %v3123_v51 = vpop.f32.mrb[10].mxu0 }
 0x22e   : > { %v4481_v44 = vadd.f32 %v4480_v38, %v6395_v3  ;;  %v4486_v13 = vadd.f32 %v3123_v51, %v2769_v37  ;;  %v3125_v53 = vpop.f32.mrb[11].mxu0  ;;  %v2777_v3 = vadd.f32 %v6303_v54, %v6452_v2 }
 0x22f   : > { %v4484_v16 = vadd.f32 %v4483_v11, %v6397_v8  ;;  %v4489_v14 = vadd.f32 %v3125_v53, %v2771_v28 }
 0x230   : > { %v3667_v9 = vmax.f32 %v4481_v44, 0.0  ;;  %v4487_v12 = vadd.f32 %v4486_v13, %v6399_v36 }
 0x231   : > { %v3668_v50 = vmax.f32 %v4484_v16, 0.0  ;;  %v4490_v40 = vadd.f32 %v4489_v14, %v6404_v4 }
 0x232   : > { %3688 = vst [vmem:[%s6471_s29 + $0x60] sm:$0xff] %v3667_v9  ;;  %v3670_v21 = vmax.f32 %v4487_v12, 0.0 }
 0x233   : > { %3689 = vst [vmem:[%s6471_s29 + $0x68] sm:$0xff] %v3668_v50  ;;  %v3671_v8 = vmax.f32 %v4490_v40, 0.0  ;;  %v3129_v61 = vpop.f32.mrb[12].mxu0 }
 0x234   : > { %3691 = vst [vmem:[%s6471_s29 + $0x78] sm:$0xff] %v3670_v21  ;;  %v4492_v49 = vadd.f32 %v3129_v61, %v2775_v10  ;;  %v3131_v6 = vpop.f32.mrb[13].mxu0 }
 0x235   : > { %3692 = vst [vmem:[%s6471_s29 + $0x80] sm:$0xff] %v3671_v8  ;;  %v4495_v36 = vadd.f32 %v3131_v6, %v2777_v3  ;;  %v3133_v4 = vpop.f32.mrb[14].mxu0 }
 0x236   : > { %v4493_v17 = vadd.f32 %v4492_v49, %v6413_v15  ;;  %v3134_v24 = vpop.f32.mrb[15].mxu0 }
 0x237   : > { %v4496_v22 = vadd.f32 %v4495_v36, %v6417_v52 }
 0x238   : > { %v3673_v20 = vmax.f32 %v4493_v17, 0.0 }
 0x239   : > { %v3674_v27 = vmax.f32 %v4496_v22, 0.0 }
 0x23a   : > { %3694 = vst [vmem:[%s6471_s29 + $0x90] sm:$0x1] %v3673_v20  ;;  %v3633_v54 = vpop.f32.mrb[128].mxu1 }
 0x23b   : > { %3695 = vst [vmem:[%s6471_s29 + $0x98] sm:$0x1] %v3674_v27  ;;  %v3634_v2 = vadd.f32 %v3633_v54, %v6454_v33  ;;  %v3635_v58 = vpop.f32.mrb[129].mxu1 }
 0x23c   : > { %v3636_v5 = vpop.f32.mrb[130].mxu1 }
 0x23d   : > { %v3663_v59 = vmax.f32 %v3634_v2, 0.0  ;;  %v3637_v45 = vadd.f32 %v3636_v5, %v6456_v46  ;;  %v3638_v63 = vpop.f32.mrb[131].mxu1 }
 0x23f   : > { %3684 = vst.msk [vmem:[%s6471_s29 + $0x40] sm:$0xff] %vm2697_vm0, %v3663_v59  ;;  %v3666_v15 = vmax.f32 %v3637_v45, 0.0 }
 0x241   : > { %3687 = vst.msk [vmem:[%s6471_s29 + $0x58] sm:$0xff] %vm2697_vm0, %v3666_v15 }
 0x242   : > { %v3641_v52 = vpop.f32.mrb[132].mxu1 }
 0x243   : > { %v3642_v19 = vadd.f32 %v3641_v52, %v6474_v62  ;;  %v3643_v57 = vpop.f32.mrb[133].mxu1 }
 0x244   : > { %v3644_v56 = vpop.f32.mrb[134].mxu1 }
 0x245   : > { %v3669_v0 = vmax.f32 %v3642_v19, 0.0  ;;  %v3645_v33 = vadd.f32 %v3644_v56, %v6478_v30  ;;  %v3646_v31 = vpop.f32.mrb[135].mxu1 }
 0x247   : > { %3690 = vst.msk [vmem:[%s6471_s29 + $0x70] sm:$0xff] %vm2697_vm0, %v3669_v0  ;;  %v3672_v39 = vmax.f32 %v3645_v33, 0.0 }
 0x249   : > { %3693 = vst.msk [vmem:[%s6471_s29 + $0x88] sm:$0xff] %vm2697_vm0, %v3672_v39 }
 0x24a   : > { %v3649_v25 = vpop.f32.mrb[136].mxu1 }
 0x24b   : > { %v3625_v46 = vpop.f32.mrb[16].mxu0  ;;  %v3650_v62 = vadd.f32 %v3649_v25, %v6495_v41  ;;  %v3651_v55 = vpop.f32.mrb[137].mxu1 }
 0x24c   : > { %v3626_v32 = vadd.f32 %v3625_v46, %v6442_v35  ;;  %v3627_v29 = vpop.f32.mrb[17].mxu0  ;;  %v3652_v30 = vpop.f32.mrb[138].mxu1 }
 0x24d   : > { %v3628_v7 = vpop.f32.mrb[18].mxu0  ;;  %v3675_v18 = vmax.f32 %v3650_v62, 0.0  ;;  %v3653_v43 = vpop.f32.mrb[139].mxu1 }
 0x24e   : > { %v3657_v34 = vmax.f32 %v3626_v32, 0.0  ;;  %v3629_v42 = vadd.f32 %v3628_v7, %v6444_v47  ;;  %v3630_v60 = vpop.f32.mrb[19].mxu0 }
 0x24f   : > { %3697 = vst.msk [vmem:[%s6471_s29 + $0xa0] sm:$0x1] %vm3696_vm1, %v3675_v18 }
 0x250   : > { %3678 = vst.msk [vmem:[%s6471_s29 + $0x10] sm:$0xff] %vm2697_vm0, %v3657_v34  ;;  %v3660_v26 = vmax.f32 %v3629_v42, 0.0 }
 0x252   : > { %3681 = vst.msk [vmem:[%s6471_s29 + $0x28] sm:$0xff] %vm2697_vm0, %v3660_v26 }
 0x253 PF: > { %s13_s14 = sadd.s32 1, %s5126_s14   ;;  %s6560_s12 = smov %s5122_s13 }
 0x254   : > { %p10_p5 = scmp.ge.s32.totalorder %s13_s14, 4   ;;  %s6561_s13 = smov %s6563_s15 }
 0x256   :  { %12 = sbr.rel (!%p10_p5) target bundleno = 2 (0x2), region = 62 }

// kernel: inception_d_forward.11
= control target key start
LH: loop header
LB: loop body
LE: loop exit
PB: predicated region body
PF: predicated region fallthrough
CT: control target
= control target key end

     0   :  { %s724_s6 = smov 0   ;;  %s726_s7 = smov 0   ;;  %s991_s0 = inlined_call_operand.vmem [shape: f32[9,2,49,4], index: 0, kind: input, shape index: {}]   ;;  %s992_s1 = inlined_call_operand.vmem [shape: f32[2,49,4], index: 1, kind: output, shape index: {}]  }
   0x1   :  { %s728_s8 = smov 0  }
   0x2 LB: > { %s597_s9 = sadd.s32 4294967295, %s712_s8   ;;  %s741_s10 = sadd.s32 1, %s712_s8   ;;  %s712_s8 = sphi %s728_s8, %s995_s8   ;;  %s708_s7 = sphi %s726_s7, %s994_s7   ;;  %s704_s6 = sphi %s724_s6, %s993_s6  }
   0x3   : > { %s15_s11 = ssub.s32 %s712_s8, %s741_s10  ;;  %s18_s12 = sadd.s32 1, %s708_s7 }
   0x4   : > { %p16_p0 = scmp.eq.s32.totalorder %s15_s11, 0  ;;  %p25_p1 = scmp.ne.s32.totalorder %s708_s7, %s704_s6 }
   0x5   : > { %p26_p2 = scmp.eq.s32.totalorder %s712_s8, 0  ;;  %p600_p4 = scmp.ge.s32.totalorder %s712_s8, 2 }
   0x6   : > { %s750_s13 = scalar_select %p16_p0, %s708_s7, %s18_s12  }
   0x7   : > { %p27_p3 = por %p26_p2, %p25_p1  ;;  %77 = sbr.rel (%p600_p4) target bundleno = 51 (0x33), region = 16 }
   0xe   : > { %80 = sbr.rel (!%p27_p3) target bundleno = 51 (0x33), region = 20  ;;  %s82_s14 = sand.u32 (%p27_p3), 1, %s708_s7  }
   0xf   : > { %s663_s15 = smul.u32 (%p27_p3), 56, %s712_s8 }
  0x10   : > { %s662_s16 = smul.u32 (%p27_p3), 504, %s82_s14 }
  0x11   : > { %s758_s19 = scalar_lea.vmem (%p27_p3), %s991_s0, %s663_s15 }
  0x12   : > { %v239_v0 = vld [vmem:[%s758_s19] sm:$0xff] (%p27_p3)  ;;  %v241_v1 = vld [vmem:[%s758_s19 + $0x8] sm:$0xff] (%p27_p3)  ;;  %v243_v2 = vld [vmem:[%s758_s19 + $0x10] sm:$0xff] (%p27_p3)  ;;  %s763_s20 = scalar_lea.vmem (%p27_p3), [#allocation2], %s662_s16 }
  0x13   : > { %240 = vst [vmem:[%s763_s20] sm:$0xff] (%p27_p3), %v239_v0  ;;  %242 = vst [vmem:[%s763_s20 + $0x8] sm:$0xff] (%p27_p3), %v241_v1  ;;  %v245_v3 = vld [vmem:[%s758_s19 + $0x18] sm:$0xff] (%p27_p3)  ;;  %v247_v4 = vld [vmem:[%s758_s19 + $0x20] sm:$0xff] (%p27_p3) }
  0x14   : > { %244 = vst [vmem:[%s763_s20 + $0x10] sm:$0xff] (%p27_p3), %v243_v2  ;;  %v249_v5 = vld [vmem:[%s758_s19 + $0x28] sm:$0xff] (%p27_p3)  ;;  %246 = vst [vmem:[%s763_s20 + $0x18] sm:$0xff] (%p27_p3), %v245_v3  ;;  %v251_v6 = vld [vmem:[%s758_s19 + $0x30] sm:$0xff] (%p27_p3) }
  0x15   : > { %248 = vst [vmem:[%s763_s20 + $0x20] sm:$0xff] %v247_v4  ;;  %250 = vst [vmem:[%s763_s20 + $0x28] sm:$0xff] %v249_v5  ;;  %v253_v7 = vld [vmem:[%s758_s19 + $0x70] sm:$0xff]  ;;  %v255_v8 = vld [vmem:[%s758_s19 + $0x78] sm:$0xff] }
  0x16   : > { %252 = vst [vmem:[%s763_s20 + $0x30] sm:$0xff] %v251_v6  ;;  %254 = vst [vmem:[%s763_s20 + $0x38] sm:$0xff] %v253_v7  ;;  %v257_v9 = vld [vmem:[%s758_s19 + $0x80] sm:$0xff]  ;;  %v259_v10 = vld [vmem:[%s758_s19 + $0x88] sm:$0xff] }
  0x17   : > { %256 = vst [vmem:[%s763_s20 + $0x40] sm:$0xff] %v255_v8  ;;  %v261_v11 = vld [vmem:[%s758_s19 + $0x90] sm:$0xff]  ;;  %258 = vst [vmem:[%s763_s20 + $0x48] sm:$0xff] %v257_v9  ;;  %v263_v12 = vld [vmem:[%s758_s19 + $0x98] sm:$0xff] }
  0x18   : > { %260 = vst [vmem:[%s763_s20 + $0x50] sm:$0xff] %v259_v10  ;;  %262 = vst [vmem:[%s763_s20 + $0x58] sm:$0xff] %v261_v11  ;;  %v265_v13 = vld [vmem:[%s758_s19 + $0xa0] sm:$0xff]  ;;  %v269_v15 = vld [vmem:[%s758_s19 + $0xe8] sm:$0xff] }
  0x19   : > { %v267_v14 = vld [vmem:[%s758_s19 + $0xe0] sm:$0xff]  ;;  %264 = vst [vmem:[%s763_s20 + $0x60] sm:$0xff] %v263_v12  ;;  %266 = vst [vmem:[%s763_s20 + $0x68] sm:$0xff] %v265_v13  ;;  %v271_v16 = vld [vmem:[%s758_s19 + $0xf0] sm:$0xff] }
  0x1a   : > { %268 = vst [vmem:[%s763_s20 + $0x70] sm:$0xff] %v267_v14  ;;  %v273_v17 = vld [vmem:[%s758_s19 + $0xf8] sm:$0xff]  ;;  %270 = vst [vmem:[%s763_s20 + $0x78] sm:$0xff] %v269_v15  ;;  %v275_v18 = vld [vmem:[%s758_s19 + $0x100] sm:$0xff] }
  0x1b   : > { %272 = vst [vmem:[%s763_s20 + $0x80] sm:$0xff] %v271_v16  ;;  %274 = vst [vmem:[%s763_s20 + $0x88] sm:$0xff] %v273_v17  ;;  %v277_v19 = vld [vmem:[%s758_s19 + $0x108] sm:$0xff]  ;;  %v279_v20 = vld [vmem:[%s758_s19 + $0x110] sm:$0xff] }
  0x1c   : > { %276 = vst [vmem:[%s763_s20 + $0x90] sm:$0xff] %v275_v18  ;;  %278 = vst [vmem:[%s763_s20 + $0x98] sm:$0xff] %v277_v19  ;;  %v281_v21 = vld [vmem:[%s758_s19 + $0x150] sm:$0xff]  ;;  %v283_v22 = vld [vmem:[%s758_s19 + $0x158] sm:$0xff] }
  0x1d   : > { %280 = vst [vmem:[%s763_s20 + $0xa0] sm:$0xff] %v279_v20  ;;  %v285_v23 = vld [vmem:[%s758_s19 + $0x160] sm:$0xff]  ;;  %282 = vst [vmem:[%s763_s20 + $0xa8] sm:$0xff] %v281_v21  ;;  %v287_v24 = vld [vmem:[%s758_s19 + $0x168] sm:$0xff] }
  0x1e   : > { %284 = vst [vmem:[%s763_s20 + $0xb0] sm:$0xff] %v283_v22  ;;  %286 = vst [vmem:[%s763_s20 + $0xb8] sm:$0xff] %v285_v23  ;;  %v289_v25 = vld [vmem:[%s758_s19 + $0x170] sm:$0xff]  ;;  %v291_v26 = vld [vmem:[%s758_s19 + $0x178] sm:$0xff] }
  0x1f   : > { %288 = vst [vmem:[%s763_s20 + $0xc0] sm:$0xff] %v287_v24  ;;  %290 = vst [vmem:[%s763_s20 + $0xc8] sm:$0xff] %v289_v25  ;;  %v293_v27 = vld [vmem:[%s758_s19 + $0x180] sm:$0xff]  ;;  %v297_v29 = vld [vmem:[%s758_s19 + $0x1c8] sm:$0xff] }
  0x20   : > { %292 = vst [vmem:[%s763_s20 + $0xd0] sm:$0xff] %v291_v26  ;;  %v295_v28 = vld [vmem:[%s758_s19 + $0x1c0] sm:$0xff]  ;;  %294 = vst [vmem:[%s763_s20 + $0xd8] sm:$0xff] %v293_v27  ;;  %v299_v30 = vld [vmem:[%s758_s19 + $0x1d0] sm:$0xff] }
  0x21   : > { %296 = vst [vmem:[%s763_s20 + $0xe0] sm:$0xff] %v295_v28  ;;  %298 = vst [vmem:[%s763_s20 + $0xe8] sm:$0xff] %v297_v29  ;;  %v301_v31 = vld [vmem:[%s758_s19 + $0x1d8] sm:$0xff]  ;;  %v303_v32 = vld [vmem:[%s758_s19 + $0x1e0] sm:$0xff] }
  0x22   : > { %300 = vst [vmem:[%s763_s20 + $0xf0] sm:$0xff] %v299_v30  ;;  %302 = vst [vmem:[%s763_s20 + $0xf8] sm:$0xff] %v301_v31  ;;  %v305_v33 = vld [vmem:[%s758_s19 + $0x1e8] sm:$0xff]  ;;  %v307_v34 = vld [vmem:[%s758_s19 + $0x1f0] sm:$0xff] }
  0x23   : > { %304 = vst [vmem:[%s763_s20 + $0x100] sm:$0xff] %v303_v32  ;;  %v309_v35 = vld [vmem:[%s758_s19 + $0x230] sm:$0xff]  ;;  %306 = vst [vmem:[%s763_s20 + $0x108] sm:$0xff] %v305_v33  ;;  %v311_v36 = vld [vmem:[%s758_s19 + $0x238] sm:$0xff] }
  0x24   : > { %308 = vst [vmem:[%s763_s20 + $0x110] sm:$0xff] %v307_v34  ;;  %310 = vst [vmem:[%s763_s20 + $0x118] sm:$0xff] %v309_v35  ;;  %v313_v37 = vld [vmem:[%s758_s19 + $0x240] sm:$0xff]  ;;  %v315_v38 = vld [vmem:[%s758_s19 + $0x248] sm:$0xff] }
  0x25   : > { %312 = vst [vmem:[%s763_s20 + $0x120] sm:$0xff] %v311_v36  ;;  %314 = vst [vmem:[%s763_s20 + $0x128] sm:$0xff] %v313_v37  ;;  %v317_v39 = vld [vmem:[%s758_s19 + $0x250] sm:$0xff]  ;;  %v319_v40 = vld [vmem:[%s758_s19 + $0x258] sm:$0xff] }
  0x26   : > { %316 = vst [vmem:[%s763_s20 + $0x130] sm:$0xff] %v315_v38  ;;  %v321_v41 = vld [vmem:[%s758_s19 + $0x260] sm:$0xff]  ;;  %318 = vst [vmem:[%s763_s20 + $0x138] sm:$0xff] %v317_v39  ;;  %v325_v43 = vld [vmem:[%s758_s19 + $0x2a8] sm:$0xff] }
  0x27   : > { %320 = vst [vmem:[%s763_s20 + $0x140] sm:$0xff] %v319_v40  ;;  %322 = vst [vmem:[%s763_s20 + $0x148] sm:$0xff] %v321_v41  ;;  %v323_v42 = vld [vmem:[%s758_s19 + $0x2a0] sm:$0xff]  ;;  %v327_v44 = vld [vmem:[%s758_s19 + $0x2b0] sm:$0xff] }
  0x28   : > { %324 = vst [vmem:[%s763_s20 + $0x150] sm:$0xff] %v323_v42  ;;  %326 = vst [vmem:[%s763_s20 + $0x158] sm:$0xff] %v325_v43  ;;  %v329_v45 = vld [vmem:[%s758_s19 + $0x2b8] sm:$0xff]  ;;  %v331_v46 = vld [vmem:[%s758_s19 + $0x2c0] sm:$0xff] }
  0x29   : > { %328 = vst [vmem:[%s763_s20 + $0x160] sm:$0xff] %v327_v44  ;;  %v333_v47 = vld [vmem:[%s758_s19 + $0x2c8] sm:$0xff]  ;;  %330 = vst [vmem:[%s763_s20 + $0x168] sm:$0xff] %v329_v45  ;;  %v335_v48 = vld [vmem:[%s758_s19 + $0x2d0] sm:$0xff] }
  0x2a   : > { %332 = vst [vmem:[%s763_s20 + $0x170] sm:$0xff] %v331_v46  ;;  %334 = vst [vmem:[%s763_s20 + $0x178] sm:$0xff] %v333_v47  ;;  %v337_v49 = vld [vmem:[%s758_s19 + $0x310] sm:$0xff]  ;;  %v339_v50 = vld [vmem:[%s758_s19 + $0x318] sm:$0xff] }
  0x2b   : > { %336 = vst [vmem:[%s763_s20 + $0x180] sm:$0xff] %v335_v48  ;;  %338 = vst [vmem:[%s763_s20 + $0x188] sm:$0xff] %v337_v49  ;;  %v341_v51 = vld [vmem:[%s758_s19 + $0x320] sm:$0xff]  ;;  %v343_v52 = vld [vmem:[%s758_s19 + $0x328] sm:$0xff] }
  0x2c   : > { %340 = vst [vmem:[%s763_s20 + $0x190] sm:$0xff] %v339_v50  ;;  %v345_v53 = vld [vmem:[%s758_s19 + $0x330] sm:$0xff]  ;;  %342 = vst [vmem:[%s763_s20 + $0x198] sm:$0xff] %v341_v51  ;;  %v347_v54 = vld [vmem:[%s758_s19 + $0x338] sm:$0xff] }
  0x2d   : > { %344 = vst [vmem:[%s763_s20 + $0x1a0] sm:$0xff] %v343_v52  ;;  %346 = vst [vmem:[%s763_s20 + $0x1a8] sm:$0xff] %v345_v53  ;;  %v349_v55 = vld [vmem:[%s758_s19 + $0x340] sm:$0xff]  ;;  %v353_v57 = vld [vmem:[%s758_s19 + $0x388] sm:$0xff] }
  0x2e   : > { %v351_v56 = vld [vmem:[%s758_s19 + $0x380] sm:$0xff]  ;;  %348 = vst [vmem:[%s763_s20 + $0x1b0] sm:$0xff] %v347_v54  ;;  %350 = vst [vmem:[%s763_s20 + $0x1b8] sm:$0xff] %v349_v55  ;;  %v355_v58 = vld [vmem:[%s758_s19 + $0x390] sm:$0xff] }
  0x2f   : > { %352 = vst [vmem:[%s763_s20 + $0x1c0] sm:$0xff] %v351_v56  ;;  %v357_v59 = vld [vmem:[%s758_s19 + $0x398] sm:$0xff]  ;;  %354 = vst [vmem:[%s763_s20 + $0x1c8] sm:$0xff] %v353_v57  ;;  %v359_v60 = vld [vmem:[%s758_s19 + $0x3a0] sm:$0xff] }
  0x30   : > { %356 = vst [vmem:[%s763_s20 + $0x1d0] sm:$0xff] %v355_v58  ;;  %358 = vst [vmem:[%s763_s20 + $0x1d8] sm:$0xff] %v357_v59  ;;  %v361_v61 = vld [vmem:[%s758_s19 + $0x3a8] sm:$0xff]  ;;  %v363_v62 = vld [vmem:[%s758_s19 + $0x3b0] sm:$0xff] }
  0x31   : > { %360 = vst [vmem:[%s763_s20 + $0x1e0] sm:$0xff] %v359_v60  ;;  %362 = vst [vmem:[%s763_s20 + $0x1e8] sm:$0xff] %v361_v61 }
  0x32   : > { %364 = vst [vmem:[%s763_s20 + $0x1f0] sm:$0xff] %v363_v62 }
  0x33 PF: > { %p602_p5 = scmp.ge.s32.totalorder %s712_s8, 1  ;;  %p369_p6 = scmp.lt.s32.totalorder %s712_s8, 3 }
  0x35   : > { %p370_p7 = pnand %p602_p5, %p369_p6 }
  0x36   : > { %s376_s21 = sand.u32 (!%p370_p7), 1, %s704_s6   ;;  %p395_p8 = scmp.lt.s32.totalorder (!%p370_p7), %s597_s9, 1  ;;  %vm527_vm0 = vcmask (!%p370_p7), 31744   ;;  %vm534_vm1 = vcmask (!%p370_p7), 24576  }
  0x37   : > { %373 = sbr.rel (%p370_p7) target bundleno = 92 (0x5c), region = 58 }
  0x38   : > { %s664_s22 = smul.u32 (!%p370_p7), 504, %s376_s21 }
  0x3a   : > { %s891_s23 = scalar_lea.vmem (!%p370_p7), [#allocation2], %s664_s22 }
  0x3b   : > { %v400_v63 = vld [vmem:[%s891_s23] sm:$0xff] (!%p370_p7)  ;;  %v604_v0 = vld [vmem:[%s891_s23 + $0x38] sm:$0xff] (!%p370_p7)  ;;  %v611_v1 = vld [vmem:[%s891_s23 + $0x70] sm:$0xff] (!%p370_p7) }
  0x3c   : > { %v415_v2 = vmax.f32 (!%p370_p7), %v400_v63, %v604_v0  ;;  %v618_v3 = vld [vmem:[%s891_s23 + $0xa8] sm:$0xff] (!%p370_p7)  ;;  %v605_v6 = vld [vmem:[%s891_s23 + $0x40] sm:$0xff] (!%p370_p7)  ;;  %v612_v7 = vld [vmem:[%s891_s23 + $0x78] sm:$0xff] (!%p370_p7) }
  0x3d   : > { %v401_v5 = vld [vmem:[%s891_s23 + $0x8] sm:$0xff] (!%p370_p7)  ;;  %v625_v8 = vld [vmem:[%s891_s23 + $0xe0] sm:$0xff] (!%p370_p7)  ;;  %v632_v11 = vld [vmem:[%s891_s23 + $0x118] sm:$0xff] (!%p370_p7) }
  0x3e   : > { %v430_v4 = vmax.f32 %v415_v2, %v611_v1  ;;  %v416_v9 = vmax.f32 %v401_v5, %v605_v6  ;;  %v619_v12 = vld [vmem:[%s891_s23 + $0xb0] sm:$0xff]  ;;  %s997_s9 = smov (!%p395_p8, %s597_s9), 1  ;;  %v606_v15 = vld [vmem:[%s891_s23 + $0x48] sm:$0xff]  ;;  %v613_v16 = vld [vmem:[%s891_s23 + $0x80] sm:$0xff] }
  0x3f   : > { %v402_v14 = vld [vmem:[%s891_s23 + $0x10] sm:$0xff]  ;;  %v626_v18 = vld [vmem:[%s891_s23 + $0xe8] sm:$0xff]  ;;  %v633_v22 = vld [vmem:[%s891_s23 + $0x120] sm:$0xff]  ;;  %s665_s24 = smul.u32 56, %s997_s9 }
  0x40   : > { %v445_v10 = vmax.f32 %v430_v4, %v618_v3  ;;  %v431_v13 = vmax.f32 %v416_v9, %v612_v7  ;;  %v417_v19 = vmax.f32 %v402_v14, %v606_v15  ;;  %v639_v20 = vld [vmem:[%s891_s23 + $0x150] sm:$0xff]  ;;  %v620_v23 = vld [vmem:[%s891_s23 + $0xb8] sm:$0xff]  ;;  %v614_v28 = vld [vmem:[%s891_s23 + $0x88] sm:$0xff] }
  0x41   : > { %v403_v26 = vld [vmem:[%s891_s23 + $0x18] sm:$0xff]  ;;  %v607_v27 = vld [vmem:[%s891_s23 + $0x50] sm:$0xff]  ;;  %v646_v29 = vld [vmem:[%s891_s23 + $0x188] sm:$0xff]  ;;  %s935_s27 = scalar_lea.vmem %s992_s1, %s665_s24 }
  0x42   : > { %v460_v17 = vmax.f32 %v445_v10, %v625_v8  ;;  %v446_v21 = vmax.f32 %v431_v13, %v619_v12  ;;  %v432_v25 = vmax.f32 %v417_v19, %v613_v16  ;;  %v653_v30 = vld [vmem:[%s891_s23 + $0x1c0] sm:$0xff]  ;;  %v627_v32 = vld [vmem:[%s891_s23 + $0xf0] sm:$0xff]  ;;  %v418_v33 = vmax.f32 %v403_v26, %v607_v27  ;;  %v640_v35 = vld [vmem:[%s891_s23 + $0x158] sm:$0xff] }
  0x43   : > { %v634_v37 = vld [vmem:[%s891_s23 + $0x128] sm:$0xff]  ;;  %v621_v38 = vld [vmem:[%s891_s23 + $0xc0] sm:$0xff]  ;;  %v608_v42 = vld [vmem:[%s891_s23 + $0x58] sm:$0xff] }
  0x44   : > { %v475_v24 = vmax.f32 %v460_v17, %v632_v11  ;;  %v461_v31 = vmax.f32 %v446_v21, %v626_v18  ;;  %v447_v36 = vmax.f32 %v432_v25, %v620_v23  ;;  %v433_v40 = vmax.f32 %v418_v33, %v614_v28  ;;  %v404_v41 = vld [vmem:[%s891_s23 + $0x20] sm:$0xff]  ;;  %v615_v43 = vld [vmem:[%s891_s23 + $0x90] sm:$0xff]  ;;  %v654_v46 = vld [vmem:[%s891_s23 + $0x1c8] sm:$0xff] }
  0x45   : > { %v647_v45 = vld [vmem:[%s891_s23 + $0x190] sm:$0xff]  ;;  %v628_v48 = vld [vmem:[%s891_s23 + $0xf8] sm:$0xff]  ;;  %v419_v49 = vmax.f32 %v404_v41, %v608_v42  ;;  %v641_v51 = vld [vmem:[%s891_s23 + $0x160] sm:$0xff] }
  0x46   : > { %v490_v34 = vmax.f32 %v475_v24, %v639_v20  ;;  %v476_v39 = vmax.f32 %v461_v31, %v633_v22  ;;  %v462_v47 = vmax.f32 %v447_v36, %v627_v32  ;;  %v448_v52 = vmax.f32 %v433_v40, %v621_v38  ;;  %v635_v53 = vld [vmem:[%s891_s23 + $0x130] sm:$0xff]  ;;  %v622_v54 = vld [vmem:[%s891_s23 + $0xc8] sm:$0xff]  ;;  %v609_v59 = vld [vmem:[%s891_s23 + $0x60] sm:$0xff] }
  0x47   : > { %v434_v57 = vmax.f32 %v419_v49, %v615_v43  ;;  %v405_v58 = vld [vmem:[%s891_s23 + $0x28] sm:$0xff]  ;;  %v616_v60 = vld [vmem:[%s891_s23 + $0x98] sm:$0xff]  ;;  %v655_v63 = vld [vmem:[%s891_s23 + $0x1d0] sm:$0xff] }
  0x48   : > { %v505_v44 = vmax.f32 %v490_v34, %v646_v29  ;;  %v491_v50 = vmax.f32 %v476_v39, %v640_v35  ;;  %v477_v56 = vmax.f32 %v462_v47, %v634_v37  ;;  %v648_v62 = vld [vmem:[%s891_s23 + $0x198] sm:$0xff]  ;;  %v463_v0 = vmax.f32 %v448_v52, %v628_v48  ;;  %v629_v1 = vld [vmem:[%s891_s23 + $0x100] sm:$0xff]  ;;  %v642_v4 = vld [vmem:[%s891_s23 + $0x168] sm:$0xff] }
  0x49   : > { %v420_v2 = vmax.f32 %v405_v58, %v609_v59  ;;  %v449_v5 = vmax.f32 %v434_v57, %v622_v54  ;;  %v636_v6 = vld [vmem:[%s891_s23 + $0x138] sm:$0xff]  ;;  %v623_v7 = vld [vmem:[%s891_s23 + $0xd0] sm:$0xff]  ;;  %v610_v12 = vld [vmem:[%s891_s23 + $0x68] sm:$0x1] }
  0x4a   : > { %v520_v55 = vmax.f32 %v505_v44, %v653_v30  ;;  %v506_v61 = vmax.f32 %v491_v50, %v647_v45  ;;  %v492_v3 = vmax.f32 %v477_v56, %v641_v51  ;;  %v478_v9 = vmax.f32 %v463_v0, %v635_v53  ;;  %v406_v11 = vld [vmem:[%s891_s23 + $0x30] sm:$0x1]  ;;  %v617_v13 = vld [vmem:[%s891_s23 + $0xa0] sm:$0x1]  ;;  %v630_v17 = vld [vmem:[%s891_s23 + $0x108] sm:$0xff] }
  0x4b   : > { %v435_v10 = vmax.f32 %v420_v2, %v616_v60  ;;  %v649_v15 = vld [vmem:[%s891_s23 + $0x1a0] sm:$0xff]  ;;  %v464_v16 = vmax.f32 %v449_v5, %v629_v1  ;;  %v421_v18 = vmax.f32 %v406_v11, %v610_v12  ;;  %v643_v20 = vld [vmem:[%s891_s23 + $0x170] sm:$0xff]  ;;  %v624_v22 = vld [vmem:[%s891_s23 + $0xd8] sm:$0x1] }
  0x4c   : > { %528 = vst.msk [vmem:[%s935_s27] sm:$0xff] %vm527_vm0, %v520_v55  ;;  %v521_v8 = vmax.f32 %v506_v61, %v654_v46  ;;  %v507_v14 = vmax.f32 %v492_v3, %v648_v62  ;;  %v493_v19 = vmax.f32 %v478_v9, %v642_v4  ;;  %v656_v24 = vld [vmem:[%s891_s23 + $0x1d8] sm:$0xff]  ;;  %v637_v26 = vld [vmem:[%s891_s23 + $0x140] sm:$0xff]  ;;  %v650_v29 = vld [vmem:[%s891_s23 + $0x1a8] sm:$0xff] }
  0x4d   : > { %v450_v21 = vmax.f32 %v435_v10, %v623_v7  ;;  %v479_v25 = vmax.f32 %v464_v16, %v636_v6  ;;  %v436_v27 = vmax.f32 %v421_v18, %v617_v13  ;;  %v631_v31 = vld [vmem:[%s891_s23 + $0x110] sm:$0x1]  ;;  %v644_v33 = vld [vmem:[%s891_s23 + $0x178] sm:$0xff]  ;;  %v657_v36 = vld [vmem:[%s891_s23 + $0x1e0] sm:$0xff] }
  0x4e   : > { %529 = vst.msk [vmem:[%s935_s27 + $0x8] sm:$0xff] %vm527_vm0, %v521_v8  ;;  %v522_v23 = vmax.f32 %v507_v14, %v655_v63  ;;  %v508_v28 = vmax.f32 %v493_v19, %v649_v15  ;;  %v638_v38 = vld [vmem:[%s891_s23 + $0x148] sm:$0x1]  ;;  %v651_v40 = vld [vmem:[%s891_s23 + $0x1b0] sm:$0xff]  ;;  %v645_v43 = vld [vmem:[%s891_s23 + $0x180] sm:$0x1] }
  0x4f   : > { %v465_v30 = vmax.f32 %v450_v21, %v630_v17  ;;  %v494_v32 = vmax.f32 %v479_v25, %v643_v20  ;;  %v451_v34 = vmax.f32 %v436_v27, %v624_v22  ;;  %v658_v45 = vld [vmem:[%s891_s23 + $0x1e8] sm:$0xff]  ;;  %v652_v48 = vld [vmem:[%s891_s23 + $0x1b8] sm:$0x1]  ;;  %v659_v51 = vld [vmem:[%s891_s23 + $0x1f0] sm:$0x1] }
  0x50   : > { %530 = vst.msk [vmem:[%s935_s27 + $0x10] sm:$0xff] %vm527_vm0, %v522_v23  ;;  %v523_v35 = vmax.f32 %v508_v28, %v656_v24 }
  0x51   : > { %v480_v37 = vmax.f32 %v465_v30, %v637_v26  ;;  %v509_v39 = vmax.f32 %v494_v32, %v650_v29  ;;  %v466_v41 = vmax.f32 %v451_v34, %v631_v31 }
  0x52   : > { %531 = vst.msk [vmem:[%s935_s27 + $0x18] sm:$0xff] %vm527_vm0, %v523_v35 }
  0x53   : > { %v495_v42 = vmax.f32 %v480_v37, %v644_v33  ;;  %v524_v44 = vmax.f32 %v509_v39, %v657_v36  ;;  %v481_v46 = vmax.f32 %v466_v41, %v638_v38 }
  0x55   : > { %v510_v47 = vmax.f32 %v495_v42, %v651_v40  ;;  %532 = vst.msk [vmem:[%s935_s27 + $0x20] sm:$0xff] %vm527_vm0, %v524_v44  ;;  %v496_v49 = vmax.f32 %v481_v46, %v645_v43 }
  0x57   : > { %v525_v50 = vmax.f32 %v510_v47, %v658_v45  ;;  %v511_v52 = vmax.f32 %v496_v49, %v652_v48 }
  0x59   : > { %533 = vst.msk [vmem:[%s935_s27 + $0x28] sm:$0xff] %vm527_vm0, %v525_v50  ;;  %v526_v53 = vmax.f32 %v511_v52, %v659_v51 }
  0x5b   : > { %535 = vst.msk [vmem:[%s935_s27 + $0x30] sm:$0x1] %vm534_vm1, %v526_v53 }
  0x5c PF: > { %p8_p9 = scmp.ge.s32.totalorder %s741_s10, 4   ;;  %s993_s6 = smov %s708_s7 }
  0x5d   : > { %s994_s7 = smov %s750_s13  ;;  %s995_s8 = smov %s741_s10 }
  0x5e   :  { %10 = sbr.rel (!%p8_p9) target bundleno = 2 (0x2), region = 105 }

</bundles_post_ra>
